<compile_context>
chip_gen: v6e
topology: v6e:2x2x1
jax: 0.10.0
libtpu: 0.0.40
codegen_flags: <defaults>
</compile_context>

<pallas_src>
import functools

import jax
import jax.numpy as jnp
from jax import lax
from jax.experimental import pallas as pl
from jax.experimental.pallas import tpu as pltpu


@functools.lru_cache(maxsize=1)
def _vmem_limit_bytes():
    """Per-generation VMEM budget (v7x: 64 MiB physical, v5e/v6e: 128 MiB)."""
    try:
        cap = int(pltpu.get_tpu_info().vmem_capacity_bytes)
    except Exception:  # pragma: no cover - conservative fallback
        cap = 64 * 1024 * 1024
    return int(min(cap * 3 // 4, 96 * 1024 * 1024))


# ----------------------------------------------------------------------------
# Pallas kernels
# ----------------------------------------------------------------------------

def _xw_scale_kernel(x_ref, w_ref, d_ref, o_ref):
    """o = bf16((x @ W) * d_rowscale): layer-1 feature transform with the
    D^-1/2 column pre-scale of the subsequent spmm folded into the epilogue."""
    x = x_ref[0].astype(jnp.bfloat16)
    xw = jnp.dot(x, w_ref[...], preferred_element_type=jnp.float32)
    o_ref[0] = (xw * d_ref[0]).astype(jnp.bfloat16)


def _spmm_kernel(a_ref, xw_ref, dr_ref, b_ref, o_ref):
    """z = diag(d_row) @ A @ XW_prescaled + bias.

    A is int8 (0/1), XW is already bf16 & pre-scaled; accumulation goes
    directly into the resident f32 output block (index_map ignores k)."""
    k = pl.program_id(2)

    @pl.when(k == 0)
    def _():
        o_ref[...] = jnp.zeros_like(o_ref)

    # int8 -> f32 -> bf16 (guaranteed-supported convert chain on all gens).
    a = a_ref[0].astype(jnp.float32).astype(jnp.bfloat16)
    o_ref[0] += jnp.dot(a, xw_ref[0], preferred_element_type=jnp.float32)

    @pl.when(k == pl.num_programs(2) - 1)
    def _():
        o_ref[0] = o_ref[0] * dr_ref[0] + b_ref[...]


def _bn_stats_kernel(z_ref, o_ref):
    """Per-column [sum; sum_of_squares] accumulated over node-row tiles."""
    @pl.when(pl.program_id(1) == 0)
    def _():
        o_ref[...] = jnp.zeros_like(o_ref)

    z = z_ref[0]
    s = jnp.sum(z, axis=0, keepdims=True)
    ss = jnp.sum(z * z, axis=0, keepdims=True)
    o_ref[0] += jnp.concatenate([s, ss], axis=0)
    # TODO(synk): single-pass E[x^2]-E[x]^2 can cancel for large activations;
    # switch to a centered / Welford variant if activations grow.


def _bn_prelu_matmul_kernel(z_ref, stats_ref, g_ref, b_ref, al_ref, w_ref,
                            d_ref, o_ref, *, n_rows):
    """Layer-2 feature transform with layer-1 BN+PReLU fused as the prologue
    and the D^-1/2 pre-scale + bf16 cast fused as the epilogue."""
    inv_n = 1.0 / float(n_rows)
    st = stats_ref[0]
    mean = st[0:1, :] * inv_n
    var = st[1:2, :] * inv_n - mean * mean
    h = (z_ref[0] - mean) * lax.rsqrt(var + 1e-5)
    h = h * g_ref[...] + b_ref[...]
    h = jnp.where(h > 0.0, h, al_ref[...] * h)
    xw = jnp.dot(h.astype(jnp.bfloat16), w_ref[...],
                 preferred_element_type=jnp.float32)
    o_ref[0] = (xw * d_ref[0]).astype(jnp.bfloat16)


def _bn_prelu_pred_loss_kernel(z_ref, stats_ref, g_ref, b_ref, al_ref,
                               w1_ref, b1_ref, w2_ref, b2_ref, pal_ref,
                               o_ref, *, n_rows, out_dim):
    """Fused: layer-2 BN+PReLU (both views) -> MLP predictor on the online
    slices -> cosine-similarity partial sums accumulated into a (1,1) output.

    loss = 2 - mean(cos(pred(online_v1), target_v2))
             - mean(cos(pred(online_v2), target_v1))
    """
    i = pl.program_id(0)

    @pl.when(i == 0)
    def _():
        o_ref[...] = jnp.zeros_like(o_ref)

    inv_n = 1.0 / float(n_rows)
    st = stats_ref[...]                              # (2, 2, 2*out)
    mean = st[:, 0:1, :] * inv_n                     # (2, 1, 2*out)
    var = st[:, 1:2, :] * inv_n - mean * mean
    h = (z_ref[...] - mean) * lax.rsqrt(var + 1e-5)  # (2, tm, 2*out)
    h = h * g_ref[...] + b_ref[...]
    h = jnp.where(h > 0.0, h, al_ref[...] * h)

    on1, tg1 = h[0, :, :out_dim], h[0, :, out_dim:]
    on2, tg2 = h[1, :, :out_dim], h[1, :, out_dim:]

    alpha = pal_ref[0, 0]                            # predictor PReLU (SMEM)

    def predict(x):
        p = jnp.dot(x.astype(jnp.bfloat16), w1_ref[...],
                    preferred_element_type=jnp.float32) + b1_ref[...]
        p = jnp.where(p > 0.0, p, alpha * p)
        return jnp.dot(p.astype(jnp.bfloat16), w2_ref[...],
                       preferred_element_type=jnp.float32) + b2_ref[...]

    def cos_sum(q, t):
        d = jnp.sum(q * t, axis=-1, keepdims=True)
        qq = jnp.sum(q * q, axis=-1, keepdims=True)
        tt = jnp.sum(t * t, axis=-1, keepdims=True)
        # torch cosine_similarity: dot / max(||q||*||t||, 1e-8)
        cos = d * lax.rsqrt(jnp.maximum(qq * tt, 1e-16))
        return jnp.sum(cos, axis=0, keepdims=True)   # (1, 1)

    # online(view1) pairs with target(view2); online(view2) with target(view1).
    # TODO(synk): for training, route target columns through lax.stop_gradient
    # outside this kernel (forward value is identical).
    o_ref[...] += cos_sum(predict(on1), tg2) + cos_sum(predict(on2), tg1)

    @pl.when(i == pl.num_programs(0) - 1)
    def _():
        o_ref[...] = 2.0 - o_ref[...] * (1.0 / float(n_rows))


# ----------------------------------------------------------------------------
# Pallas wrappers
# ----------------------------------------------------------------------------

def gcn_xw(feat_s, w_cat_bf16, d_s, tm=256):
    v, n, in_dim = feat_s.shape
    hc = w_cat_bf16.shape[1]
    tm = min(tm, n)
    assert n % tm == 0
    return pl.pallas_call(
        _xw_scale_kernel,
        out_shape=jax.ShapeDtypeStruct((v, n, hc), jnp.bfloat16),
        grid=(v, n // tm),
        in_specs=[pl.BlockSpec((1, tm, in_dim), lambda b, i: (b, i, 0)),
                  pl.BlockSpec((in_dim, hc), lambda b, i: (0, 0)),
                  pl.BlockSpec((1, tm, 1), lambda b, i: (b, i, 0))],
        out_specs=pl.BlockSpec((1, tm, hc), lambda b, i: (b, i, 0)),
        compiler_params=pltpu.CompilerParams(
            dimension_semantics=("parallel", "parallel"),
            vmem_limit_bytes=_vmem_limit_bytes()),
    )(feat_s, w_cat_bf16, d_s)


def spmm_norm_bias(a_s, xw_s, d_s, bias_cat, tm=256, tk=512):
    v, n, _ = a_s.shape
    hc = xw_s.shape[2]
    tm = min(tm, n)
    tk = min(tk, n)
    assert n % tm == 0 and n % tk == 0
    return pl.pallas_call(
        _spmm_kernel,
        out_shape=jax.ShapeDtypeStruct((v, n, hc), jnp.float32),
        grid=(v, n // tm, n // tk),
        in_specs=[pl.BlockSpec((1, tm, tk), lambda b, i, k: (b, i, k)),
                  pl.BlockSpec((1, tk, hc), lambda b, i, k: (b, k, 0)),
                  pl.BlockSpec((1, tm, 1), lambda b, i, k: (b, i, 0)),
                  pl.BlockSpec((1, hc), lambda b, i, k: (0, 0))],
        out_specs=pl.BlockSpec((1, tm, hc), lambda b, i, k: (b, i, 0)),
        compiler_params=pltpu.CompilerParams(
            dimension_semantics=("parallel", "parallel", "arbitrary"),
            vmem_limit_bytes=_vmem_limit_bytes()),
    )(a_s, xw_s, d_s, bias_cat)


def bn_stats(z_s, tm=256):
    v, n, hc = z_s.shape
    tm = min(tm, n)
    assert n % tm == 0
    return pl.pallas_call(
        _bn_stats_kernel,
        out_shape=jax.ShapeDtypeStruct((v, 2, hc), jnp.float32),
        grid=(v, n // tm),
        in_specs=[pl.BlockSpec((1, tm, hc), lambda b, i: (b, i, 0))],
        out_specs=pl.BlockSpec((1, 2, hc), lambda b, i: (b, 0, 0)),
        compiler_params=pltpu.CompilerParams(
            dimension_semantics=("parallel", "arbitrary"),
            vmem_limit_bytes=_vmem_limit_bytes()),
    )(z_s)


def bn_prelu_xw(z_s, stats_s, gamma, beta, alpha_vec, w_bd_bf16, d_s, tm=256):
    v, n, hc_in = z_s.shape
    hc_out = w_bd_bf16.shape[1]
    tm = min(tm, n)
    assert n % tm == 0
    kern = functools.partial(_bn_prelu_matmul_kernel, n_rows=n)
    return pl.pallas_call(
        kern,
        out_shape=jax.ShapeDtypeStruct((v, n, hc_out), jnp.bfloat16),
        grid=(v, n // tm),
        in_specs=[pl.BlockSpec((1, tm, hc_in), lambda b, i: (b, i, 0)),
                  pl.BlockSpec((1, 2, hc_in), lambda b, i: (b, 0, 0)),
                  pl.BlockSpec((1, hc_in), lambda b, i: (0, 0)),
                  pl.BlockSpec((1, hc_in), lambda b, i: (0, 0)),
                  pl.BlockSpec((1, hc_in), lambda b, i: (0, 0)),
                  pl.BlockSpec((hc_in, hc_out), lambda b, i: (0, 0)),
                  pl.BlockSpec((1, tm, 1), lambda b, i: (b, i, 0))],
        out_specs=pl.BlockSpec((1, tm, hc_out), lambda b, i: (b, i, 0)),
        compiler_params=pltpu.CompilerParams(
            dimension_semantics=("parallel", "parallel"),
            vmem_limit_bytes=_vmem_limit_bytes()),
    )(z_s, stats_s, gamma, beta, alpha_vec, w_bd_bf16, d_s)


def bn_prelu_predict_loss(z_s, stats_s, gamma, beta, alpha_vec,
                          pw1_bf16, pb1, pw2_bf16, pb2, palpha, out_dim,
                          tm=256):
    v, n, hc = z_s.shape
    hid = pw1_bf16.shape[1]
    tm = min(tm, n)
    assert v == 2 and n % tm == 0
    kern = functools.partial(_bn_prelu_pred_loss_kernel,
                             n_rows=n, out_dim=out_dim)
    res = pl.pallas_call(
        kern,
        out_shape=jax.ShapeDtypeStruct((1, 1), jnp.float32),
        grid=(n // tm,),
        in_specs=[pl.BlockSpec((2, tm, hc), lambda i: (0, i, 0)),
                  pl.BlockSpec((2, 2, hc), lambda i: (0, 0, 0)),
                  pl.BlockSpec((1, hc), lambda i: (0, 0)),
                  pl.BlockSpec((1, hc), lambda i: (0, 0)),
                  pl.BlockSpec((1, hc), lambda i: (0, 0)),
                  pl.BlockSpec((out_dim, hid), lambda i: (0, 0)),
                  pl.BlockSpec((1, hid), lambda i: (0, 0)),
                  pl.BlockSpec((hid, out_dim), lambda i: (0, 0)),
                  pl.BlockSpec((1, out_dim), lambda i: (0, 0)),
                  pl.BlockSpec(memory_space=pltpu.MemorySpace.SMEM)],
        out_specs=pl.BlockSpec((1, 1), lambda i: (0, 0)),
        compiler_params=pltpu.CompilerParams(
            dimension_semantics=("arbitrary",),
            vmem_limit_bytes=_vmem_limit_bytes()),
    )(z_s, stats_s, gamma, beta, alpha_vec, pw1_bf16, pb1, pw2_bf16, pb2,
      palpha)
    return res[0, 0]


# ----------------------------------------------------------------------------
# Plain-JAX glue: augmentations, parameter init, encoder composition
# ----------------------------------------------------------------------------

def augment(key, adj, feat, drop_edge_p, feat_mask_p):
    """DropEdge + FeatMask + add_self_loop; returns int8 A and D^-1/2 vector."""
    n = adj.shape[0]
    k_edge, k_feat = jax.random.split(key)
    keep = (jax.random.uniform(k_edge, adj.shape) > drop_edge_p
            ).astype(adj.dtype)
    a = adj * keep
    eye = jnp.eye(n, dtype=adj.dtype)
    a = a * (1.0 - eye) + eye                         # dgl.add_self_loop
    feat_keep = (jax.random.uniform(k_feat, (1, feat.shape[1])) > feat_mask_p
                 ).astype(feat.dtype)
    f = feat * feat_keep
    deg = jnp.sum(a, axis=1, keepdims=True)
    d_inv_sqrt = lax.rsqrt(jnp.maximum(deg, 1e-12))   # (N, 1)
    # TODO(synk): fuse DropEdge mask + self-loop into the spmm A-tile path
    # (pltpu.prng_seed/prng_random_bits, seeded per (view, i, k) tile so both
    # layers see the same mask), so the augmented N^2 A never hits HBM.
    return a.astype(jnp.int8), f, d_inv_sqrt.astype(jnp.float32)


def _glorot(k, fan_in, fan_out):
    scale = jnp.sqrt(6.0 / (fan_in + fan_out))
    return jax.random.uniform(k, (fan_in, fan_out), jnp.float32, -scale, scale)


def init_encoder_params(key, in_dim, hid_dim, out_dim):
    k1, k2 = jax.random.split(key)
    return dict(
        w1=_glorot(k1, in_dim, hid_dim),
        b1=jnp.zeros((1, hid_dim), jnp.float32),
        g1=jnp.ones((1, hid_dim), jnp.float32),
        be1=jnp.zeros((1, hid_dim), jnp.float32),
        al1=jnp.full((1, 1), 0.25, jnp.float32),
        w2=_glorot(k2, hid_dim, out_dim),
        b2=jnp.zeros((1, out_dim), jnp.float32),
        g2=jnp.ones((1, out_dim), jnp.float32),
        be2=jnp.zeros((1, out_dim), jnp.float32),
        al2=jnp.full((1, 1), 0.25, jnp.float32),
    )


def init_predictor_params(key, in_dim, hid_dim, out_dim):
    k1, k2 = jax.random.split(key)
    return dict(
        w1=_glorot(k1, in_dim, hid_dim),
        b1=jnp.zeros((1, hid_dim), jnp.float32),
        al=jnp.full((1, 1), 0.25, jnp.float32),
        w2=_glorot(k2, hid_dim, out_dim),
        b2=jnp.zeros((1, out_dim), jnp.float32),
    )


def _cat_cols(a, b):
    return jnp.concatenate([a, b], axis=1)


def _block_diag(w_a, w_b):
    ra, ca = w_a.shape
    rb, cb = w_b.shape
    top = jnp.concatenate([w_a, jnp.zeros((ra, cb), w_a.dtype)], axis=1)
    bot = jnp.concatenate([jnp.zeros((rb, ca), w_b.dtype), w_b], axis=1)
    return jnp.concatenate([top, bot], axis=0)


@jax.jit
def bgrl_forward(online_params, target_params, pred_params, adj, feat,
                 aug_key):
    hid = online_params["w1"].shape[1]
    out_dim = online_params["w2"].shape[1]

    k1, k2 = jax.random.split(aug_key)
    a1, f1, d1 = augment(k1, adj, feat, 0.3, 0.3)     # transform_1 (view 1)
    a2, f2, d2 = augment(k2, adj, feat, 0.2, 0.4)     # transform_2 (view 2)

    a_s = jnp.stack([a1, a2])                         # (2, N, N)  int8
    f_s = jnp.stack([f1, f2])                         # (2, N, IN) f32
    d_s = jnp.stack([d1, d2])                         # (2, N, 1)  f32

    on, tar = online_params, target_params

    # ---- layer 1: online|target lane-concatenated, one adjacency pass/view --
    w1_cat = _cat_cols(on["w1"], tar["w1"]).astype(jnp.bfloat16)
    b1_cat = _cat_cols(on["b1"], tar["b1"])
    xw1 = gcn_xw(f_s, w1_cat, d_s)                    # (2, N, 2*hid) bf16
    z1 = spmm_norm_bias(a_s, xw1, d_s, b1_cat)        # (2, N, 2*hid) f32
    st1 = bn_stats(z1)                                # (2, 2, 2*hid)

    g1_cat = _cat_cols(on["g1"], tar["g1"])
    be1_cat = _cat_cols(on["be1"], tar["be1"])
    al1_cat = _cat_cols(jnp.broadcast_to(on["al1"], (1, hid)),
                        jnp.broadcast_to(tar["al1"], (1, hid)))

    # ---- layer 2: BN+PReLU fused into the block-diagonal feature transform --
    w2_bd = _block_diag(on["w2"], tar["w2"]).astype(jnp.bfloat16)
    b2_cat = _cat_cols(on["b2"], tar["b2"])
    xw2 = bn_prelu_xw(z1, st1, g1_cat, be1_cat, al1_cat, w2_bd, d_s)
    z2 = spmm_norm_bias(a_s, xw2, d_s, b2_cat)        # (2, N, 2*out) f32
    st2 = bn_stats(z2)

    g2_cat = _cat_cols(on["g2"], tar["g2"])
    be2_cat = _cat_cols(on["be2"], tar["be2"])
    al2_cat = _cat_cols(jnp.broadcast_to(on["al2"], (1, out_dim)),
                        jnp.broadcast_to(tar["al2"], (1, out_dim)))

    # ---- fused BN+PReLU + MLP predictor + cosine loss (cross-view pairing) --
    return bn_prelu_predict_loss(
        z2, st2, g2_cat, be2_cat, al2_cat,
        pred_params["w1"].astype(jnp.bfloat16), pred_params["b1"],
        pred_params["w2"].astype(jnp.bfloat16), pred_params["b2"],
        pred_params["al"], out_dim)


# ----------------------------------------------------------------------------
# Driver
# ----------------------------------------------------------------------------

if __name__ == "__main__":
    N_NODES, IN_DIM, HID_DIM, OUT_DIM, PRED_HID = 256, 32, 64, 64, 128

    root = jax.random.PRNGKey(0)
    k_graph, k_feat, k_online, k_target, k_pred, k_aug = jax.random.split(
        root, 6)

    # Deterministic random undirected graph (dense adjacency, no self loops).
    upper = (jax.random.uniform(k_graph, (N_NODES, N_NODES)) > 0.9
             ).astype(jnp.float32)
    adj = jnp.triu(upper, k=1)
    adj = adj + adj.T

    feat = jax.random.normal(k_feat, (N_NODES, IN_DIM), jnp.float32)

    online_params = init_encoder_params(k_online, IN_DIM, HID_DIM, OUT_DIM)
    # target_encoder = deepcopy(encoder); target_encoder.reset_parameters()
    # -> same architecture, independently re-initialized weights:
    target_params = init_encoder_params(k_target, IN_DIM, HID_DIM, OUT_DIM)
    pred_params = init_predictor_params(k_pred, OUT_DIM, PRED_HID, OUT_DIM)

    loss = bgrl_forward(online_params, target_params, pred_params,
                        adj, feat, k_aug)
    jax.block_until_ready(loss)
    assert loss.shape == () and bool(jnp.isfinite(loss))
    print("KERNEL_OK")
</pallas_src>

<mosaic_0001>
module attributes {stable_mosaic.version = 11 : i64} {
  func.func @_xw_scale_kernel(%arg0: i32, %arg1: i32, %arg2: memref<1x256x32xf32, #tpu.memory_space<vmem>>, %arg3: memref<32x128xbf16, #tpu.memory_space<vmem>>, %arg4: memref<1x256x1xf32, #tpu.memory_space<vmem>>, %arg5: memref<1x256x128xbf16, #tpu.memory_space<vmem>>) attributes {dimension_semantics = [#tpu.dimension_semantics<parallel>, #tpu.dimension_semantics<parallel>], iteration_bounds = array<i64: 2, 1>, scalar_prefetch = 0 : i64, scratch_operands = 0 : i64, tpu.core_type = #tpu.core_type<tc>, window_params = [{transform_indices = @transform_0, window_bounds = array<i64: 1, 256, 32>}, {pipeline_mode = #tpu.pipeline_mode<synchronous>, transform_indices = @transform_1, window_bounds = array<i64: 32, 128>}, {transform_indices = @transform_2, window_bounds = array<i64: 1, 256, 1>}, {transform_indices = @transform_3, window_bounds = array<i64: 1, 256, 128>}]} {
    %c0 = arith.constant 0 : index
    %c0_0 = arith.constant 0 : index
    %c0_1 = arith.constant 0 : index
    %0 = vector.load %arg2[%c0, %c0_0, %c0_1] : memref<1x256x32xf32, #tpu.memory_space<vmem>>, vector<1x256x32xf32>
    %1 = vector.shape_cast %0 : vector<1x256x32xf32> to vector<256x32xf32>
    %2 = arith.truncf %1 : vector<256x32xf32> to vector<256x32xbf16>
    %c0_2 = arith.constant 0 : index
    %c0_3 = arith.constant 0 : index
    %3 = vector.load %arg3[%c0_2, %c0_3] : memref<32x128xbf16, #tpu.memory_space<vmem>>, vector<32x128xbf16>
    %cst = arith.constant dense<0.000000e+00> : vector<256x128xf32>
    %4 = tpu.matmul %2, %3, %cst {dimension_numbers = #tpu.dot_dimension_numbers<[1], [0], [0], [1], [0, 0, 1, 1], [], []>} : vector<256x32xbf16>, vector<32x128xbf16>, vector<256x128xf32> -> vector<256x128xf32>
    %c0_4 = arith.constant 0 : index
    %c0_5 = arith.constant 0 : index
    %c0_6 = arith.constant 0 : index
    %5 = vector.load %arg4[%c0_4, %c0_5, %c0_6] : memref<1x256x1xf32, #tpu.memory_space<vmem>>, vector<1x256x1xf32>
    %6 = vector.shape_cast %5 : vector<1x256x1xf32> to vector<256x1xf32>
    %7 = vector.broadcast %6 : vector<256x1xf32> to vector<256x128xf32>
    %8 = arith.mulf %4, %7 : vector<256x128xf32>
    %9 = arith.truncf %8 : vector<256x128xf32> to vector<256x128xbf16>
    %c0_7 = arith.constant 0 : index
    %c0_8 = arith.constant 0 : index
    %c0_9 = arith.constant 0 : index
    %10 = vector.load %arg5[%c0_7, %c0_8, %c0_9] : memref<1x256x128xbf16, #tpu.memory_space<vmem>>, vector<1x256x128xbf16>
    %11 = vector.shape_cast %10 : vector<1x256x128xbf16> to vector<256x128xbf16>
    %12 = vector.shape_cast %9 : vector<256x128xbf16> to vector<1x256x128xbf16>
    tpu.vector_store %arg5[%c0_7, %c0_8, %c0_9], %12 {strides = array<i32>} : memref<1x256x128xbf16, #tpu.memory_space<vmem>>, vector<1x256x128xbf16>,
    return
  }
  func.func @transform_0(%arg0: i32, %arg1: i32) -> (i32, i32, i32) {
    %c0_i32 = arith.constant 0 : i32
    %c0_i32_0 = arith.constant 0 : i32
    return %arg0, %arg1, %c0_i32 : i32, i32, i32
  }
  func.func @transform_1(%arg0: i32, %arg1: i32) -> (i32, i32) {
    %c0_i32 = arith.constant 0 : i32
    %c0_i32_0 = arith.constant 0 : i32
    %c0_i32_1 = arith.constant 0 : i32
    return %c0_i32, %c0_i32_0 : i32, i32
  }
  func.func @transform_2(%arg0: i32, %arg1: i32) -> (i32, i32, i32) {
    %c0_i32 = arith.constant 0 : i32
    %c0_i32_0 = arith.constant 0 : i32
    return %arg0, %arg1, %c0_i32 : i32, i32, i32
  }
  func.func @transform_3(%arg0: i32, %arg1: i32) -> (i32, i32, i32) {
    %c0_i32 = arith.constant 0 : i32
    %c0_i32_0 = arith.constant 0 : i32
    return %arg0, %arg1, %c0_i32 : i32, i32, i32
  }
}

module attributes {stable_mosaic.version = 11 : i64} {
  func.func @_spmm_kernel(%arg0: i32, %arg1: i32, %arg2: i32, %arg3: memref<1x256x256xi8, #tpu.memory_space<vmem>>, %arg4: memref<1x256x128xbf16, #tpu.memory_space<vmem>>, %arg5: memref<1x256x1xf32, #tpu.memory_space<vmem>>, %arg6: memref<1x128xf32, #tpu.memory_space<vmem>>, %arg7: memref<1x256x128xf32, #tpu.memory_space<vmem>>) attributes {dimension_semantics = [#tpu.dimension_semantics<parallel>, #tpu.dimension_semantics<parallel>, #tpu.dimension_semantics<arbitrary>], iteration_bounds = array<i64: 2, 1, 1>, scalar_prefetch = 0 : i64, scratch_operands = 0 : i64, tpu.core_type = #tpu.core_type<tc>, window_params = [{transform_indices = @transform_0, window_bounds = array<i64: 1, 256, 256>}, {transform_indices = @transform_1, window_bounds = array<i64: 1, 256, 128>}, {transform_indices = @transform_2, window_bounds = array<i64: 1, 256, 1>}, {pipeline_mode = #tpu.pipeline_mode<synchronous>, transform_indices = @transform_3, window_bounds = array<i64: 1, 128>}, {transform_indices = @transform_4, window_bounds = array<i64: 1, 256, 128>}]} {
    %c0_i32 = arith.constant 0 : i32
    %0 = arith.cmpi eq, %arg2, %c0_i32 : i32
    %1 = arith.extui %0 : i1 to i32
    %c0_i32_0 = arith.constant 0 : i32
    %2 = arith.cmpi ne, %1, %c0_i32_0 : i32
    scf.if %2 {
      %cst_14 = arith.constant 0.000000e+00 : f32
      %19 = vector.broadcast %cst_14 : f32 to vector<1x256x128xf32>
      %c0_15 = arith.constant 0 : index
      %c0_16 = arith.constant 0 : index
      %c0_17 = arith.constant 0 : index
      %20 = vector.load %arg7[%c0_15, %c0_16, %c0_17] : memref<1x256x128xf32, #tpu.memory_space<vmem>>, vector<1x256x128xf32>
      tpu.vector_store %arg7[%c0_15, %c0_16, %c0_17], %19 {strides = array<i32>} : memref<1x256x128xf32, #tpu.memory_space<vmem>>, vector<1x256x128xf32>,
    } else {
    }
    %c0 = arith.constant 0 : index
    %c0_1 = arith.constant 0 : index
    %c0_2 = arith.constant 0 : index
    %3 = vector.load %arg3[%c0, %c0_1, %c0_2] : memref<1x256x256xi8, #tpu.memory_space<vmem>>, vector<1x256x256xi8>
    %4 = vector.shape_cast %3 : vector<1x256x256xi8> to vector<256x256xi8>
    %5 = arith.sitofp %4 : vector<256x256xi8> to vector<256x256xf32>
    %6 = arith.truncf %5 : vector<256x256xf32> to vector<256x256xbf16>
    %c0_3 = arith.constant 0 : index
    %c0_4 = arith.constant 0 : index
    %c0_5 = arith.constant 0 : index
    %7 = vector.load %arg7[%c0_3, %c0_4, %c0_5] : memref<1x256x128xf32, #tpu.memory_space<vmem>>, vector<1x256x128xf32>
    %8 = vector.shape_cast %7 : vector<1x256x128xf32> to vector<256x128xf32>
    %c0_6 = arith.constant 0 : index
    %c0_7 = arith.constant 0 : index
    %c0_8 = arith.constant 0 : index
    %9 = vector.load %arg4[%c0_6, %c0_7, %c0_8] : memref<1x256x128xbf16, #tpu.memory_space<vmem>>, vector<1x256x128xbf16>
    %10 = vector.shape_cast %9 : vector<1x256x128xbf16> to vector<256x128xbf16>
    %cst = arith.constant dense<0.000000e+00> : vector<256x128xf32>
    %11 = tpu.matmul %6, %10, %cst {dimension_numbers = #tpu.dot_dimension_numbers<[1], [0], [0], [1], [0, 0, 1, 1], [], []>} : vector<256x256xbf16>, vector<256x128xbf16>, vector<256x128xf32> -> vector<256x128xf32>
    %12 = arith.addf %8, %11 : vector<256x128xf32>
    %c0_9 = arith.constant 0 : index
    %c0_10 = arith.constant 0 : index
    %c0_11 = arith.constant 0 : index
    %13 = vector.load %arg7[%c0_9, %c0_10, %c0_11] : memref<1x256x128xf32, #tpu.memory_space<vmem>>, vector<1x256x128xf32>
    %14 = vector.shape_cast %13 : vector<1x256x128xf32> to vector<256x128xf32>
    %15 = vector.shape_cast %12 : vector<256x128xf32> to vector<1x256x128xf32>
    tpu.vector_store %arg7[%c0_9, %c0_10, %c0_11], %15 {strides = array<i32>} : memref<1x256x128xf32, #tpu.memory_space<vmem>>, vector<1x256x128xf32>,
    %c0_i32_12 = arith.constant 0 : i32
    %16 = arith.cmpi eq, %arg2, %c0_i32_12 : i32
    %17 = arith.extui %16 : i1 to i32
    %c0_i32_13 = arith.constant 0 : i32
    %18 = arith.cmpi ne, %17, %c0_i32_13 : i32
    scf.if %18 {
      %c0_14 = arith.constant 0 : index
      %c0_15 = arith.constant 0 : index
      %c0_16 = arith.constant 0 : index
      %19 = vector.load %arg7[%c0_14, %c0_15, %c0_16] : memref<1x256x128xf32, #tpu.memory_space<vmem>>, vector<1x256x128xf32>
      %20 = vector.shape_cast %19 : vector<1x256x128xf32> to vector<256x128xf32>
      %c0_17 = arith.constant 0 : index
      %c0_18 = arith.constant 0 : index
      %c0_19 = arith.constant 0 : index
      %21 = vector.load %arg5[%c0_17, %c0_18, %c0_19] : memref<1x256x1xf32, #tpu.memory_space<vmem>>, vector<1x256x1xf32>
      %22 = vector.shape_cast %21 : vector<1x256x1xf32> to vector<256x1xf32>
      %23 = vector.broadcast %22 : vector<256x1xf32> to vector<256x128xf32>
      %24 = arith.mulf %20, %23 : vector<256x128xf32>
      %c0_20 = arith.constant 0 : index
      %c0_21 = arith.constant 0 : index
      %25 = vector.load %arg6[%c0_20, %c0_21] : memref<1x128xf32, #tpu.memory_space<vmem>>, vector<1x128xf32>
      %26 = vector.broadcast %25 : vector<1x128xf32> to vector<256x128xf32>
      %27 = arith.addf %24, %26 : vector<256x128xf32>
      %c0_22 = arith.constant 0 : index
      %c0_23 = arith.constant 0 : index
      %c0_24 = arith.constant 0 : index
      %28 = vector.load %arg7[%c0_22, %c0_23, %c0_24] : memref<1x256x128xf32, #tpu.memory_space<vmem>>, vector<1x256x128xf32>
      %29 = vector.shape_cast %28 : vector<1x256x128xf32> to vector<256x128xf32>
      %30 = vector.shape_cast %27 : vector<256x128xf32> to vector<1x256x128xf32>
      tpu.vector_store %arg7[%c0_22, %c0_23, %c0_24], %30 {strides = array<i32>} : memref<1x256x128xf32, #tpu.memory_space<vmem>>, vector<1x256x128xf32>,
    } else {
    }
    return
  }
  func.func @transform_0(%arg0: i32, %arg1: i32, %arg2: i32) -> (i32, i32, i32) {
    %c0_i32 = arith.constant 0 : i32
    return %arg0, %arg1, %arg2 : i32, i32, i32
  }
  func.func @transform_1(%arg0: i32, %arg1: i32, %arg2: i32) -> (i32, i32, i32) {
    %c0_i32 = arith.constant 0 : i32
    %c0_i32_0 = arith.constant 0 : i32
    return %arg0, %arg2, %c0_i32 : i32, i32, i32
  }
  func.func @transform_2(%arg0: i32, %arg1: i32, %arg2: i32) -> (i32, i32, i32) {
    %c0_i32 = arith.constant 0 : i32
    %c0_i32_0 = arith.constant 0 : i32
    return %arg0, %arg1, %c0_i32 : i32, i32, i32
  }
  func.func @transform_3(%arg0: i32, %arg1: i32, %arg2: i32) -> (i32, i32) {
    %c0_i32 = arith.constant 0 : i32
    %c0_i32_0 = arith.constant 0 : i32
    %c0_i32_1 = arith.constant 0 : i32
    return %c0_i32, %c0_i32_0 : i32, i32
  }
  func.func @transform_4(%arg0: i32, %arg1: i32, %arg2: i32) -> (i32, i32, i32) {
    %c0_i32 = arith.constant 0 : i32
    %c0_i32_0 = arith.constant 0 : i32
    return %arg0, %arg1, %c0_i32 : i32, i32, i32
  }
}

module attributes {stable_mosaic.version = 11 : i64} {
  func.func @_bn_stats_kernel(%arg0: i32, %arg1: i32, %arg2: memref<1x256x128xf32, #tpu.memory_space<vmem>>, %arg3: memref<1x2x128xf32, #tpu.memory_space<vmem>>) attributes {dimension_semantics = [#tpu.dimension_semantics<parallel>, #tpu.dimension_semantics<arbitrary>], iteration_bounds = array<i64: 2, 1>, scalar_prefetch = 0 : i64, scratch_operands = 0 : i64, tpu.core_type = #tpu.core_type<tc>, window_params = [{transform_indices = @transform_0, window_bounds = array<i64: 1, 256, 128>}, {transform_indices = @transform_1, window_bounds = array<i64: 1, 2, 128>}]} {
    %c0_i32 = arith.constant 0 : i32
    %0 = arith.cmpi eq, %arg1, %c0_i32 : i32
    %1 = arith.extui %0 : i1 to i32
    %c0_i32_0 = arith.constant 0 : i32
    %2 = arith.cmpi ne, %1, %c0_i32_0 : i32
    scf.if %2 {
      %cst_10 = arith.constant 0.000000e+00 : f32
      %17 = vector.broadcast %cst_10 : f32 to vector<1x2x128xf32>
      %c0_11 = arith.constant 0 : index
      %c0_12 = arith.constant 0 : index
      %c0_13 = arith.constant 0 : index
      %18 = vector.load %arg3[%c0_11, %c0_12, %c0_13] : memref<1x2x128xf32, #tpu.memory_space<vmem>>, vector<1x2x128xf32>
      tpu.vector_store %arg3[%c0_11, %c0_12, %c0_13], %17 {strides = array<i32>} : memref<1x2x128xf32, #tpu.memory_space<vmem>>, vector<1x2x128xf32>,
    } else {
    }
    %c0 = arith.constant 0 : index
    %c0_1 = arith.constant 0 : index
    %c0_2 = arith.constant 0 : index
    %3 = vector.load %arg2[%c0, %c0_1, %c0_2] : memref<1x256x128xf32, #tpu.memory_space<vmem>>, vector<1x256x128xf32>
    %4 = vector.shape_cast %3 : vector<1x256x128xf32> to vector<256x128xf32>
    %cst = arith.constant dense<0.000000e+00> : vector<128xf32>
    %5 = vector.multi_reduction <add>, %4, %cst [0] : vector<256x128xf32> to vector<128xf32>
    %6 = vector.shape_cast %5 : vector<128xf32> to vector<1x128xf32>
    %7 = arith.mulf %4, %4 : vector<256x128xf32>
    %cst_3 = arith.constant dense<0.000000e+00> : vector<128xf32>
    %8 = vector.multi_reduction <add>, %7, %cst_3 [0] : vector<256x128xf32> to vector<128xf32>
    %9 = vector.shape_cast %8 : vector<128xf32> to vector<1x128xf32>
    %c0_4 = arith.constant 0 : index
    %c0_5 = arith.constant 0 : index
    %c0_6 = arith.constant 0 : index
    %10 = vector.load %arg3[%c0_4, %c0_5, %c0_6] : memref<1x2x128xf32, #tpu.memory_space<vmem>>, vector<1x2x128xf32>
    %11 = vector.shape_cast %10 : vector<1x2x128xf32> to vector<2x128xf32>
    %12 = tpu.concatenate %6, %9 in 0 : vector<1x128xf32>, vector<1x128xf32> -> vector<2x128xf32>
    %13 = arith.addf %11, %12 : vector<2x128xf32>
    %c0_7 = arith.constant 0 : index
    %c0_8 = arith.constant 0 : index
    %c0_9 = arith.constant 0 : index
    %14 = vector.load %arg3[%c0_7, %c0_8, %c0_9] : memref<1x2x128xf32, #tpu.memory_space<vmem>>, vector<1x2x128xf32>
    %15 = vector.shape_cast %14 : vector<1x2x128xf32> to vector<2x128xf32>
    %16 = vector.shape_cast %13 : vector<2x128xf32> to vector<1x2x128xf32>
    tpu.vector_store %arg3[%c0_7, %c0_8, %c0_9], %16 {strides = array<i32>} : memref<1x2x128xf32, #tpu.memory_space<vmem>>, vector<1x2x128xf32>,
    return
  }
  func.func @transform_0(%arg0: i32, %arg1: i32) -> (i32, i32, i32) {
    %c0_i32 = arith.constant 0 : i32
    %c0_i32_0 = arith.constant 0 : i32
    return %arg0, %arg1, %c0_i32 : i32, i32, i32
  }
  func.func @transform_1(%arg0: i32, %arg1: i32) -> (i32, i32, i32) {
    %c0_i32 = arith.constant 0 : i32
    %c0_i32_0 = arith.constant 0 : i32
    %c0_i32_1 = arith.constant 0 : i32
    return %arg0, %c0_i32, %c0_i32_0 : i32, i32, i32
  }
}

module attributes {stable_mosaic.version = 11 : i64} {
  func.func @_bn_prelu_matmul_kernel(%arg0: i32, %arg1: i32, %arg2: memref<1x256x128xf32, #tpu.memory_space<vmem>>, %arg3: memref<1x2x128xf32, #tpu.memory_space<vmem>>, %arg4: memref<1x128xf32, #tpu.memory_space<vmem>>, %arg5: memref<1x128xf32, #tpu.memory_space<vmem>>, %arg6: memref<1x128xf32, #tpu.memory_space<vmem>>, %arg7: memref<128x128xbf16, #tpu.memory_space<vmem>>, %arg8: memref<1x256x1xf32, #tpu.memory_space<vmem>>, %arg9: memref<1x256x128xbf16, #tpu.memory_space<vmem>>) attributes {dimension_semantics = [#tpu.dimension_semantics<parallel>, #tpu.dimension_semantics<parallel>], iteration_bounds = array<i64: 2, 1>, scalar_prefetch = 0 : i64, scratch_operands = 0 : i64, tpu.core_type = #tpu.core_type<tc>, window_params = [{transform_indices = @transform_0, window_bounds = array<i64: 1, 256, 128>}, {transform_indices = @transform_1, window_bounds = array<i64: 1, 2, 128>}, {pipeline_mode = #tpu.pipeline_mode<synchronous>, transform_indices = @transform_2, window_bounds = array<i64: 1, 128>}, {pipeline_mode = #tpu.pipeline_mode<synchronous>, transform_indices = @transform_3, window_bounds = array<i64: 1, 128>}, {pipeline_mode = #tpu.pipeline_mode<synchronous>, transform_indices = @transform_4, window_bounds = array<i64: 1, 128>}, {pipeline_mode = #tpu.pipeline_mode<synchronous>, transform_indices = @transform_5, window_bounds = array<i64: 128, 128>}, {transform_indices = @transform_6, window_bounds = array<i64: 1, 256, 1>}, {transform_indices = @transform_7, window_bounds = array<i64: 1, 256, 128>}]} {
    %c0 = arith.constant 0 : index
    %c0_0 = arith.constant 0 : index
    %c0_1 = arith.constant 0 : index
    %0 = vector.load %arg3[%c0, %c0_0, %c0_1] : memref<1x2x128xf32, #tpu.memory_space<vmem>>, vector<1x2x128xf32>
    %1 = vector.shape_cast %0 : vector<1x2x128xf32> to vector<2x128xf32>
    %2 = vector.extract_strided_slice %1 {offsets = [0, 0], sizes = [1, 128], strides = [1, 1]} : vector<2x128xf32> to vector<1x128xf32>
    %cst = arith.constant 3.906250e-03 : f32
    %3 = vector.broadcast %cst : f32 to vector<1x128xf32>
    %4 = arith.mulf %2, %3 : vector<1x128xf32>
    %5 = vector.extract_strided_slice %1 {offsets = [1, 0], sizes = [1, 128], strides = [1, 1]} : vector<2x128xf32> to vector<1x128xf32>
    %cst_2 = arith.constant 3.906250e-03 : f32
    %6 = vector.broadcast %cst_2 : f32 to vector<1x128xf32>
    %7 = arith.mulf %5, %6 : vector<1x128xf32>
    %8 = arith.mulf %4, %4 : vector<1x128xf32>
    %9 = arith.subf %7, %8 : vector<1x128xf32>
    %c0_3 = arith.constant 0 : index
    %c0_4 = arith.constant 0 : index
    %c0_5 = arith.constant 0 : index
    %10 = vector.load %arg2[%c0_3, %c0_4, %c0_5] : memref<1x256x128xf32, #tpu.memory_space<vmem>>, vector<1x256x128xf32>
    %11 = vector.shape_cast %10 : vector<1x256x128xf32> to vector<256x128xf32>
    %12 = vector.broadcast %4 : vector<1x128xf32> to vector<256x128xf32>
    %13 = arith.subf %11, %12 : vector<256x128xf32>
    %cst_6 = arith.constant 9.99999974E-6 : f32
    %14 = vector.broadcast %cst_6 : f32 to vector<1x128xf32>
    %15 = arith.addf %9, %14 : vector<1x128xf32>
    %16 = math.rsqrt %15 : vector<1x128xf32>
    %17 = vector.broadcast %16 : vector<1x128xf32> to vector<256x128xf32>
    %18 = arith.mulf %13, %17 : vector<256x128xf32>
    %c0_7 = arith.constant 0 : index
    %c0_8 = arith.constant 0 : index
    %19 = vector.load %arg4[%c0_7, %c0_8] : memref<1x128xf32, #tpu.memory_space<vmem>>, vector<1x128xf32>
    %20 = vector.broadcast %19 : vector<1x128xf32> to vector<256x128xf32>
    %21 = arith.mulf %18, %20 : vector<256x128xf32>
    %c0_9 = arith.constant 0 : index
    %c0_10 = arith.constant 0 : index
    %22 = vector.load %arg5[%c0_9, %c0_10] : memref<1x128xf32, #tpu.memory_space<vmem>>, vector<1x128xf32>
    %23 = vector.broadcast %22 : vector<1x128xf32> to vector<256x128xf32>
    %24 = arith.addf %21, %23 : vector<256x128xf32>
    %cst_11 = arith.constant 0.000000e+00 : f32
    %25 = vector.broadcast %cst_11 : f32 to vector<256x128xf32>
    %26 = arith.cmpf ogt, %24, %25 : vector<256x128xf32>
    %c0_12 = arith.constant 0 : index
    %c0_13 = arith.constant 0 : index
    %27 = vector.load %arg6[%c0_12, %c0_13] : memref<1x128xf32, #tpu.memory_space<vmem>>, vector<1x128xf32>
    %28 = vector.broadcast %27 : vector<1x128xf32> to vector<256x128xf32>
    %29 = arith.mulf %28, %24 : vector<256x128xf32>
    %30 = arith.select %26, %24, %29 : vector<256x128xi1>, vector<256x128xf32>
    %31 = arith.truncf %30 : vector<256x128xf32> to vector<256x128xbf16>
    %c0_14 = arith.constant 0 : index
    %c0_15 = arith.constant 0 : index
    %32 = vector.load %arg7[%c0_14, %c0_15] : memref<128x128xbf16, #tpu.memory_space<vmem>>, vector<128x128xbf16>
    %cst_16 = arith.constant dense<0.000000e+00> : vector<256x128xf32>
    %33 = tpu.matmul %31, %32, %cst_16 {dimension_numbers = #tpu.dot_dimension_numbers<[1], [0], [0], [1], [0, 0, 1, 1], [], []>} : vector<256x128xbf16>, vector<128x128xbf16>, vector<256x128xf32> -> vector<256x128xf32>
    %c0_17 = arith.constant 0 : index
    %c0_18 = arith.constant 0 : index
    %c0_19 = arith.constant 0 : index
    %34 = vector.load %arg8[%c0_17, %c0_18, %c0_19] : memref<1x256x1xf32, #tpu.memory_space<vmem>>, vector<1x256x1xf32>
    %35 = vector.shape_cast %34 : vector<1x256x1xf32> to vector<256x1xf32>
    %36 = vector.broadcast %35 : vector<256x1xf32> to vector<256x128xf32>
    %37 = arith.mulf %33, %36 : vector<256x128xf32>
    %38 = arith.truncf %37 : vector<256x128xf32> to vector<256x128xbf16>
    %c0_20 = arith.constant 0 : index
    %c0_21 = arith.constant 0 : index
    %c0_22 = arith.constant 0 : index
    %39 = vector.load %arg9[%c0_20, %c0_21, %c0_22] : memref<1x256x128xbf16, #tpu.memory_space<vmem>>, vector<1x256x128xbf16>
    %40 = vector.shape_cast %39 : vector<1x256x128xbf16> to vector<256x128xbf16>
    %41 = vector.shape_cast %38 : vector<256x128xbf16> to vector<1x256x128xbf16>
    tpu.vector_store %arg9[%c0_20, %c0_21, %c0_22], %41 {strides = array<i32>} : memref<1x256x128xbf16, #tpu.memory_space<vmem>>, vector<1x256x128xbf16>,
    return
  }
  func.func @transform_0(%arg0: i32, %arg1: i32) -> (i32, i32, i32) {
    %c0_i32 = arith.constant 0 : i32
    %c0_i32_0 = arith.constant 0 : i32
    return %arg0, %arg1, %c0_i32 : i32, i32, i32
  }
  func.func @transform_1(%arg0: i32, %arg1: i32) -> (i32, i32, i32) {
    %c0_i32 = arith.constant 0 : i32
    %c0_i32_0 = arith.constant 0 : i32
    %c0_i32_1 = arith.constant 0 : i32
    return %arg0, %c0_i32, %c0_i32_0 : i32, i32, i32
  }
  func.func @transform_2(%arg0: i32, %arg1: i32) -> (i32, i32) {
    %c0_i32 = arith.constant 0 : i32
    %c0_i32_0 = arith.constant 0 : i32
    %c0_i32_1 = arith.constant 0 : i32
    return %c0_i32, %c0_i32_0 : i32, i32
  }
  func.func @transform_3(%arg0: i32, %arg1: i32) -> (i32, i32) {
    %c0_i32 = arith.constant 0 : i32
    %c0_i32_0 = arith.constant 0 : i32
    %c0_i32_1 = arith.constant 0 : i32
    return %c0_i32, %c0_i32_0 : i32, i32
  }
  func.func @transform_4(%arg0: i32, %arg1: i32) -> (i32, i32) {
    %c0_i32 = arith.constant 0 : i32
    %c0_i32_0 = arith.constant 0 : i32
    %c0_i32_1 = arith.constant 0 : i32
    return %c0_i32, %c0_i32_0 : i32, i32
  }
  func.func @transform_5(%arg0: i32, %arg1: i32) -> (i32, i32) {
    %c0_i32 = arith.constant 0 : i32
    %c0_i32_0 = arith.constant 0 : i32
    %c0_i32_1 = arith.constant 0 : i32
    return %c0_i32, %c0_i32_0 : i32, i32
  }
  func.func @transform_6(%arg0: i32, %arg1: i32) -> (i32, i32, i32) {
    %c0_i32 = arith.constant 0 : i32
    %c0_i32_0 = arith.constant 0 : i32
    return %arg0, %arg1, %c0_i32 : i32, i32, i32
  }
  func.func @transform_7(%arg0: i32, %arg1: i32) -> (i32, i32, i32) {
    %c0_i32 = arith.constant 0 : i32
    %c0_i32_0 = arith.constant 0 : i32
    return %arg0, %arg1, %c0_i32 : i32, i32, i32
  }
}

module attributes {stable_mosaic.version = 11 : i64} {
  func.func @_bn_prelu_pred_loss_kernel(%arg0: i32, %arg1: memref<2x256x128xf32, #tpu.memory_space<vmem>>, %arg2: memref<2x2x128xf32, #tpu.memory_space<vmem>>, %arg3: memref<1x128xf32, #tpu.memory_space<vmem>>, %arg4: memref<1x128xf32, #tpu.memory_space<vmem>>, %arg5: memref<1x128xf32, #tpu.memory_space<vmem>>, %arg6: memref<64x128xbf16, #tpu.memory_space<vmem>>, %arg7: memref<1x128xf32, #tpu.memory_space<vmem>>, %arg8: memref<128x64xbf16, #tpu.memory_space<vmem>>, %arg9: memref<1x64xf32, #tpu.memory_space<vmem>>, %arg10: memref<1x1xf32, #tpu.memory_space<smem>>, %arg11: memref<1x1xf32, #tpu.memory_space<vmem>>) attributes {dimension_semantics = [#tpu.dimension_semantics<arbitrary>], iteration_bounds = array<i64: 1>, scalar_prefetch = 0 : i64, scratch_operands = 0 : i64, tpu.core_type = #tpu.core_type<tc>, window_params = [{transform_indices = @transform_0, window_bounds = array<i64: 2, 256, 128>}, {pipeline_mode = #tpu.pipeline_mode<synchronous>, transform_indices = @transform_1, window_bounds = array<i64: 2, 2, 128>}, {pipeline_mode = #tpu.pipeline_mode<synchronous>, transform_indices = @transform_2, window_bounds = array<i64: 1, 128>}, {pipeline_mode = #tpu.pipeline_mode<synchronous>, transform_indices = @transform_3, window_bounds = array<i64: 1, 128>}, {pipeline_mode = #tpu.pipeline_mode<synchronous>, transform_indices = @transform_4, window_bounds = array<i64: 1, 128>}, {pipeline_mode = #tpu.pipeline_mode<synchronous>, transform_indices = @transform_5, window_bounds = array<i64: 64, 128>}, {pipeline_mode = #tpu.pipeline_mode<synchronous>, transform_indices = @transform_6, window_bounds = array<i64: 1, 128>}, {pipeline_mode = #tpu.pipeline_mode<synchronous>, transform_indices = @transform_7, window_bounds = array<i64: 128, 64>}, {pipeline_mode = #tpu.pipeline_mode<synchronous>, transform_indices = @transform_8, window_bounds = array<i64: 1, 64>}, {transform_indices = @transform_9, window_bounds = array<i64: 1, 1>}, {pipeline_mode = #tpu.pipeline_mode<synchronous>, transform_indices = @transform_10, window_bounds = array<i64: 1, 1>}]} {
    %c0_i32 = arith.constant 0 : i32
    %0 = arith.cmpi eq, %arg0, %c0_i32 : i32
    %1 = arith.extui %0 : i1 to i32
    %c0_i32_0 = arith.constant 0 : i32
    %2 = arith.cmpi ne, %1, %c0_i32_0 : i32
    scf.if %2 {
      %cst_55 = arith.constant 0.000000e+00 : f32
      %117 = vector.broadcast %cst_55 : f32 to vector<1x1xf32>
      %c0_56 = arith.constant 0 : index
      %c0_57 = arith.constant 0 : index
      %118 = vector.load %arg11[%c0_56, %c0_57] : memref<1x1xf32, #tpu.memory_space<vmem>>, vector<1x1xf32>
      tpu.vector_store %arg11[%c0_56, %c0_57], %117 {strides = array<i32>} : memref<1x1xf32, #tpu.memory_space<vmem>>, vector<1x1xf32>,
    } else {
    }
    %c0 = arith.constant 0 : index
    %c0_1 = arith.constant 0 : index
    %c0_2 = arith.constant 0 : index
    %3 = vector.load %arg2[%c0, %c0_1, %c0_2] : memref<2x2x128xf32, #tpu.memory_space<vmem>>, vector<2x2x128xf32>
    %4 = vector.extract_strided_slice %3 {offsets = [0, 0, 0], sizes = [2, 1, 128], strides = [1, 1, 1]} : vector<2x2x128xf32> to vector<2x1x128xf32>
    %cst = arith.constant 3.906250e-03 : f32
    %5 = vector.broadcast %cst : f32 to vector<2x1x128xf32>
    %6 = arith.mulf %4, %5 : vector<2x1x128xf32>
    %7 = vector.extract_strided_slice %3 {offsets = [0, 1, 0], sizes = [2, 1, 128], strides = [1, 1, 1]} : vector<2x2x128xf32> to vector<2x1x128xf32>
    %cst_3 = arith.constant 3.906250e-03 : f32
    %8 = vector.broadcast %cst_3 : f32 to vector<2x1x128xf32>
    %9 = arith.mulf %7, %8 : vector<2x1x128xf32>
    %10 = arith.mulf %6, %6 : vector<2x1x128xf32>
    %11 = arith.subf %9, %10 : vector<2x1x128xf32>
    %c0_4 = arith.constant 0 : index
    %c0_5 = arith.constant 0 : index
    %c0_6 = arith.constant 0 : index
    %12 = vector.load %arg1[%c0_4, %c0_5, %c0_6] : memref<2x256x128xf32, #tpu.memory_space<vmem>>, vector<2x256x128xf32>
    %13 = vector.broadcast %6 : vector<2x1x128xf32> to vector<2x256x128xf32>
    %14 = arith.subf %12, %13 : vector<2x256x128xf32>
    %cst_7 = arith.constant 9.99999974E-6 : f32
    %15 = vector.broadcast %cst_7 : f32 to vector<2x1x128xf32>
    %16 = arith.addf %11, %15 : vector<2x1x128xf32>
    %17 = math.rsqrt %16 : vector<2x1x128xf32>
    %18 = vector.broadcast %17 : vector<2x1x128xf32> to vector<2x256x128xf32>
    %19 = arith.mulf %14, %18 : vector<2x256x128xf32>
    %c0_8 = arith.constant 0 : index
    %c0_9 = arith.constant 0 : index
    %20 = vector.load %arg3[%c0_8, %c0_9] : memref<1x128xf32, #tpu.memory_space<vmem>>, vector<1x128xf32>
    %21 = vector.shape_cast %20 : vector<1x128xf32> to vector<1x1x128xf32>
    %22 = vector.broadcast %21 : vector<1x1x128xf32> to vector<2x256x128xf32>
    %23 = arith.mulf %19, %22 : vector<2x256x128xf32>
    %c0_10 = arith.constant 0 : index
    %c0_11 = arith.constant 0 : index
    %24 = vector.load %arg4[%c0_10, %c0_11] : memref<1x128xf32, #tpu.memory_space<vmem>>, vector<1x128xf32>
    %25 = vector.shape_cast %24 : vector<1x128xf32> to vector<1x1x128xf32>
    %26 = vector.broadcast %25 : vector<1x1x128xf32> to vector<2x256x128xf32>
    %27 = arith.addf %23, %26 : vector<2x256x128xf32>
    %cst_12 = arith.constant 0.000000e+00 : f32
    %28 = vector.broadcast %cst_12 : f32 to vector<2x256x128xf32>
    %29 = arith.cmpf ogt, %27, %28 : vector<2x256x128xf32>
    %c0_13 = arith.constant 0 : index
    %c0_14 = arith.constant 0 : index
    %30 = vector.load %arg5[%c0_13, %c0_14] : memref<1x128xf32, #tpu.memory_space<vmem>>, vector<1x128xf32>
    %31 = vector.shape_cast %30 : vector<1x128xf32> to vector<1x1x128xf32>
    %32 = vector.broadcast %31 : vector<1x1x128xf32> to vector<2x256x128xf32>
    %33 = arith.mulf %32, %27 : vector<2x256x128xf32>
    %34 = arith.select %29, %27, %33 : vector<2x256x128xi1>, vector<2x256x128xf32>
    %35 = vector.extract_strided_slice %34 {offsets = [0, 0, 0], sizes = [1, 256, 64], strides = [1, 1, 1]} : vector<2x256x128xf32> to vector<1x256x64xf32>
    %36 = vector.shape_cast %35 : vector<1x256x64xf32> to vector<256x64xf32>
    %37 = vector.extract_strided_slice %34 {offsets = [0, 0, 64], sizes = [1, 256, 64], strides = [1, 1, 1]} : vector<2x256x128xf32> to vector<1x256x64xf32>
    %38 = vector.shape_cast %37 : vector<1x256x64xf32> to vector<256x64xf32>
    %39 = vector.extract_strided_slice %34 {offsets = [1, 0, 0], sizes = [1, 256, 64], strides = [1, 1, 1]} : vector<2x256x128xf32> to vector<1x256x64xf32>
    %40 = vector.shape_cast %39 : vector<1x256x64xf32> to vector<256x64xf32>
    %41 = vector.extract_strided_slice %34 {offsets = [1, 0, 64], sizes = [1, 256, 64], strides = [1, 1, 1]} : vector<2x256x128xf32> to vector<1x256x64xf32>
    %42 = vector.shape_cast %41 : vector<1x256x64xf32> to vector<256x64xf32>
    %c0_15 = arith.constant 0 : index
    %c0_16 = arith.constant 0 : index
    %43 = memref.load %arg10[%c0_15, %c0_16] : memref<1x1xf32, #tpu.memory_space<smem>>
    %c0_17 = arith.constant 0 : index
    %c0_18 = arith.constant 0 : index
    %44 = vector.load %arg11[%c0_17, %c0_18] : memref<1x1xf32, #tpu.memory_space<vmem>>, vector<1x1xf32>
    %45 = arith.truncf %36 : vector<256x64xf32> to vector<256x64xbf16>
    %c0_19 = arith.constant 0 : index
    %c0_20 = arith.constant 0 : index
    %46 = vector.load %arg6[%c0_19, %c0_20] : memref<64x128xbf16, #tpu.memory_space<vmem>>, vector<64x128xbf16>
    %cst_21 = arith.constant dense<0.000000e+00> : vector<256x128xf32>
    %47 = tpu.matmul %45, %46, %cst_21 {dimension_numbers = #tpu.dot_dimension_numbers<[1], [0], [0], [1], [0, 0, 1, 1], [], []>} : vector<256x64xbf16>, vector<64x128xbf16>, vector<256x128xf32> -> vector<256x128xf32>
    %c0_22 = arith.constant 0 : index
    %c0_23 = arith.constant 0 : index
    %48 = vector.load %arg7[%c0_22, %c0_23] : memref<1x128xf32, #tpu.memory_space<vmem>>, vector<1x128xf32>
    %49 = vector.broadcast %48 : vector<1x128xf32> to vector<256x128xf32>
    %50 = arith.addf %47, %49 : vector<256x128xf32>
    %cst_24 = arith.constant 0.000000e+00 : f32
    %51 = vector.broadcast %cst_24 : f32 to vector<256x128xf32>
    %52 = arith.cmpf ogt, %50, %51 : vector<256x128xf32>
    %53 = vector.broadcast %43 : f32 to vector<256x128xf32>
    %54 = arith.mulf %53, %50 : vector<256x128xf32>
    %55 = arith.select %52, %50, %54 : vector<256x128xi1>, vector<256x128xf32>
    %56 = arith.truncf %55 : vector<256x128xf32> to vector<256x128xbf16>
    %c0_25 = arith.constant 0 : index
    %c0_26 = arith.constant 0 : index
    %57 = vector.load %arg8[%c0_25, %c0_26] : memref<128x64xbf16, #tpu.memory_space<vmem>>, vector<128x64xbf16>
    %cst_27 = arith.constant dense<0.000000e+00> : vector<256x64xf32>
    %58 = tpu.matmul %56, %57, %cst_27 {dimension_numbers = #tpu.dot_dimension_numbers<[1], [0], [0], [1], [0, 0, 1, 1], [], []>} : vector<256x128xbf16>, vector<128x64xbf16>, vector<256x64xf32> -> vector<256x64xf32>
    %c0_28 = arith.constant 0 : index
    %c0_29 = arith.constant 0 : index
    %59 = vector.load %arg9[%c0_28, %c0_29] : memref<1x64xf32, #tpu.memory_space<vmem>>, vector<1x64xf32>
    %60 = vector.broadcast %59 : vector<1x64xf32> to vector<256x64xf32>
    %61 = arith.addf %58, %60 : vector<256x64xf32>
    %62 = arith.mulf %61, %42 : vector<256x64xf32>
    %cst_30 = arith.constant dense<0.000000e+00> : vector<256xf32>
    %63 = vector.multi_reduction <add>, %62, %cst_30 [1] : vector<256x64xf32> to vector<256xf32>
    %64 = vector.shape_cast %63 : vector<256xf32> to vector<256x1xf32>
    %65 = arith.mulf %61, %61 : vector<256x64xf32>
    %cst_31 = arith.constant dense<0.000000e+00> : vector<256xf32>
    %66 = vector.multi_reduction <add>, %65, %cst_31 [1] : vector<256x64xf32> to vector<256xf32>
    %67 = vector.shape_cast %66 : vector<256xf32> to vector<256x1xf32>
    %68 = arith.mulf %42, %42 : vector<256x64xf32>
    %cst_32 = arith.constant dense<0.000000e+00> : vector<256xf32>
    %69 = vector.multi_reduction <add>, %68, %cst_32 [1] : vector<256x64xf32> to vector<256xf32>
    %70 = vector.shape_cast %69 : vector<256xf32> to vector<256x1xf32>
    %71 = arith.mulf %67, %70 : vector<256x1xf32>
    %cst_33 = arith.constant 1.000000e-16 : f32
    %72 = vector.broadcast %cst_33 : f32 to vector<256x1xf32>
    %73 = arith.maximumf %71, %72 : vector<256x1xf32>
    %74 = math.rsqrt %73 : vector<256x1xf32>
    %75 = arith.mulf %64, %74 : vector<256x1xf32>
    %cst_34 = arith.constant dense<0.000000e+00> : vector<1xf32>
    %76 = vector.multi_reduction <add>, %75, %cst_34 [0] : vector<256x1xf32> to vector<1xf32>
    %77 = vector.shape_cast %76 : vector<1xf32> to vector<1x1xf32>
    %78 = arith.truncf %40 : vector<256x64xf32> to vector<256x64xbf16>
    %c0_35 = arith.constant 0 : index
    %c0_36 = arith.constant 0 : index
    %79 = vector.load %arg6[%c0_35, %c0_36] : memref<64x128xbf16, #tpu.memory_space<vmem>>, vector<64x128xbf16>
    %cst_37 = arith.constant dense<0.000000e+00> : vector<256x128xf32>
    %80 = tpu.matmul %78, %79, %cst_37 {dimension_numbers = #tpu.dot_dimension_numbers<[1], [0], [0], [1], [0, 0, 1, 1], [], []>} : vector<256x64xbf16>, vector<64x128xbf16>, vector<256x128xf32> -> vector<256x128xf32>
    %c0_38 = arith.constant 0 : index
    %c0_39 = arith.constant 0 : index
    %81 = vector.load %arg7[%c0_38, %c0_39] : memref<1x128xf32, #tpu.memory_space<vmem>>, vector<1x128xf32>
    %82 = vector.broadcast %81 : vector<1x128xf32> to vector<256x128xf32>
    %83 = arith.addf %80, %82 : vector<256x128xf32>
    %cst_40 = arith.constant 0.000000e+00 : f32
    %84 = vector.broadcast %cst_40 : f32 to vector<256x128xf32>
    %85 = arith.cmpf ogt, %83, %84 : vector<256x128xf32>
    %86 = vector.broadcast %43 : f32 to vector<256x128xf32>
    %87 = arith.mulf %86, %83 : vector<256x128xf32>
    %88 = arith.select %85, %83, %87 : vector<256x128xi1>, vector<256x128xf32>
    %89 = arith.truncf %88 : vector<256x128xf32> to vector<256x128xbf16>
    %c0_41 = arith.constant 0 : index
    %c0_42 = arith.constant 0 : index
    %90 = vector.load %arg8[%c0_41, %c0_42] : memref<128x64xbf16, #tpu.memory_space<vmem>>, vector<128x64xbf16>
    %cst_43 = arith.constant dense<0.000000e+00> : vector<256x64xf32>
    %91 = tpu.matmul %89, %90, %cst_43 {dimension_numbers = #tpu.dot_dimension_numbers<[1], [0], [0], [1], [0, 0, 1, 1], [], []>} : vector<256x128xbf16>, vector<128x64xbf16>, vector<256x64xf32> -> vector<256x64xf32>
    %c0_44 = arith.constant 0 : index
    %c0_45 = arith.constant 0 : index
    %92 = vector.load %arg9[%c0_44, %c0_45] : memref<1x64xf32, #tpu.memory_space<vmem>>, vector<1x64xf32>
    %93 = vector.broadcast %92 : vector<1x64xf32> to vector<256x64xf32>
    %94 = arith.addf %91, %93 : vector<256x64xf32>
    %95 = arith.mulf %94, %38 : vector<256x64xf32>
    %cst_46 = arith.constant dense<0.000000e+00> : vector<256xf32>
    %96 = vector.multi_reduction <add>, %95, %cst_46 [1] : vector<256x64xf32> to vector<256xf32>
    %97 = vector.shape_cast %96 : vector<256xf32> to vector<256x1xf32>
    %98 = arith.mulf %94, %94 : vector<256x64xf32>
    %cst_47 = arith.constant dense<0.000000e+00> : vector<256xf32>
    %99 = vector.multi_reduction <add>, %98, %cst_47 [1] : vector<256x64xf32> to vector<256xf32>
    %100 = vector.shape_cast %99 : vector<256xf32> to vector<256x1xf32>
    %101 = arith.mulf %38, %38 : vector<256x64xf32>
    %cst_48 = arith.constant dense<0.000000e+00> : vector<256xf32>
    %102 = vector.multi_reduction <add>, %101, %cst_48 [1] : vector<256x64xf32> to vector<256xf32>
    %103 = vector.shape_cast %102 : vector<256xf32> to vector<256x1xf32>
    %104 = arith.mulf %100, %103 : vector<256x1xf32>
    %cst_49 = arith.constant 1.000000e-16 : f32
    %105 = vector.broadcast %cst_49 : f32 to vector<256x1xf32>
    %106 = arith.maximumf %104, %105 : vector<256x1xf32>
    %107 = math.rsqrt %106 : vector<256x1xf32>
    %108 = arith.mulf %97, %107 : vector<256x1xf32>
    %cst_50 = arith.constant dense<0.000000e+00> : vector<1xf32>
    %109 = vector.multi_reduction <add>, %108, %cst_50 [0] : vector<256x1xf32> to vector<1xf32>
    %110 = vector.shape_cast %109 : vector<1xf32> to vector<1x1xf32>
    %111 = arith.addf %77, %110 : vector<1x1xf32>
    %112 = arith.addf %44, %111 : vector<1x1xf32>
    %c0_51 = arith.constant 0 : index
    %c0_52 = arith.constant 0 : index
    %113 = vector.load %arg11[%c0_51, %c0_52] : memref<1x1xf32, #tpu.memory_space<vmem>>, vector<1x1xf32>
    tpu.vector_store %arg11[%c0_51, %c0_52], %112 {strides = array<i32>} : memref<1x1xf32, #tpu.memory_space<vmem>>, vector<1x1xf32>,
    %c0_i32_53 = arith.constant 0 : i32
    %114 = arith.cmpi eq, %arg0, %c0_i32_53 : i32
    %115 = arith.extui %114 : i1 to i32
    %c0_i32_54 = arith.constant 0 : i32
    %116 = arith.cmpi ne, %115, %c0_i32_54 : i32
    scf.if %116 {
      %c0_55 = arith.constant 0 : index
      %c0_56 = arith.constant 0 : index
      %117 = vector.load %arg11[%c0_55, %c0_56] : memref<1x1xf32, #tpu.memory_space<vmem>>, vector<1x1xf32>
      %cst_57 = arith.constant 3.906250e-03 : f32
      %118 = vector.broadcast %cst_57 : f32 to vector<1x1xf32>
      %119 = arith.mulf %117, %118 : vector<1x1xf32>
      %cst_58 = arith.constant 2.000000e+00 : f32
      %120 = vector.broadcast %cst_58 : f32 to vector<1x1xf32>
      %121 = arith.subf %120, %119 : vector<1x1xf32>
      %c0_59 = arith.constant 0 : index
      %c0_60 = arith.constant 0 : index
      %122 = vector.load %arg11[%c0_59, %c0_60] : memref<1x1xf32, #tpu.memory_space<vmem>>, vector<1x1xf32>
      tpu.vector_store %arg11[%c0_59, %c0_60], %121 {strides = array<i32>} : memref<1x1xf32, #tpu.memory_space<vmem>>, vector<1x1xf32>,
    } else {
    }
    return
  }
  func.func @transform_0(%arg0: i32) -> (i32, i32, i32) {
    %c0_i32 = arith.constant 0 : i32
    %c0_i32_0 = arith.constant 0 : i32
    %c0_i32_1 = arith.constant 0 : i32
    return %c0_i32, %arg0, %c0_i32_0 : i32, i32, i32
  }
  func.func @transform_1(%arg0: i32) -> (i32, i32, i32) {
    %c0_i32 = arith.constant 0 : i32
    %c0_i32_0 = arith.constant 0 : i32
    %c0_i32_1 = arith.constant 0 : i32
    %c0_i32_2 = arith.constant 0 : i32
    return %c0_i32, %c0_i32_0, %c0_i32_1 : i32, i32, i32
  }
  func.func @transform_2(%arg0: i32) -> (i32, i32) {
    %c0_i32 = arith.constant 0 : i32
    %c0_i32_0 = arith.constant 0 : i32
    %c0_i32_1 = arith.constant 0 : i32
    return %c0_i32, %c0_i32_0 : i32, i32
  }
  func.func @transform_3(%arg0: i32) -> (i32, i32) {
    %c0_i32 = arith.constant 0 : i32
    %c0_i32_0 = arith.constant 0 : i32
    %c0_i32_1 = arith.constant 0 : i32
    return %c0_i32, %c0_i32_0 : i32, i32
  }
  func.func @transform_4(%arg0: i32) -> (i32, i32) {
    %c0_i32 = arith.constant 0 : i32
    %c0_i32_0 = arith.constant 0 : i32
    %c0_i32_1 = arith.constant 0 : i32
    return %c0_i32, %c0_i32_0 : i32, i32
  }
  func.func @transform_5(%arg0: i32) -> (i32, i32) {
    %c0_i32 = arith.constant 0 : i32
    %c0_i32_0 = arith.constant 0 : i32
    %c0_i32_1 = arith.constant 0 : i32
    return %c0_i32, %c0_i32_0 : i32, i32
  }
  func.func @transform_6(%arg0: i32) -> (i32, i32) {
    %c0_i32 = arith.constant 0 : i32
    %c0_i32_0 = arith.constant 0 : i32
    %c0_i32_1 = arith.constant 0 : i32
    return %c0_i32, %c0_i32_0 : i32, i32
  }
  func.func @transform_7(%arg0: i32) -> (i32, i32) {
    %c0_i32 = arith.constant 0 : i32
    %c0_i32_0 = arith.constant 0 : i32
    %c0_i32_1 = arith.constant 0 : i32
    return %c0_i32, %c0_i32_0 : i32, i32
  }
  func.func @transform_8(%arg0: i32) -> (i32, i32) {
    %c0_i32 = arith.constant 0 : i32
    %c0_i32_0 = arith.constant 0 : i32
    %c0_i32_1 = arith.constant 0 : i32
    return %c0_i32, %c0_i32_0 : i32, i32
  }
  func.func @transform_9(%arg0: i32) -> (i32, i32) {
    %c0_i32 = arith.constant 0 : i32
    %c0_i32_0 = arith.constant 0 : i32
    %c0_i32_1 = arith.constant 0 : i32
    return %c0_i32, %c0_i32_0 : i32, i32
  }
  func.func @transform_10(%arg0: i32) -> (i32, i32) {
    %c0_i32 = arith.constant 0 : i32
    %c0_i32_0 = arith.constant 0 : i32
    %c0_i32_1 = arith.constant 0 : i32
    return %c0_i32, %c0_i32_0 : i32, i32
  }
}

</mosaic_0001>

<bundles_post_ra>
// kernel: bgrl_forward.9
= control target key start
LH: loop header
LB: loop body
LE: loop exit
PB: predicated region body
PF: predicated region fallthrough
CT: control target
= control target key end

     0   :  { %s429_s6 = smov 0   ;;  %s431_s7 = smov 0   ;;  %s501_s0 = inlined_call_operand.vmem [shape: f32[2,256,128], index: 0, kind: input, shape index: {}]   ;;  %s502_s1 = inlined_call_operand.vmem [shape: f32[2,2,128], index: 1, kind: output, shape index: {}]  }
   0x1   :  { %s433_s8 = smov 0  }
   0x2 LB: > { %s23_s9 = sadd.s32 1, %s412_s7  ;;  %p362_p0 = scmp.ge.s32.totalorder %s416_s8, 1  ;;  %s416_s8 = sphi %s433_s8, %s11_s8   ;;  %s412_s7 = sphi %s431_s7, %s504_s7   ;;  %s408_s6 = sphi %s429_s6, %s503_s6  }
   0x3   : > { %p25_p1 = scmp.ge.s32.totalorder %s23_s9, 2  ;;  %p106_p2 = scmp.lt.s32.totalorder %s416_s8, 3 }
   0x5   : > { %s506_s9 = smov (%p25_p1, %s23_s9), 0  ;;  %p107_p3 = pnand %p362_p0, %p106_p2 }
   0x6   : > { %p130_p4 = scmp.lt.s32.totalorder (!%p107_p3), %s408_s6, 1 }
   0x7   : > { %110 = sbr.rel (%p107_p3) target bundleno = 96 (0x60), region = 24 }
   0xc   : > { %s508_s6 = smov (!%p130_p4, %s408_s6), 1  ;;  %v418_v0 = vmov 0.0   ;;  %vm287_vm0 = vcmask 1040384  }
   0xd   : > { %s368_s10 = sshll.u32 %s508_s6, 8  ;;  %s365_s11 = sshll.u32 %s508_s6, 1 }
   0xe   : > { %s450_s14 = scalar_lea.vmem %s501_s0, %s368_s10  ;;  %s455_s17 = scalar_lea.vmem %s502_s1, %s365_s11 }
   0xf   : > { %147 = vst [vmem:[%s455_s17] sm:$0x3] %v418_v0  ;;  %v148_v1 = vld [vmem:[%s450_s14] sm:$0xff]  ;;  %v149_v2 = vld [vmem:[%s450_s14 + $0x8] sm:$0xff]  ;;  %v150_v3 = vld [vmem:[%s450_s14 + $0x10] sm:$0xff] }
  0x10   : > { %v151_v4 = vld [vmem:[%s450_s14 + $0x18] sm:$0xff]  ;;  %v180_v5 = vadd.f32 %v149_v2, %v148_v1  ;;  %v217_v6 = vmul.f32 %v148_v1, %v148_v1  ;;  %v218_v7 = vmul.f32 %v149_v2, %v149_v2  ;;  %v219_v8 = vmul.f32 %v150_v3, %v150_v3  ;;  %v152_v9 = vld [vmem:[%s450_s14 + $0x20] sm:$0xff]  ;;  %v153_v13 = vld [vmem:[%s450_s14 + $0x28] sm:$0xff] }
  0x11   : > { %v220_v11 = vmul.f32 %v151_v4, %v151_v4  ;;  %v221_v15 = vmul.f32 %v152_v9, %v152_v9  ;;  %v154_v17 = vld [vmem:[%s450_s14 + $0x30] sm:$0xff]  ;;  %v222_v19 = vmul.f32 %v153_v13, %v153_v13  ;;  %v155_v21 = vld [vmem:[%s450_s14 + $0x38] sm:$0xff]  ;;  %v156_v25 = vld [vmem:[%s450_s14 + $0x40] sm:$0xff] }
  0x12   : > { %v181_v10 = vadd.f32 %v180_v5, %v150_v3  ;;  %v249_v12 = vadd.f32 %v218_v7, %v217_v6  ;;  %v223_v23 = vmul.f32 %v154_v17, %v154_v17  ;;  %v224_v27 = vmul.f32 %v155_v21, %v155_v21  ;;  %v157_v29 = vld [vmem:[%s450_s14 + $0x48] sm:$0xff]  ;;  %v158_v33 = vld [vmem:[%s450_s14 + $0x50] sm:$0xff]  ;;  %v159_v37 = vld [vmem:[%s450_s14 + $0x58] sm:$0xff] }
  0x13   : > { %v225_v31 = vmul.f32 %v156_v25, %v156_v25  ;;  %v226_v35 = vmul.f32 %v157_v29, %v157_v29  ;;  %v227_v39 = vmul.f32 %v158_v33, %v158_v33  ;;  %v160_v41 = vld [vmem:[%s450_s14 + $0x60] sm:$0xff]  ;;  %v228_v43 = vmul.f32 %v159_v37, %v159_v37  ;;  %v161_v45 = vld [vmem:[%s450_s14 + $0x68] sm:$0xff]  ;;  %v162_v49 = vld [vmem:[%s450_s14 + $0x70] sm:$0xff] }
  0x14   : > { %v182_v14 = vadd.f32 %v181_v10, %v151_v4  ;;  %v250_v16 = vadd.f32 %v249_v12, %v219_v8  ;;  %v229_v47 = vmul.f32 %v160_v41, %v160_v41  ;;  %v230_v51 = vmul.f32 %v161_v45, %v161_v45  ;;  %v163_v53 = vld [vmem:[%s450_s14 + $0x78] sm:$0xff]  ;;  %v164_v57 = vld [vmem:[%s450_s14 + $0x80] sm:$0xff]  ;;  %v165_v61 = vld [vmem:[%s450_s14 + $0x88] sm:$0xff] }
  0x15   : > { %v231_v55 = vmul.f32 %v162_v49, %v162_v49  ;;  %v232_v59 = vmul.f32 %v163_v53, %v163_v53  ;;  %v233_v63 = vmul.f32 %v164_v57, %v164_v57  ;;  %v166_v1 = vld [vmem:[%s450_s14 + $0x90] sm:$0xff]  ;;  %v234_v3 = vmul.f32 %v165_v61, %v165_v61  ;;  %v167_v5 = vld [vmem:[%s450_s14 + $0x98] sm:$0xff] }
  0x16   : > { %v183_v18 = vadd.f32 %v182_v14, %v152_v9  ;;  %v251_v20 = vadd.f32 %v250_v16, %v220_v11  ;;  %v235_v7 = vmul.f32 %v166_v1, %v166_v1  ;;  %v168_v9 = vld [vmem:[%s450_s14 + $0xa0] sm:$0xff]  ;;  %v236_v11 = vmul.f32 %v167_v5, %v167_v5 }
  0x18   : > { %v184_v22 = vadd.f32 %v183_v18, %v153_v13  ;;  %v252_v24 = vadd.f32 %v251_v20, %v221_v15  ;;  %v169_v13 = vld [vmem:[%s450_s14 + $0xa8] sm:$0xff]  ;;  %v237_v15 = vmul.f32 %v168_v9, %v168_v9 }
  0x1a   : > { %v185_v26 = vadd.f32 %v184_v22, %v154_v17  ;;  %v253_v28 = vadd.f32 %v252_v24, %v222_v19  ;;  %v170_v17 = vld [vmem:[%s450_s14 + $0xb0] sm:$0xff]  ;;  %v238_v19 = vmul.f32 %v169_v13, %v169_v13 }
  0x1c   : > { %v186_v30 = vadd.f32 %v185_v26, %v155_v21  ;;  %v254_v32 = vadd.f32 %v253_v28, %v223_v23  ;;  %v171_v21 = vld [vmem:[%s450_s14 + $0xb8] sm:$0xff]  ;;  %v239_v23 = vmul.f32 %v170_v17, %v170_v17 }
  0x1e   : > { %v187_v34 = vadd.f32 %v186_v30, %v156_v25  ;;  %v255_v36 = vadd.f32 %v254_v32, %v224_v27  ;;  %v172_v25 = vld [vmem:[%s450_s14 + $0xc0] sm:$0xff]  ;;  %v240_v27 = vmul.f32 %v171_v21, %v171_v21 }
  0x20   : > { %v188_v38 = vadd.f32 %v187_v34, %v157_v29  ;;  %v256_v40 = vadd.f32 %v255_v36, %v225_v31  ;;  %v173_v29 = vld [vmem:[%s450_s14 + $0xc8] sm:$0xff]  ;;  %v241_v31 = vmul.f32 %v172_v25, %v172_v25 }
  0x22   : > { %v189_v42 = vadd.f32 %v188_v38, %v158_v33  ;;  %v257_v44 = vadd.f32 %v256_v40, %v226_v35  ;;  %v174_v33 = vld [vmem:[%s450_s14 + $0xd0] sm:$0xff]  ;;  %v242_v35 = vmul.f32 %v173_v29, %v173_v29 }
  0x24   : > { %v190_v46 = vadd.f32 %v189_v42, %v159_v37  ;;  %v258_v48 = vadd.f32 %v257_v44, %v227_v39  ;;  %v175_v37 = vld [vmem:[%s450_s14 + $0xd8] sm:$0xff]  ;;  %v243_v39 = vmul.f32 %v174_v33, %v174_v33 }
  0x26   : > { %v191_v50 = vadd.f32 %v190_v46, %v160_v41  ;;  %v259_v52 = vadd.f32 %v258_v48, %v228_v43  ;;  %v176_v41 = vld [vmem:[%s450_s14 + $0xe0] sm:$0xff]  ;;  %v244_v43 = vmul.f32 %v175_v37, %v175_v37 }
  0x28   : > { %v192_v54 = vadd.f32 %v191_v50, %v161_v45  ;;  %v260_v56 = vadd.f32 %v259_v52, %v229_v47  ;;  %v177_v45 = vld [vmem:[%s450_s14 + $0xe8] sm:$0xff]  ;;  %v245_v47 = vmul.f32 %v176_v41, %v176_v41 }
  0x2a   : > { %v193_v58 = vadd.f32 %v192_v54, %v162_v49  ;;  %v261_v60 = vadd.f32 %v260_v56, %v230_v51  ;;  %v178_v49 = vld [vmem:[%s450_s14 + $0xf0] sm:$0xff]  ;;  %v246_v51 = vmul.f32 %v177_v45, %v177_v45 }
  0x2c   : > { %v194_v62 = vadd.f32 %v193_v58, %v163_v53  ;;  %v262_v0 = vadd.f32 %v261_v60, %v231_v55  ;;  %v179_v53 = vld [vmem:[%s450_s14 + $0xf8] sm:$0xff]  ;;  %v247_v55 = vmul.f32 %v178_v49, %v178_v49 }
  0x2d   : > { %v248_v58 = vmul.f32 %v179_v53, %v179_v53 }
  0x2e   : > { %v195_v2 = vadd.f32 %v194_v62, %v164_v57  ;;  %v263_v4 = vadd.f32 %v262_v0, %v232_v59 }
  0x30   : > { %v196_v6 = vadd.f32 %v195_v2, %v165_v61  ;;  %v264_v8 = vadd.f32 %v263_v4, %v233_v63 }
  0x32   : > { %v197_v10 = vadd.f32 %v196_v6, %v166_v1  ;;  %v265_v12 = vadd.f32 %v264_v8, %v234_v3 }
  0x34   : > { %v198_v14 = vadd.f32 %v197_v10, %v167_v5  ;;  %v266_v16 = vadd.f32 %v265_v12, %v235_v7 }
  0x36   : > { %v199_v18 = vadd.f32 %v198_v14, %v168_v9  ;;  %v267_v20 = vadd.f32 %v266_v16, %v236_v11  ;;  %v286_v11 = vld [vmem:[%s455_s17] sm:$0x3] }
  0x38   : > { %v200_v22 = vadd.f32 %v199_v18, %v169_v13  ;;  %v268_v24 = vadd.f32 %v267_v20, %v237_v15 }
  0x3a   : > { %v201_v26 = vadd.f32 %v200_v22, %v170_v17  ;;  %v269_v28 = vadd.f32 %v268_v24, %v238_v19 }
  0x3c   : > { %v202_v30 = vadd.f32 %v201_v26, %v171_v21  ;;  %v270_v32 = vadd.f32 %v269_v28, %v239_v23 }
  0x3e   : > { %v203_v34 = vadd.f32 %v202_v30, %v172_v25  ;;  %v271_v36 = vadd.f32 %v270_v32, %v240_v27 }
  0x40   : > { %v204_v38 = vadd.f32 %v203_v34, %v173_v29  ;;  %v272_v40 = vadd.f32 %v271_v36, %v241_v31 }
  0x42   : > { %v205_v42 = vadd.f32 %v204_v38, %v174_v33  ;;  %v273_v44 = vadd.f32 %v272_v40, %v242_v35 }
  0x44   : > { %v206_v46 = vadd.f32 %v205_v42, %v175_v37  ;;  %v274_v48 = vadd.f32 %v273_v44, %v243_v39 }
  0x46   : > { %v207_v50 = vadd.f32 %v206_v46, %v176_v41  ;;  %v275_v52 = vadd.f32 %v274_v48, %v244_v43 }
  0x48   : > { %v208_v54 = vadd.f32 %v207_v50, %v177_v45  ;;  %v276_v56 = vadd.f32 %v275_v52, %v245_v47 }
  0x4a   : > { %v209_v57 = vadd.f32 %v208_v54, %v178_v49  ;;  %v277_v59 = vadd.f32 %v276_v56, %v246_v51 }
  0x4c   : > { %v210_v60 = vadd.f32 %v209_v57, %v179_v53  ;;  %v278_v61 = vadd.f32 %v277_v59, %v247_v55 }
  0x4e   : > { %v211_v62 = vrot.slane %v210_v60, 4  ;;  %v279_v63 = vadd.f32 %v278_v61, %v248_v58 }
  0x50   : > { %v212_v0 = vadd.f32 %v211_v62, %v210_v60  ;;  %v280_v1 = vrot.slane %v279_v63, 4 }
  0x52   : > { %v213_v2 = vrot.slane %v212_v0, 2  ;;  %v281_v3 = vadd.f32 %v280_v1, %v279_v63 }
  0x54   : > { %v214_v4 = vadd.f32 %v213_v2, %v212_v0  ;;  %v282_v5 = vrot.slane %v281_v3, 2 }
  0x56   : > { %v215_v6 = vrot.slane %v214_v4, 1  ;;  %v283_v7 = vadd.f32 %v282_v5, %v281_v3 }
  0x58   : > { %v216_v8 = vadd.f32 %v215_v6, %v214_v4  ;;  %v284_v9 = vrot.slane %v283_v7, 1 }
  0x5a   : > { %v285_v10 = vadd.f32 %v284_v9, %v283_v7 }
  0x5c   : > { %v288_v12 = vsel %vm287_vm0, %v216_v8, %v285_v10 }
  0x5d   : > { %v289_v13 = vadd.f32 %v288_v12, %v286_v11 }
  0x5f   : > { %290 = vst [vmem:[%s455_s17] sm:$0x3] %v289_v13 }
  0x60 PF: > { %s11_s8 = sadd.s32 1, %s416_s8   ;;  %s503_s6 = smov %s412_s7 }
  0x61   : > { %p8_p5 = scmp.ge.s32.totalorder %s11_s8, 4   ;;  %s504_s7 = smov %s506_s9 }
  0x63   :  { %10 = sbr.rel (!%p8_p5) target bundleno = 2 (0x2), region = 58 }

// kernel: bgrl_forward.7
= control target key start
LH: loop header
LB: loop body
LE: loop exit
PB: predicated region body
PF: predicated region fallthrough
CT: control target
= control target key end

     0   :  { %s1335_s12 = smov 0   ;;  %s1337_s13 = smov 0   ;;  %s1510_s0 = inlined_call_operand.vmem [shape: f32[2,256,32], index: 0, kind: input, shape index: {}]   ;;  %s1511_s1 = inlined_call_operand.vmem [shape: bf16[32,128], index: 1, kind: input, shape index: {}]   ;;  %s1512_s2 = inlined_call_operand.vmem [shape: f32[2,256,1], index: 2, kind: input, shape index: {}]   ;;  %s1513_s3 = inlined_call_operand.vmem [shape: bf16[2,256,128], index: 3, kind: output, shape index: {}]  }
   0x1   :  { %s1339_s14 = smov 0  }
   0x2 LB: > { %s25_s15 = sadd.s32 1, %s1308_s13  ;;  %p1014_p0 = scmp.ge.s32.totalorder %s1312_s14, 1  ;;  %s1312_s14 = sphi %s1339_s14, %s13_s14   ;;  %s1308_s13 = sphi %s1337_s13, %s1515_s13   ;;  %s1304_s12 = sphi %s1335_s12, %s1514_s12  }
   0x3   : > { %p27_p1 = scmp.ge.s32.totalorder %s25_s15, 2  ;;  %p175_p2 = scmp.lt.s32.totalorder %s1312_s14, 3 }
   0x5   : > { %s1517_s15 = smov (%p27_p1, %s25_s15), 0  ;;  %p176_p3 = pnand %p1014_p0, %p175_p2 }
   0x6   : > { %p217_p4 = scmp.lt.s32.totalorder (!%p176_p3), %s1304_s12, 1 }
   0x7   : > { %179 = sbr.rel (%p176_p3) target bundleno = 250 (0xfa), region = 32 }
   0xc   : > { %v1288_v0 = vld [vmem:[%s1511_s1 + $0x8] sm:$0xff]   ;;  %v1314_v1 = vmov 0   ;;  %v1289_v2 = vld [vmem:[%s1511_s1] sm:$0xff]   ;;  %s1519_s12 = smov (!%p217_p4, %s1304_s12), 1  ;;  %vm311_vm0 = vcmask 261120  }
   0xd   : > { %1287 = vset.pattern.permute.xlu1 %v1314_v1  ;;  %1286 = vset.pattern.permute.xlu0 %v1314_v1  ;;  %s1073_s20 = sshll.u32 %s1519_s12, 8  ;;  %s1075_s27 = sshll.u32 %s1519_s12, 7 }
   0xe   : > { %1221 = vmatprep.subr.bf16.mxu0 %v1288_v0  ;;  %1257 = vmatprep.subr.bf16.mxu1 %v1288_v0  ;;  %s1365_s23 = scalar_lea.vmem %s1512_s2, %s1073_s20  ;;  %s1370_s26 = scalar_lea.vmem %s1510_s0, %s1073_s20 }
   0xf   : > { %1222 = vmatpush3.bf16.msra.mxu0 %v1288_v0  ;;  %1259 = vmatpush3.bf16.msra.mxu1 %v1288_v0  ;;  %v523_v3 = vld [vmem:[%s1365_s23 + $0x10] sm:$0xff]  ;;  %v521_v4 = vld [vmem:[%s1365_s23] sm:$0xff]  ;;  %v248_v6 = vld [vmem:[%s1370_s26 + $0x8] sm:$0xff]  ;;  %s1474_s30 = scalar_lea.vmem %s1513_s3, %s1075_s27 }
  0x10   : > { %1223 = vmatprep.subr.bf16.mxu0 %v1289_v2  ;;  %1258 = vmatprep.subr.bf16.mxu1 %v1289_v2  ;;  %v247_v5 = vld [vmem:[%s1370_s26] sm:$0xff]  ;;  %v264_v8 = vld [vmem:[%s1370_s26 + $0x88] sm:$0xff]  ;;  %v524_v11 = vld [vmem:[%s1365_s23 + $0x18] sm:$0xff] }
  0x11   : > { %565 = vperm.xlu1 %1287, %v523_v3   ;;  %555 = vperm.xlu0 %1286, %v521_v4   ;;  %v263_v7 = vld [vmem:[%s1370_s26 + $0x80] sm:$0xff]  ;;  %v279_v9 = vpack.c.bf16 %v248_v6, %v247_v5  ;;  %v522_v12 = vld [vmem:[%s1365_s23 + $0x8] sm:$0xff]  ;;  %v249_v13 = vld [vmem:[%s1370_s26 + $0x10] sm:$0xff] }
  0x12   : > { %v287_v10 = vpack.c.bf16 %v264_v8, %v263_v7  ;;  %v250_v14 = vld [vmem:[%s1370_s26 + $0x18] sm:$0xff]  ;;  %v265_v15 = vld [vmem:[%s1370_s26 + $0x90] sm:$0xff]  ;;  %v251_v19 = vld [vmem:[%s1370_s26 + $0x20] sm:$0xff] }
  0x13   : > { %1224 = vmatpush3.bf16.msra.mxu0 %v1289_v2  ;;  %1260 = vmatpush3.bf16.msra.mxu1 %v1289_v2  ;;  %v266_v16 = vld [vmem:[%s1370_s26 + $0x98] sm:$0xff]  ;;  %v280_v17 = vpack.c.bf16 %v250_v14, %v249_v13  ;;  %v252_v20 = vld [vmem:[%s1370_s26 + $0x28] sm:$0xff]  ;;  %v267_v21 = vld [vmem:[%s1370_s26 + $0xa0] sm:$0xff] }
  0x14   : > { %1225 = vmatprep.mubr.msk.bf16.mxu0 %vm311_vm0, %v279_v9  ;;  %1241 = vmatprep.mubr.msk.bf16.mxu1 %vm311_vm0, %v287_v10  ;;  %v288_v18 = vpack.c.bf16 %v266_v16, %v265_v15  ;;  %v268_v22 = vld [vmem:[%s1370_s26 + $0xa8] sm:$0xff]  ;;  %v525_v24 = vld [vmem:[%s1365_s23 + $0x20] sm:$0xff]  ;;  %v281_v25 = vpack.c.bf16 %v252_v20, %v251_v19  ;;  %v253_v27 = vld [vmem:[%s1370_s26 + $0x30] sm:$0xff] }
  0x15   : > { %570 = vperm.xlu1 %1287, %v524_v11   ;;  %560 = vperm.xlu0 %1286, %v522_v12   ;;  %v526_v23 = vld [vmem:[%s1365_s23 + $0x28] sm:$0xff]  ;;  %v289_v26 = vpack.c.bf16 %v268_v22, %v267_v21  ;;  %v254_v28 = vld [vmem:[%s1370_s26 + $0x38] sm:$0xff]  ;;  %v269_v29 = vld [vmem:[%s1370_s26 + $0xb0] sm:$0xff] }
  0x16   : > { %1226 = vmatmul.mubr.msk.bf16.vlgmr.msra.gmra.mxu0 %vm311_vm0, %v280_v17  ;;  %1242 = vmatmul.mubr.msk.bf16.vlgmr.msra.gmra.mxu1 %vm311_vm0, %v288_v18  ;;  %v270_v30 = vld [vmem:[%s1370_s26 + $0xb8] sm:$0xff]  ;;  %v255_v31 = vld [vmem:[%s1370_s26 + $0x40] sm:$0xff]  ;;  %v256_v32 = vld [vmem:[%s1370_s26 + $0x48] sm:$0xff]  ;;  %v282_v37 = vpack.c.bf16 %v254_v28, %v253_v27 }
  0x17   : > { %1229 = vmatprep.mubr.msk.bf16.mxu0 %vm311_vm0, %v281_v25  ;;  %1245 = vmatprep.mubr.msk.bf16.mxu1 %vm311_vm0, %v289_v26  ;;  %v271_v33 = vld [vmem:[%s1370_s26 + $0xc0] sm:$0xff]  ;;  %v272_v34 = vld [vmem:[%s1370_s26 + $0xc8] sm:$0xff]  ;;  %v528_v35 = vld [vmem:[%s1365_s23 + $0x38] sm:$0xff]  ;;  %v290_v38 = vpack.c.bf16 %v270_v30, %v269_v29  ;;  %v283_v39 = vpack.c.bf16 %v256_v32, %v255_v31 }
  0x18   : > { %v527_v36 = vld [vmem:[%s1365_s23 + $0x30] sm:$0xff]  ;;  %v291_v40 = vpack.c.bf16 %v272_v34, %v271_v33  ;;  %v530_v41 = vld [vmem:[%s1365_s23 + $0x48] sm:$0xff]  ;;  %v529_v42 = vld [vmem:[%s1365_s23 + $0x40] sm:$0xff] }
  0x19   : > { %580 = vperm.xlu1 %1287, %v526_v23   ;;  %575 = vperm.xlu0 %1286, %v525_v24   ;;  %v257_v43 = vld [vmem:[%s1370_s26 + $0x50] sm:$0xff]  ;;  %v258_v44 = vld [vmem:[%s1370_s26 + $0x58] sm:$0xff]  ;;  %v259_v47 = vld [vmem:[%s1370_s26 + $0x60] sm:$0xff] }
  0x1a   : > { %v273_v45 = vld [vmem:[%s1370_s26 + $0xd0] sm:$0xff]  ;;  %v274_v46 = vld [vmem:[%s1370_s26 + $0xd8] sm:$0xff]  ;;  %v260_v48 = vld [vmem:[%s1370_s26 + $0x68] sm:$0xff]  ;;  %v284_v53 = vpack.c.bf16 %v258_v44, %v257_v43 }
  0x1b   : > { %v275_v49 = vld [vmem:[%s1370_s26 + $0xe0] sm:$0xff]  ;;  %v276_v50 = vld [vmem:[%s1370_s26 + $0xe8] sm:$0xff]  ;;  %v532_v51 = vld [vmem:[%s1365_s23 + $0x58] sm:$0xff]  ;;  %v292_v54 = vpack.c.bf16 %v274_v46, %v273_v45  ;;  %v285_v55 = vpack.c.bf16 %v260_v48, %v259_v47 }
  0x1c   : > { %v531_v52 = vld [vmem:[%s1365_s23 + $0x50] sm:$0xff]  ;;  %v293_v56 = vpack.c.bf16 %v276_v50, %v275_v49  ;;  %v534_v57 = vld [vmem:[%s1365_s23 + $0x68] sm:$0xff]  ;;  %v533_v58 = vld [vmem:[%s1365_s23 + $0x60] sm:$0xff] }
  0x1d   : > { %590 = vperm.xlu1 %1287, %v528_v35   ;;  %585 = vperm.xlu0 %1286, %v527_v36   ;;  %v261_v59 = vld [vmem:[%s1370_s26 + $0x70] sm:$0xff]  ;;  %v262_v60 = vld [vmem:[%s1370_s26 + $0x78] sm:$0xff]  ;;  %v538_v3 = vld [vmem:[%s1365_s23 + $0x88] sm:$0xff] }
  0x1e   : > { %1230 = vmatmul.mubr.msk.bf16.gmra.mxu0 %vm311_vm0, %v282_v37  ;;  %1246 = vmatmul.mubr.msk.bf16.gmra.mxu1 %vm311_vm0, %v290_v38  ;;  %v277_v61 = vld [vmem:[%s1370_s26 + $0xf0] sm:$0xff]  ;;  %v278_v62 = vld [vmem:[%s1370_s26 + $0xf8] sm:$0xff]  ;;  %v286_v1 = vpack.c.bf16 %v262_v60, %v261_v59  ;;  %v537_v4 = vld [vmem:[%s1365_s23 + $0x80] sm:$0xff] }
  0x1f   : > { %1233 = vmatprep.mubr.msk.bf16.mxu0 %vm311_vm0, %v283_v39  ;;  %1249 = vmatprep.mubr.msk.bf16.mxu1 %vm311_vm0, %v291_v40  ;;  %v536_v63 = vld [vmem:[%s1365_s23 + $0x78] sm:$0xff]  ;;  %v535_v0 = vld [vmem:[%s1365_s23 + $0x70] sm:$0xff]  ;;  %v294_v2 = vpack.c.bf16 %v278_v62, %v277_v61  ;;  %v542_v7 = vld [vmem:[%s1365_s23 + $0xa8] sm:$0xff] }
  0x20   : > { %v540_v5 = vld [vmem:[%s1365_s23 + $0x98] sm:$0xff]  ;;  %v539_v6 = vld [vmem:[%s1365_s23 + $0x90] sm:$0xff]  ;;  %v541_v8 = vld [vmem:[%s1365_s23 + $0xa0] sm:$0xff] }
  0x21   : > { %600 = vperm.xlu1 %1287, %v530_v41   ;;  %595 = vperm.xlu0 %1286, %v529_v42   ;;  %v544_v9 = vld [vmem:[%s1365_s23 + $0xb8] sm:$0xff]  ;;  %v543_v10 = vld [vmem:[%s1365_s23 + $0xb0] sm:$0xff]  ;;  %v546_v11 = vld [vmem:[%s1365_s23 + $0xc8] sm:$0xff] }
  0x22   : > { %v545_v12 = vld [vmem:[%s1365_s23 + $0xc0] sm:$0xff]  ;;  %v548_v13 = vld [vmem:[%s1365_s23 + $0xd8] sm:$0xff]  ;;  %v547_v14 = vld [vmem:[%s1365_s23 + $0xd0] sm:$0xff] }
  0x23   : > { %v550_v15 = vld [vmem:[%s1365_s23 + $0xe8] sm:$0xff]  ;;  %v549_v16 = vld [vmem:[%s1365_s23 + $0xe0] sm:$0xff]  ;;  %v552_v17 = vld [vmem:[%s1365_s23 + $0xf8] sm:$0xff] }
  0x24   : > { %v551_v18 = vld [vmem:[%s1365_s23 + $0xf0] sm:$0xff] }
  0x25   : > { %610 = vperm.xlu1 %1287, %v532_v51   ;;  %605 = vperm.xlu0 %1286, %v531_v52  }
  0x26   : > { %1234 = vmatmul.mubr.msk.bf16.gmra.mxu0 %vm311_vm0, %v284_v53  ;;  %1250 = vmatmul.mubr.msk.bf16.gmra.mxu1 %vm311_vm0, %v292_v54 }
  0x27   : > { %1237 = vmatprep.mubr.msk.bf16.mxu0 %vm311_vm0, %v285_v55  ;;  %1253 = vmatprep.mubr.msk.bf16.mxu1 %vm311_vm0, %v293_v56 }
  0x29   : > { %620 = vperm.xlu1 %1287, %v534_v57   ;;  %615 = vperm.xlu0 %1286, %v533_v58  }
  0x2d   : > { %630 = vperm.xlu1 %1287, %v536_v63   ;;  %625 = vperm.xlu0 %1286, %v535_v0  }
  0x2e   : > { %1238 = vmatmul.mubr.msk.bf16.gmra.mxu0 %vm311_vm0, %v286_v1  ;;  %1254 = vmatmul.mubr.msk.bf16.gmra.mxu1 %vm311_vm0, %v294_v2 }
  0x31   : > { %640 = vperm.xlu1 %1287, %v538_v3   ;;  %635 = vperm.xlu0 %1286, %v537_v4  }
  0x35   : > { %650 = vperm.xlu1 %1287, %v540_v5   ;;  %645 = vperm.xlu0 %1286, %v539_v6  }
  0x39   : > { %660 = vperm.xlu1 %1287, %v542_v7   ;;  %655 = vperm.xlu0 %1286, %v541_v8  }
  0x3d   : > { %670 = vperm.xlu1 %1287, %v544_v9   ;;  %665 = vperm.xlu0 %1286, %v543_v10  }
  0x41   : > { %680 = vperm.xlu1 %1287, %v546_v11   ;;  %675 = vperm.xlu0 %1286, %v545_v12  }
  0x45   : > { %690 = vperm.xlu1 %1287, %v548_v13   ;;  %685 = vperm.xlu0 %1286, %v547_v14  }
  0x49   : > { %700 = vperm.xlu1 %1287, %v550_v15   ;;  %695 = vperm.xlu0 %1286, %v549_v16  }
  0x4d   : > { %710 = vperm.xlu1 %1287, %v552_v17   ;;  %705 = vperm.xlu0 %1286, %v551_v18  }
  0x8c   : > { %v566_v19 = vpop.permute.xlu1 %565  ;;  %v556_v20 = vpop.permute.xlu0 %555 }
  0x90   : > { %v571_v21 = vpop.permute.xlu1 %570  ;;  %v561_v22 = vpop.permute.xlu0 %560 }
  0x94   : > { %v1452_v23 = vpop.permute.xlu1 %580  ;;  %v576_v24 = vpop.permute.xlu0 %575 }
  0x98   : > { %v591_v25 = vpop.permute.xlu1 %590  ;;  %v586_v26 = vpop.permute.xlu0 %585 }
  0x9c   : > { %v1454_v27 = vpop.permute.xlu1 %600  ;;  %v1456_v28 = vpop.permute.xlu0 %595 }
  0xa0   : > { %v1458_v29 = vpop.permute.xlu1 %610  ;;  %v1460_v30 = vpop.permute.xlu0 %605 }
  0xa4   : > { %v1462_v31 = vpop.permute.xlu1 %620  ;;  %v1464_v32 = vpop.permute.xlu0 %615 }
  0xa8   : > { %v1466_v33 = vpop.permute.xlu1 %630  ;;  %v1468_v34 = vpop.permute.xlu0 %625 }
  0xac   : > { %v641_v35 = vpop.permute.xlu1 %640  ;;  %v636_v36 = vpop.permute.xlu0 %635 }
  0xb0   : > { %v651_v37 = vpop.permute.xlu1 %650  ;;  %v646_v38 = vpop.permute.xlu0 %645 }
  0xb4   : > { %v661_v39 = vpop.permute.xlu1 %660  ;;  %v656_v40 = vpop.permute.xlu0 %655 }
  0xb8   : > { %v671_v45 = vpop.permute.xlu1 %670  ;;  %v666_v46 = vpop.permute.xlu0 %665 }
  0xbc   : > { %v681_v63 = vpop.permute.xlu1 %680  ;;  %v676_v0 = vpop.permute.xlu0 %675 }
  0xc0   : > { %v691_v15 = vpop.permute.xlu1 %690  ;;  %v686_v16 = vpop.permute.xlu0 %685 }
  0xd6   : > { %v1227_v41 = vpop.f32.mrf.mxu0  ;;  %v1243_v42 = vpop.f32.mrf.mxu1 }
  0xd7   : > { %v715_v49 = vmul.f32 %v1227_v41, %v566_v19  ;;  %v731_v50 = vmul.f32 %v1243_v42, %v646_v38  ;;  %v701_v38 = vpop.permute.xlu1 %700 }
  0xd8   : > { %v394_v43 = vpop.f32.mrf.mxu0  ;;  %v458_v44 = vpop.f32.mrf.mxu1 }
  0xd9   : > { %v713_v53 = vmul.f32 %v556_v20, %v394_v43  ;;  %v729_v54 = vmul.f32 %v636_v36, %v458_v44 }
  0xda   : > { %v1228_v47 = vpop.f32.mrf.mxu0  ;;  %v1244_v48 = vpop.f32.mrf.mxu1 }
  0xdb   : > { %v716_v51 = vmul.f32 %v1228_v47, %v571_v21  ;;  %v732_v52 = vmul.f32 %v1244_v48, %v651_v37 }
  0xdc   : > { %v397_v55 = vpop.f32.mrf.mxu0  ;;  %v461_v56 = vpop.f32.mrf.mxu1 }
  0xdd   : > { %v1116_v57 = vpack.c.bf16 %v716_v51, %v715_v49  ;;  %v1156_v58 = vpack.c.bf16 %v732_v52, %v731_v50  ;;  %v714_v59 = vmul.f32 %v561_v22, %v397_v55  ;;  %v730_v60 = vmul.f32 %v641_v35, %v461_v56  ;;  %v711_v55 = vpop.permute.xlu1 %710 }
  0xde   : > { %v1231_v61 = vpop.f32.mrf.mxu0  ;;  %v1247_v62 = vpop.f32.mrf.mxu1 }
  0xdf   : > { %1188 = vst [vmem:[%s1474_s30 + $0x8] sm:$0xff] %v1116_v57   ;;  %1196 = vst [vmem:[%s1474_s30 + $0x48] sm:$0xff] %v1156_v58   ;;  %v1111_v1 = vpack.c.bf16 %v714_v59, %v713_v53  ;;  %v1151_v2 = vpack.c.bf16 %v730_v60, %v729_v54  ;;  %v719_v7 = vmul.f32 %v1231_v61, %v586_v26 }
  0xe0   : > { %v410_v3 = vpop.f32.mrf.mxu0  ;;  %v474_v4 = vpop.f32.mrf.mxu1  ;;  %v735_v8 = vmul.f32 %v1247_v62, %v666_v46 }
  0xe1   : > { %1112 = vst [vmem:[%s1474_s30] sm:$0xff] %v1111_v1   ;;  %1195 = vst [vmem:[%s1474_s30 + $0x40] sm:$0xff] %v1151_v2   ;;  %v717_v11 = vmul.f32 %v576_v24, %v410_v3  ;;  %v733_v12 = vmul.f32 %v656_v40, %v474_v4  ;;  %v696_v40 = vpop.permute.xlu0 %695 }
  0xe2   : > { %v1232_v5 = vpop.f32.mrf.mxu0  ;;  %v1248_v6 = vpop.f32.mrf.mxu1 }
  0xe3   : > { %v720_v9 = vmul.f32 %v1232_v5, %v591_v25  ;;  %v736_v10 = vmul.f32 %v1248_v6, %v671_v45 }
  0xe4   : > { %v413_v13 = vpop.f32.mrf.mxu0  ;;  %v477_v14 = vpop.f32.mrf.mxu1 }
  0xe5   : > { %v1126_v17 = vpack.c.bf16 %v720_v9, %v719_v7  ;;  %v1166_v18 = vpack.c.bf16 %v736_v10, %v735_v8  ;;  %v718_v19 = vmul.f32 %v1452_v23, %v413_v13  ;;  %v734_v20 = vmul.f32 %v661_v39, %v477_v14 }
  0xe6   : > { %v1235_v21 = vpop.f32.mrf.mxu0  ;;  %v1251_v22 = vpop.f32.mrf.mxu1 }
  0xe7   : > { %1190 = vst [vmem:[%s1474_s30 + $0x18] sm:$0xff] %v1126_v17   ;;  %1198 = vst [vmem:[%s1474_s30 + $0x58] sm:$0xff] %v1166_v18   ;;  %v1121_v26 = vpack.c.bf16 %v718_v19, %v717_v11  ;;  %v1161_v25 = vpack.c.bf16 %v734_v20, %v733_v12  ;;  %v723_v41 = vmul.f32 %v1235_v21, %v1460_v30 }
  0xe8   : > { %v426_v35 = vpop.f32.mrf.mxu0  ;;  %v490_v24 = vpop.f32.mrf.mxu1  ;;  %v739_v23 = vmul.f32 %v1251_v22, %v686_v16 }
  0xe9   : > { %1189 = vst [vmem:[%s1474_s30 + $0x10] sm:$0xff] %v1121_v26   ;;  %1197 = vst [vmem:[%s1474_s30 + $0x50] sm:$0xff] %v1161_v25   ;;  %v721_v43 = vmul.f32 %v1456_v28, %v426_v35  ;;  %v737_v44 = vmul.f32 %v676_v0, %v490_v24  ;;  %v706_v28 = vpop.permute.xlu0 %705 }
  0xea   : > { %v1236_v36 = vpop.f32.mrf.mxu0  ;;  %v1252_v37 = vpop.f32.mrf.mxu1 }
  0xeb   : > { %v724_v39 = vmul.f32 %v1236_v36, %v1458_v29  ;;  %v740_v42 = vmul.f32 %v1252_v37, %v691_v15 }
  0xec   : > { %v429_v45 = vpop.f32.mrf.mxu0  ;;  %v493_v46 = vpop.f32.mrf.mxu1 }
  0xed   : > { %v1136_v47 = vpack.c.bf16 %v724_v39, %v723_v41  ;;  %v1176_v48 = vpack.c.bf16 %v740_v42, %v739_v23  ;;  %v722_v49 = vmul.f32 %v1454_v27, %v429_v45  ;;  %v738_v50 = vmul.f32 %v681_v63, %v493_v46 }
  0xee   : > { %v1239_v51 = vpop.f32.mrf.mxu0  ;;  %v1255_v52 = vpop.f32.mrf.mxu1 }
  0xef   : > { %1192 = vst [vmem:[%s1474_s30 + $0x28] sm:$0xff] %v1136_v47   ;;  %1200 = vst [vmem:[%s1474_s30 + $0x68] sm:$0xff] %v1176_v48   ;;  %v1131_v30 = vpack.c.bf16 %v722_v49, %v721_v43  ;;  %v1171_v53 = vpack.c.bf16 %v738_v50, %v737_v44  ;;  %v727_v58 = vmul.f32 %v1239_v51, %v1468_v34 }
  0xf0   : > { %v442_v29 = vpop.f32.mrf.mxu0  ;;  %v506_v54 = vpop.f32.mrf.mxu1  ;;  %v743_v27 = vmul.f32 %v1255_v52, %v706_v28 }
  0xf1   : > { %1191 = vst [vmem:[%s1474_s30 + $0x20] sm:$0xff] %v1131_v30   ;;  %1199 = vst [vmem:[%s1474_s30 + $0x60] sm:$0xff] %v1171_v53   ;;  %v725_v61 = vmul.f32 %v1464_v32, %v442_v29  ;;  %v741_v62 = vmul.f32 %v696_v40, %v506_v54 }
  0xf2   : > { %v1240_v56 = vpop.f32.mrf.mxu0  ;;  %v1256_v57 = vpop.f32.mrf.mxu1 }
  0xf3   : > { %v728_v59 = vmul.f32 %v1240_v56, %v1466_v33  ;;  %v744_v60 = vmul.f32 %v1256_v57, %v711_v55 }
  0xf4   : > { %v445_v63 = vpop.f32.mrf.mxu0  ;;  %v509_v0 = vpop.f32.mrf.mxu1 }
  0xf5   : > { %v1146_v1 = vpack.c.bf16 %v728_v59, %v727_v58  ;;  %v1186_v2 = vpack.c.bf16 %v744_v60, %v743_v27  ;;  %v726_v3 = vmul.f32 %v1462_v31, %v445_v63  ;;  %v742_v4 = vmul.f32 %v701_v38, %v509_v0 }
  0xf7   : > { %1194 = vst [vmem:[%s1474_s30 + $0x38] sm:$0xff] %v1146_v1   ;;  %1202 = vst [vmem:[%s1474_s30 + $0x78] sm:$0xff] %v1186_v2   ;;  %v1141_v5 = vpack.c.bf16 %v726_v3, %v725_v61  ;;  %v1181_v34 = vpack.c.bf16 %v742_v4, %v741_v62 }
  0xf9   : > { %1193 = vst [vmem:[%s1474_s30 + $0x30] sm:$0xff] %v1141_v5   ;;  %1201 = vst [vmem:[%s1474_s30 + $0x70] sm:$0xff] %v1181_v34  }
  0xfa PF: > { %s13_s14 = sadd.s32 1, %s1312_s14   ;;  %s1514_s12 = smov %s1308_s13 }
  0xfb   : > { %p10_p5 = scmp.ge.s32.totalorder %s13_s14, 4   ;;  %s1515_s13 = smov %s1517_s15 }
  0xfd   :  { %12 = sbr.rel (!%p10_p5) target bundleno = 2 (0x2), region = 65 }

// kernel: bgrl_forward.8
= control target key start
LH: loop header
LB: loop body
LE: loop exit
PB: predicated region body
PF: predicated region fallthrough
CT: control target
= control target key end

     0   :  { %s1525_s15 = smov 0   ;;  %s1527_s16 = smov 0   ;;  %s1752_s0 = inlined_call_operand.vmem [shape: s8[2,256,256], index: 0, kind: input, shape index: {}]   ;;  %s1753_s1 = inlined_call_operand.vmem [shape: bf16[2,256,128], index: 1, kind: input, shape index: {}]   ;;  %s1754_s2 = inlined_call_operand.vmem [shape: f32[2,256,1], index: 2, kind: input, shape index: {}]   ;;  %s1755_s3 = inlined_call_operand.vmem [shape: f32[1,128], index: 3, kind: input, shape index: {}]   ;;  %s1756_s4 = inlined_call_operand.vmem [shape: f32[2,256,128], index: 4, kind: output, shape index: {}]  }
   0x1   :  { %s1529_s17 = smov 0  }
   0x2 LB: > { %s33_s18 = sadd.s32 1, %s1493_s16  ;;  %p1271_p0 = scmp.ge.s32.totalorder %s1497_s17, 1  ;;  %s1497_s17 = sphi %s1529_s17, %s14_s17   ;;  %s1493_s16 = sphi %s1527_s16, %s1758_s16   ;;  %s1489_s15 = sphi %s1525_s15, %s1757_s15  }
   0x3   : > { %p35_p1 = scmp.ge.s32.totalorder %s33_s18, 2  ;;  %p232_p2 = scmp.lt.s32.totalorder %s1497_s17, 3 }
   0x5   : > { %s1760_s18 = smov (%p35_p1, %s33_s18), 0  ;;  %p233_p3 = pnand %p1271_p0, %p232_p2 }
   0x6   : > { %p291_p4 = scmp.lt.s32.totalorder (!%p233_p3), %s1489_s15, 1 }
   0x7   : > { %236 = sbr.rel (%p233_p3) target bundleno = 310 (0x136), region = 36 }
   0xc   : > { %v1499_v0 = vmov 0   ;;  %s1762_s15 = smov (!%p291_p4, %s1489_s15), 1 }
   0xd   : > { %1458 = vset.pattern.permute.xlu1 %v1499_v0  ;;  %1457 = vset.pattern.permute.xlu0 %v1499_v0  ;;  %s1299_s19 = sshll.u32 %s1762_s15, 7  ;;  %s1301_s26 = sshll.u32 %s1762_s15, 8 }
   0xe   : > { %s1549_s22 = scalar_lea.vmem %s1753_s1, %s1299_s19  ;;  %s1563_s25 = scalar_lea.vmem %s1752_s0, %s1299_s19 }
   0xf   : > { %v1459_v1 = vld [vmem:[%s1549_s22 + $0x78] sm:$0xff]   ;;  %v1461_v3 = vld [vmem:[%s1549_s22 + $0x70] sm:$0xff]   ;;  %v1463_v5 = vld [vmem:[%s1549_s22 + $0x68] sm:$0xff]   ;;  %s1575_s29 = scalar_lea.vmem %s1754_s2, %s1301_s26  ;;  %s1664_s8 = scalar_lea.vmem %s1756_s4, %s1301_s26 }
  0x10   : > { %v1460_v2 = vld [vmem:[%s1549_s22 + $0x38] sm:$0xff]   ;;  %1303 = vmatprep.subr.bf16.mxu0 %v1459_v1  ;;  %1415 = vmatprep.subr.bf16.mxu1 %v1459_v1  ;;  %v1462_v4 = vld [vmem:[%s1549_s22 + $0x30] sm:$0xff]   ;;  %v1464_v6 = vld [vmem:[%s1549_s22 + $0x28] sm:$0xff]  }
  0x11   : > { %1304 = vmatpush3.bf16.msra.mxu0 %v1460_v2  ;;  %1423 = vmatpush3.bf16.msra.mxu1 %v1460_v2  ;;  %v1465_v7 = vld [vmem:[%s1549_s22 + $0x60] sm:$0xff]   ;;  %v1467_v9 = vld [vmem:[%s1549_s22 + $0x58] sm:$0xff]   ;;  %v1469_v11 = vld [vmem:[%s1549_s22 + $0x50] sm:$0xff]  }
  0x12   : > { %1305 = vmatprep.subr.bf16.mxu0 %v1461_v3  ;;  %1416 = vmatprep.subr.bf16.mxu1 %v1461_v3  ;;  %v1466_v8 = vld [vmem:[%s1549_s22 + $0x20] sm:$0xff]   ;;  %v1468_v10 = vld [vmem:[%s1549_s22 + $0x18] sm:$0xff]   ;;  %v373_v12 = vld [vmem:[%s1563_s25 + $0x8] sm:$0xff] }
  0x13   : > { %v381_v13 = vld [vmem:[%s1563_s25 + $0x48] sm:$0xff]  ;;  %v389_v14 = vunpack.c.l.s8.bf16 %v373_v12  ;;  %v1470_v16 = vld [vmem:[%s1549_s22 + $0x10] sm:$0xff]   ;;  %v840_v18 = vld [vmem:[%s1575_s29] sm:$0xff]  ;;  %v391_v31 = vunpack.c.h.s8.bf16 %v373_v12 }
  0x14   : > { %v405_v15 = vunpack.c.l.s8.bf16 %v381_v13  ;;  %v842_v17 = vld [vmem:[%s1575_s29 + $0x10] sm:$0xff]  ;;  %v1471_v19 = vld [vmem:[%s1549_s22 + $0x48] sm:$0xff]   ;;  %874 = vperm.xlu0 %1457, %v840_v18   ;;  %v843_v21 = vld [vmem:[%s1575_s29 + $0x18] sm:$0xff]  ;;  %v407_v32 = vunpack.c.h.s8.bf16 %v381_v13 }
  0x15   : > { %1306 = vmatpush3.bf16.msra.mxu0 %v1462_v4  ;;  %1424 = vmatpush3.bf16.msra.mxu1 %v1462_v4  ;;  %v1472_v20 = vld [vmem:[%s1549_s22 + $0x8] sm:$0xff]   ;;  %v1473_v23 = vld [vmem:[%s1549_s22 + $0x40] sm:$0xff]   ;;  %v847_v33 = vld [vmem:[%s1575_s29 + $0x38] sm:$0xff] }
  0x16   : > { %1307 = vmatprep.subr.bf16.mxu0 %v1463_v5  ;;  %1417 = vmatprep.subr.bf16.mxu1 %v1463_v5  ;;  %v841_v22 = vld [vmem:[%s1575_s29 + $0x8] sm:$0xff]  ;;  %v1474_v24 = vld [vmem:[%s1549_s22] sm:$0xff]   ;;  %v846_v34 = vld [vmem:[%s1575_s29 + $0x30] sm:$0xff] }
  0x17   : > { %612 = vmatprep.mubr.bf16.mxu0 %v389_v14  ;;  %676 = vmatprep.mubr.bf16.mxu1 %v405_v15  ;;  %v372_v25 = vld [vmem:[%s1563_s25] sm:$0xff]  ;;  %v845_v27 = vld [vmem:[%s1575_s29 + $0x28] sm:$0xff]  ;;  %v375_v35 = vld [vmem:[%s1563_s25 + $0x18] sm:$0xff] }
  0x18   : > { %884 = vperm.xlu1 %1458, %v842_v17   ;;  %879 = vperm.xlu0 %1457, %v841_v22   ;;  %v380_v26 = vld [vmem:[%s1563_s25 + $0x40] sm:$0xff]  ;;  %v388_v29 = vunpack.c.l.s8.bf16 %v372_v25  ;;  %v383_v36 = vld [vmem:[%s1563_s25 + $0x58] sm:$0xff]  ;;  %v849_v37 = vld [vmem:[%s1575_s29 + $0x48] sm:$0xff]  ;;  %v390_v39 = vunpack.c.h.s8.bf16 %v372_v25  ;;  %v393_v41 = vunpack.c.l.s8.bf16 %v375_v35  ;;  %v395_v51 = vunpack.c.h.s8.bf16 %v375_v35 }
  0x19   : > { %1308 = vmatpush3.bf16.msra.mxu0 %v1464_v6  ;;  %1425 = vmatpush3.bf16.msra.mxu1 %v1464_v6  ;;  %v844_v28 = vld [vmem:[%s1575_s29 + $0x20] sm:$0xff]  ;;  %v404_v30 = vunpack.c.l.s8.bf16 %v380_v26  ;;  %v406_v40 = vunpack.c.h.s8.bf16 %v380_v26  ;;  %v409_v42 = vunpack.c.l.s8.bf16 %v383_v36  ;;  %v851_v43 = vld [vmem:[%s1575_s29 + $0x58] sm:$0xff]  ;;  %v850_v44 = vld [vmem:[%s1575_s29 + $0x50] sm:$0xff]  ;;  %v411_v52 = vunpack.c.h.s8.bf16 %v383_v36 }
  0x1a   : > { %1309 = vmatprep.subr.bf16.mxu0 %v1465_v7  ;;  %1418 = vmatprep.subr.bf16.mxu1 %v1465_v7  ;;  %v848_v38 = vld [vmem:[%s1575_s29 + $0x40] sm:$0xff]  ;;  %v374_v45 = vld [vmem:[%s1563_s25 + $0x10] sm:$0xff]  ;;  %v853_v47 = vld [vmem:[%s1575_s29 + $0x68] sm:$0xff] }
  0x1b   : > { %v382_v46 = vld [vmem:[%s1563_s25 + $0x50] sm:$0xff]  ;;  %v852_v48 = vld [vmem:[%s1575_s29 + $0x60] sm:$0xff]  ;;  %v392_v49 = vunpack.c.l.s8.bf16 %v374_v45  ;;  %v855_v53 = vld [vmem:[%s1575_s29 + $0x78] sm:$0xff]  ;;  %v394_v59 = vunpack.c.h.s8.bf16 %v374_v45 }
  0x1c   : > { %889 = vperm.xlu1 %1458, %v843_v21   ;;  %894 = vperm.xlu0 %1457, %v844_v28   ;;  %v408_v50 = vunpack.c.l.s8.bf16 %v382_v46  ;;  %v854_v54 = vld [vmem:[%s1575_s29 + $0x70] sm:$0xff]  ;;  %v377_v55 = vld [vmem:[%s1563_s25 + $0x28] sm:$0xff]  ;;  %v856_v58 = vld [vmem:[%s1575_s29 + $0x80] sm:$0xff]  ;;  %v410_v60 = vunpack.c.h.s8.bf16 %v382_v46 }
  0x1d   : > { %1310 = vmatpush3.bf16.msra.mxu0 %v1466_v8  ;;  %1426 = vmatpush3.bf16.msra.mxu1 %v1466_v8  ;;  %v385_v56 = vld [vmem:[%s1563_s25 + $0x68] sm:$0xff]  ;;  %v397_v61 = vunpack.c.l.s8.bf16 %v377_v55  ;;  %v859_v63 = vld [vmem:[%s1575_s29 + $0x98] sm:$0xff]  ;;  %v858_v0 = vld [vmem:[%s1575_s29 + $0x90] sm:$0xff]  ;;  %v399_v7 = vunpack.c.h.s8.bf16 %v377_v55 }
  0x1e   : > { %1311 = vmatprep.subr.bf16.mxu0 %v1467_v9  ;;  %1419 = vmatprep.subr.bf16.mxu1 %v1467_v9  ;;  %v857_v57 = vld [vmem:[%s1575_s29 + $0x88] sm:$0xff]  ;;  %v413_v62 = vunpack.c.l.s8.bf16 %v385_v56  ;;  %v376_v1 = vld [vmem:[%s1563_s25 + $0x20] sm:$0xff]  ;;  %v415_v8 = vunpack.c.h.s8.bf16 %v385_v56  ;;  %v863_v9 = vld [vmem:[%s1575_s29 + $0xb8] sm:$0xff] }
  0x1f   : > { %v384_v2 = vld [vmem:[%s1563_s25 + $0x60] sm:$0xff]  ;;  %v861_v3 = vld [vmem:[%s1575_s29 + $0xa8] sm:$0xff]  ;;  %v396_v5 = vunpack.c.l.s8.bf16 %v376_v1  ;;  %v387_v12 = vld [vmem:[%s1563_s25 + $0x78] sm:$0xff]  ;;  %v398_v15 = vunpack.c.h.s8.bf16 %v376_v1 }
  0x20   : > { %899 = vperm.xlu1 %1458, %v845_v27   ;;  %904 = vperm.xlu0 %1457, %v846_v34   ;;  %v860_v4 = vld [vmem:[%s1575_s29 + $0xa0] sm:$0xff]  ;;  %v412_v6 = vunpack.c.l.s8.bf16 %v384_v2  ;;  %v865_v13 = vld [vmem:[%s1575_s29 + $0xc8] sm:$0xff]  ;;  %v417_v18 = vunpack.c.l.s8.bf16 %v387_v12  ;;  %v378_v21 = vld [vmem:[%s1563_s25 + $0x30] sm:$0xff]  ;;  %v419_v28 = vunpack.c.h.s8.bf16 %v387_v12 }
  0x21   : > { %1312 = vmatpush3.bf16.msra.mxu0 %v1468_v10  ;;  %1427 = vmatpush3.bf16.msra.mxu1 %v1468_v10  ;;  %v862_v10 = vld [vmem:[%s1575_s29 + $0xb0] sm:$0xff]  ;;  %v864_v14 = vld [vmem:[%s1575_s29 + $0xc0] sm:$0xff]  ;;  %v400_v25 = vunpack.c.l.s8.bf16 %v378_v21 }
  0x22   : > { %1313 = vmatprep.subr.bf16.mxu0 %v1469_v11  ;;  %1420 = vmatprep.subr.bf16.mxu1 %v1469_v11  ;;  %v379_v11 = vld [vmem:[%s1563_s25 + $0x38] sm:$0xff]  ;;  %v386_v22 = vld [vmem:[%s1563_s25 + $0x70] sm:$0xff] }
  0x23   : > { %v401_v17 = vunpack.c.l.s8.bf16 %v379_v11  ;;  %v416_v26 = vunpack.c.l.s8.bf16 %v386_v22  ;;  %v403_v27 = vunpack.c.h.s8.bf16 %v379_v11 }
  0x24   : > { %909 = vperm.xlu1 %1458, %v847_v33   ;;  %914 = vperm.xlu0 %1457, %v848_v38  }
  0x25   : > { %1314 = vmatpush3.bf16.msra.mxu0 %v1470_v16  ;;  %1428 = vmatpush3.bf16.msra.mxu1 %v1470_v16  ;;  %v414_v16 = vunpack.c.h.s8.bf16 %v384_v2 }
  0x26   : > { %1315 = vmatprep.subr.bf16.mxu0 %v1471_v19  ;;  %1421 = vmatprep.subr.bf16.mxu1 %v1471_v19  ;;  %v867_v19 = vld [vmem:[%s1575_s29 + $0xd8] sm:$0xff] }
  0x28   : > { %919 = vperm.xlu1 %1458, %v849_v37   ;;  %924 = vperm.xlu0 %1457, %v850_v44  }
  0x29   : > { %1316 = vmatpush3.bf16.msra.mxu0 %v1472_v20  ;;  %1429 = vmatpush3.bf16.msra.mxu1 %v1472_v20  ;;  %v866_v20 = vld [vmem:[%s1575_s29 + $0xd0] sm:$0xff] }
  0x2a   : > { %1317 = vmatprep.subr.bf16.mxu0 %v1473_v23  ;;  %1422 = vmatprep.subr.bf16.mxu1 %v1473_v23  ;;  %v869_v23 = vld [vmem:[%s1575_s29 + $0xe8] sm:$0xff] }
  0x2c   : > { %929 = vperm.xlu1 %1458, %v851_v43   ;;  %934 = vperm.xlu0 %1457, %v852_v48  }
  0x2d   : > { %1318 = vmatpush3.bf16.msra.mxu0 %v1474_v24  ;;  %1430 = vmatpush3.bf16.msra.mxu1 %v1474_v24  ;;  %v868_v24 = vld [vmem:[%s1575_s29 + $0xe0] sm:$0xff] }
  0x30   : > { %613 = vmatmul.mubr.bf16.vlgmr.msra.gmra.mxu0 %v388_v29  ;;  %677 = vmatmul.mubr.bf16.vlgmr.msra.gmra.mxu1 %v404_v30  ;;  %v871_v29 = vld [vmem:[%s1575_s29 + $0xf8] sm:$0xff]  ;;  %v870_v30 = vld [vmem:[%s1575_s29 + $0xf0] sm:$0xff] }
  0x31   : > { %620 = vmatprep.mubr.bf16.mxu0 %v391_v31  ;;  %684 = vmatprep.mubr.bf16.mxu1 %v407_v32  ;;  %v402_v31 = vunpack.c.h.s8.bf16 %v378_v21  ;;  %v418_v32 = vunpack.c.h.s8.bf16 %v386_v22 }
  0x32   : > { %939 = vperm.xlu1 %1458, %v853_v47   ;;  %944 = vperm.xlu0 %1457, %v854_v54  }
  0x36   : > { %949 = vperm.xlu1 %1458, %v855_v53   ;;  %954 = vperm.xlu0 %1457, %v856_v58   ;;  %v1657_v58 = vld [vmem:[%s1755_s3] ss:$0 sm:$0xff] }
  0x38   : > { %621 = vmatmul.mubr.bf16.gmra.mxu0 %v390_v39  ;;  %685 = vmatmul.mubr.bf16.gmra.mxu1 %v406_v40 }
  0x39   : > { %628 = vmatprep.mubr.bf16.mxu0 %v393_v41  ;;  %692 = vmatprep.mubr.bf16.mxu1 %v409_v42 }
  0x3a   : > { %959 = vperm.xlu1 %1458, %v857_v57   ;;  %964 = vperm.xlu0 %1457, %v858_v0  }
  0x3e   : > { %969 = vperm.xlu1 %1458, %v859_v63   ;;  %974 = vperm.xlu0 %1457, %v860_v4  }
  0x40   : > { %629 = vmatmul.mubr.bf16.gmra.mxu0 %v392_v49  ;;  %693 = vmatmul.mubr.bf16.gmra.mxu1 %v408_v50 }
  0x41   : > { %636 = vmatprep.mubr.bf16.mxu0 %v395_v51  ;;  %700 = vmatprep.mubr.bf16.mxu1 %v411_v52 }
  0x42   : > { %979 = vperm.xlu1 %1458, %v861_v3   ;;  %984 = vperm.xlu0 %1457, %v862_v10  }
  0x46   : > { %989 = vperm.xlu1 %1458, %v863_v9   ;;  %994 = vperm.xlu0 %1457, %v864_v14  }
  0x48   : > { %637 = vmatmul.mubr.bf16.gmra.mxu0 %v394_v59  ;;  %701 = vmatmul.mubr.bf16.gmra.mxu1 %v410_v60 }
  0x49   : > { %644 = vmatprep.mubr.bf16.mxu0 %v397_v61  ;;  %708 = vmatprep.mubr.bf16.mxu1 %v413_v62 }
  0x4a   : > { %999 = vperm.xlu1 %1458, %v865_v13   ;;  %1004 = vperm.xlu0 %1457, %v866_v20  }
  0x4e   : > { %1009 = vperm.xlu1 %1458, %v867_v19   ;;  %1014 = vperm.xlu0 %1457, %v868_v24  }
  0x50   : > { %645 = vmatmul.mubr.bf16.gmra.mxu0 %v396_v5  ;;  %709 = vmatmul.mubr.bf16.gmra.mxu1 %v412_v6 }
  0x51   : > { %652 = vmatprep.mubr.bf16.mxu0 %v399_v7  ;;  %716 = vmatprep.mubr.bf16.mxu1 %v415_v8 }
  0x52   : > { %1019 = vperm.xlu1 %1458, %v869_v23   ;;  %1024 = vperm.xlu0 %1457, %v870_v30  }
  0x56   : > { %1029 = vperm.xlu1 %1458, %v871_v29  }
  0x58   : > { %653 = vmatmul.mubr.bf16.gmra.mxu0 %v398_v15  ;;  %717 = vmatmul.mubr.bf16.gmra.mxu1 %v414_v16 }
  0x59   : > { %660 = vmatprep.mubr.bf16.mxu0 %v401_v17  ;;  %724 = vmatprep.mubr.bf16.mxu1 %v417_v18 }
  0x60   : > { %661 = vmatmul.mubr.bf16.gmra.mxu0 %v400_v25  ;;  %725 = vmatmul.mubr.bf16.gmra.mxu1 %v416_v26 }
  0x61   : > { %668 = vmatprep.mubr.bf16.mxu0 %v403_v27  ;;  %732 = vmatprep.mubr.bf16.mxu1 %v419_v28 }
  0x68   : > { %669 = vmatmul.mubr.bf16.gmra.mxu0 %v402_v31  ;;  %733 = vmatmul.mubr.bf16.gmra.mxu1 %v418_v32 }
  0x8f   : > { %v875_v33 = vpop.permute.xlu0 %874 }
  0x93   : > { %v885_v34 = vpop.permute.xlu1 %884  ;;  %v880_v35 = vpop.permute.xlu0 %879 }
  0x97   : > { %v1628_v36 = vpop.permute.xlu1 %889  ;;  %v1630_v37 = vpop.permute.xlu0 %894 }
  0x9b   : > { %v1632_v38 = vpop.permute.xlu1 %899  ;;  %v1634_v39 = vpop.permute.xlu0 %904 }
  0x9f   : > { %v1636_v40 = vpop.permute.xlu1 %909  ;;  %v1638_v41 = vpop.permute.xlu0 %914 }
  0xa3   : > { %v1640_v42 = vpop.permute.xlu1 %919  ;;  %v1642_v43 = vpop.permute.xlu0 %924 }
  0xa7   : > { %v1644_v44 = vpop.permute.xlu1 %929  ;;  %v1646_v45 = vpop.permute.xlu0 %934 }
  0xad   : > { %v1648_v46 = vpop.permute.xlu1 %939  ;;  %v1650_v47 = vpop.permute.xlu0 %944 }
  0xb1   : > { %v1652_v52 = vpop.permute.xlu1 %949  ;;  %v955_v57 = vpop.permute.xlu0 %954 }
  0xb5   : > { %v960_v3 = vpop.permute.xlu1 %959  ;;  %v965_v14 = vpop.permute.xlu0 %964 }
  0xb9   : > { %v970_v25 = vpop.permute.xlu1 %969 }
  0xf0   : > { %v1319_v48 = vpop.f32.mrf.mxu0  ;;  %v1367_v49 = vpop.f32.mrf.mxu1 }
  0xf2   : > { %v1320_v50 = vpop.f32.mrf.mxu0  ;;  %v1368_v51 = vpop.f32.mrf.mxu1 }
  0xf3   : > { %v1321_v53 = vadd.f32 %v1320_v50, %v1319_v48  ;;  %v1369_v54 = vadd.f32 %v1368_v51, %v1367_v49  ;;  %v975_v48 = vpop.permute.xlu0 %974 }
  0xf4   : > { %v1322_v55 = vpop.f32.mrf.mxu0  ;;  %v1370_v56 = vpop.f32.mrf.mxu1 }
  0xf5   : > { %v1032_v61 = vmul.f32 %v1321_v53, %v875_v33  ;;  %v1048_v62 = vmul.f32 %v1369_v54, %v955_v57 }
  0xf6   : > { %v1323_v59 = vpop.f32.mrf.mxu0  ;;  %v1371_v60 = vpop.f32.mrf.mxu1 }
  0xf7   : > { %v1324_v63 = vadd.f32 %v1323_v59, %v1322_v55  ;;  %v1372_v0 = vadd.f32 %v1371_v60, %v1370_v56  ;;  %v1071_v4 = vadd.f32 %v1657_v58, %v1032_v61  ;;  %v1087_v5 = vadd.f32 %v1657_v58, %v1048_v62  ;;  %v980_v60 = vpop.permute.xlu1 %979 }
  0xf8   : > { %v1325_v1 = vpop.f32.mrf.mxu0  ;;  %v1373_v2 = vpop.f32.mrf.mxu1 }
  0xf9   : > { %1103 = vst [vmem:[%s1664_s8] sm:$0xff] %v1071_v4  ;;  %1119 = vst [vmem:[%s1664_s8 + $0x80] sm:$0xff] %v1087_v5  ;;  %v1033_v8 = vmul.f32 %v1324_v63, %v880_v35  ;;  %v1049_v9 = vmul.f32 %v1372_v0, %v960_v3 }
  0xfa   : > { %v1326_v6 = vpop.f32.mrf.mxu0  ;;  %v1374_v7 = vpop.f32.mrf.mxu1 }
  0xfb   : > { %v1327_v10 = vadd.f32 %v1326_v6, %v1325_v1  ;;  %v1375_v11 = vadd.f32 %v1374_v7, %v1373_v2  ;;  %v1072_v15 = vadd.f32 %v1657_v58, %v1033_v8  ;;  %v1088_v16 = vadd.f32 %v1657_v58, %v1049_v9  ;;  %v985_v6 = vpop.permute.xlu0 %984 }
  0xfc   : > { %v1328_v12 = vpop.f32.mrf.mxu0  ;;  %v1376_v13 = vpop.f32.mrf.mxu1 }
  0xfd   : > { %1104 = vst [vmem:[%s1664_s8 + $0x8] sm:$0xff] %v1072_v15  ;;  %1120 = vst [vmem:[%s1664_s8 + $0x88] sm:$0xff] %v1088_v16  ;;  %v1034_v19 = vmul.f32 %v1327_v10, %v885_v34  ;;  %v1050_v20 = vmul.f32 %v1375_v11, %v965_v14  ;;  %v990_v16 = vpop.permute.xlu1 %989 }
  0xfe   : > { %v1329_v17 = vpop.f32.mrf.mxu0  ;;  %v1377_v18 = vpop.f32.mrf.mxu1 }
  0xff   : > { %v1330_v21 = vadd.f32 %v1329_v17, %v1328_v12  ;;  %v1378_v22 = vadd.f32 %v1377_v18, %v1376_v13  ;;  %v1073_v26 = vadd.f32 %v1657_v58, %v1034_v19  ;;  %v1089_v27 = vadd.f32 %v1657_v58, %v1050_v20 }
 0x100   : > { %v1331_v23 = vpop.f32.mrf.mxu0  ;;  %v1379_v24 = vpop.f32.mrf.mxu1 }
 0x101   : > { %1105 = vst [vmem:[%s1664_s8 + $0x10] sm:$0xff] %v1073_v26  ;;  %1121 = vst [vmem:[%s1664_s8 + $0x90] sm:$0xff] %v1089_v27  ;;  %v1035_v30 = vmul.f32 %v1330_v21, %v1628_v36  ;;  %v1051_v31 = vmul.f32 %v1378_v22, %v970_v25  ;;  %v995_v26 = vpop.permute.xlu0 %994 }
 0x102   : > { %v1332_v28 = vpop.f32.mrf.mxu0  ;;  %v1380_v29 = vpop.f32.mrf.mxu1 }
 0x103   : > { %v1333_v32 = vadd.f32 %v1332_v28, %v1331_v23  ;;  %v1381_v33 = vadd.f32 %v1380_v29, %v1379_v24  ;;  %v1074_v49 = vadd.f32 %v1657_v58, %v1035_v30  ;;  %v1090_v50 = vadd.f32 %v1657_v58, %v1051_v31 }
 0x104   : > { %v1334_v34 = vpop.f32.mrf.mxu0  ;;  %v1382_v35 = vpop.f32.mrf.mxu1 }
 0x105   : > { %1106 = vst [vmem:[%s1664_s8 + $0x18] sm:$0xff] %v1074_v49  ;;  %1122 = vst [vmem:[%s1664_s8 + $0x98] sm:$0xff] %v1090_v50  ;;  %v1036_v54 = vmul.f32 %v1333_v32, %v1630_v37  ;;  %v1052_v55 = vmul.f32 %v1381_v33, %v975_v48  ;;  %v1000_v48 = vpop.permute.xlu1 %999 }
 0x106   : > { %v1335_v51 = vpop.f32.mrf.mxu0  ;;  %v1383_v53 = vpop.f32.mrf.mxu1 }
 0x107   : > { %v1336_v36 = vadd.f32 %v1335_v51, %v1334_v34  ;;  %v1384_v56 = vadd.f32 %v1383_v53, %v1382_v35  ;;  %v1075_v61 = vadd.f32 %v1657_v58, %v1036_v54  ;;  %v1091_v62 = vadd.f32 %v1657_v58, %v1052_v55 }
 0x108   : > { %v1337_v57 = vpop.f32.mrf.mxu0  ;;  %v1385_v59 = vpop.f32.mrf.mxu1 }
 0x109   : > { %1107 = vst [vmem:[%s1664_s8 + $0x20] sm:$0xff] %v1075_v61  ;;  %1123 = vst [vmem:[%s1664_s8 + $0xa0] sm:$0xff] %v1091_v62  ;;  %v1037_v1 = vmul.f32 %v1336_v36, %v1632_v38  ;;  %v1053_v2 = vmul.f32 %v1384_v56, %v980_v60 }
 0x10a   : > { %v1338_v63 = vpop.f32.mrf.mxu0  ;;  %v1386_v0 = vpop.f32.mrf.mxu1 }
 0x10b   : > { %v1339_v37 = vadd.f32 %v1338_v63, %v1337_v57  ;;  %v1387_v3 = vadd.f32 %v1386_v0, %v1385_v59  ;;  %v1076_v7 = vadd.f32 %v1657_v58, %v1037_v1  ;;  %v1092_v8 = vadd.f32 %v1657_v58, %v1053_v2  ;;  %v1005_v59 = vpop.permute.xlu0 %1004 }
 0x10c   : > { %v1340_v4 = vpop.f32.mrf.mxu0  ;;  %v1388_v5 = vpop.f32.mrf.mxu1 }
 0x10d   : > { %1108 = vst [vmem:[%s1664_s8 + $0x28] sm:$0xff] %v1076_v7  ;;  %1124 = vst [vmem:[%s1664_s8 + $0xa8] sm:$0xff] %v1092_v8  ;;  %v1038_v11 = vmul.f32 %v1339_v37, %v1634_v39  ;;  %v1054_v12 = vmul.f32 %v1387_v3, %v985_v6 }
 0x10e   : > { %v1341_v9 = vpop.f32.mrf.mxu0  ;;  %v1389_v10 = vpop.f32.mrf.mxu1 }
 0x10f   : > { %v1342_v38 = vadd.f32 %v1341_v9, %v1340_v4  ;;  %v1390_v13 = vadd.f32 %v1389_v10, %v1388_v5  ;;  %v1077_v17 = vadd.f32 %v1657_v58, %v1038_v11  ;;  %v1093_v18 = vadd.f32 %v1657_v58, %v1054_v12  ;;  %v1010_v4 = vpop.permute.xlu1 %1009 }
 0x110   : > { %v1343_v14 = vpop.f32.mrf.mxu0  ;;  %v1391_v15 = vpop.f32.mrf.mxu1 }
 0x111   : > { %1109 = vst [vmem:[%s1664_s8 + $0x30] sm:$0xff] %v1077_v17  ;;  %1125 = vst [vmem:[%s1664_s8 + $0xb0] sm:$0xff] %v1093_v18  ;;  %v1039_v21 = vmul.f32 %v1342_v38, %v1636_v40  ;;  %v1055_v22 = vmul.f32 %v1390_v13, %v990_v16  ;;  %v1015_v13 = vpop.permute.xlu0 %1014 }
 0x112   : > { %v1344_v19 = vpop.f32.mrf.mxu0  ;;  %v1392_v20 = vpop.f32.mrf.mxu1 }
 0x113   : > { %v1345_v39 = vadd.f32 %v1344_v19, %v1343_v14  ;;  %v1393_v23 = vadd.f32 %v1392_v20, %v1391_v15  ;;  %v1078_v27 = vadd.f32 %v1657_v58, %v1039_v21  ;;  %v1094_v28 = vadd.f32 %v1657_v58, %v1055_v22 }
 0x114   : > { %v1346_v24 = vpop.f32.mrf.mxu0  ;;  %v1394_v25 = vpop.f32.mrf.mxu1 }
 0x115   : > { %1110 = vst [vmem:[%s1664_s8 + $0x38] sm:$0xff] %v1078_v27  ;;  %1126 = vst [vmem:[%s1664_s8 + $0xb8] sm:$0xff] %v1094_v28  ;;  %v1040_v31 = vmul.f32 %v1345_v39, %v1638_v41  ;;  %v1056_v32 = vmul.f32 %v1393_v23, %v995_v26  ;;  %v1020_v39 = vpop.permute.xlu1 %1019 }
 0x116   : > { %v1347_v29 = vpop.f32.mrf.mxu0  ;;  %v1395_v30 = vpop.f32.mrf.mxu1 }
 0x117   : > { %v1348_v40 = vadd.f32 %v1347_v29, %v1346_v24  ;;  %v1396_v33 = vadd.f32 %v1395_v30, %v1394_v25  ;;  %v1079_v49 = vadd.f32 %v1657_v58, %v1040_v31  ;;  %v1095_v50 = vadd.f32 %v1657_v58, %v1056_v32  ;;  %v1025_v32 = vpop.permute.xlu0 %1024 }
 0x118   : > { %v1349_v34 = vpop.f32.mrf.mxu0  ;;  %v1397_v35 = vpop.f32.mrf.mxu1 }
 0x119   : > { %1111 = vst [vmem:[%s1664_s8 + $0x40] sm:$0xff] %v1079_v49  ;;  %1127 = vst [vmem:[%s1664_s8 + $0xc0] sm:$0xff] %v1095_v50  ;;  %v1041_v54 = vmul.f32 %v1348_v40, %v1640_v42  ;;  %v1057_v55 = vmul.f32 %v1396_v33, %v1000_v48 }
 0x11a   : > { %v1350_v51 = vpop.f32.mrf.mxu0  ;;  %v1398_v53 = vpop.f32.mrf.mxu1 }
 0x11b   : > { %v1351_v41 = vadd.f32 %v1350_v51, %v1349_v34  ;;  %v1399_v36 = vadd.f32 %v1398_v53, %v1397_v35  ;;  %v1080_v60 = vadd.f32 %v1657_v58, %v1041_v54  ;;  %v1096_v61 = vadd.f32 %v1657_v58, %v1057_v55  ;;  %v1030_v54 = vpop.permute.xlu1 %1029 }
 0x11c   : > { %v1352_v56 = vpop.f32.mrf.mxu0  ;;  %v1400_v57 = vpop.f32.mrf.mxu1 }
 0x11d   : > { %1112 = vst [vmem:[%s1664_s8 + $0x48] sm:$0xff] %v1080_v60  ;;  %1128 = vst [vmem:[%s1664_s8 + $0xc8] sm:$0xff] %v1096_v61  ;;  %v1042_v0 = vmul.f32 %v1351_v41, %v1642_v43  ;;  %v1058_v1 = vmul.f32 %v1399_v36, %v1005_v59 }
 0x11e   : > { %v1353_v62 = vpop.f32.mrf.mxu0  ;;  %v1401_v63 = vpop.f32.mrf.mxu1 }
 0x11f   : > { %v1354_v42 = vadd.f32 %v1353_v62, %v1352_v56  ;;  %v1402_v2 = vadd.f32 %v1401_v63, %v1400_v57  ;;  %v1081_v5 = vadd.f32 %v1657_v58, %v1042_v0  ;;  %v1097_v6 = vadd.f32 %v1657_v58, %v1058_v1 }
 0x120   : > { %v1355_v37 = vpop.f32.mrf.mxu0  ;;  %v1403_v3 = vpop.f32.mrf.mxu1 }
 0x121   : > { %1113 = vst [vmem:[%s1664_s8 + $0x50] sm:$0xff] %v1081_v5  ;;  %1129 = vst [vmem:[%s1664_s8 + $0xd0] sm:$0xff] %v1097_v6  ;;  %v1043_v9 = vmul.f32 %v1354_v42, %v1644_v44  ;;  %v1059_v10 = vmul.f32 %v1402_v2, %v1010_v4 }
 0x122   : > { %v1356_v7 = vpop.f32.mrf.mxu0  ;;  %v1404_v8 = vpop.f32.mrf.mxu1 }
 0x123   : > { %v1357_v43 = vadd.f32 %v1356_v7, %v1355_v37  ;;  %v1405_v11 = vadd.f32 %v1404_v8, %v1403_v3  ;;  %v1082_v14 = vadd.f32 %v1657_v58, %v1043_v9  ;;  %v1098_v15 = vadd.f32 %v1657_v58, %v1059_v10 }
 0x124   : > { %v1358_v12 = vpop.f32.mrf.mxu0  ;;  %v1406_v38 = vpop.f32.mrf.mxu1 }
 0x125   : > { %1114 = vst [vmem:[%s1664_s8 + $0x58] sm:$0xff] %v1082_v14  ;;  %1130 = vst [vmem:[%s1664_s8 + $0xd8] sm:$0xff] %v1098_v15  ;;  %v1044_v18 = vmul.f32 %v1357_v43, %v1646_v45  ;;  %v1060_v19 = vmul.f32 %v1405_v11, %v1015_v13 }
 0x126   : > { %v1359_v16 = vpop.f32.mrf.mxu0  ;;  %v1407_v17 = vpop.f32.mrf.mxu1 }
 0x127   : > { %v1360_v44 = vadd.f32 %v1359_v16, %v1358_v12  ;;  %v1408_v20 = vadd.f32 %v1407_v17, %v1406_v38  ;;  %v1083_v23 = vadd.f32 %v1657_v58, %v1044_v18  ;;  %v1099_v24 = vadd.f32 %v1657_v58, %v1060_v19 }
 0x128   : > { %v1361_v21 = vpop.f32.mrf.mxu0  ;;  %v1409_v22 = vpop.f32.mrf.mxu1 }
 0x129   : > { %1115 = vst [vmem:[%s1664_s8 + $0x60] sm:$0xff] %v1083_v23  ;;  %1131 = vst [vmem:[%s1664_s8 + $0xe0] sm:$0xff] %v1099_v24  ;;  %v1045_v27 = vmul.f32 %v1360_v44, %v1648_v46  ;;  %v1061_v28 = vmul.f32 %v1408_v20, %v1020_v39 }
 0x12a   : > { %v1362_v25 = vpop.f32.mrf.mxu0  ;;  %v1410_v26 = vpop.f32.mrf.mxu1 }
 0x12b   : > { %v1363_v45 = vadd.f32 %v1362_v25, %v1361_v21  ;;  %v1411_v29 = vadd.f32 %v1410_v26, %v1409_v22  ;;  %v1084_v40 = vadd.f32 %v1657_v58, %v1045_v27  ;;  %v1100_v33 = vadd.f32 %v1657_v58, %v1061_v28 }
 0x12c   : > { %v1364_v30 = vpop.f32.mrf.mxu0  ;;  %v1412_v31 = vpop.f32.mrf.mxu1 }
 0x12d   : > { %1116 = vst [vmem:[%s1664_s8 + $0x68] sm:$0xff] %v1084_v40  ;;  %1132 = vst [vmem:[%s1664_s8 + $0xe8] sm:$0xff] %v1100_v33  ;;  %v1046_v46 = vmul.f32 %v1363_v45, %v1650_v47  ;;  %v1062_v48 = vmul.f32 %v1411_v29, %v1025_v32 }
 0x12e   : > { %v1365_v34 = vpop.f32.mrf.mxu0  ;;  %v1413_v35 = vpop.f32.mrf.mxu1 }
 0x12f   : > { %v1366_v49 = vadd.f32 %v1365_v34, %v1364_v30  ;;  %v1414_v50 = vadd.f32 %v1413_v35, %v1412_v31  ;;  %v1085_v51 = vadd.f32 %v1657_v58, %v1046_v46  ;;  %v1101_v53 = vadd.f32 %v1657_v58, %v1062_v48 }
 0x131   : > { %1117 = vst [vmem:[%s1664_s8 + $0x70] sm:$0xff] %v1085_v51  ;;  %1133 = vst [vmem:[%s1664_s8 + $0xf0] sm:$0xff] %v1101_v53  ;;  %v1047_v55 = vmul.f32 %v1366_v49, %v1652_v52  ;;  %v1063_v41 = vmul.f32 %v1414_v50, %v1030_v54 }
 0x133   : > { %v1086_v36 = vadd.f32 %v1657_v58, %v1047_v55  ;;  %v1102_v56 = vadd.f32 %v1657_v58, %v1063_v41 }
 0x135   : > { %1118 = vst [vmem:[%s1664_s8 + $0x78] sm:$0xff] %v1086_v36  ;;  %1134 = vst [vmem:[%s1664_s8 + $0xf8] sm:$0xff] %v1102_v56 }
 0x136 PF: > { %s14_s17 = sadd.s32 1, %s1497_s17   ;;  %s1757_s15 = smov %s1493_s16 }
 0x137   : > { %p11_p5 = scmp.ge.s32.totalorder %s14_s17, 4   ;;  %s1758_s16 = smov %s1760_s18 }
 0x139   :  { %13 = sbr.rel (!%p11_p5) target bundleno = 2 (0x2), region = 80 }

// kernel: bgrl_forward.10
= control target key start
LH: loop header
LB: loop body
LE: loop exit
PB: predicated region body
PF: predicated region fallthrough
CT: control target
= control target key end

     0   :  { %s1785_s24 = smov 0   ;;  %s1787_s25 = smov 0   ;;  %s2349_s0 = inlined_call_operand.vmem [shape: f32[2,256,128], index: 0, kind: input, shape index: {}]   ;;  %s2350_s1 = inlined_call_operand.vmem [shape: f32[2,2,128], index: 1, kind: input, shape index: {}]   ;;  %s2351_s2 = inlined_call_operand.vmem [shape: f32[1,128], index: 2, kind: input, shape index: {}]   ;;  %s2352_s3 = inlined_call_operand.vmem [shape: f32[1,128], index: 3, kind: input, shape index: {}]   ;;  %s2353_s4 = inlined_call_operand.vmem [shape: f32[1,128], index: 4, kind: input, shape index: {}]   ;;  %s2354_s5 = inlined_call_operand.vmem [shape: bf16[128,128], index: 5, kind: input, shape index: {}]   ;;  %s2355_s6 = inlined_call_operand.vmem [shape: f32[2,256,1], index: 6, kind: input, shape index: {}]   ;;  %s2356_s7 = inlined_call_operand.vmem [shape: bf16[2,256,128], index: 7, kind: output, shape index: {}]  }
   0x1   :  { %s1789_s26 = smov 0  }
   0x2 LB: > { %s29_s27 = sadd.s32 1, %s1738_s25  ;;  %p1412_p0 = scmp.ge.s32.totalorder %s1742_s26, 1  ;;  %s1742_s26 = sphi %s1789_s26, %s17_s26   ;;  %s1738_s25 = sphi %s1787_s25, %s2371_s25   ;;  %s1734_s24 = sphi %s1785_s24, %s2370_s24  }
   0x3   : > { %p31_p1 = scmp.ge.s32.totalorder %s29_s27, 2  ;;  %p284_p2 = scmp.lt.s32.totalorder %s1742_s26, 3 }
   0x5   : > { %s2373_s27 = smov (%p31_p1, %s29_s27), 0  ;;  %p285_p3 = pnand %p1412_p0, %p284_p2 }
   0x6   : > { %p338_p4 = scmp.lt.s32.totalorder (!%p285_p3), %s1734_s24, 1 }
   0x7   : > { %288 = sbr.rel (%p285_p3) target bundleno = 308 (0x134), region = 48 }
   0xc   : > { %v1710_v0 = vld [vmem:[%s2354_s5 + $0x38] sm:$0xff]   ;;  %v1711_v1 = vld [vmem:[%s2354_s5 + $0x30] sm:$0xff]   ;;  %v1744_v2 = vmov 0   ;;  %s2375_s24 = smov (!%p338_p4, %s1734_s24), 1  ;;  %v1712_v3 = vld [vmem:[%s2354_s5 + $0x28] sm:$0xff]   ;;  %v411_v8 = vlaneseq }
   0xd   : > { %1709 = vset.pattern.permute.xlu1 %v1744_v2  ;;  %1708 = vset.pattern.permute.xlu0 %v1744_v2  ;;  %s1465_s11 = sshll.u32 %s2375_s24, 8  ;;  %s1415_s12 = sshll.u32 %s2375_s24, 1  ;;  %v1713_v9 = vld [vmem:[%s2354_s5 + $0x20] sm:$0xff]   ;;  %v1714_v15 = vld [vmem:[%s2354_s5 + $0x18] sm:$0xff]   ;;  %v1715_v21 = vld [vmem:[%s2354_s5 + $0x10] sm:$0xff]  }
   0xe   : > { %1619 = vmatprep.subr.bf16.mxu0 %v1710_v0  ;;  %1667 = vmatprep.subr.bf16.mxu1 %v1710_v0  ;;  %s350_s15 = scalar_lea.vmem %s2350_s1, %s1415_s12  ;;  %s1824_s18 = scalar_lea.vmem %s2355_s6, %s1465_s11  ;;  %v1833_v14 = vshrl.u32 %v411_v8, 7  ;;  %v1716_v24 = vld [vmem:[%s2354_s5 + $0x8] sm:$0xff]   ;;  %v1878_v33 = vld [vmem:[%s2354_s5] sm:$0xff]  }
   0xf   : > { %1620 = vmatpush3.bf16.msra.mxu0 %v1710_v0  ;;  %1675 = vmatpush3.bf16.msra.mxu1 %v1710_v0  ;;  %v372_v4 = vld [vmem:[%s350_s15] sm:$0x3]  ;;  %v909_v5 = vld [vmem:[%s1824_s18 + $0x10] sm:$0xff]  ;;  %v910_v11 = vld [vmem:[%s1824_s18 + $0x18] sm:$0xff]  ;;  %s1849_s8 = scalar_lea.vmem %s2349_s0, %s1465_s11 }
  0x10   : > { %1621 = vmatprep.subr.bf16.mxu0 %v1711_v1  ;;  %1668 = vmatprep.subr.bf16.mxu1 %v1711_v1  ;;  %v907_v6 = vld [vmem:[%s1824_s18] sm:$0xff]  ;;  %v373_v7 = vmul.f32 0.00390625, %v372_v4  ;;  %v908_v12 = vld [vmem:[%s1824_s18 + $0x8] sm:$0xff]  ;;  %v413_v19 = vsub.s32 0, %v1833_v14  ;;  %v914_v22 = vld [vmem:[%s1824_s18 + $0x38] sm:$0xff] }
  0x11   : > { %951 = vperm.xlu1 %1709, %v909_v5   ;;  %941 = vperm.xlu0 %1708, %v907_v6   ;;  %v912_v17 = vld [vmem:[%s1824_s18 + $0x28] sm:$0xff]  ;;  %v911_v18 = vld [vmem:[%s1824_s18 + $0x20] sm:$0xff]  ;;  %v913_v23 = vld [vmem:[%s1824_s18 + $0x30] sm:$0xff] }
  0x12   : > { %v374_v10 = vmul.f32 %v373_v7, %v373_v7  ;;  %v1856_v25 = vrot.slane %v373_v7, %v413_v19  ;;  %v916_v26 = vld [vmem:[%s1824_s18 + $0x48] sm:$0xff]  ;;  %v915_v27 = vld [vmem:[%s1824_s18 + $0x40] sm:$0xff]  ;;  %v1873_v32 = vld [vmem:[%s1849_s8 + $0x10] sm:$0xff] }
  0x13   : > { %1622 = vmatpush3.bf16.msra.mxu0 %v1711_v1  ;;  %1676 = vmatpush3.bf16.msra.mxu1 %v1711_v1  ;;  %v1861_v28 = vld [vmem:[%s1849_s8] sm:$0xff]  ;;  %v1864_v29 = vld [vmem:[%s1849_s8 + $0x8] sm:$0xff]  ;;  %v1881_v34 = vld [vmem:[%s1849_s8 + $0x18] sm:$0xff] }
  0x14   : > { %1623 = vmatprep.subr.bf16.mxu0 %v1712_v3  ;;  %1669 = vmatprep.subr.bf16.mxu1 %v1712_v3  ;;  %v376_v13 = vrot.slane %v374_v10, 7  ;;  %v1867_v30 = vld [vmem:[%s1849_s8 + $0x80] sm:$0xff]  ;;  %v1870_v31 = vld [vmem:[%s1849_s8 + $0x88] sm:$0xff]  ;;  %v1884_v35 = vld [vmem:[%s1849_s8 + $0x90] sm:$0xff]  ;;  %v415_v42 = vsub.f32 %v1861_v28, %v1856_v25  ;;  %v416_v43 = vsub.f32 %v1864_v29, %v1856_v25  ;;  %v417_v49 = vsub.f32 %v1873_v32, %v1856_v25 }
  0x15   : > { %956 = vperm.xlu1 %1709, %v910_v11   ;;  %946 = vperm.xlu0 %1708, %v908_v12   ;;  %v1887_v36 = vld [vmem:[%s1849_s8 + $0x98] sm:$0xff]  ;;  %v1890_v37 = vld [vmem:[%s1849_s8 + $0x20] sm:$0xff]  ;;  %v1893_v38 = vld [vmem:[%s1849_s8 + $0x28] sm:$0xff]  ;;  %v431_v44 = vsub.f32 %v1867_v30, %v1856_v25  ;;  %v432_v48 = vsub.f32 %v1870_v31, %v1856_v25  ;;  %v418_v50 = vsub.f32 %v1881_v34, %v1856_v25 }
  0x16   : > { %v378_v16 = vsub.f32 %v373_v7, %v376_v13  ;;  %v1896_v39 = vld [vmem:[%s1849_s8 + $0xa0] sm:$0xff]  ;;  %v918_v40 = vld [vmem:[%s1824_s18 + $0x58] sm:$0xff]  ;;  %v917_v41 = vld [vmem:[%s1824_s18 + $0x50] sm:$0xff]  ;;  %v433_v54 = vsub.f32 %v1884_v35, %v1856_v25  ;;  %v434_v55 = vsub.f32 %v1887_v36, %v1856_v25  ;;  %v419_v56 = vsub.f32 %v1890_v37, %v1856_v25 }
  0x17   : > { %1624 = vmatpush3.bf16.msra.mxu0 %v1712_v3  ;;  %1677 = vmatpush3.bf16.msra.mxu1 %v1712_v3  ;;  %v1907_v45 = vld [vmem:[%s1849_s8 + $0xa8] sm:$0xff]  ;;  %v1910_v46 = vld [vmem:[%s1849_s8 + $0x30] sm:$0xff]  ;;  %v1913_v47 = vld [vmem:[%s1849_s8 + $0x38] sm:$0xff]  ;;  %v420_v57 = vsub.f32 %v1893_v38, %v1856_v25  ;;  %v435_v61 = vsub.f32 %v1896_v39, %v1856_v25  ;;  %v451_v3 = vsub.s32 1, %v1833_v14 }
  0x18   : > { %1625 = vmatprep.subr.bf16.mxu0 %v1713_v9  ;;  %1670 = vmatprep.subr.bf16.mxu1 %v1713_v9  ;;  %v447_v20 = vadd.f32 1e-05, %v378_v16  ;;  %v1922_v51 = vld [vmem:[%s1849_s8 + $0xb0] sm:$0xff]  ;;  %v1925_v52 = vld [vmem:[%s1849_s8 + $0xb8] sm:$0xff]  ;;  %v1928_v53 = vld [vmem:[%s1849_s8 + $0x40] sm:$0xff]  ;;  %v436_v62 = vsub.f32 %v1907_v45, %v1856_v25  ;;  %v421_v63 = vsub.f32 %v1910_v46, %v1856_v25  ;;  %v422_v6 = vsub.f32 %v1913_v47, %v1856_v25 }
  0x19   : > { %966 = vperm.xlu1 %1709, %v912_v17   ;;  %961 = vperm.xlu0 %1708, %v911_v18   ;;  %v1939_v58 = vld [vmem:[%s1849_s8 + $0x48] sm:$0xff]  ;;  %v1942_v59 = vld [vmem:[%s1849_s8 + $0xc0] sm:$0xff]  ;;  %v1954_v0 = vld [vmem:[%s1849_s8 + $0x50] sm:$0xff]  ;;  %v437_v7 = vsub.f32 %v1922_v51, %v1856_v25  ;;  %v438_v8 = vsub.f32 %v1925_v52, %v1856_v25  ;;  %v423_v12 = vsub.f32 %v1928_v53, %v1856_v25 }
  0x1a   : > { %1718 = vrsqrt.f32 %v447_v20  ;;  %v1945_v60 = vld [vmem:[%s1849_s8 + $0xc8] sm:$0xff]  ;;  %v1957_v1 = vld [vmem:[%s1849_s8 + $0x58] sm:$0xff]  ;;  %v1960_v2 = vld [vmem:[%s1849_s8 + $0xd0] sm:$0xff]  ;;  %v424_v13 = vsub.f32 %v1939_v58, %v1856_v25  ;;  %v439_v14 = vsub.f32 %v1942_v59, %v1856_v25 }
  0x1b   : > { %1626 = vmatpush3.bf16.msra.mxu0 %v1713_v9  ;;  %1678 = vmatpush3.bf16.msra.mxu1 %v1713_v9  ;;  %v920_v4 = vld [vmem:[%s1824_s18 + $0x68] sm:$0xff]  ;;  %v919_v5 = vld [vmem:[%s1824_s18 + $0x60] sm:$0xff]  ;;  %v1974_v9 = vld [vmem:[%s1849_s8 + $0xd8] sm:$0xff]  ;;  %v2357_v53 = vsub.f32 %v1945_v60, %v1856_v25 }
  0x1c   : > { %1627 = vmatprep.subr.bf16.mxu0 %v1714_v15  ;;  %1671 = vmatprep.subr.bf16.mxu1 %v1714_v15  ;;  %v1977_v10 = vld [vmem:[%s1849_s8 + $0x60] sm:$0xff]  ;;  %v1980_v11 = vld [vmem:[%s1849_s8 + $0x68] sm:$0xff]  ;;  %v1995_v17 = vld [vmem:[%s1849_s8 + $0x70] sm:$0xff] }
  0x1d   : > { %976 = vperm.xlu1 %1709, %v914_v22   ;;  %971 = vperm.xlu0 %1708, %v913_v23   ;;  %v1992_v16 = vld [vmem:[%s1849_s8 + $0xe8] sm:$0xff]  ;;  %v2006_v22 = vld [vmem:[%s1849_s8 + $0x78] sm:$0xff]  ;;  %v2009_v23 = vld [vmem:[%s1849_s8 + $0xf0] sm:$0xff] }
  0x1e   : > { %v2061_v28 = vld [vmem:[%s2352_s3] ss:$0 sm:$0xff] }
  0x1f   : > { %1628 = vmatpush3.bf16.msra.mxu0 %v1714_v15  ;;  %1679 = vmatpush3.bf16.msra.mxu1 %v1714_v15  ;;  %v1989_v15 = vld [vmem:[%s1849_s8 + $0xe0] sm:$0xff] }
  0x20   : > { %1629 = vmatprep.subr.bf16.mxu0 %v1715_v21  ;;  %1672 = vmatprep.subr.bf16.mxu1 %v1715_v21  ;;  %v2087_v35 = vld [vmem:[%s2353_s4] ss:$0 sm:$0xff] }
  0x21   : > { %986 = vperm.xlu1 %1709, %v916_v26   ;;  %981 = vperm.xlu0 %1708, %v915_v27   ;;  %v2033_v27 = vld [vmem:[%s2351_s2] ss:$0 sm:$0xff] }
  0x23   : > { %1630 = vmatpush3.bf16.msra.mxu0 %v1715_v21  ;;  %1680 = vmatpush3.bf16.msra.mxu1 %v1715_v21 }
  0x24   : > { %1631 = vmatprep.subr.bf16.mxu0 %v1716_v24  ;;  %1673 = vmatprep.subr.bf16.mxu1 %v1716_v24 }
  0x25   : > { %996 = vperm.xlu1 %1709, %v918_v40   ;;  %991 = vperm.xlu0 %1708, %v917_v41   ;;  %v926_v40 = vld [vmem:[%s1824_s18 + $0x98] sm:$0xff] }
  0x27   : > { %1632 = vmatpush3.bf16.msra.mxu0 %v1716_v24  ;;  %1681 = vmatpush3.bf16.msra.mxu1 %v1716_v24  ;;  %v2012_v24 = vld [vmem:[%s1849_s8 + $0xf8] sm:$0xff]  ;;  %v1719_v26 = vpop.eup %1718 }
  0x28   : > { %1633 = vmatprep.subr.bf16.mxu0 %v1878_v33  ;;  %1674 = vmatprep.subr.bf16.mxu1 %v1878_v33  ;;  %v2022_v21 = vrot.slane %v1719_v26, %v451_v3  ;;  %v922_v26 = vld [vmem:[%s1824_s18 + $0x78] sm:$0xff] }
  0x29   : > { %1006 = vperm.xlu1 %1709, %v920_v4   ;;  %1001 = vperm.xlu0 %1708, %v919_v5  }
  0x2a   : > { %v454_v4 = vmul.f32 %v2022_v21, %v416_v43  ;;  %v469_v5 = vmul.f32 %v2022_v21, %v431_v44  ;;  %v470_v19 = vmul.f32 %v2022_v21, %v432_v48  ;;  %v455_v29 = vmul.f32 %v2022_v21, %v417_v49  ;;  %v921_v43 = vld [vmem:[%s1824_s18 + $0x70] sm:$0xff] }
  0x2b   : > { %1634 = vmatpush3.bf16.msra.mxu0 %v1878_v33  ;;  %1682 = vmatpush3.bf16.msra.mxu1 %v1878_v33  ;;  %v453_v33 = vmul.f32 %v2022_v21, %v415_v42  ;;  %v456_v30 = vmul.f32 %v2022_v21, %v418_v50  ;;  %v471_v31 = vmul.f32 %v2022_v21, %v433_v54 }
  0x2c   : > { %v472_v42 = vmul.f32 %v2022_v21, %v434_v55  ;;  %v493_v44 = vmul.f32 %v2033_v27, %v454_v4  ;;  %v508_v34 = vmul.f32 %v2033_v27, %v469_v5  ;;  %v509_v48 = vmul.f32 %v2033_v27, %v470_v19  ;;  %v924_v5 = vld [vmem:[%s1824_s18 + $0x88] sm:$0xff] }
  0x2d   : > { %v492_v32 = vmul.f32 %v2033_v27, %v453_v33  ;;  %v494_v36 = vmul.f32 %v2033_v27, %v455_v29  ;;  %v495_v49 = vmul.f32 %v2033_v27, %v456_v30  ;;  %v510_v50 = vmul.f32 %v2033_v27, %v471_v31  ;;  %1016 = vperm.xlu1 %1709, %v922_v26  }
  0x2e   : > { %v511_v54 = vmul.f32 %v2033_v27, %v472_v42  ;;  %v532_v33 = vadd.f32 %v2061_v28, %v493_v44  ;;  %v547_v19 = vadd.f32 %v2061_v28, %v508_v34  ;;  %v548_v4 = vadd.f32 %v2061_v28, %v509_v48  ;;  %1011 = vperm.xlu0 %1708, %v921_v43   ;;  %v923_v42 = vld [vmem:[%s1824_s18 + $0x80] sm:$0xff] }
  0x2f   : > { %v531_v55 = vadd.f32 %v2061_v28, %v492_v32  ;;  %v533_v3 = vadd.f32 %v2061_v28, %v494_v36  ;;  %v534_v29 = vadd.f32 %v2061_v28, %v495_v49  ;;  %v549_v30 = vadd.f32 %v2061_v28, %v510_v50 }
  0x30   : > { %v550_v31 = vadd.f32 %v2061_v28, %v511_v54  ;;  %vm564_vm1 = vcmp.gt.f32.partialorder %v532_v33, 0.0  ;;  %v603_v32 = vmul.f32 %v2087_v35, %v532_v33  ;;  %vm579_vm2 = vcmp.gt.f32.partialorder %v547_v19, 0.0 }
  0x31   : > { %vm563_vm0 = vcmp.gt.f32.partialorder %v531_v55, 0.0  ;;  %v602_v26 = vmul.f32 %v2087_v35, %v531_v55  ;;  %vm580_vm3 = vcmp.gt.f32.partialorder %v548_v4, 0.0  ;;  %v618_v43 = vmul.f32 %v2087_v35, %v547_v19  ;;  %1026 = vperm.xlu1 %1709, %v924_v5  }
  0x32   : > { %v619_v44 = vmul.f32 %v2087_v35, %v548_v4  ;;  %v635_v48 = vsel %vm564_vm1, %v532_v33, %v603_v32  ;;  %vm565_vm4 = vcmp.gt.f32.partialorder %v533_v3, 0.0  ;;  %vm566_vm5 = vcmp.gt.f32.partialorder %v534_v29, 0.0  ;;  %1021 = vperm.xlu0 %1708, %v923_v42  }
  0x33   : > { %v634_v34 = vsel %vm563_vm0, %v531_v55, %v602_v26  ;;  %v650_v49 = vsel %vm579_vm2, %v547_v19, %v618_v43  ;;  %v604_v54 = vmul.f32 %v2087_v35, %v533_v3  ;;  %v605_v41 = vmul.f32 %v2087_v35, %v534_v29  ;;  %v930_v43 = vld [vmem:[%s1824_s18 + $0xb8] sm:$0xff] }
  0x34   : > { %v666_v36 = vpack.c.bf16 %v635_v48, %v634_v34  ;;  %v651_v50 = vsel %vm580_vm3, %v548_v4, %v619_v44  ;;  %vm581_vm6 = vcmp.gt.f32.partialorder %v549_v30, 0.0  ;;  %vm582_vm7 = vcmp.gt.f32.partialorder %v550_v31, 0.0  ;;  %v925_v4 = vld [vmem:[%s1824_s18 + $0x90] sm:$0xff] }
  0x35   : > { %v674_v20 = vpack.c.bf16 %v651_v50, %v650_v49  ;;  %v636_v18 = vsel %vm565_vm4, %v533_v3, %v604_v54  ;;  %v620_v55 = vmul.f32 %v2087_v35, %v549_v30  ;;  %v621_v33 = vmul.f32 %v2087_v35, %v550_v31  ;;  %1036 = vperm.xlu1 %1709, %v926_v40   ;;  %v929_v48 = vld [vmem:[%s1824_s18 + $0xb0] sm:$0xff] }
  0x36   : > { %1635 = vmatprep.mubr.bf16.mxu0 %v666_v36  ;;  %v457_v19 = vmul.f32 %v2022_v21, %v419_v56  ;;  %v637_v5 = vsel %vm566_vm5, %v534_v29, %v605_v41  ;;  %v458_v42 = vmul.f32 %v2022_v21, %v420_v57  ;;  %v473_v3 = vmul.f32 %v2022_v21, %v435_v61  ;;  %v928_v61 = vld [vmem:[%s1824_s18 + $0xa8] sm:$0xff] }
  0x37   : > { %1651 = vmatprep.mubr.bf16.mxu1 %v674_v20  ;;  %v474_v37 = vmul.f32 %v2022_v21, %v436_v62  ;;  %v667_v56 = vpack.c.bf16 %v637_v5, %v636_v18  ;;  %v652_v20 = vsel %vm581_vm6, %v549_v30, %v620_v55  ;;  %v653_v26 = vsel %vm582_vm7, %v550_v31, %v621_v33  ;;  %v927_v30 = vld [vmem:[%s1824_s18 + $0xa0] sm:$0xff] }
  0x38   : > { %v496_v41 = vmul.f32 %v2033_v27, %v457_v19  ;;  %v675_v38 = vpack.c.bf16 %v653_v26, %v652_v20  ;;  %v497_v57 = vmul.f32 %v2033_v27, %v458_v42  ;;  %v512_v29 = vmul.f32 %v2033_v27, %v473_v3  ;;  %1031 = vperm.xlu0 %1708, %v925_v4   ;;  %v932_v3 = vld [vmem:[%s1824_s18 + $0xc8] sm:$0xff] }
  0x39   : > { %v513_v39 = vmul.f32 %v2033_v27, %v474_v37  ;;  %1636 = vmatmul.mubr.bf16.vlgmr.msra.gmra.mxu0 %v667_v56  ;;  %v459_v62 = vmul.f32 %v2022_v21, %v421_v63  ;;  %v460_v18 = vmul.f32 %v2022_v21, %v422_v6  ;;  %v475_v40 = vmul.f32 %v2022_v21, %v437_v7 }
  0x3a   : > { %v535_v45 = vadd.f32 %v2061_v28, %v496_v41  ;;  %1652 = vmatmul.mubr.bf16.vlgmr.msra.gmra.mxu1 %v675_v38  ;;  %v536_v31 = vadd.f32 %v2061_v28, %v497_v57  ;;  %v551_v32 = vadd.f32 %v2061_v28, %v512_v29  ;;  %v476_v47 = vmul.f32 %v2022_v21, %v438_v8  ;;  %v931_v41 = vld [vmem:[%s1824_s18 + $0xc0] sm:$0xff] }
  0x3b   : > { %v552_v46 = vadd.f32 %v2061_v28, %v513_v39  ;;  %v498_v63 = vmul.f32 %v2033_v27, %v459_v62  ;;  %v499_v6 = vmul.f32 %v2033_v27, %v460_v18  ;;  %1046 = vperm.xlu1 %1709, %v928_v61   ;;  %v514_v50 = vmul.f32 %v2033_v27, %v475_v40 }
  0x3c   : > { %vm567_vm8 = vcmp.gt.f32.partialorder %v535_v45, 0.0  ;;  %v606_v51 = vmul.f32 %v2087_v35, %v535_v45  ;;  %vm568_vm9 = vcmp.gt.f32.partialorder %v536_v31, 0.0  ;;  %v607_v7 = vmul.f32 %v2087_v35, %v536_v31  ;;  %1041 = vperm.xlu0 %1708, %v927_v30  }
  0x3d   : > { %vm583_vm10 = vcmp.gt.f32.partialorder %v551_v32, 0.0  ;;  %vm584_vm11 = vcmp.gt.f32.partialorder %v552_v46, 0.0  ;;  %v622_v52 = vmul.f32 %v2087_v35, %v551_v32  ;;  %v623_v8 = vmul.f32 %v2087_v35, %v552_v46 }
  0x3e   : > { %v638_v44 = vsel %vm567_vm8, %v535_v45, %v606_v51  ;;  %v537_v34 = vadd.f32 %v2061_v28, %v498_v63  ;;  %v639_v36 = vsel %vm568_vm9, %v536_v31, %v607_v7  ;;  %v538_v49 = vadd.f32 %v2061_v28, %v499_v6  ;;  %v934_v45 = vld [vmem:[%s1824_s18 + $0xd8] sm:$0xff] }
  0x3f   : > { %v515_v54 = vmul.f32 %v2033_v27, %v476_v47  ;;  %v668_v55 = vpack.c.bf16 %v639_v36, %v638_v44  ;;  %v654_v33 = vsel %vm583_vm10, %v551_v32, %v622_v52  ;;  %v655_v19 = vsel %vm584_vm11, %v552_v46, %v623_v8  ;;  %1056 = vperm.xlu1 %1709, %v930_v43   ;;  %v933_v32 = vld [vmem:[%s1824_s18 + $0xd0] sm:$0xff]  ;;  %v936_v52 = vld [vmem:[%s1824_s18 + $0xe8] sm:$0xff] }
  0x40   : > { %vm569_vm12 = vcmp.gt.f32.partialorder %v537_v34, 0.0  ;;  %v676_v4 = vpack.c.bf16 %v655_v19, %v654_v33  ;;  %vm570_vm13 = vcmp.gt.f32.partialorder %v538_v49, 0.0  ;;  %v608_v5 = vmul.f32 %v2087_v35, %v537_v34  ;;  %1051 = vperm.xlu0 %1708, %v929_v48   ;;  %v935_v48 = vld [vmem:[%s1824_s18 + $0xe0] sm:$0xff] }
  0x41   : > { %v609_v42 = vmul.f32 %v2087_v35, %v538_v49  ;;  %1639 = vmatprep.mubr.bf16.mxu0 %v668_v55  ;;  %v553_v37 = vadd.f32 %v2061_v28, %v514_v50  ;;  %v554_v56 = vadd.f32 %v2061_v28, %v515_v54  ;;  %v461_v20 = vmul.f32 %v2022_v21, %v423_v12 }
  0x42   : > { %v462_v26 = vmul.f32 %v2022_v21, %v424_v13  ;;  %1655 = vmatprep.mubr.bf16.mxu1 %v676_v4  ;;  %v640_v38 = vsel %vm569_vm12, %v537_v34, %v608_v5  ;;  %v477_v29 = vmul.f32 %v2022_v21, %v439_v14  ;;  %v478_v12 = vmul.f32 %v2022_v21, %v2357_v53 }
  0x43   : > { %v641_v57 = vsel %vm570_vm13, %v538_v49, %v609_v42  ;;  %vm585_vm14 = vcmp.gt.f32.partialorder %v553_v37, 0.0  ;;  %vm586_vm15 = vcmp.gt.f32.partialorder %v554_v56, 0.0  ;;  %v624_v58 = vmul.f32 %v2087_v35, %v553_v37  ;;  %1066 = vperm.xlu1 %1709, %v932_v3  }
  0x44   : > { %v669_v39 = vpack.c.bf16 %v641_v57, %v640_v38  ;;  %v625_v13 = vmul.f32 %v2087_v35, %v554_v56  ;;  %v500_v61 = vmul.f32 %v2033_v27, %v461_v20  ;;  %v501_v59 = vmul.f32 %v2033_v27, %v462_v26  ;;  %1061 = vperm.xlu0 %1708, %v931_v41   ;;  %v937_v57 = vld [vmem:[%s1824_s18 + $0xf0] sm:$0xff] }
  0x45   : > { %v516_v14 = vmul.f32 %v2033_v27, %v477_v29  ;;  %v656_v60 = vsel %vm585_vm14, %v553_v37, %v624_v58  ;;  %v517_v62 = vmul.f32 %v2033_v27, %v478_v12  ;;  %v2358_v18 = vsub.f32 %v1954_v0, %v1856_v25  ;;  %v938_v37 = vld [vmem:[%s1824_s18 + $0xf8] sm:$0xff]  ;;  %s1467_s18 = sshll.u32 %s2375_s24, 7 }
  0x46   : > { %1640 = vmatmul.mubr.bf16.gmra.mxu0 %v669_v39  ;;  %v2359_v30 = vsub.f32 %v1957_v1, %v1856_v25  ;;  %v657_v46 = vsel %vm586_vm15, %v554_v56, %v625_v13  ;;  %v539_v47 = vadd.f32 %v2061_v28, %v500_v61  ;;  %v540_v51 = vadd.f32 %v2061_v28, %v501_v59  ;;  %s2314_s22 = scalar_lea.vmem %s2356_s7, %s1467_s18 }
  0x47   : > { %v463_v40 = vmul.f32 %v2022_v21, %v2358_v18  ;;  %v555_v63 = vadd.f32 %v2061_v28, %v516_v14  ;;  %v677_v6 = vpack.c.bf16 %v657_v46, %v656_v60  ;;  %v556_v0 = vadd.f32 %v2061_v28, %v517_v62  ;;  %1076 = vperm.xlu1 %1709, %v934_v45  }
  0x48   : > { %v464_v31 = vmul.f32 %v2022_v21, %v2359_v30  ;;  %vm571_vm0 = vcmp.gt.f32.partialorder %v539_v47, 0.0  ;;  %vm572_vm1 = vcmp.gt.f32.partialorder %v540_v51, 0.0  ;;  %v610_v1 = vmul.f32 %v2087_v35, %v539_v47  ;;  %1071 = vperm.xlu0 %1708, %v933_v32  }
  0x49   : > { %v502_v7 = vmul.f32 %v2033_v27, %v463_v40  ;;  %v611_v44 = vmul.f32 %v2087_v35, %v540_v51  ;;  %1656 = vmatmul.mubr.bf16.gmra.mxu1 %v677_v6  ;;  %vm587_vm2 = vcmp.gt.f32.partialorder %v555_v63, 0.0  ;;  %vm588_vm3 = vcmp.gt.f32.partialorder %v556_v0, 0.0 }
  0x4a   : > { %v503_v43 = vmul.f32 %v2033_v27, %v464_v31  ;;  %v626_v8 = vmul.f32 %v2087_v35, %v555_v63  ;;  %v627_v34 = vmul.f32 %v2087_v35, %v556_v0  ;;  %v642_v36 = vsel %vm571_vm0, %v539_v47, %v610_v1 }
  0x4b   : > { %v643_v49 = vsel %vm572_vm1, %v540_v51, %v611_v44  ;;  %v541_v50 = vadd.f32 %v2061_v28, %v502_v7  ;;  %v2360_v4 = vsub.f32 %v1960_v2, %v1856_v25  ;;  %1086 = vperm.xlu1 %1709, %v936_v52   ;;  %v2361_v20 = vsub.f32 %v1974_v9, %v1856_v25 }
  0x4c   : > { %v542_v54 = vadd.f32 %v2061_v28, %v503_v43  ;;  %v670_v55 = vpack.c.bf16 %v643_v49, %v642_v36  ;;  %v658_v33 = vsel %vm587_vm2, %v555_v63, %v626_v8  ;;  %v659_v19 = vsel %vm588_vm3, %v556_v0, %v627_v34  ;;  %1081 = vperm.xlu0 %1708, %v935_v48  }
  0x4d   : > { %v479_v5 = vmul.f32 %v2022_v21, %v2360_v4  ;;  %v678_v42 = vpack.c.bf16 %v659_v19, %v658_v33  ;;  %vm573_vm4 = vcmp.gt.f32.partialorder %v541_v50, 0.0  ;;  %v612_v3 = vmul.f32 %v2087_v35, %v541_v50 }
  0x4e   : > { %vm574_vm5 = vcmp.gt.f32.partialorder %v542_v54, 0.0  ;;  %1643 = vmatprep.mubr.bf16.mxu0 %v670_v55  ;;  %v613_v56 = vmul.f32 %v2087_v35, %v542_v54  ;;  %v480_v26 = vmul.f32 %v2022_v21, %v2361_v20  ;;  %v2362_v41 = vsub.f32 %v1977_v10, %v1856_v25 }
  0x4f   : > { %v518_v2 = vmul.f32 %v2033_v27, %v479_v5  ;;  %1659 = vmatprep.mubr.bf16.mxu1 %v678_v42  ;;  %v644_v29 = vsel %vm573_vm4, %v541_v50, %v612_v3  ;;  %v2363_v53 = vsub.f32 %v1980_v11, %v1856_v25  ;;  %v2364_v9 = vsub.f32 %v1989_v15, %v1856_v25 }
  0x50   : > { %v465_v38 = vmul.f32 %v2022_v21, %v2362_v41  ;;  %v2365_v58 = vsub.f32 %v1992_v16, %v1856_v25  ;;  %v645_v13 = vsel %vm574_vm5, %v542_v54, %v613_v56  ;;  %v519_v61 = vmul.f32 %v2033_v27, %v480_v26  ;;  %1096 = vperm.xlu1 %1709, %v938_v37  }
  0x51   : > { %v466_v12 = vmul.f32 %v2022_v21, %v2363_v53  ;;  %v481_v39 = vmul.f32 %v2022_v21, %v2364_v9  ;;  %v557_v59 = vadd.f32 %v2061_v28, %v518_v2  ;;  %v671_v11 = vpack.c.bf16 %v645_v13, %v644_v29  ;;  %1091 = vperm.xlu0 %1708, %v937_v57  }
  0x52   : > { %v482_v10 = vmul.f32 %v2022_v21, %v2365_v58  ;;  %v504_v14 = vmul.f32 %v2033_v27, %v465_v38  ;;  %v558_v16 = vadd.f32 %v2061_v28, %v519_v61  ;;  %v2366_v32 = vsub.f32 %v1995_v17, %v1856_v25 }
  0x53   : > { %v505_v45 = vmul.f32 %v2033_v27, %v466_v12  ;;  %v520_v15 = vmul.f32 %v2033_v27, %v481_v39  ;;  %vm589_vm6 = vcmp.gt.f32.partialorder %v557_v59, 0.0  ;;  %v628_v62 = vmul.f32 %v2087_v35, %v557_v59  ;;  %1644 = vmatmul.mubr.bf16.gmra.mxu0 %v671_v11 }
  0x54   : > { %v521_v60 = vmul.f32 %v2033_v27, %v482_v10  ;;  %v543_v18 = vadd.f32 %v2061_v28, %v504_v14  ;;  %v467_v46 = vmul.f32 %v2022_v21, %v2366_v32  ;;  %vm590_vm7 = vcmp.gt.f32.partialorder %v558_v16, 0.0 }
  0x55   : > { %v544_v40 = vadd.f32 %v2061_v28, %v505_v45  ;;  %v559_v30 = vadd.f32 %v2061_v28, %v520_v15  ;;  %v629_v47 = vmul.f32 %v2087_v35, %v558_v16  ;;  %v660_v51 = vsel %vm589_vm6, %v557_v59, %v628_v62 }
  0x56   : > { %v560_v31 = vadd.f32 %v2061_v28, %v521_v60  ;;  %vm575_vm8 = vcmp.gt.f32.partialorder %v543_v18, 0.0  ;;  %v614_v63 = vmul.f32 %v2087_v35, %v543_v18  ;;  %v2367_v52 = vsub.f32 %v2006_v22, %v1856_v25 }
  0x57   : > { %vm576_vm9 = vcmp.gt.f32.partialorder %v544_v40, 0.0  ;;  %v615_v6 = vmul.f32 %v2087_v35, %v544_v40  ;;  %vm591_vm10 = vcmp.gt.f32.partialorder %v559_v30, 0.0  ;;  %v661_v0 = vsel %vm590_vm7, %v558_v16, %v629_v47 }
  0x58   : > { %vm592_vm11 = vcmp.gt.f32.partialorder %v560_v31, 0.0  ;;  %v630_v7 = vmul.f32 %v2087_v35, %v559_v30  ;;  %v631_v43 = vmul.f32 %v2087_v35, %v560_v31  ;;  %v679_v17 = vpack.c.bf16 %v661_v0, %v660_v51 }
  0x59   : > { %v646_v1 = vsel %vm575_vm8, %v543_v18, %v614_v63  ;;  %v647_v44 = vsel %vm576_vm9, %v544_v40, %v615_v6  ;;  %v468_v8 = vmul.f32 %v2022_v21, %v2367_v52  ;;  %v506_v49 = vmul.f32 %v2033_v27, %v467_v46 }
  0x5a   : > { %v672_v34 = vpack.c.bf16 %v647_v44, %v646_v1  ;;  %v662_v48 = vsel %vm591_vm10, %v559_v30, %v630_v7  ;;  %v663_v36 = vsel %vm592_vm11, %v560_v31, %v631_v43  ;;  %1660 = vmatmul.mubr.bf16.gmra.mxu1 %v679_v17  ;;  %v2368_v55 = vsub.f32 %v2009_v23, %v1856_v25 }
  0x5b   : > { %v680_v50 = vpack.c.bf16 %v663_v36, %v662_v48  ;;  %v507_v54 = vmul.f32 %v2033_v27, %v468_v8  ;;  %v2369_v19 = vsub.f32 %v2012_v24, %v1856_v25  ;;  %v545_v4 = vadd.f32 %v2061_v28, %v506_v49 }
  0x5c   : > { %v483_v33 = vmul.f32 %v2022_v21, %v2368_v55  ;;  %1647 = vmatprep.mubr.bf16.mxu0 %v672_v34 }
  0x5d   : > { %v484_v22 = vmul.f32 %v2022_v21, %v2369_v19  ;;  %1663 = vmatprep.mubr.bf16.mxu1 %v680_v50  ;;  %v546_v5 = vadd.f32 %v2061_v28, %v507_v54  ;;  %vm577_vm12 = vcmp.gt.f32.partialorder %v545_v4, 0.0  ;;  %v616_v23 = vmul.f32 %v2087_v35, %v545_v4 }
  0x5e   : > { %v522_v42 = vmul.f32 %v2033_v27, %v483_v33 }
  0x5f   : > { %v523_v3 = vmul.f32 %v2033_v27, %v484_v22  ;;  %vm578_vm13 = vcmp.gt.f32.partialorder %v546_v5, 0.0  ;;  %v617_v37 = vmul.f32 %v2087_v35, %v546_v5  ;;  %v648_v24 = vsel %vm577_vm12, %v545_v4, %v616_v23 }
  0x60   : > { %v561_v25 = vadd.f32 %v2061_v28, %v522_v42 }
  0x61   : > { %v562_v21 = vadd.f32 %v2061_v28, %v523_v3  ;;  %v649_v56 = vsel %vm578_vm13, %v546_v5, %v617_v37 }
  0x62   : > { %vm593_vm14 = vcmp.gt.f32.partialorder %v561_v25, 0.0  ;;  %v632_v20 = vmul.f32 %v2087_v35, %v561_v25  ;;  %v673_v26 = vpack.c.bf16 %v649_v56, %v648_v24 }
  0x63   : > { %vm594_vm15 = vcmp.gt.f32.partialorder %v562_v21, 0.0  ;;  %v633_v2 = vmul.f32 %v2087_v35, %v562_v21 }
  0x64   : > { %v664_v27 = vsel %vm593_vm14, %v561_v25, %v632_v20  ;;  %1648 = vmatmul.mubr.bf16.gmra.mxu0 %v673_v26 }
  0x65   : > { %v665_v41 = vsel %vm594_vm15, %v562_v21, %v633_v2 }
  0x66   : > { %v681_v38 = vpack.c.bf16 %v665_v41, %v664_v27 }
  0x68   : > { %1664 = vmatmul.mubr.bf16.gmra.mxu1 %v681_v38 }
  0x8c   : > { %v952_v57 = vpop.permute.xlu1 %951  ;;  %v942_v29 = vpop.permute.xlu0 %941 }
  0x90   : > { %v957_v53 = vpop.permute.xlu1 %956  ;;  %v947_v12 = vpop.permute.xlu0 %946 }
  0x94   : > { %v967_v9 = vpop.permute.xlu1 %966  ;;  %v962_v28 = vpop.permute.xlu0 %961 }
  0x98   : > { %v977_v39 = vpop.permute.xlu1 %976  ;;  %v972_v58 = vpop.permute.xlu0 %971 }
  0x9c   : > { %v2294_v10 = vpop.permute.xlu1 %986  ;;  %v2296_v13 = vpop.permute.xlu0 %981 }
  0xa0   : > { %v2298_v61 = vpop.permute.xlu1 %996  ;;  %v2300_v35 = vpop.permute.xlu0 %991 }
  0xa4   : > { %v2302_v59 = vpop.permute.xlu1 %1006  ;;  %v2304_v14 = vpop.permute.xlu0 %1001 }
  0xa8   : > { %v2306_v11 = vpop.permute.xlu1 %1016 }
  0xa9   : > { %v2308_v45 = vpop.permute.xlu0 %1011 }
  0xac   : > { %v1027_v15 = vpop.permute.xlu1 %1026 }
  0xad   : > { %v1022_v60 = vpop.permute.xlu0 %1021 }
  0xb0   : > { %v1037_v30 = vpop.permute.xlu1 %1036 }
  0xb3   : > { %v1032_v32 = vpop.permute.xlu0 %1031 }
  0xb6   : > { %v1047_v49 = vpop.permute.xlu1 %1046 }
  0xb7   : > { %v1042_v50 = vpop.permute.xlu0 %1041 }
  0xba   : > { %v1057_v42 = vpop.permute.xlu1 %1056 }
  0xbb   : > { %v1052_v25 = vpop.permute.xlu0 %1051 }
  0xf9   : > { %v1637_v16 = vpop.f32.mrf.mxu0 }
  0xfa   : > { %v1653_v62 = vpop.f32.mrf.mxu1  ;;  %v1101_v46 = vmul.f32 %v1637_v16, %v952_v57 }
  0xfb   : > { %v780_v18 = vpop.f32.mrf.mxu0  ;;  %v1117_v63 = vmul.f32 %v1653_v62, %v1032_v32 }
  0xfc   : > { %v844_v40 = vpop.f32.mrf.mxu1  ;;  %v1099_v7 = vmul.f32 %v942_v29, %v780_v18 }
  0xfd   : > { %v1638_v31 = vpop.f32.mrf.mxu0  ;;  %v1115_v44 = vmul.f32 %v1022_v60, %v844_v40 }
  0xfe   : > { %v1102_v47 = vmul.f32 %v1638_v31, %v957_v53  ;;  %v1654_v51 = vpop.f32.mrf.mxu1  ;;  %v1067_v53 = vpop.permute.xlu1 %1066 }
  0xff   : > { %v1118_v6 = vmul.f32 %v1654_v51, %v1037_v30  ;;  %v783_v0 = vpop.f32.mrf.mxu0 }
 0x100   : > { %v1508_v43 = vpack.c.bf16 %v1102_v47, %v1101_v46  ;;  %v1100_v17 = vmul.f32 %v947_v12, %v783_v0  ;;  %v847_v1 = vpop.f32.mrf.mxu1  ;;  %v1062_v12 = vpop.permute.xlu0 %1061 }
 0x101   : > { %v1548_v52 = vpack.c.bf16 %v1118_v6, %v1117_v63  ;;  %v1116_v8 = vmul.f32 %v1027_v15, %v847_v1 }
 0x102   : > { %1580 = vst [vmem:[%s2314_s22 + $0x8] sm:$0xff] %v1508_v43   ;;  %v1503_v34 = vpack.c.bf16 %v1100_v17, %v1099_v7  ;;  %v1077_v40 = vpop.permute.xlu1 %1076 }
 0x103   : > { %1588 = vst [vmem:[%s2314_s22 + $0x48] sm:$0xff] %v1548_v52   ;;  %v1543_v48 = vpack.c.bf16 %v1116_v8, %v1115_v44 }
 0x104   : > { %1504 = vst [vmem:[%s2314_s22] sm:$0xff] %v1503_v34   ;;  %v1072_v31 = vpop.permute.xlu0 %1071 }
 0x105   : > { %1587 = vst [vmem:[%s2314_s22 + $0x40] sm:$0xff] %v1543_v48  }
 0x106   : > { %v1641_v36 = vpop.f32.mrf.mxu0  ;;  %v1087_v6 = vpop.permute.xlu1 %1086 }
 0x107   : > { %v1105_v19 = vmul.f32 %v1641_v36, %v972_v58 }
 0x108   : > { %v796_v54 = vpop.f32.mrf.mxu0  ;;  %v1082_v7 = vpop.permute.xlu0 %1081 }
 0x109   : > { %v1657_v55 = vpop.f32.mrf.mxu1  ;;  %v1103_v3 = vmul.f32 %v962_v28, %v796_v54 }
 0x10a   : > { %v1642_v33 = vpop.f32.mrf.mxu0  ;;  %v1121_v24 = vmul.f32 %v1657_v55, %v1052_v25  ;;  %v1097_v8 = vpop.permute.xlu1 %1096 }
 0x10b   : > { %v1106_v22 = vmul.f32 %v1642_v33, %v977_v39  ;;  %v860_v4 = vpop.f32.mrf.mxu1 }
 0x10c   : > { %v799_v5 = vpop.f32.mrf.mxu0  ;;  %v1119_v2 = vmul.f32 %v1042_v50, %v860_v4  ;;  %v1092_v48 = vpop.permute.xlu0 %1091 }
 0x10d   : > { %v1518_v23 = vpack.c.bf16 %v1106_v22, %v1105_v19  ;;  %v1104_v37 = vmul.f32 %v967_v9, %v799_v5  ;;  %v1658_v21 = vpop.f32.mrf.mxu1 }
 0x10e   : > { %v1122_v56 = vmul.f32 %v1658_v21, %v1057_v42 }
 0x10f   : > { %1582 = vst [vmem:[%s2314_s22 + $0x18] sm:$0xff] %v1518_v23   ;;  %v1513_v20 = vpack.c.bf16 %v1104_v37, %v1103_v3  ;;  %v863_v26 = vpop.f32.mrf.mxu1 }
 0x110   : > { %v1558_v27 = vpack.c.bf16 %v1122_v56, %v1121_v24  ;;  %v1120_v41 = vmul.f32 %v1047_v49, %v863_v26 }
 0x111   : > { %1581 = vst [vmem:[%s2314_s22 + $0x10] sm:$0xff] %v1513_v20  }
 0x112   : > { %1590 = vst [vmem:[%s2314_s22 + $0x58] sm:$0xff] %v1558_v27   ;;  %v1553_v38 = vpack.c.bf16 %v1120_v41, %v1119_v2 }
 0x113   : > { %v1645_v57 = vpop.f32.mrf.mxu0 }
 0x114   : > { %1589 = vst [vmem:[%s2314_s22 + $0x50] sm:$0xff] %v1553_v38   ;;  %v1109_v28 = vmul.f32 %v1645_v57, %v2300_v35 }
 0x115   : > { %v812_v29 = vpop.f32.mrf.mxu0 }
 0x116   : > { %v1107_v60 = vmul.f32 %v2296_v13, %v812_v29 }
 0x117   : > { %v1646_v9 = vpop.f32.mrf.mxu0 }
 0x118   : > { %v1110_v39 = vmul.f32 %v1646_v9, %v2298_v61 }
 0x119   : > { %v815_v15 = vpop.f32.mrf.mxu0 }
 0x11a   : > { %v1661_v58 = vpop.f32.mrf.mxu1  ;;  %v1528_v16 = vpack.c.bf16 %v1110_v39, %v1109_v28  ;;  %v1108_v62 = vmul.f32 %v2294_v10, %v815_v15 }
 0x11b   : > { %v1125_v46 = vmul.f32 %v1661_v58, %v1072_v31 }
 0x11c   : > { %v876_v18 = vpop.f32.mrf.mxu1  ;;  %1584 = vst [vmem:[%s2314_s22 + $0x28] sm:$0xff] %v1528_v16   ;;  %v1523_v30 = vpack.c.bf16 %v1108_v62, %v1107_v60 }
 0x11d   : > { %v1123_v61 = vmul.f32 %v1062_v12, %v876_v18 }
 0x11e   : > { %v1662_v32 = vpop.f32.mrf.mxu1  ;;  %1583 = vst [vmem:[%s2314_s22 + $0x20] sm:$0xff] %v1523_v30  }
 0x11f   : > { %v1126_v47 = vmul.f32 %v1662_v32, %v1077_v40 }
 0x120   : > { %v879_v35 = vpop.f32.mrf.mxu1 }
 0x121   : > { %v1568_v51 = vpack.c.bf16 %v1126_v47, %v1125_v46  ;;  %v1124_v63 = vmul.f32 %v1067_v53, %v879_v35 }
 0x123   : > { %1592 = vst [vmem:[%s2314_s22 + $0x68] sm:$0xff] %v1568_v51   ;;  %v1563_v13 = vpack.c.bf16 %v1124_v63, %v1123_v61 }
 0x124   : > { %v1649_v0 = vpop.f32.mrf.mxu0 }
 0x125   : > { %1591 = vst [vmem:[%s2314_s22 + $0x60] sm:$0xff] %v1563_v13   ;;  %v1113_v1 = vmul.f32 %v1649_v0, %v2308_v45 }
 0x126   : > { %v828_v10 = vpop.f32.mrf.mxu0 }
 0x127   : > { %v1111_v36 = vmul.f32 %v2304_v14, %v828_v10 }
 0x128   : > { %v1665_v43 = vpop.f32.mrf.mxu1  ;;  %v1650_v17 = vpop.f32.mrf.mxu0 }
 0x129   : > { %v1114_v52 = vmul.f32 %v1650_v17, %v2306_v11  ;;  %v1129_v55 = vmul.f32 %v1665_v43, %v1092_v48 }
 0x12a   : > { %v892_v44 = vpop.f32.mrf.mxu1  ;;  %v831_v34 = vpop.f32.mrf.mxu0 }
 0x12b   : > { %v1538_v49 = vpack.c.bf16 %v1114_v52, %v1113_v1  ;;  %v1112_v54 = vmul.f32 %v2302_v59, %v831_v34  ;;  %v1127_v22 = vmul.f32 %v1082_v7, %v892_v44 }
 0x12c   : > { %v1666_v50 = vpop.f32.mrf.mxu1 }
 0x12d   : > { %v1130_v33 = vmul.f32 %v1666_v50, %v1097_v8  ;;  %1586 = vst [vmem:[%s2314_s22 + $0x38] sm:$0xff] %v1538_v49   ;;  %v1533_v19 = vpack.c.bf16 %v1112_v54, %v1111_v36 }
 0x12e   : > { %v895_v45 = vpop.f32.mrf.mxu1 }
 0x12f   : > { %v1578_v4 = vpack.c.bf16 %v1130_v33, %v1129_v55  ;;  %v1128_v11 = vmul.f32 %v1087_v6, %v895_v45  ;;  %1585 = vst [vmem:[%s2314_s22 + $0x30] sm:$0xff] %v1533_v19  }
 0x131   : > { %1594 = vst [vmem:[%s2314_s22 + $0x78] sm:$0xff] %v1578_v4   ;;  %v1573_v5 = vpack.c.bf16 %v1128_v11, %v1127_v22 }
 0x133   : > { %1593 = vst [vmem:[%s2314_s22 + $0x70] sm:$0xff] %v1573_v5  }
 0x134 PF: > { %s17_s26 = sadd.s32 1, %s1742_s26   ;;  %s2370_s24 = smov %s1738_s25 }
 0x135   : > { %p14_p5 = scmp.ge.s32.totalorder %s17_s26, 4   ;;  %s2371_s25 = smov %s2373_s27 }
 0x137   :  { %16 = sbr.rel (!%p14_p5) target bundleno = 2 (0x2), region = 84 }

// kernel: bgrl_forward.15
= control target key start
LH: loop header
LB: loop body
LE: loop exit
PB: predicated region body
PF: predicated region fallthrough
CT: control target
= control target key end

     0   :  { %v122_v1 = vlaneseq  ;;  %vm668_vm0 = vcmask 523264   ;;  %s6794_s0 = inlined_call_operand.vmem [shape: f32[2,256,128], index: 0, kind: input, shape index: {}]   ;;  %s6795_s1 = inlined_call_operand.vmem [shape: f32[2,2,128], index: 1, kind: input, shape index: {}]   ;;  %s6796_s2 = inlined_call_operand.vmem [shape: f32[1,128], index: 2, kind: input, shape index: {}]   ;;  %s6797_s3 = inlined_call_operand.vmem [shape: f32[1,128], index: 3, kind: input, shape index: {}]   ;;  %s6798_s4 = inlined_call_operand.vmem [shape: f32[1,128], index: 4, kind: input, shape index: {}]   ;;  %s6799_s5 = inlined_call_operand.vmem [shape: bf16[64,128], index: 5, kind: input, shape index: {}]   ;;  %s6800_s6 = inlined_call_operand.vmem [shape: f32[1,128], index: 6, kind: input, shape index: {}]   ;;  %s6801_s7 = inlined_call_operand.vmem [shape: bf16[128,64], index: 7, kind: input, shape index: {}]   ;;  %s6802_s8 = inlined_call_operand.vmem [shape: f32[1,64], index: 8, kind: input, shape index: {}]   ;;  %s6803_s9 = inlined_call_operand.<no memory space> [shape: f32[1,1], index: 9, kind: input, shape index: {}]   ;;  %s6804_s10 = inlined_call_operand.hbm [shape: f32[1,1], index: 10, kind: output, shape index: {}]  }
   0x1   :  { %v3919_v0 = vld [vmem:[%s6799_s5 + $0x18] sm:$0xff]   ;;  %v3924_v2 = vld [vmem:[%s6799_s5 + $0x10] sm:$0xff]   ;;  %v3934_v4 = vld [vmem:[%s6799_s5 + $0x8] sm:$0xff]  }
   0x2   :  { %3493 = vmatprep.subr.bf16.mxu0 %v3919_v0  ;;  %v3928_v3 = vshrl.u32 %v122_v1, 7  ;;  %v44_v5 = vld [vmem:[%s6795_s1] sm:$0x3]  ;;  %v3955_v12 = vld [vmem:[%s6794_s0 + $0x8] sm:$0xff]  ;;  %v3965_v15 = vld [vmem:[%s6794_s0 + $0x10] sm:$0xff] }
   0x3   :  { %3494 = vmatpush3.bf16.msra.mxu0 %v3919_v0  ;;  %v46_v6 = vmul.f32 0.00390625, %v44_v5  ;;  %v3945_v9 = vld [vmem:[%s6799_s5] sm:$0xff]   ;;  %v3970_v16 = vld [vmem:[%s6794_s0 + $0x18] sm:$0xff]  ;;  %v3981_v18 = vld [vmem:[%s6794_s0 + $0x28] sm:$0xff] }
   0x4   :  { %3495 = vmatprep.subr.bf16.mxu0 %v3924_v2  ;;  %v124_v8 = vsub.s32 0, %v3928_v3  ;;  %v3950_v11 = vld [vmem:[%s6794_s0] sm:$0xff]  ;;  %v3986_v19 = vld [vmem:[%s6794_s0 + $0x30] sm:$0xff]  ;;  %v3991_v20 = vld [vmem:[%s6794_s0 + $0x38] sm:$0xff] }
   0x5   :  { %v48_v7 = vmul.f32 %v46_v6, %v46_v6  ;;  %v3975_v17 = vld [vmem:[%s6794_s0 + $0x20] sm:$0xff]  ;;  %v4001_v23 = vld [vmem:[%s6794_s0 + $0x48] sm:$0xff]  ;;  %v4006_v24 = vld [vmem:[%s6794_s0 + $0x50] sm:$0xff] }
   0x6   :  { %v3960_v14 = vrot.slane %v46_v6, %v124_v8  ;;  %v3996_v21 = vld [vmem:[%s6794_s0 + $0x40] sm:$0xff]  ;;  %v4014_v26 = vld [vmem:[%s6794_s0 + $0x58] sm:$0xff]  ;;  %v4024_v28 = vld [vmem:[%s6794_s0 + $0x68] sm:$0xff] }
   0x7   :  { %3496 = vmatpush3.bf16.msra.mxu0 %v3924_v2  ;;  %v52_v10 = vrot.slane %v48_v7, 7  ;;  %v45_v25 = vld [vmem:[%s6795_s1 + $0x2] sm:$0x3]  ;;  %v4035_v32 = vld [vmem:[%s6794_s0 + $0x70] sm:$0xff]  ;;  %v4040_v33 = vld [vmem:[%s6794_s0 + $0x78] sm:$0xff] }
   0x8   :  { %3497 = vmatprep.subr.bf16.mxu0 %v3934_v4  ;;  %v4019_v27 = vld [vmem:[%s6794_s0 + $0x60] sm:$0xff]  ;;  %v4056_v38 = vld [vmem:[%s6794_s0 + $0x88] sm:$0xff]  ;;  %v4061_v39 = vld [vmem:[%s6794_s0 + $0x90] sm:$0xff]  ;;  %v47_v41 = vmul.f32 0.00390625, %v45_v25  ;;  %v6889_v51 = vsub.f32 %v3970_v16, %v3960_v14  ;;  %v6892_v16 = vsub.f32 %v3986_v19, %v3960_v14 }
   0x9   :  { %v56_v13 = vsub.f32 %v46_v6, %v52_v10  ;;  %v4045_v34 = vld [vmem:[%s6794_s0 + $0x80] sm:$0xff]  ;;  %v4066_v40 = vld [vmem:[%s6794_s0 + $0x98] sm:$0xff]  ;;  %v4085_v47 = vld [vmem:[%s6794_s0 + $0xa8] sm:$0xff] }
   0xa   :  { %v4080_v46 = vld [vmem:[%s6794_s0 + $0xa0] sm:$0xff]  ;;  %v4090_v48 = vld [vmem:[%s6794_s0 + $0xb0] sm:$0xff]  ;;  %v4101_v52 = vld [vmem:[%s6794_s0 + $0xb8] sm:$0xff]  ;;  %v49_v53 = vmul.f32 %v47_v41, %v47_v41  ;;  %v4147_v7 = vrot.slane %v47_v41, %v124_v8 }
   0xb   :  { %3498 = vmatpush3.bf16.msra.mxu0 %v3934_v4  ;;  %v194_v22 = vadd.f32 1e-05, %v56_v13  ;;  %v4106_v54 = vld [vmem:[%s6794_s0 + $0xc0] sm:$0xff]  ;;  %v4111_v55 = vld [vmem:[%s6794_s0 + $0xc8] sm:$0xff]  ;;  %v4124_v60 = vld [vmem:[%s6794_s0 + $0x110] sm:$0xff] }
   0xc   :  { %3499 = vmatprep.subr.bf16.mxu0 %v3945_v9  ;;  %v4129_v61 = vld [vmem:[%s6794_s0 + $0xd0] sm:$0xff]  ;;  %v4134_v62 = vld [vmem:[%s6794_s0 + $0xd8] sm:$0xff]  ;;  %v4139_v63 = vld [vmem:[%s6794_s0 + $0xe0] sm:$0xff]  ;;  %v53_v6 = vrot.slane %v49_v53, 7 }
   0xd   :  { %3700 = vrsqrt.f32 %v194_v22  ;;  %v4152_v10 = vld [vmem:[%s6794_s0 + $0x118] sm:$0xff]  ;;  %v4157_v13 = vld [vmem:[%s6794_s0 + $0x100] sm:$0xff]  ;;  %v4162_v22 = vld [vmem:[%s6794_s0 + $0x128] sm:$0xff] }
   0xe   :  { %v4167_v8 = vld [vmem:[%s6794_s0 + $0xe8] sm:$0xff]  ;;  %v4177_v53 = vld [vmem:[%s6794_s0 + $0xf0] sm:$0xff]  ;;  %v4190_v57 = vld [vmem:[%s6794_s0 + $0xf8] sm:$0xff]  ;;  %v57_v5 = vsub.f32 %v47_v41, %v53_v6 }
   0xf   :  { %3500 = vmatpush3.bf16.msra.mxu0 %v3945_v9  ;;  %v4172_v25 = vld [vmem:[%s6794_s0 + $0x108] sm:$0xff]  ;;  %6871 = vst [vmem:[#allocation6_spill] sm:$0xff] %v4177_v53  ;;  %6872 = vst [vmem:[#allocation7_spill] sm:$0xff] %v4190_v57  ;;  %v4195_v56 = vld [vmem:[%s6794_s0 + $0x138] sm:$0xff] }
  0x10   :  { %3581 = vmatprep.subr.bf16.mxu0 %v3919_v0  ;;  %6873 = vst [vmem:[#allocation8_spill] sm:$0xff] %v4195_v56  ;;  %v4200_v1 = vld [vmem:[%s6794_s0 + $0x120] sm:$0xff]  ;;  %v4211_v50 = vld [vmem:[%s6794_s0 + $0x148] sm:$0xff]  ;;  %v4216_v49 = vld [vmem:[%s6794_s0 + $0x130] sm:$0xff]  ;;  %v195_v41 = vadd.f32 1e-05, %v57_v5 }
  0x11   :  { %6874 = vst [vmem:[#allocation9_spill] sm:$0xff] %v4200_v1  ;;  %6875 = vst [vmem:[#allocation10_spill] sm:$0xff] %v4211_v50  ;;  %v4221_v59 = vld [vmem:[%s6794_s0 + $0x158] sm:$0xff]  ;;  %v4234_v45 = vld [vmem:[%s6794_s0 + $0x140] sm:$0xff]  ;;  %v6885_v50 = vsub.s32 1, %v3928_v3 }
  0x12   :  { %6876 = vst [vmem:[#allocation11_spill] sm:$0xff] %v4221_v59  ;;  %6877 = vst [vmem:[#allocation12_spill] sm:$0xff] %v4234_v45  ;;  %v4239_v44 = vld [vmem:[%s6794_s0 + $0x168] sm:$0xff]  ;;  %v4244_v6 = vld [vmem:[%s6794_s0 + $0x150] sm:$0xff]  ;;  %3702 = vrsqrt.f32 %v195_v41  ;;  %v6887_v59 = vsub.f32 %v3955_v12, %v3960_v14  ;;  %v6888_v41 = vsub.f32 %v3965_v15, %v3960_v14  ;;  %v6890_v12 = vsub.f32 %v3975_v17, %v3960_v14 }
  0x13   :  { %6878 = vst [vmem:[#allocation13_spill] sm:$0xff] %v4239_v44  ;;  %v4257_v42 = vld [vmem:[%s6794_s0 + $0x178] sm:$0xff]  ;;  %v4262_v37 = vld [vmem:[%s6794_s0 + $0x160] sm:$0xff]  ;;  %v4267_v58 = vld [vmem:[%s6794_s0 + $0x188] sm:$0xff]  ;;  %v6891_v15 = vsub.f32 %v3981_v18, %v3960_v14 }
  0x14   :  { %v4280_v35 = vld [vmem:[%s6794_s0 + $0x170] sm:$0xff]  ;;  %v4285_v30 = vld [vmem:[%s6794_s0 + $0x198] sm:$0xff]  ;;  %v4290_v43 = vld [vmem:[%s6794_s0 + $0x180] sm:$0xff] }
  0x15   :  { %6879 = vst [vmem:[#allocation14_spill] sm:$0xff] %v4280_v35  ;;  %6880 = vst [vmem:[#allocation15_spill] sm:$0xff] %v4285_v30  ;;  %v4301_v31 = vld [vmem:[%s6794_s0 + $0x1a8] sm:$0xff]  ;;  %v4306_v57 = vld [vmem:[%s6794_s0 + $0x190] sm:$0xff] }
  0x16   :  { %6881 = vst [vmem:[#allocation16_spill] sm:$0xff] %v4290_v43  ;;  %6882 = vst [vmem:[#allocation17_spill] sm:$0xff] %v4301_v31  ;;  %v4311_v5 = vld [vmem:[%s6794_s0 + $0x1b8] sm:$0xff]  ;;  %v4324_v56 = vld [vmem:[%s6796_s2] ss:$0 sm:$0xff] }
  0x17   :  { %6883 = vst [vmem:[#allocation18_spill] sm:$0xff] %v4306_v57  ;;  %6884 = vst [vmem:[#allocation19_spill] sm:$0xff] %v4311_v5 }
  0x1a   :  { %v3701_v1 = vpop.eup %3700 }
  0x1b   :  { %v4336_v44 = vrot.slane %v3701_v1, %v6885_v50  ;;  %v6886_v1 = vsub.f32 %v3950_v11, %v3960_v14  ;;  %v4369_v11 = vld [vmem:[%s6797_s3] ss:$0 sm:$0xff] }
  0x1d   :  { %v206_v45 = vmul.f32 %v4336_v44, %v6886_v1  ;;  %v207_v53 = vmul.f32 %v4336_v44, %v6887_v59  ;;  %v208_v29 = vmul.f32 %v4336_v44, %v6888_v41  ;;  %v209_v50 = vmul.f32 %v4336_v44, %v6889_v51 }
  0x1e   :  { %v210_v59 = vmul.f32 %v4336_v44, %v6890_v12  ;;  %v211_v1 = vmul.f32 %v4336_v44, %v6891_v15  ;;  %v212_v51 = vmul.f32 %v4336_v44, %v6892_v16  ;;  %v6893_v41 = vsub.f32 %v3991_v20, %v3960_v14 }
  0x20   :  { %v213_v36 = vmul.f32 %v4336_v44, %v6893_v41 }
  0x21   :  { %16 = vsyncpa [#allocation4], 0  ;;  %v277_v17 = vmul.f32 %v4324_v56, %v206_v45  ;;  %v278_v12 = vmul.f32 %v4324_v56, %v207_v53  ;;  %v279_v5 = vmul.f32 %v4324_v56, %v208_v29  ;;  %v280_v18 = vmul.f32 %v4324_v56, %v209_v50  ;;  %v4394_v19 = vld [vmem:[%s6798_s4] ss:$0 sm:$0xff]  ;;  %s3858_s12 = smov 64  }
  0x22   :  { %v281_v15 = vmul.f32 %v4324_v56, %v210_v59  ;;  %v282_v20 = vmul.f32 %v4324_v56, %v211_v1  ;;  %v283_v16 = vmul.f32 %v4324_v56, %v212_v51  ;;  %v284_v41 = vmul.f32 %v4324_v56, %v213_v36  ;;  %v4411_v36 = vld [vmem:[%s6794_s0 + $0x1a0] sm:$0xff]  ;;  %v4416_v51 = vld [vmem:[%s6794_s0 + $0x1c8] sm:$0xff] }
  0x23   :  { %v348_v45 = vadd.f32 %v4369_v11, %v277_v17  ;;  %v349_v53 = vadd.f32 %v4369_v11, %v278_v12  ;;  %v350_v29 = vadd.f32 %v4369_v11, %v279_v5  ;;  %v351_v50 = vadd.f32 %v4369_v11, %v280_v18 }
  0x24   :  { %v352_v57 = vadd.f32 %v4369_v11, %v281_v15  ;;  %v353_v31 = vadd.f32 %v4369_v11, %v282_v20  ;;  %v354_v59 = vadd.f32 %v4369_v11, %v283_v16  ;;  %v355_v1 = vadd.f32 %v4369_v11, %v284_v41 }
  0x25   :  { %vm412_vm1 = vcmp.gt.f32.partialorder %v348_v45, 0.0  ;;  %vm413_vm2 = vcmp.gt.f32.partialorder %v349_v53, 0.0  ;;  %v483_v5 = vmul.f32 %v4394_v19, %v348_v45  ;;  %v484_v17 = vmul.f32 %v4394_v19, %v349_v53 }
  0x26   :  { %vm414_vm3 = vcmp.gt.f32.partialorder %v350_v29, 0.0  ;;  %vm415_vm4 = vcmp.gt.f32.partialorder %v351_v50, 0.0  ;;  %v485_v12 = vmul.f32 %v4394_v19, %v350_v29  ;;  %v486_v18 = vmul.f32 %v4394_v19, %v351_v50 }
  0x27   :  { %v4422_v15 = vsel %vm412_vm1, %v348_v45, %v483_v5  ;;  %v4424_v20 = vsel %vm413_vm2, %v349_v53, %v484_v17  ;;  %vm416_vm5 = vcmp.gt.f32.partialorder %v352_v57, 0.0  ;;  %vm417_vm6 = vcmp.gt.f32.partialorder %v353_v31, 0.0 }
  0x28   :  { %6894 = vst [vmem:[#allocation20_spill] sm:$0xff] %v4424_v20  ;;  %v613_v43 = vpack.c.bf16 %v4424_v20, %v4422_v15  ;;  %v4432_v30 = vsel %vm414_vm3, %v350_v29, %v485_v12  ;;  %v4434_v35 = vsel %vm415_vm4, %v351_v50, %v486_v18  ;;  %v487_v45 = vmul.f32 %v4394_v19, %v352_v57  ;;  %v4443_v12 = vpop.eup %3702 }
  0x29   :  { %6895 = vst [vmem:[#allocation21_spill] sm:$0xff] %v4432_v30  ;;  %6896 = vst [vmem:[#allocation22_spill] sm:$0xff] %v4434_v35  ;;  %v488_v53 = vmul.f32 %v4394_v19, %v353_v31  ;;  %vm418_vm7 = vcmp.gt.f32.partialorder %v354_v59, 0.0  ;;  %v614_v5 = vpack.c.bf16 %v4434_v35, %v4432_v30  ;;  %vm419_vm8 = vcmp.gt.f32.partialorder %v355_v1, 0.0 }
  0x2a   :  { %3501 = vmatprep.mubr.msk.bf16.mxu0 %vm668_vm0, %v613_v43  ;;  %v489_v17 = vmul.f32 %v4394_v19, %v354_v59  ;;  %v490_v29 = vmul.f32 %v4394_v19, %v355_v1  ;;  %v4445_v41 = vsel %vm416_vm5, %v352_v57, %v487_v45  ;;  %v6897_v18 = vsub.f32 %v3996_v21, %v3960_v14 }
  0x2b   :  { %v4447_v50 = vsel %vm417_vm6, %v353_v31, %v488_v53  ;;  %v6898_v43 = vsub.f32 %v4001_v23, %v3960_v14  ;;  %3502 = vmatmul.mubr.msk.bf16.vlgmr.msra.gmra.mxu0 %vm668_vm0, %v614_v5  ;;  %v6899_v31 = vsub.f32 %v4006_v24, %v3960_v14  ;;  %v6900_v5 = vsub.f32 %v4014_v26, %v3960_v14 }
  0x2c   :  { %v214_v16 = vmul.f32 %v4336_v44, %v6897_v18  ;;  %v615_v35 = vpack.c.bf16 %v4447_v50, %v4445_v41  ;;  %v4460_v30 = vsel %vm418_vm7, %v354_v59, %v489_v17  ;;  %v4462_v57 = vsel %vm419_vm8, %v355_v1, %v490_v29  ;;  %3582 = vmatpush3.bf16.msra.mxu0 %v3919_v0 }
  0x2d   :  { %v215_v20 = vmul.f32 %v4336_v44, %v6898_v43  ;;  %v216_v21 = vmul.f32 %v4336_v44, %v6899_v31  ;;  %v616_v45 = vpack.c.bf16 %v4462_v57, %v4460_v30  ;;  %v217_v59 = vmul.f32 %v4336_v44, %v6900_v5  ;;  %3583 = vmatprep.subr.bf16.mxu0 %v3924_v2 }
  0x2e   :  { %v285_v23 = vmul.f32 %v4324_v56, %v214_v16  ;;  %3505 = vmatprep.mubr.msk.bf16.mxu0 %vm668_vm0, %v615_v35  ;;  %v6901_v1 = vsub.f32 %v4019_v27, %v3960_v14  ;;  %v6902_v16 = vsub.f32 %v4024_v28, %v3960_v14  ;;  %v6903_v26 = vsub.f32 %v4035_v32, %v3960_v14 }
  0x2f   :  { %v286_v53 = vmul.f32 %v4324_v56, %v215_v20  ;;  %v287_v24 = vmul.f32 %v4324_v56, %v216_v21  ;;  %v288_v18 = vmul.f32 %v4324_v56, %v217_v59  ;;  %v6904_v27 = vsub.f32 %v4040_v33, %v3960_v14 }
  0x30   :  { %v218_v17 = vmul.f32 %v4336_v44, %v6901_v1  ;;  %v219_v20 = vmul.f32 %v4336_v44, %v6902_v16  ;;  %v220_v29 = vmul.f32 %v4336_v44, %v6903_v26  ;;  %v356_v0 = vadd.f32 %v4369_v11, %v285_v23  ;;  %3584 = vmatpush3.bf16.msra.mxu0 %v3924_v2 }
  0x31   :  { %v357_v35 = vadd.f32 %v4369_v11, %v286_v53  ;;  %v221_v43 = vmul.f32 %v4336_v44, %v6904_v27  ;;  %v358_v28 = vadd.f32 %v4369_v11, %v287_v24  ;;  %v359_v33 = vadd.f32 %v4369_v11, %v288_v18  ;;  %3585 = vmatprep.subr.bf16.mxu0 %v3934_v4 }
  0x32   :  { %v289_v31 = vmul.f32 %v4324_v56, %v218_v17  ;;  %v290_v32 = vmul.f32 %v4324_v56, %v219_v20  ;;  %v291_v21 = vmul.f32 %v4324_v56, %v220_v29  ;;  %vm420_vm9 = vcmp.gt.f32.partialorder %v356_v0, 0.0 }
  0x33   :  { %vm421_vm10 = vcmp.gt.f32.partialorder %v357_v35, 0.0  ;;  %v491_v23 = vmul.f32 %v4394_v19, %v356_v0  ;;  %v492_v53 = vmul.f32 %v4394_v19, %v357_v35  ;;  %vm422_vm11 = vcmp.gt.f32.partialorder %v358_v28, 0.0  ;;  %3506 = vmatmul.mubr.msk.bf16.gmra.mxu0 %vm668_vm0, %v616_v45 }
  0x34   :  { %v493_v5 = vmul.f32 %v4394_v19, %v358_v28  ;;  %v360_v59 = vadd.f32 %v4369_v11, %v289_v31  ;;  %v361_v17 = vadd.f32 %v4369_v11, %v290_v32  ;;  %v292_v16 = vmul.f32 %v4324_v56, %v221_v43  ;;  %3586 = vmatpush3.bf16.msra.mxu0 %v3934_v4 }
  0x35   :  { %v4510_v24 = vsel %vm420_vm9, %v356_v0, %v491_v23  ;;  %v4512_v1 = vsel %vm421_vm10, %v357_v35, %v492_v53  ;;  %vm423_vm12 = vcmp.gt.f32.partialorder %v359_v33, 0.0  ;;  %v494_v20 = vmul.f32 %v4394_v19, %v359_v33  ;;  %3587 = vmatprep.subr.bf16.mxu0 %v3945_v9 }
  0x36   :  { %6905 = vst [vmem:[#allocation23_spill] sm:$0xff] %v4510_v24  ;;  %v617_v2 = vpack.c.bf16 %v4512_v1, %v4510_v24  ;;  %v4520_v26 = vsel %vm422_vm11, %v358_v28, %v493_v5  ;;  %vm424_vm13 = vcmp.gt.f32.partialorder %v360_v59, 0.0  ;;  %vm425_vm14 = vcmp.gt.f32.partialorder %v361_v17, 0.0 }
  0x37   :  { %6906 = vst [vmem:[#allocation24_spill] sm:$0xff] %v4520_v26  ;;  %v495_v29 = vmul.f32 %v4394_v19, %v360_v59  ;;  %v496_v0 = vmul.f32 %v4394_v19, %v361_v17  ;;  %v4526_v35 = vsel %vm423_vm12, %v359_v33, %v494_v20  ;;  %v362_v45 = vadd.f32 %v4369_v11, %v291_v21 }
  0x38   :  { %3509 = vmatprep.mubr.msk.bf16.mxu0 %vm668_vm0, %v617_v2  ;;  %6907 = vst [vmem:[#allocation25_spill] sm:$0xff] %v4526_v35  ;;  %v363_v18 = vadd.f32 %v4369_v11, %v292_v16  ;;  %v6908_v27 = vsub.f32 %v4045_v34, %v3960_v14  ;;  %v618_v28 = vpack.c.bf16 %v4526_v35, %v4520_v26 }
  0x39   :  { %v4536_v31 = vsel %vm424_vm13, %v360_v59, %v495_v29  ;;  %v4538_v32 = vsel %vm425_vm14, %v361_v17, %v496_v0  ;;  %v6911_v4 = vsub.f32 %v4056_v38, %v3960_v14  ;;  %vm426_vm15 = vcmp.gt.f32.partialorder %v362_v45, 0.0  ;;  %3588 = vmatpush3.bf16.msra.mxu0 %v3945_v9 }
  0x3a   :  { %v222_v43 = vmul.f32 %v4336_v44, %v6908_v27  ;;  %6909 = vst [vmem:[#allocation26_spill] sm:$0xff] %v4536_v31  ;;  %6910 = vst [vmem:[#allocation27_spill] sm:$0xff] %v4538_v32  ;;  %v619_v21 = vpack.c.bf16 %v4538_v32, %v4536_v31  ;;  %vm427_vm1 = vcmp.gt.f32.partialorder %v363_v18, 0.0  ;;  %v497_v34 = vmul.f32 %v4394_v19, %v362_v45 }
  0x3b   :  { %v223_v23 = vmul.f32 %v4336_v44, %v6911_v4  ;;  %v498_v53 = vmul.f32 %v4394_v19, %v363_v18  ;;  %v6912_v38 = vsub.f32 %v4061_v39, %v3960_v14  ;;  %v6914_v16 = vsub.f32 %v4066_v40, %v3960_v14  ;;  %3510 = vmatmul.mubr.msk.bf16.gmra.mxu0 %vm668_vm0, %v618_v28 }
  0x3c   :  { %v293_v33 = vmul.f32 %v4324_v56, %v222_v43  ;;  %v4556_v17 = vsel %vm426_vm15, %v362_v45, %v497_v34  ;;  %v6915_v20 = vsub.f32 %v4080_v46, %v3960_v14  ;;  %v6916_v0 = vsub.f32 %v4085_v47, %v3960_v14  ;;  %3513 = vmatprep.mubr.msk.bf16.mxu0 %vm668_vm0, %v619_v21 }
  0x3d   :  { %v294_v5 = vmul.f32 %v4324_v56, %v223_v23  ;;  %v224_v59 = vmul.f32 %v4336_v44, %v6912_v38  ;;  %6913 = vst [vmem:[#allocation28_spill] sm:$0xff] %v4556_v17  ;;  %v225_v2 = vmul.f32 %v4336_v44, %v6914_v16  ;;  %v4570_v27 = vsel %vm427_vm1, %v363_v18, %v498_v53 }
  0x3e   :  { %v226_v29 = vmul.f32 %v4336_v44, %v6915_v20  ;;  %v227_v39 = vmul.f32 %v4336_v44, %v6916_v0  ;;  %6917 = vst [vmem:[#allocation29_spill] sm:$0xff] %v4570_v27  ;;  %v364_v9 = vadd.f32 %v4369_v11, %v293_v33  ;;  %v620_v46 = vpack.c.bf16 %v4570_v27, %v4556_v17  ;;  %v121_v27 = vld [vmem:[%s6794_s0 + $0x1f8] sm:$0xff] }
  0x3f   :  { %v365_v45 = vadd.f32 %v4369_v11, %v294_v5  ;;  %v295_v40 = vmul.f32 %v4324_v56, %v224_v59  ;;  %v296_v43 = vmul.f32 %v4324_v56, %v225_v2  ;;  %v6920_v21 = vsub.f32 %v4090_v48, %v3960_v14 }
  0x40   :  { %v297_v4 = vmul.f32 %v4324_v56, %v226_v29  ;;  %v298_v47 = vmul.f32 %v4324_v56, %v227_v39  ;;  %vm428_vm2 = vcmp.gt.f32.partialorder %v364_v9, 0.0  ;;  %v499_v18 = vmul.f32 %v4394_v19, %v364_v9 }
  0x41   :  { %vm429_vm3 = vcmp.gt.f32.partialorder %v365_v45, 0.0  ;;  %v500_v23 = vmul.f32 %v4394_v19, %v365_v45  ;;  %v366_v34 = vadd.f32 %v4369_v11, %v295_v40  ;;  %v367_v28 = vadd.f32 %v4369_v11, %v296_v43 }
  0x42   :  { %v368_v53 = vadd.f32 %v4369_v11, %v297_v4  ;;  %v369_v33 = vadd.f32 %v4369_v11, %v298_v47  ;;  %v4588_v5 = vsel %vm428_vm2, %v364_v9, %v499_v18  ;;  %v228_v59 = vmul.f32 %v4336_v44, %v6920_v21 }
  0x43   :  { %6918 = vst [vmem:[#allocation30_spill] sm:$0xff] %v4588_v5  ;;  %v4590_v38 = vsel %vm429_vm3, %v365_v45, %v500_v23  ;;  %v6921_v16 = vsub.f32 %v4101_v52, %v3960_v14  ;;  %vm430_vm4 = vcmp.gt.f32.partialorder %v366_v34, 0.0  ;;  %vm431_vm5 = vcmp.gt.f32.partialorder %v367_v28, 0.0  ;;  %3514 = vmatmul.mubr.msk.bf16.gmra.mxu0 %vm668_vm0, %v620_v46 }
  0x44   :  { %6919 = vst [vmem:[#allocation31_spill] sm:$0xff] %v4590_v38  ;;  %v621_v20 = vpack.c.bf16 %v4590_v38, %v4588_v5  ;;  %v501_v29 = vmul.f32 %v4394_v19, %v366_v34  ;;  %v502_v0 = vmul.f32 %v4394_v19, %v367_v28  ;;  %vm432_vm6 = vcmp.gt.f32.partialorder %v368_v53, 0.0  ;;  %v6977_v5 = vld [vmem:[#allocation18_spill] sm:$0xff] }
  0x45   :  { %v229_v2 = vmul.f32 %v4336_v44, %v6921_v16  ;;  %vm433_vm7 = vcmp.gt.f32.partialorder %v369_v33, 0.0  ;;  %v503_v48 = vmul.f32 %v4394_v19, %v368_v53  ;;  %v504_v9 = vmul.f32 %v4394_v19, %v369_v33 }
  0x46   :  { %v4605_v39 = vsel %vm430_vm4, %v366_v34, %v501_v29  ;;  %v299_v52 = vmul.f32 %v4324_v56, %v228_v59  ;;  %v4610_v40 = vsel %vm431_vm5, %v367_v28, %v502_v0  ;;  %v6925_v4 = vsub.s32 1, %v3928_v3  ;;  %3517 = vmatprep.mubr.msk.bf16.mxu0 %vm668_vm0, %v621_v20 }
  0x47   :  { %6922 = vst [vmem:[#allocation32_spill] sm:$0xff] %v4605_v39  ;;  %v300_v45 = vmul.f32 %v4324_v56, %v229_v2  ;;  %6923 = vst [vmem:[#allocation33_spill] sm:$0xff] %v4610_v40  ;;  %v4612_v43 = vsel %vm432_vm6, %v368_v53, %v503_v48  ;;  %v6926_v18 = vsub.f32 %v4106_v54, %v3960_v14 }
  0x48   :  { %6924 = vst [vmem:[#allocation34_spill] sm:$0xff] %v4612_v43  ;;  %v4617_v47 = vrot.slane %v4443_v12, %v6925_v4  ;;  %v622_v34 = vpack.c.bf16 %v4610_v40, %v4605_v39  ;;  %v4626_v21 = vsel %vm433_vm7, %v369_v33, %v504_v9  ;;  %v370_v28 = vadd.f32 %v4369_v11, %v299_v52 }
  0x49   :  { %v230_v23 = vmul.f32 %v4336_v44, %v6926_v18  ;;  %6927 = vst [vmem:[#allocation35_spill] sm:$0xff] %v4626_v21  ;;  %v371_v53 = vadd.f32 %v4369_v11, %v300_v45  ;;  %v623_v3 = vpack.c.bf16 %v4626_v21, %v4612_v43  ;;  %v6928_v54 = vsub.f32 %v4124_v60, %v4147_v7 }
  0x4a   :  { %v6929_v46 = vsub.f32 %v4111_v55, %v3960_v14  ;;  %vm434_vm8 = vcmp.gt.f32.partialorder %v370_v28, 0.0  ;;  %v505_v16 = vmul.f32 %v4394_v19, %v370_v28  ;;  %v6930_v0 = vsub.f32 %v4129_v61, %v3960_v14 }
  0x4b   :  { %v240_v12 = vmul.f32 %v4617_v47, %v6928_v54  ;;  %v301_v59 = vmul.f32 %v4324_v56, %v230_v23  ;;  %vm435_vm9 = vcmp.gt.f32.partialorder %v371_v53, 0.0  ;;  %v506_v2 = vmul.f32 %v4394_v19, %v371_v53  ;;  %3518 = vmatmul.mubr.msk.bf16.gmra.mxu0 %vm668_vm0, %v622_v34 }
  0x4c   :  { %v231_v33 = vmul.f32 %v4336_v44, %v6929_v46  ;;  %v232_v55 = vmul.f32 %v4336_v44, %v6930_v0  ;;  %v4651_v48 = vsel %vm434_vm8, %v370_v28, %v505_v16  ;;  %v6933_v52 = vsub.f32 %v4134_v62, %v3960_v14  ;;  %3521 = vmatprep.mubr.msk.bf16.mxu0 %vm668_vm0, %v623_v3 }
  0x4d   :  { %v311_v20 = vmul.f32 %v4324_v56, %v240_v12  ;;  %v372_v60 = vadd.f32 %v4369_v11, %v301_v59  ;;  %6931 = vst [vmem:[#allocation36_spill] sm:$0xff] %v4651_v48  ;;  %v4653_v9 = vsel %vm435_vm9, %v371_v53, %v506_v2  ;;  %v6934_v4 = vsub.f32 %v4152_v10, %v4147_v7 }
  0x4e   :  { %v302_v29 = vmul.f32 %v4324_v56, %v231_v33  ;;  %6932 = vst [vmem:[#allocation37_spill] sm:$0xff] %v4653_v9  ;;  %v233_v45 = vmul.f32 %v4336_v44, %v6933_v52  ;;  %v624_v23 = vpack.c.bf16 %v4653_v9, %v4651_v48  ;;  %v303_v54 = vmul.f32 %v4324_v56, %v232_v55 }
  0x4f   :  { %v241_v18 = vmul.f32 %v4617_v47, %v6934_v4  ;;  %v382_v61 = vadd.f32 %v4369_v11, %v311_v20  ;;  %vm436_vm10 = vcmp.gt.f32.partialorder %v372_v60, 0.0  ;;  %v507_v53 = vmul.f32 %v4394_v19, %v372_v60  ;;  %v4703_v4 = vld [vmem:[%s6794_s0 + $0x1b0] sm:$0xff] }
  0x50   :  { %v373_v28 = vadd.f32 %v4369_v11, %v302_v29  ;;  %v304_v62 = vmul.f32 %v4324_v56, %v233_v45  ;;  %v374_v59 = vadd.f32 %v4369_v11, %v303_v54  ;;  %v6937_v0 = vsub.f32 %v4157_v13, %v4147_v7 }
  0x51   :  { %v312_v12 = vmul.f32 %v4324_v56, %v241_v18  ;;  %vm446_vm11 = vcmp.gt.f32.partialorder %v382_v61, 0.0  ;;  %v517_v10 = vmul.f32 %v4394_v19, %v382_v61  ;;  %v4674_v33 = vsel %vm436_vm10, %v372_v60, %v507_v53 }
  0x52   :  { %vm437_vm12 = vcmp.gt.f32.partialorder %v373_v28, 0.0  ;;  %v508_v46 = vmul.f32 %v4394_v19, %v373_v28  ;;  %6935 = vst [vmem:[#allocation38_spill] sm:$0xff] %v4674_v33  ;;  %v375_v16 = vadd.f32 %v4369_v11, %v304_v62  ;;  %v238_v55 = vmul.f32 %v4617_v47, %v6937_v0 }
  0x53   :  { %v383_v2 = vadd.f32 %v4369_v11, %v312_v12  ;;  %v4680_v20 = vsel %vm446_vm11, %v382_v61, %v517_v10  ;;  %v6938_v34 = vsub.f32 %v4162_v22, %v4147_v7  ;;  %vm438_vm13 = vcmp.gt.f32.partialorder %v374_v59, 0.0  ;;  %3522 = vmatmul.mubr.msk.bf16.gmra.mxu0 %vm668_vm0, %v624_v23 }
  0x54   :  { %v4682_v29 = vsel %vm437_vm12, %v373_v28, %v508_v46  ;;  %1259 = vrot.lane.b32.xlu1 %v4680_v20, %s3858_s12  ;;  %vm439_vm14 = vcmp.gt.f32.partialorder %v375_v16, 0.0  ;;  %v509_v52 = vmul.f32 %v4394_v19, %v374_v59  ;;  %v510_v13 = vmul.f32 %v4394_v19, %v375_v16 }
  0x55   :  { %6936 = vst [vmem:[#allocation39_spill] sm:$0xff] %v4682_v29  ;;  %v243_v60 = vmul.f32 %v4617_v47, %v6938_v34  ;;  %v625_v3 = vpack.c.bf16 %v4682_v29, %v4674_v33  ;;  %vm447_vm15 = vcmp.gt.f32.partialorder %v383_v2, 0.0  ;;  %v518_v45 = vmul.f32 %v4394_v19, %v383_v2  ;;  %v6969_v33 = vld [vmem:[#allocation14_spill] sm:$0xff]  ;;  %v6971_v29 = vld [vmem:[#allocation15_spill] sm:$0xff] }
  0x56   :  { %v309_v22 = vmul.f32 %v4324_v56, %v238_v55  ;;  %v4705_v18 = vsel %vm438_vm13, %v374_v59, %v509_v52  ;;  %v6940_v28 = vsub.f32 %v4139_v63, %v3960_v14  ;;  %v6941_v54 = vsub.f32 %v4167_v8, %v3960_v14 }
  0x57   :  { %6939 = vst [vmem:[#allocation40_spill] sm:$0xff] %v4705_v18  ;;  %v314_v61 = vmul.f32 %v4324_v56, %v243_v60  ;;  %v4716_v12 = vsel %vm439_vm14, %v375_v16, %v510_v13  ;;  %v4718_v10 = vsel %vm447_vm15, %v383_v2, %v518_v45  ;;  %v6943_v59 = vsub.f32 %v4172_v25, %v4147_v7  ;;  %v6944_v13 = vld [vmem:[#allocation6_spill] sm:$0xff] }
  0x58   :  { %v234_v53 = vmul.f32 %v4336_v44, %v6940_v28  ;;  %v235_v62 = vmul.f32 %v4336_v44, %v6941_v54  ;;  %6942 = vst [vmem:[#allocation41_spill] sm:$0xff] %v4716_v12  ;;  %v380_v46 = vadd.f32 %v4369_v11, %v309_v22  ;;  %v626_v63 = vpack.c.bf16 %v4716_v12, %v4705_v18  ;;  %v6946_v54 = vld [vmem:[#allocation7_spill] sm:$0xff]  ;;  %v4861_v18 = vld [vmem:[%s6801_s7 + $0x20] sm:$0xff]  }
  0x59   :  { %v239_v0 = vmul.f32 %v4617_v47, %v6943_v59  ;;  %1261 = vrot.lane.b32.xlu1 %v4718_v10, %s3858_s12  ;;  %v385_v8 = vadd.f32 %v4369_v11, %v314_v61  ;;  %v6945_v45 = vsub.f32 %v6944_v13, %v3960_v14  ;;  %3525 = vmatprep.mubr.msk.bf16.mxu0 %vm668_vm0, %v625_v3  ;;  %v4755_v59 = vld [vmem:[%s6801_s7 + $0x38] sm:$0xff]  }
  0x5a   :  { %v305_v16 = vmul.f32 %v4324_v56, %v234_v53  ;;  %vm444_vm1 = vcmp.gt.f32.partialorder %v380_v46, 0.0  ;;  %v515_v55 = vmul.f32 %v4394_v19, %v380_v46  ;;  %v306_v25 = vmul.f32 %v4324_v56, %v235_v62  ;;  %3533 = vmatprep.subr.bf16.mxu1 %v4755_v59  ;;  %3621 = vmatprep.subr.bf16.mxu0 %v4755_v59 }
  0x5b   :  { %v310_v34 = vmul.f32 %v4324_v56, %v239_v0  ;;  %vm449_vm2 = vcmp.gt.f32.partialorder %v385_v8, 0.0  ;;  %v520_v60 = vmul.f32 %v4394_v19, %v385_v8  ;;  %v236_v22 = vmul.f32 %v4336_v44, %v6945_v45  ;;  %3534 = vmatpush3.bf16.msra.mxu1 %v4755_v59  ;;  %3526 = vmatmul.mubr.msk.bf16.gmra.mxu0 %vm668_vm0, %v626_v63 }
  0x5c   :  { %v376_v52 = vadd.f32 %v4369_v11, %v305_v16  ;;  %v4744_v61 = vsel %vm444_vm1, %v380_v46, %v515_v55  ;;  %v377_v28 = vadd.f32 %v4369_v11, %v306_v25  ;;  %v6947_v23 = vsub.f32 %v6946_v54, %v3960_v14  ;;  %v6949_v25 = vld [vmem:[#allocation8_spill] sm:$0xff] }
  0x5d   :  { %v381_v53 = vadd.f32 %v4369_v11, %v310_v34  ;;  %1255 = vrot.lane.b32.xlu0 %v4744_v61, %s3858_s12  ;;  %v4759_v3 = vsel %vm449_vm2, %v385_v8, %v520_v60  ;;  %v307_v0 = vmul.f32 %v4324_v56, %v236_v22  ;;  %v6950_v34 = vsub.f32 %v6949_v25, %v4147_v7  ;;  %v6952_v22 = vld [vmem:[#allocation9_spill] sm:$0xff] }
  0x5e   :  { %v237_v62 = vmul.f32 %v4336_v44, %v6947_v23  ;;  %vm440_vm3 = vcmp.gt.f32.partialorder %v376_v52, 0.0  ;;  %v511_v46 = vmul.f32 %v4394_v19, %v376_v52  ;;  %1265 = vrot.lane.b32.xlu1 %v4759_v3, %s3858_s12  ;;  %vm441_vm4 = vcmp.gt.f32.partialorder %v377_v28, 0.0  ;;  %v6954_v23 = vld [vmem:[#allocation10_spill] sm:$0xff] }
  0x5f   :  { %v512_v14 = vmul.f32 %v4394_v19, %v377_v28  ;;  %vm445_vm5 = vcmp.gt.f32.partialorder %v381_v53, 0.0  ;;  %v516_v44 = vmul.f32 %v4394_v19, %v381_v53  ;;  %v378_v55 = vadd.f32 %v4369_v11, %v307_v0  ;;  %v4792_v0 = vld [vmem:[%s6801_s7 + $0x30] sm:$0xff]  }
  0x60   :  { %v4768_v16 = vsel %vm440_vm3, %v376_v52, %v511_v46  ;;  %v308_v8 = vmul.f32 %v4324_v56, %v237_v62  ;;  %v245_v60 = vmul.f32 %v4617_v47, %v6950_v34  ;;  %v6953_v54 = vsub.f32 %v6952_v22, %v4147_v7  ;;  %3535 = vmatprep.subr.bf16.mxu1 %v4792_v0 }
  0x61   :  { %6948 = vst [vmem:[#allocation6_spill] sm:$0xff] %v4768_v16  ;;  %v4777_v13 = vsel %vm441_vm4, %v377_v28, %v512_v14  ;;  %v4779_v45 = vsel %vm445_vm5, %v381_v53, %v516_v44  ;;  %v6955_v62 = vsub.f32 %v6954_v23, %v4147_v7  ;;  %vm442_vm6 = vcmp.gt.f32.partialorder %v378_v55, 0.0  ;;  %3536 = vmatpush3.bf16.msra.mxu1 %v4792_v0 }
  0x62   :  { %6951 = vst [vmem:[#allocation7_spill] sm:$0xff] %v4777_v13  ;;  %v242_v52 = vmul.f32 %v4617_v47, %v6953_v54  ;;  %v627_v28 = vpack.c.bf16 %v4777_v13, %v4768_v16  ;;  %1257 = vrot.lane.b32.xlu0 %v4779_v45, %s3858_s12  ;;  %v2028_v53 = vpack.c.bf16 %v4779_v45, %v4744_v61 }
  0x63   :  { %v247_v46 = vmul.f32 %v4617_v47, %v6955_v62  ;;  %v379_v14 = vadd.f32 %v4369_v11, %v308_v8  ;;  %v513_v44 = vmul.f32 %v4394_v19, %v378_v55  ;;  %v316_v25 = vmul.f32 %v4324_v56, %v245_v60  ;;  %v6957_v62 = vld [vmem:[#allocation11_spill] sm:$0xff] }
  0x64   :  { %v313_v34 = vmul.f32 %v4324_v56, %v242_v52  ;;  %v6956_v23 = vsub.f32 %v4216_v49, %v4147_v7  ;;  %v6958_v2 = vsub.f32 %v6957_v62, %v4147_v7  ;;  %3529 = vmatprep.mubr.msk.bf16.mxu0 %vm668_vm0, %v627_v28  ;;  %v4827_v49 = vld [vmem:[%s6801_s7 + $0x28] sm:$0xff]   ;;  %v6961_v28 = vld [vmem:[#allocation12_spill] sm:$0xff]  ;;  %v6968_v12 = vsub.f32 %v4267_v58, %v4147_v7 }
  0x65   :  { %v318_v22 = vmul.f32 %v4324_v56, %v247_v46  ;;  %vm443_vm7 = vcmp.gt.f32.partialorder %v379_v14, 0.0  ;;  %v514_v54 = vmul.f32 %v4394_v19, %v379_v14  ;;  %v4819_v52 = vsel %vm442_vm6, %v378_v55, %v513_v44  ;;  %3537 = vmatprep.subr.bf16.mxu1 %v4827_v49 }
  0x66   :  { %v244_v8 = vmul.f32 %v4617_v47, %v6956_v23  ;;  %v249_v60 = vmul.f32 %v4617_v47, %v6958_v2  ;;  %6959 = vst [vmem:[#allocation8_spill] sm:$0xff] %v4819_v52  ;;  %v387_v63 = vadd.f32 %v4369_v11, %v316_v25  ;;  %v384_v46 = vadd.f32 %v4369_v11, %v313_v34 }
  0x67   :  { %v389_v16 = vadd.f32 %v4369_v11, %v318_v22  ;;  %v4829_v23 = vsel %vm443_vm7, %v379_v14, %v514_v54  ;;  %v6962_v55 = vsub.f32 %v6961_v28, %v4147_v7  ;;  %v4843_v14 = vld [vmem:[%s6794_s0 + $0x1d8] sm:$0xff]  ;;  %3538 = vmatpush3.bf16.msra.mxu1 %v4827_v49  ;;  %v6978_v38 = vsub.f32 %v6977_v5, %v4147_v7 }
  0x68   :  { %6960 = vst [vmem:[#allocation9_spill] sm:$0xff] %v4829_v23  ;;  %v315_v2 = vmul.f32 %v4324_v56, %v244_v8  ;;  %v320_v62 = vmul.f32 %v4324_v56, %v249_v60  ;;  %v628_v25 = vpack.c.bf16 %v4829_v23, %v4819_v52  ;;  %vm451_vm8 = vcmp.gt.f32.partialorder %v387_v63, 0.0  ;;  %v6963_v52 = vld [vmem:[#allocation13_spill] sm:$0xff]  ;;  %3539 = vmatprep.subr.bf16.mxu1 %v4861_v18 }
  0x69   :  { %v246_v44 = vmul.f32 %v4617_v47, %v6962_v55  ;;  %v522_v34 = vmul.f32 %v4394_v19, %v387_v63  ;;  %vm448_vm9 = vcmp.gt.f32.partialorder %v384_v46, 0.0  ;;  %v519_v22 = vmul.f32 %v4394_v19, %v384_v46 }
  0x6a   :  { %vm453_vm10 = vcmp.gt.f32.partialorder %v389_v16, 0.0  ;;  %v524_v54 = vmul.f32 %v4394_v19, %v389_v16  ;;  %v386_v8 = vadd.f32 %v4369_v11, %v315_v2  ;;  %v391_v28 = vadd.f32 %v4369_v11, %v320_v62  ;;  %3530 = vmatmul.mubr.msk.bf16.gmra.mxu0 %vm668_vm0, %v628_v25 }
  0x6b   :  { %v4850_v60 = vsel %vm451_vm8, %v387_v63, %v522_v34  ;;  %v317_v55 = vmul.f32 %v4324_v56, %v246_v44  ;;  %v6964_v23 = vsub.f32 %v6963_v52, %v4147_v7  ;;  %v4865_v2 = vsel %vm448_vm9, %v384_v46, %v519_v22  ;;  %3589 = vmatprep.mubr.msk.bf16.mxu0 %vm668_vm0, %v2028_v53 }
  0x6c   :  { %1269 = vrot.lane.b32.xlu1 %v4850_v60, %s3858_s12  ;;  %vm450_vm11 = vcmp.gt.f32.partialorder %v386_v8, 0.0  ;;  %v521_v63 = vmul.f32 %v4394_v19, %v386_v8  ;;  %1263 = vrot.lane.b32.xlu0 %v4865_v2, %s3858_s12  ;;  %v4872_v52 = vsel %vm453_vm10, %v389_v16, %v524_v54  ;;  %vm455_vm12 = vcmp.gt.f32.partialorder %v391_v28, 0.0 }
  0x6d   :  { %v251_v13 = vmul.f32 %v4617_v47, %v6964_v23  ;;  %v526_v23 = vmul.f32 %v4394_v19, %v391_v28  ;;  %v388_v44 = vadd.f32 %v4369_v11, %v317_v55  ;;  %v6965_v22 = vsub.f32 %v4244_v6, %v4147_v7  ;;  %3540 = vmatpush3.bf16.msra.mxu1 %v4861_v18  ;;  %v4899_v6 = vld [vmem:[%s6801_s7 + $0x18] sm:$0xff]  }
  0x6e   :  { %v4878_v46 = vsel %vm450_vm11, %v386_v8, %v521_v63  ;;  %v6966_v16 = vsub.f32 %v4257_v42, %v4147_v7  ;;  %v2029_v55 = vpack.c.bf16 %v4718_v10, %v4680_v20  ;;  %v2030_v25 = vpack.c.bf16 %v4759_v3, %v4865_v2  ;;  %3541 = vmatprep.subr.bf16.mxu1 %v4899_v6 }
  0x6f   :  { %v322_v34 = vmul.f32 %v4324_v56, %v251_v13  ;;  %v248_v62 = vmul.f32 %v4617_v47, %v6965_v22  ;;  %vm452_vm13 = vcmp.gt.f32.partialorder %v388_v44, 0.0  ;;  %v523_v13 = vmul.f32 %v4394_v19, %v388_v44 }
  0x70   :  { %v253_v54 = vmul.f32 %v4617_v47, %v6966_v16  ;;  %1273 = vrot.lane.b32.xlu1 %v4872_v52, %s3858_s12  ;;  %v6967_v53 = vsub.f32 %v4262_v37, %v4147_v7  ;;  %1267 = vrot.lane.b32.xlu0 %v4878_v46, %s3858_s12  ;;  %v4913_v16 = vsel %vm455_vm12, %v391_v28, %v526_v23  ;;  %v4930_v28 = vld [vmem:[%s6794_s0 + $0x1c0] sm:$0xff] }
  0x71   :  { %v393_v42 = vadd.f32 %v4369_v11, %v322_v34  ;;  %v319_v8 = vmul.f32 %v4324_v56, %v248_v62  ;;  %v255_v34 = vmul.f32 %v4617_v47, %v6968_v12  ;;  %v6970_v62 = vsub.f32 %v6969_v33, %v4147_v7  ;;  %3542 = vmatpush3.bf16.msra.mxu1 %v4899_v6 }
  0x72   :  { %v324_v63 = vmul.f32 %v4324_v56, %v253_v54  ;;  %v250_v22 = vmul.f32 %v4617_v47, %v6967_v53  ;;  %v6972_v37 = vsub.f32 %v6971_v29, %v4147_v7  ;;  %v4932_v23 = vsel %vm452_vm13, %v388_v44, %v523_v13  ;;  %3590 = vmatmul.mubr.msk.bf16.vlgmr.msra.gmra.mxu0 %vm668_vm0, %v2029_v55 }
  0x73   :  { %v252_v54 = vmul.f32 %v4617_v47, %v6970_v62  ;;  %vm457_vm14 = vcmp.gt.f32.partialorder %v393_v42, 0.0  ;;  %v528_v58 = vmul.f32 %v4394_v19, %v393_v42  ;;  %v390_v12 = vadd.f32 %v4369_v11, %v319_v8  ;;  %v4964_v8 = vld [vmem:[%s6794_s0 + $0x1d0] sm:$0xff]  ;;  %3593 = vmatprep.mubr.msk.bf16.mxu0 %vm668_vm0, %v2030_v25  ;;  %3622 = vmatpush3.bf16.msra.mxu0 %v4755_v59 }
  0x74   :  { %v257_v53 = vmul.f32 %v4617_v47, %v6972_v37  ;;  %v395_v33 = vadd.f32 %v4369_v11, %v324_v63  ;;  %v321_v29 = vmul.f32 %v4324_v56, %v250_v22  ;;  %v326_v62 = vmul.f32 %v4324_v56, %v255_v34  ;;  %1277 = vrot.lane.b32.xlu1 %v4913_v16, %s3858_s12  ;;  %v4951_v63 = vld [vmem:[%s6794_s0 + $0x1e8] sm:$0xff] }
  0x75   :  { %v323_v37 = vmul.f32 %v4324_v56, %v252_v54  ;;  %vm454_vm15 = vcmp.gt.f32.partialorder %v390_v12, 0.0  ;;  %v525_v44 = vmul.f32 %v4394_v19, %v390_v12  ;;  %1271 = vrot.lane.b32.xlu0 %v4932_v23, %s3858_s12  ;;  %v4956_v22 = vsel %vm457_vm14, %v393_v42, %v528_v58  ;;  %v6973_v42 = vld [vmem:[#allocation16_spill] sm:$0xff]  ;;  %3623 = vmatprep.subr.bf16.mxu0 %v4792_v0 }
  0x76   :  { %v328_v13 = vmul.f32 %v4324_v56, %v257_v53  ;;  %v530_v34 = vmul.f32 %v4394_v19, %v395_v33  ;;  %v392_v54 = vadd.f32 %v4369_v11, %v321_v29  ;;  %v397_v53 = vadd.f32 %v4369_v11, %v326_v62 }
  0x77   :  { %v4967_v48 = vsel %vm454_vm15, %v390_v12, %v525_v44  ;;  %vm459_vm1 = vcmp.gt.f32.partialorder %v395_v33, 0.0  ;;  %v394_v9 = vadd.f32 %v4369_v11, %v323_v37  ;;  %v6974_v58 = vsub.f32 %v6973_v42, %v4147_v7  ;;  %v4982_v12 = vld [vmem:[%s6801_s7 + $0x10] sm:$0xff]   ;;  %v6975_v44 = vld [vmem:[#allocation17_spill] sm:$0xff]  ;;  %3624 = vmatpush3.bf16.msra.mxu0 %v4792_v0 }
  0x78   :  { %vm456_vm2 = vcmp.gt.f32.partialorder %v392_v54, 0.0  ;;  %v527_v29 = vmul.f32 %v4394_v19, %v392_v54  ;;  %v399_v62 = vadd.f32 %v4369_v11, %v328_v13  ;;  %v2031_v37 = vpack.c.bf16 %v4850_v60, %v4878_v46  ;;  %1281 = vrot.lane.b32.xlu1 %v4956_v22, %s3858_s12  ;;  %3543 = vmatprep.subr.bf16.mxu1 %v4982_v12 }
  0x79   :  { %v254_v43 = vmul.f32 %v4617_v47, %v6974_v58  ;;  %vm461_vm3 = vcmp.gt.f32.partialorder %v397_v53, 0.0  ;;  %v532_v25 = vmul.f32 %v4394_v19, %v397_v53  ;;  %1275 = vrot.lane.b32.xlu0 %v4967_v48, %s3858_s12  ;;  %v4996_v13 = vsel %vm459_vm1, %v395_v33, %v530_v34  ;;  %3544 = vmatpush3.bf16.msra.mxu1 %v4982_v12 }
  0x7a   :  { %v529_v42 = vmul.f32 %v4394_v19, %v394_v9  ;;  %v2032_v55 = vpack.c.bf16 %v4872_v52, %v4932_v23  ;;  %v5004_v21 = vsel %vm456_vm2, %v392_v54, %v527_v29  ;;  %vm458_vm4 = vcmp.gt.f32.partialorder %v394_v9, 0.0  ;;  %v5022_v29 = vld [vmem:[%s6801_s7 + $0x8] sm:$0xff]   ;;  %3594 = vmatmul.mubr.msk.bf16.gmra.mxu0 %vm668_vm0, %v2031_v37  ;;  %v118_v37 = vld [vmem:[%s6794_s0 + $0x1e0] sm:$0xff]  ;;  %3625 = vmatprep.subr.bf16.mxu0 %v4827_v49 }
  0x7b   :  { %v325_v58 = vmul.f32 %v4324_v56, %v254_v43  ;;  %v6976_v39 = vsub.f32 %v6975_v44, %v4147_v7  ;;  %v5011_v33 = vsel %vm461_vm3, %v397_v53, %v532_v25  ;;  %v534_v43 = vmul.f32 %v4394_v19, %v399_v62  ;;  %v6979_v53 = vld [vmem:[#allocation19_spill] sm:$0xff]  ;;  %3545 = vmatprep.subr.bf16.mxu1 %v5022_v29 }
  0x7c   :  { %v256_v54 = vmul.f32 %v4617_v47, %v6978_v38  ;;  %1285 = vrot.lane.b32.xlu1 %v4996_v13, %s3858_s12  ;;  %v6980_v25 = vsub.f32 %v6979_v53, %v4147_v7  ;;  %v6981_v5 = vsub.f32 %v4411_v36, %v4147_v7  ;;  %vm463_vm5 = vcmp.gt.f32.partialorder %v399_v62, 0.0  ;;  %3597 = vmatprep.mubr.msk.bf16.mxu0 %vm668_vm0, %v2032_v55 }
  0x7d   :  { %v259_v40 = vmul.f32 %v4617_v47, %v6976_v39  ;;  %v396_v34 = vadd.f32 %v4369_v11, %v325_v58  ;;  %v6982_v58 = vsub.f32 %v4416_v51, %v4147_v7  ;;  %1279 = vrot.lane.b32.xlu0 %v5004_v21, %s3858_s12  ;;  %v6983_v53 = vsub.f32 %v4703_v4, %v4147_v7 }
  0x7e   :  { %v261_v44 = vmul.f32 %v4617_v47, %v6980_v25  ;;  %v258_v38 = vmul.f32 %v4617_v47, %v6981_v5  ;;  %v327_v36 = vmul.f32 %v4324_v56, %v256_v54  ;;  %v193_v54 = vsub.f32 %v121_v27, %v4147_v7  ;;  %v5079_v27 = vld [vmem:[%s6794_s0 + $0x1f0] sm:$0xff]  ;;  %3546 = vmatpush3.bf16.msra.mxu1 %v5022_v29 }
  0x7f   :  { %v330_v39 = vmul.f32 %v4324_v56, %v259_v40  ;;  %v263_v17 = vmul.f32 %v4617_v47, %v6982_v58  ;;  %v5046_v40 = vsel %vm458_vm4, %v394_v9, %v529_v42  ;;  %v260_v51 = vmul.f32 %v4617_v47, %v6983_v53  ;;  %3626 = vmatpush3.bf16.msra.mxu0 %v4827_v49 }
  0x80   :  { %v531_v25 = vmul.f32 %v4394_v19, %v396_v34  ;;  %v332_v58 = vmul.f32 %v4324_v56, %v261_v44  ;;  %v329_v9 = vmul.f32 %v4324_v56, %v258_v38  ;;  %vm460_vm6 = vcmp.gt.f32.partialorder %v396_v34, 0.0  ;;  %1289 = vrot.lane.b32.xlu1 %v5011_v33, %s3858_s12  ;;  %3627 = vmatprep.subr.bf16.mxu0 %v4861_v18 }
  0x81   :  { %v401_v5 = vadd.f32 %v4369_v11, %v330_v39  ;;  %v398_v42 = vadd.f32 %v4369_v11, %v327_v36  ;;  %v334_v4 = vmul.f32 %v4324_v56, %v263_v17  ;;  %v5069_v39 = vld [vmem:[%s6801_s7] sm:$0xff]   ;;  %v331_v17 = vmul.f32 %v4324_v56, %v260_v51  ;;  %1283 = vrot.lane.b32.xlu0 %v5046_v40, %s3858_s12 }
  0x82   :  { %v403_v44 = vadd.f32 %v4369_v11, %v332_v58  ;;  %v5085_v38 = vsel %vm463_vm5, %v399_v62, %v534_v43  ;;  %v400_v36 = vadd.f32 %v4369_v11, %v329_v9  ;;  %v6984_v53 = vsub.f32 %v4843_v14, %v4147_v7  ;;  %3547 = vmatprep.subr.bf16.mxu1 %v5069_v39 }
  0x83   :  { %v536_v55 = vmul.f32 %v4394_v19, %v401_v5  ;;  %vm465_vm7 = vcmp.gt.f32.partialorder %v401_v5, 0.0  ;;  %v2033_v58 = vpack.c.bf16 %v4913_v16, %v4967_v48  ;;  %v5096_v31 = vsel %vm460_vm6, %v396_v34, %v531_v25  ;;  %3548 = vmatpush3.bf16.msra.mxu1 %v5069_v39  ;;  %3628 = vmatpush3.bf16.msra.mxu0 %v4861_v18 }
  0x84   :  { %v265_v51 = vmul.f32 %v4617_v47, %v6984_v53  ;;  %v533_v32 = vmul.f32 %v4394_v19, %v398_v42  ;;  %v190_v62 = vsub.f32 %v118_v37, %v4147_v7  ;;  %v2034_v43 = vpack.c.bf16 %v4956_v22, %v5004_v21  ;;  %1293 = vrot.lane.b32.xlu1 %v5085_v38, %s3858_s12 }
  0x85   :  { %vm462_vm8 = vcmp.gt.f32.partialorder %v398_v42, 0.0  ;;  %v405_v14 = vadd.f32 %v4369_v11, %v334_v4  ;;  %v192_v9 = vsub.f32 %v5079_v27, %v4147_v7  ;;  %v2035_v34 = vpack.c.bf16 %v4996_v13, %v5046_v40  ;;  %1287 = vrot.lane.b32.xlu0 %v5096_v31, %s3858_s12  ;;  %3598 = vmatmul.mubr.msk.bf16.gmra.mxu0 %vm668_vm0, %v2033_v58 }
  0x86   :  { %v5112_v25 = vsel %vm465_vm7, %v401_v5, %v536_v55  ;;  %vm467_vm9 = vcmp.gt.f32.partialorder %v403_v44, 0.0  ;;  %v402_v37 = vadd.f32 %v4369_v11, %v331_v17  ;;  %v538_v4 = vmul.f32 %v4394_v19, %v403_v44  ;;  %3601 = vmatprep.mubr.msk.bf16.mxu0 %vm668_vm0, %v2034_v43  ;;  %3669 = vmatprep.subr.bf16.mxu1 %v4755_v59 }
  0x87   :  { %v535_v27 = vmul.f32 %v4394_v19, %v400_v36  ;;  %v336_v53 = vmul.f32 %v4324_v56, %v265_v51  ;;  %v6985_v26 = vsub.f32 %v4930_v28, %v4147_v7  ;;  %v5127_v55 = vsel %vm462_vm8, %v398_v42, %v533_v32  ;;  %3629 = vmatprep.subr.bf16.mxu0 %v4899_v6 }
  0x88   :  { %vm464_vm10 = vcmp.gt.f32.partialorder %v400_v36, 0.0  ;;  %v6986_v17 = vsub.f32 %v4951_v63, %v4147_v7  ;;  %v6987_v24 = vsub.f32 %v4964_v8, %v4147_v7  ;;  %vm469_vm11 = vcmp.gt.f32.partialorder %v405_v14, 0.0  ;;  %1297 = vrot.lane.b32.xlu1 %v5112_v25, %s3858_s12  ;;  %3630 = vmatpush3.bf16.msra.mxu0 %v4899_v6 }
  0x89   :  { %v262_v5 = vmul.f32 %v4617_v47, %v6985_v26  ;;  %v540_v26 = vmul.f32 %v4394_v19, %v405_v14  ;;  %v269_v32 = vmul.f32 %v4617_v47, %v193_v54  ;;  %v537_v63 = vmul.f32 %v4394_v19, %v402_v37  ;;  %1291 = vrot.lane.b32.xlu0 %v5127_v55, %s3858_s12 }
  0x8a   :  { %v267_v35 = vmul.f32 %v4617_v47, %v6986_v17  ;;  %v264_v51 = vmul.f32 %v4617_v47, %v6987_v24  ;;  %v407_v42 = vadd.f32 %v4369_v11, %v336_v53  ;;  %v266_v24 = vmul.f32 %v4617_v47, %v190_v62  ;;  %3631 = vmatprep.subr.bf16.mxu0 %v4982_v12 }
  0x8b   :  { %v333_v28 = vmul.f32 %v4324_v56, %v262_v5  ;;  %v5150_v8 = vsel %vm467_vm9, %v403_v44, %v538_v4  ;;  %v5152_v58 = vsel %vm464_vm10, %v400_v36, %v535_v27  ;;  %vm466_vm12 = vcmp.gt.f32.partialorder %v402_v37, 0.0 }
  0x8c   :  { %v338_v7 = vmul.f32 %v4324_v56, %v267_v35  ;;  %v335_v54 = vmul.f32 %v4324_v56, %v264_v51  ;;  %v3832_v35 = vld [vmem:[%s6796_s2] ss:$0 sm:$0xff]  ;;  %v2036_v44 = vpack.c.bf16 %v5011_v33, %v5096_v31  ;;  %1301 = vrot.lane.b32.xlu1 %v5150_v8, %s3858_s12  ;;  %v5168_v56 = vsel %vm469_vm11, %v405_v14, %v540_v26 }
  0x8d   :  { %v404_v43 = vadd.f32 %v4369_v11, %v333_v28  ;;  %v340_v62 = vmul.f32 %v3832_v35, %v269_v32  ;;  %v337_v5 = vmul.f32 %v3832_v35, %v266_v24  ;;  %v5170_v36 = vsel %vm466_vm12, %v402_v37, %v537_v63  ;;  %1295 = vrot.lane.b32.xlu0 %v5152_v58, %s3858_s12 }
  0x8e   :  { %v409_v53 = vadd.f32 %v4369_v11, %v338_v7  ;;  %vm471_vm13 = vcmp.gt.f32.partialorder %v407_v42, 0.0  ;;  %v542_v4 = vmul.f32 %v4394_v19, %v407_v42  ;;  %v406_v17 = vadd.f32 %v4369_v11, %v335_v54  ;;  %3602 = vmatmul.mubr.msk.bf16.gmra.mxu0 %vm668_vm0, %v2035_v34 }
  0x8f   :  { %v408_v51 = vadd.f32 %v4369_v11, %v337_v5  ;;  %v539_v14 = vmul.f32 %v4394_v19, %v404_v43  ;;  %v411_v37 = vadd.f32 %v4369_v11, %v340_v62  ;;  %v268_v26 = vmul.f32 %v4617_v47, %v192_v9  ;;  %3605 = vmatprep.mubr.msk.bf16.mxu0 %vm668_vm0, %v2036_v44 }
  0x90   :  { %v544_v27 = vmul.f32 %v4394_v19, %v409_v53  ;;  %vm473_vm14 = vcmp.gt.f32.partialorder %v409_v53, 0.0  ;;  %vm468_vm15 = vcmp.gt.f32.partialorder %v404_v43, 0.0  ;;  %v2037_v32 = vpack.c.bf16 %v5085_v38, %v5127_v55  ;;  %1305 = vrot.lane.b32.xlu1 %v5168_v56, %s3858_s12  ;;  %3632 = vmatpush3.bf16.msra.mxu0 %v4982_v12 }
  0x91   :  { %vm472_vm1 = vcmp.gt.f32.partialorder %v408_v51, 0.0  ;;  %v543_v28 = vmul.f32 %v4394_v19, %v408_v51  ;;  %v339_v34 = vmul.f32 %v3832_v35, %v268_v26  ;;  %1299 = vrot.lane.b32.xlu0 %v5170_v36, %s3858_s12  ;;  %v5193_v11 = vsel %vm471_vm13, %v407_v42, %v542_v4  ;;  %v3833_v35 = vld [vmem:[%s6797_s3] ss:$0 sm:$0xff]  ;;  %3633 = vmatprep.subr.bf16.mxu0 %v5022_v29 }
  0x92   :  { %v5195_v47 = vsel %vm473_vm14, %v409_v53, %v544_v27  ;;  %v541_v9 = vmul.f32 %v4394_v19, %v406_v17  ;;  %v5200_v7 = vsel %vm468_vm15, %v404_v43, %v539_v14  ;;  %v546_v24 = vmul.f32 %v4394_v19, %v411_v37  ;;  %v3834_v19 = vld [vmem:[%s6798_s4] ss:$0 sm:$0xff] }
  0x93   :  { %v5198_v63 = vsel %vm472_vm1, %v408_v51, %v543_v28  ;;  %v410_v62 = vadd.f32 %v3833_v35, %v339_v34  ;;  %v2038_v42 = vpack.c.bf16 %v5112_v25, %v5152_v58  ;;  %vm470_vm2 = vcmp.gt.f32.partialorder %v406_v17, 0.0 }
  0x94   :  { %v2042_v54 = vpack.c.bf16 %v5195_v47, %v5198_v63  ;;  %vm475_vm3 = vcmp.gt.f32.partialorder %v411_v37, 0.0  ;;  %1309 = vrot.lane.b32.xlu1 %v5193_v11, %s3858_s12  ;;  %v5221_v53 = vsel %vm470_vm2, %v406_v17, %v541_v9  ;;  %3634 = vmatpush3.bf16.msra.mxu0 %v5022_v29  ;;  %v2039_v27 = vpack.c.bf16 %v5150_v8, %v5170_v36 }
  0x95   :  { %vm474_vm4 = vcmp.gt.f32.partialorder %v410_v62, 0.0  ;;  %v545_v43 = vmul.f32 %v3834_v19, %v410_v62  ;;  %1303 = vrot.lane.b32.xlu0 %v5200_v7, %s3858_s12  ;;  %v5223_v5 = vsel %vm475_vm3, %v411_v37, %v546_v24  ;;  %3635 = vmatprep.subr.bf16.mxu0 %v5069_v39  ;;  %v2040_v17 = vpack.c.bf16 %v5168_v56, %v5200_v7 }
  0x96   :  { %3606 = vmatmul.mubr.msk.bf16.gmra.mxu0 %vm668_vm0, %v2037_v32  ;;  %v1607_v51 = vmul.f32 %v4744_v61, %v4744_v61  ;;  %v1609_v14 = vmul.f32 %v4680_v20, %v4680_v20  ;;  %v1608_v61 = vmul.f32 %v4779_v45, %v4779_v45  ;;  %v2041_v37 = vpack.c.bf16 %v5193_v11, %v5221_v53 }
  0x97   :  { %v5225_v44 = vsel %vm474_vm4, %v410_v62, %v545_v43  ;;  %3609 = vmatprep.mubr.msk.bf16.mxu0 %vm668_vm0, %v2038_v42  ;;  %v1610_v26 = vmul.f32 %v4718_v10, %v4718_v10  ;;  %v1611_v28 = vmul.f32 %v4865_v2, %v4865_v2  ;;  %v1612_v20 = vmul.f32 %v4759_v3, %v4759_v3 }
  0x98   :  { %v2043_v4 = vpack.c.bf16 %v5223_v5, %v5225_v44  ;;  %1313 = vrot.lane.b32.xlu1 %v5195_v47, %s3858_s12  ;;  %3636 = vmatpush3.bf16.msra.mxu0 %v5069_v39  ;;  %v1613_v45 = vmul.f32 %v4878_v46, %v4878_v46  ;;  %v1614_v10 = vmul.f32 %v4850_v60, %v4850_v60 }
  0x99   :  { %1307 = vrot.lane.b32.xlu0 %v5221_v53, %s3858_s12  ;;  %v1615_v2 = vmul.f32 %v4932_v23, %v4932_v23  ;;  %v1616_v3 = vmul.f32 %v4872_v52, %v4872_v52  ;;  %v1617_v46 = vmul.f32 %v4967_v48, %v4967_v48  ;;  %v1618_v60 = vmul.f32 %v4913_v16, %v4913_v16 }
  0x9a   :  { %v1619_v23 = vmul.f32 %v5004_v21, %v5004_v21  ;;  %v1620_v52 = vmul.f32 %v4956_v22, %v4956_v22  ;;  %v1621_v48 = vmul.f32 %v5046_v40, %v5046_v40  ;;  %v1622_v16 = vmul.f32 %v4996_v13, %v4996_v13 }
  0x9b   :  { %v1623_v21 = vmul.f32 %v5096_v31, %v5096_v31  ;;  %v1624_v22 = vmul.f32 %v5011_v33, %v5011_v33  ;;  %v1625_v40 = vmul.f32 %v5127_v55, %v5127_v55  ;;  %v1626_v13 = vmul.f32 %v5085_v38, %v5085_v38 }
  0x9c   :  { %1317 = vrot.lane.b32.xlu1 %v5223_v5, %s3858_s12  ;;  %v1627_v31 = vmul.f32 %v5152_v58, %v5152_v58  ;;  %v1628_v33 = vmul.f32 %v5112_v25, %v5112_v25  ;;  %v1629_v55 = vmul.f32 %v5170_v36, %v5170_v36  ;;  %v1630_v38 = vmul.f32 %v5150_v8, %v5150_v8 }
  0x9d   :  { %1311 = vrot.lane.b32.xlu0 %v5198_v63, %s3858_s12  ;;  %v1631_v58 = vmul.f32 %v5200_v7, %v5200_v7  ;;  %v1632_v25 = vmul.f32 %v5168_v56, %v5168_v56  ;;  %v1633_v36 = vmul.f32 %v5221_v53, %v5221_v53  ;;  %v1634_v9 = vmul.f32 %v5193_v11, %v5193_v11 }
  0x9e   :  { %3610 = vmatmul.mubr.msk.bf16.gmra.mxu0 %vm668_vm0, %v2039_v27  ;;  %v1635_v7 = vmul.f32 %v5198_v63, %v5198_v63  ;;  %v1636_v24 = vmul.f32 %v5195_v47, %v5195_v47  ;;  %v1637_v35 = vmul.f32 %v5225_v44, %v5225_v44  ;;  %v1638_v11 = vmul.f32 %v5223_v5, %v5223_v5 }
  0x9f   :  { %3613 = vmatprep.mubr.msk.bf16.mxu0 %vm668_vm0, %v2040_v17 }
  0xa0   :  { %1671 = vrot.lane.b32.xlu1 %v1607_v51, %s3858_s12  ;;  %v5387_v51 = vld [vmem:[%s6800_s6] ss:$0 sm:$0xff] }
  0xa1   :  { %1315 = vrot.lane.b32.xlu0 %v5225_v44, %s3858_s12 }
  0xa4   :  { %1675 = vrot.lane.b32.xlu1 %v1609_v14, %s3858_s12 }
  0xa5   :  { %1673 = vrot.lane.b32.xlu0 %v1608_v61, %s3858_s12 }
  0xa6   :  { %3614 = vmatmul.mubr.msk.bf16.gmra.mxu0 %vm668_vm0, %v2041_v37 }
  0xa7   :  { %3617 = vmatprep.mubr.msk.bf16.mxu0 %vm668_vm0, %v2042_v54 }
  0xa8   :  { %1677 = vrot.lane.b32.xlu1 %v1610_v26, %s3858_s12 }
  0xa9   :  { %1679 = vrot.lane.b32.xlu0 %v1611_v28, %s3858_s12 }
  0xac   :  { %1681 = vrot.lane.b32.xlu1 %v1612_v20, %s3858_s12  ;;  %v5397_v20 = vstv %s6803_s9 }
  0xad   :  { %1683 = vrot.lane.b32.xlu0 %v1613_v45, %s3858_s12 }
  0xae   :  { %3618 = vmatmul.mubr.msk.bf16.gmra.mxu0 %vm668_vm0, %v2043_v4 }
  0xb0   :  { %1685 = vrot.lane.b32.xlu1 %v1614_v10, %s3858_s12 }
  0xb1   :  { %1687 = vrot.lane.b32.xlu0 %v1615_v2, %s3858_s12 }
  0xb4   :  { %1689 = vrot.lane.b32.xlu1 %v1616_v3, %s3858_s12 }
  0xb5   :  { %1691 = vrot.lane.b32.xlu0 %v1617_v46, %s3858_s12 }
  0xb8   :  { %1693 = vrot.lane.b32.xlu1 %v1618_v60, %s3858_s12 }
  0xb9   :  { %1695 = vrot.lane.b32.xlu0 %v1619_v23, %s3858_s12 }
  0xbc   :  { %1697 = vrot.lane.b32.xlu1 %v1620_v52, %s3858_s12 }
  0xbd   :  { %1699 = vrot.lane.b32.xlu0 %v1621_v48, %s3858_s12 }
  0xc0   :  { %1701 = vrot.lane.b32.xlu1 %v1622_v16, %s3858_s12 }
  0xc1   :  { %1703 = vrot.lane.b32.xlu0 %v1623_v21, %s3858_s12 }
  0xc4   :  { %1705 = vrot.lane.b32.xlu1 %v1624_v22, %s3858_s12 }
  0xc5   :  { %1707 = vrot.lane.b32.xlu0 %v1625_v40, %s3858_s12 }
  0xc6   :  { %v5324_v32 = vpop.permute.xlu1 %1259 }
  0xc8   :  { %1709 = vrot.lane.b32.xlu1 %v1626_v13, %s3858_s12 }
  0xc9   :  { %1711 = vrot.lane.b32.xlu0 %v1627_v31, %s3858_s12 }
  0xcb   :  { %v5335_v34 = vpop.permute.xlu1 %1261 }
  0xcc   :  { %1713 = vrot.lane.b32.xlu1 %v1628_v33, %s3858_s12 }
  0xcd   :  { %1715 = vrot.lane.b32.xlu0 %v1629_v55, %s3858_s12 }
  0xcf   :  { %v5337_v8 = vpop.permute.xlu0 %1255 }
  0xd0   :  { %1717 = vrot.lane.b32.xlu1 %v1630_v38, %s3858_s12  ;;  %v5346_v56 = vpop.permute.xlu1 %1265 }
  0xd1   :  { %1719 = vrot.lane.b32.xlu0 %v1631_v58, %s3858_s12 }
  0xd4   :  { %1721 = vrot.lane.b32.xlu1 %v1632_v25, %s3858_s12  ;;  %v5351_v54 = vpop.permute.xlu0 %1257 }
  0xd5   :  { %1723 = vrot.lane.b32.xlu0 %v1633_v36, %s3858_s12 }
  0xd8   :  { %1725 = vrot.lane.b32.xlu1 %v1634_v9, %s3858_s12 }
  0xd9   :  { %1727 = vrot.lane.b32.xlu0 %v1635_v7, %s3858_s12 }
  0xdc   :  { %1729 = vrot.lane.b32.xlu1 %v1636_v24, %s3858_s12 }
  0xdd   :  { %1731 = vrot.lane.b32.xlu0 %v1637_v35, %s3858_s12 }
  0xde   :  { %v5359_v63 = vpop.permute.xlu1 %1269  ;;  %v5361_v62 = vpop.permute.xlu0 %1263 }
  0xe0   :  { %1733 = vrot.lane.b32.xlu1 %v1638_v11, %s3858_s12 }
  0xe2   :  { %v5364_v47 = vpop.permute.xlu1 %1273  ;;  %v5366_v42 = vpop.permute.xlu0 %1267 }
  0xe6   :  { %v5368_v19 = vpop.permute.xlu1 %1277 }
  0xe7   :  { %v5370_v43 = vpop.permute.xlu0 %1271 }
  0xea   :  { %v5372_v53 = vpop.permute.xlu1 %1281 }
  0xeb   :  { %v5374_v44 = vpop.permute.xlu0 %1275  ;;  %v3503_v14 = vpop.f32.mrf.mxu0 }
  0xec   :  { %v760_v26 = vadd.f32 %v3503_v14, %v5387_v51 }
  0xed   :  { %v751_v28 = vpop.f32.mrf.mxu0 }
  0xee   :  { %v5376_v5 = vpop.permute.xlu1 %1285  ;;  %v752_v45 = vadd.f32 %v5387_v51, %v751_v28  ;;  %v913_v60 = vmul.f32 %v5397_v20, %v760_v26  ;;  %vm880_vm6 = vcmp.gt.f32.partialorder %v760_v26, 0.0 }
  0xef   :  { %v5378_v4 = vpop.permute.xlu0 %1279  ;;  %v3504_v10 = vpop.f32.mrf.mxu0 }
  0xf0   :  { %v763_v3 = vadd.f32 %v3504_v10, %v5387_v51  ;;  %v911_v52 = vmul.f32 %v5397_v20, %v752_v45  ;;  %vm878_vm7 = vcmp.gt.f32.partialorder %v752_v45, 0.0  ;;  %v945_v36 = vsel %vm880_vm6, %v760_v26, %v913_v60 }
  0xf1   :  { %v754_v23 = vpop.f32.mrf.mxu0 }
  0xf2   :  { %v5380_v27 = vpop.permute.xlu1 %1289  ;;  %vm881_vm5 = vcmp.gt.f32.partialorder %v763_v3, 0.0  ;;  %v914_v48 = vmul.f32 %v5397_v20, %v763_v3  ;;  %v755_v16 = vadd.f32 %v5387_v51, %v754_v23  ;;  %v943_v58 = vsel %vm878_vm7, %v752_v45, %v911_v52 }
  0xf3   :  { %v5382_v17 = vpop.permute.xlu0 %1283  ;;  %v3507_v21 = vpop.f32.mrf.mxu0 }
  0xf4   :  { %v912_v40 = vmul.f32 %v5397_v20, %v755_v16  ;;  %v776_v13 = vadd.f32 %v3507_v21, %v5387_v51  ;;  %vm879_vm8 = vcmp.gt.f32.partialorder %v755_v16, 0.0  ;;  %v946_v33 = vsel %vm881_vm5, %v763_v3, %v914_v48 }
  0xf5   :  { %v767_v55 = vpop.f32.mrf.mxu0  ;;  %v976_v35 = vpack.c.bf16 %v946_v33, %v945_v36 }
  0xf6   :  { %v5389_v61 = vpop.permute.xlu1 %1293  ;;  %v768_v38 = vadd.f32 %v5387_v51, %v767_v55  ;;  %v944_v25 = vsel %vm879_vm8, %v755_v16, %v912_v40  ;;  %v917_v9 = vmul.f32 %v5397_v20, %v776_v13  ;;  %vm884_vm9 = vcmp.gt.f32.partialorder %v776_v13, 0.0 }
  0xf7   :  { %v5391_v37 = vpop.permute.xlu0 %1287  ;;  %v3508_v7 = vpop.f32.mrf.mxu0  ;;  %v975_v24 = vpack.c.bf16 %v944_v25, %v943_v58 }
  0xf8   :  { %vm882_vm10 = vcmp.gt.f32.partialorder %v768_v38, 0.0  ;;  %v915_v14 = vmul.f32 %v5397_v20, %v768_v38  ;;  %v779_v28 = vadd.f32 %v3508_v7, %v5387_v51  ;;  %v949_v48 = vsel %vm884_vm9, %v776_v13, %v917_v9 }
  0xf9   :  { %v770_v3 = vpop.f32.mrf.mxu0  ;;  %3549 = vmatprep.mubr.bf16.mxu1 %v975_v24 }
  0xfa   :  { %v5400_v2 = vpop.permute.xlu1 %1297  ;;  %vm885_vm11 = vcmp.gt.f32.partialorder %v779_v28, 0.0  ;;  %v918_v26 = vmul.f32 %v5397_v20, %v779_v28  ;;  %v771_v45 = vadd.f32 %v5387_v51, %v770_v3  ;;  %3550 = vmatmul.mubr.bf16.vlgmr.msra.gmra.mxu1 %v976_v35  ;;  %v947_v52 = vsel %vm882_vm10, %v768_v38, %v915_v14 }
  0xfb   :  { %v5403_v46 = vpop.permute.xlu0 %1291  ;;  %v3511_v60 = vpop.f32.mrf.mxu0  ;;  %3677 = vmatpush3.bf16.msra.mxu1 %v4755_v59 }
  0xfc   :  { %vm883_vm12 = vcmp.gt.f32.partialorder %v771_v45, 0.0  ;;  %v916_v16 = vmul.f32 %v5397_v20, %v771_v45  ;;  %v792_v21 = vadd.f32 %v3511_v60, %v5387_v51  ;;  %v950_v33 = vsel %vm885_vm11, %v779_v28, %v918_v26  ;;  %3670 = vmatprep.subr.bf16.mxu1 %v4792_v0 }
  0xfd   :  { %v783_v55 = vpop.f32.mrf.mxu0  ;;  %v978_v36 = vpack.c.bf16 %v950_v33, %v949_v48 }
  0xfe   :  { %v5409_v22 = vpop.permute.xlu1 %1301  ;;  %v784_v58 = vadd.f32 %v5387_v51, %v783_v55  ;;  %v948_v25 = vsel %vm883_vm12, %v771_v45, %v916_v16  ;;  %v921_v38 = vmul.f32 %v5397_v20, %v792_v21  ;;  %vm888_vm13 = vcmp.gt.f32.partialorder %v792_v21, 0.0 }
  0xff   :  { %v5413_v31 = vpop.permute.xlu0 %1295  ;;  %v3512_v13 = vpop.f32.mrf.mxu0  ;;  %v977_v9 = vpack.c.bf16 %v948_v25, %v947_v52  ;;  %3678 = vmatpush3.bf16.msra.mxu1 %v4792_v0 }
 0x100   :  { %vm886_vm14 = vcmp.gt.f32.partialorder %v784_v58, 0.0  ;;  %v919_v7 = vmul.f32 %v5397_v20, %v784_v58  ;;  %v795_v24 = vadd.f32 %v3512_v13, %v5387_v51  ;;  %3671 = vmatprep.subr.bf16.mxu1 %v4827_v49  ;;  %v953_v60 = vsel %vm888_vm13, %v792_v21, %v921_v38 }
 0x101   :  { %v786_v14 = vpop.f32.mrf.mxu0  ;;  %3553 = vmatprep.mubr.bf16.mxu1 %v977_v9 }
 0x102   :  { %v5417_v11 = vpop.permute.xlu1 %1305  ;;  %vm889_vm15 = vcmp.gt.f32.partialorder %v795_v24, 0.0  ;;  %v922_v28 = vmul.f32 %v5397_v20, %v795_v24  ;;  %v787_v3 = vadd.f32 %v5387_v51, %v786_v14  ;;  %3554 = vmatmul.mubr.bf16.gmra.mxu1 %v978_v36  ;;  %v951_v45 = vsel %vm886_vm14, %v784_v58, %v919_v7 }
 0x103   :  { %v5421_v10 = vpop.permute.xlu0 %1299  ;;  %v3515_v26 = vpop.f32.mrf.mxu0  ;;  %3679 = vmatpush3.bf16.msra.mxu1 %v4827_v49 }
 0x104   :  { %vm887_vm1 = vcmp.gt.f32.partialorder %v787_v3, 0.0  ;;  %v920_v52 = vmul.f32 %v5397_v20, %v787_v3  ;;  %v808_v48 = vadd.f32 %v3515_v26, %v5387_v51  ;;  %v954_v33 = vsel %vm889_vm15, %v795_v24, %v922_v28  ;;  %3672 = vmatprep.subr.bf16.mxu1 %v4861_v18 }
 0x105   :  { %v799_v55 = vpop.f32.mrf.mxu0  ;;  %v980_v13 = vpack.c.bf16 %v954_v33, %v953_v60 }
 0x106   :  { %v5425_v23 = vpop.permute.xlu1 %1309  ;;  %v800_v25 = vadd.f32 %v5387_v51, %v799_v55  ;;  %v952_v36 = vsel %vm887_vm1, %v787_v3, %v920_v52  ;;  %vm892_vm2 = vcmp.gt.f32.partialorder %v808_v48, 0.0  ;;  %v925_v21 = vmul.f32 %v5397_v20, %v808_v48 }
 0x107   :  { %v5430_v40 = vpop.permute.xlu0 %1303  ;;  %v3516_v58 = vpop.f32.mrf.mxu0  ;;  %v979_v49 = vpack.c.bf16 %v952_v36, %v951_v45  ;;  %3680 = vmatpush3.bf16.msra.mxu1 %v4861_v18 }
 0x108   :  { %vm890_vm3 = vcmp.gt.f32.partialorder %v800_v25, 0.0  ;;  %v923_v9 = vmul.f32 %v5397_v20, %v800_v25  ;;  %v811_v7 = vadd.f32 %v3516_v58, %v5387_v51  ;;  %3673 = vmatprep.subr.bf16.mxu1 %v4899_v6  ;;  %v957_v52 = vsel %vm892_vm2, %v808_v48, %v925_v21 }
 0x109   :  { %v802_v28 = vpop.f32.mrf.mxu0  ;;  %3557 = vmatprep.mubr.bf16.mxu1 %v979_v49 }
 0x10a   :  { %v5435_v59 = vpop.permute.xlu1 %1313  ;;  %vm893_vm4 = vcmp.gt.f32.partialorder %v811_v7, 0.0  ;;  %v926_v3 = vmul.f32 %v5397_v20, %v811_v7  ;;  %v803_v26 = vadd.f32 %v5387_v51, %v802_v28  ;;  %3558 = vmatmul.mubr.bf16.gmra.mxu1 %v980_v13  ;;  %v955_v60 = vsel %vm890_vm3, %v800_v25, %v923_v9 }
 0x10b   :  { %v5440_v35 = vpop.permute.xlu0 %1307  ;;  %v3519_v18 = vpop.f32.mrf.mxu0  ;;  %3681 = vmatpush3.bf16.msra.mxu1 %v4899_v6 }
 0x10c   :  { %vm891_vm5 = vcmp.gt.f32.partialorder %v803_v26, 0.0  ;;  %v924_v33 = vmul.f32 %v5397_v20, %v803_v26  ;;  %v824_v55 = vadd.f32 %v3519_v18, %v5387_v51  ;;  %3674 = vmatprep.subr.bf16.mxu1 %v4982_v12  ;;  %v958_v13 = vsel %vm893_vm4, %v811_v7, %v926_v3 }
 0x10d   :  { %v815_v49 = vpop.f32.mrf.mxu0 }
 0x10e   :  { %v5445_v0 = vpop.permute.xlu1 %1317  ;;  %v816_v48 = vadd.f32 %v5387_v51, %v815_v49  ;;  %v956_v21 = vsel %vm891_vm5, %v803_v26, %v924_v33  ;;  %vm896_vm6 = vcmp.gt.f32.partialorder %v824_v55, 0.0  ;;  %v929_v6 = vmul.f32 %v5397_v20, %v824_v55 }
 0x10f   :  { %v5450_v16 = vpop.permute.xlu0 %1311  ;;  %v981_v9 = vpack.c.bf16 %v956_v21, %v955_v60  ;;  %3682 = vmatpush3.bf16.msra.mxu1 %v4982_v12 }
 0x110   :  { %vm894_vm7 = vcmp.gt.f32.partialorder %v816_v48, 0.0  ;;  %v927_v18 = vmul.f32 %v5397_v20, %v816_v48  ;;  %3675 = vmatprep.subr.bf16.mxu1 %v5022_v29  ;;  %v961_v49 = vsel %vm896_vm6, %v824_v55, %v929_v6 }
 0x111   :  { %3561 = vmatprep.mubr.bf16.mxu1 %v981_v9 }
 0x112   :  { %v1672_v38 = vpop.permute.xlu1 %1671 }
 0x113   :  { %v5458_v24 = vpop.permute.xlu0 %1315  ;;  %v1767_v14 = vsel %vm668_vm0, %v1672_v38, 0.0  ;;  %v3520_v38 = vpop.f32.mrf.mxu0  ;;  %3683 = vmatpush3.bf16.msra.mxu1 %v5022_v29 }
 0x114   :  { %1768 = vadd.xlane.f32.xlu0 %v1767_v14  ;;  %v982_v14 = vpack.c.bf16 %v958_v13, %v957_v52  ;;  %v827_v7 = vadd.f32 %v3520_v38, %v5387_v51  ;;  %3676 = vmatprep.subr.bf16.mxu1 %v5069_v39 }
 0x115   :  { %v818_v26 = vpop.f32.mrf.mxu0 }
 0x116   :  { %v1676_v45 = vpop.permute.xlu1 %1675  ;;  %vm897_vm8 = vcmp.gt.f32.partialorder %v827_v7, 0.0  ;;  %v930_v60 = vmul.f32 %v5397_v20, %v827_v7  ;;  %v819_v12 = vadd.f32 %v5387_v51, %v818_v26  ;;  %3562 = vmatmul.mubr.bf16.gmra.mxu1 %v982_v14 }
 0x117   :  { %v1674_v36 = vpop.permute.xlu0 %1673  ;;  %v1773_v58 = vsel %vm668_vm0, %v1676_v45, 0.0  ;;  %v3523_v52 = vpop.f32.mrf.mxu0  ;;  %3684 = vmatpush3.bf16.msra.mxu1 %v5069_v39 }
 0x118   :  { %1774 = vadd.xlane.f32.xlu0 %v1773_v58  ;;  %v1770_v25 = vsel %vm668_vm0, %v1674_v36, 0.0  ;;  %v959_v58 = vsel %vm894_vm7, %v816_v48, %v927_v18  ;;  %vm895_vm9 = vcmp.gt.f32.partialorder %v819_v12, 0.0  ;;  %v928_v13 = vmul.f32 %v5397_v20, %v819_v12 }
 0x119   :  { %1771 = vadd.xlane.f32.xlu1 %v1770_v25  ;;  %v840_v25 = vadd.f32 %v3523_v52, %v5387_v51  ;;  %v831_v9 = vpop.f32.mrf.mxu0  ;;  %v962_v14 = vsel %vm897_vm8, %v827_v7, %v930_v60 }
 0x11a   :  { %v1678_v28 = vpop.permute.xlu1 %1677  ;;  %v832_v55 = vadd.f32 %v5387_v51, %v831_v9  ;;  %v960_v6 = vsel %vm895_vm9, %v819_v12, %v928_v13 }
 0x11b   :  { %v1680_v3 = vpop.permute.xlu0 %1679  ;;  %v1776_v45 = vsel %vm668_vm0, %v1678_v28, 0.0  ;;  %vm900_vm10 = vcmp.gt.f32.partialorder %v840_v25, 0.0  ;;  %v933_v29 = vmul.f32 %v5397_v20, %v840_v25  ;;  %v3524_v28 = vpop.f32.mrf.mxu0  ;;  %v983_v18 = vpack.c.bf16 %v960_v6, %v959_v58 }
 0x11c   :  { %1777 = vadd.xlane.f32.xlu0 %v1776_v45  ;;  %v1779_v33 = vsel %vm668_vm0, %v1680_v3, 0.0  ;;  %v984_v3 = vpack.c.bf16 %v962_v14, %v961_v49  ;;  %vm898_vm11 = vcmp.gt.f32.partialorder %v832_v55, 0.0  ;;  %v931_v26 = vmul.f32 %v5397_v20, %v832_v55 }
 0x11d   :  { %1780 = vadd.xlane.f32.xlu1 %v1779_v33  ;;  %v843_v7 = vadd.f32 %v3524_v28, %v5387_v51  ;;  %v834_v52 = vpop.f32.mrf.mxu0  ;;  %3565 = vmatprep.mubr.bf16.mxu1 %v983_v18 }
 0x11e   :  { %v1682_v36 = vpop.permute.xlu1 %1681  ;;  %v835_v58 = vadd.f32 %v5387_v51, %v834_v52  ;;  %3566 = vmatmul.mubr.bf16.gmra.mxu1 %v984_v3  ;;  %v963_v13 = vsel %vm898_vm11, %v832_v55, %v931_v26 }
 0x11f   :  { %v1684_v21 = vpop.permute.xlu0 %1683  ;;  %v1782_v38 = vsel %vm668_vm0, %v1682_v36, 0.0  ;;  %vm901_vm12 = vcmp.gt.f32.partialorder %v843_v7, 0.0  ;;  %v934_v36 = vmul.f32 %v5397_v20, %v843_v7  ;;  %v3527_v39 = vpop.f32.mrf.mxu0 }
 0x120   :  { %1783 = vadd.xlane.f32.xlu0 %v1782_v38  ;;  %v1785_v48 = vsel %vm668_vm0, %v1684_v21, 0.0  ;;  %v965_v21 = vsel %vm900_vm10, %v840_v25, %v933_v29  ;;  %vm899_vm13 = vcmp.gt.f32.partialorder %v835_v58, 0.0  ;;  %v932_v38 = vmul.f32 %v5397_v20, %v835_v58 }
 0x121   :  { %1786 = vadd.xlane.f32.xlu1 %v1785_v48  ;;  %v856_v9 = vadd.f32 %v3527_v39, %v5387_v51  ;;  %v847_v6 = vpop.f32.mrf.mxu0  ;;  %v966_v28 = vsel %vm901_vm12, %v843_v7, %v934_v36 }
 0x122   :  { %v1686_v45 = vpop.permute.xlu1 %1685  ;;  %v848_v3 = vadd.f32 %v5387_v51, %v847_v6  ;;  %v986_v26 = vpack.c.bf16 %v966_v28, %v965_v21 }
 0x123   :  { %v1688_v33 = vpop.permute.xlu0 %1687  ;;  %v1788_v60 = vsel %vm668_vm0, %v1686_v45, 0.0  ;;  %v964_v45 = vsel %vm899_vm13, %v835_v58, %v932_v38  ;;  %vm904_vm14 = vcmp.gt.f32.partialorder %v856_v9, 0.0  ;;  %v937_v25 = vmul.f32 %v5397_v20, %v856_v9  ;;  %v3528_v55 = vpop.f32.mrf.mxu0 }
 0x124   :  { %1789 = vadd.xlane.f32.xlu0 %v1788_v60  ;;  %v1791_v12 = vsel %vm668_vm0, %v1688_v33, 0.0  ;;  %v985_v29 = vpack.c.bf16 %v964_v45, %v963_v13  ;;  %vm902_vm15 = vcmp.gt.f32.partialorder %v848_v3, 0.0  ;;  %v935_v60 = vmul.f32 %v5397_v20, %v848_v3 }
 0x125   :  { %1792 = vadd.xlane.f32.xlu1 %v1791_v12  ;;  %v859_v52 = vadd.f32 %v3528_v55, %v5387_v51  ;;  %v850_v36 = vpop.f32.mrf.mxu0 }
 0x126   :  { %v1690_v49 = vpop.permute.xlu1 %1689  ;;  %3569 = vmatprep.mubr.bf16.mxu1 %v985_v29  ;;  %v967_v38 = vsel %vm902_vm15, %v848_v3, %v935_v60 }
 0x127   :  { %v1692_v14 = vpop.permute.xlu0 %1691  ;;  %v1794_v48 = vsel %vm668_vm0, %v1690_v49, 0.0  ;;  %vm905_vm1 = vcmp.gt.f32.partialorder %v859_v52, 0.0  ;;  %v938_v39 = vmul.f32 %v5397_v20, %v859_v52  ;;  %v851_v49 = vadd.f32 %v5387_v51, %v850_v36  ;;  %3570 = vmatmul.mubr.bf16.gmra.mxu1 %v986_v26 }
 0x128   :  { %1795 = vadd.xlane.f32.xlu0 %v1794_v48  ;;  %v1797_v18 = vsel %vm668_vm0, %v1692_v14, 0.0  ;;  %v969_v14 = vsel %vm904_vm14, %v856_v9, %v937_v25 }
 0x129   :  { %1798 = vadd.xlane.f32.xlu1 %v1797_v18  ;;  %vm903_vm2 = vcmp.gt.f32.partialorder %v851_v49, 0.0  ;;  %v936_v48 = vmul.f32 %v5397_v20, %v851_v49  ;;  %v970_v55 = vsel %vm905_vm1, %v859_v52, %v938_v39 }
 0x12a   :  { %v1694_v33 = vpop.permute.xlu1 %1693  ;;  %v3531_v13 = vpop.f32.mrf.mxu0  ;;  %v988_v60 = vpack.c.bf16 %v970_v55, %v969_v14 }
 0x12b   :  { %v1696_v12 = vpop.permute.xlu0 %1695  ;;  %v1800_v7 = vsel %vm668_vm0, %v1694_v33, 0.0  ;;  %v872_v6 = vadd.f32 %v3531_v13, %v5387_v51  ;;  %v968_v33 = vsel %vm903_vm2, %v851_v49, %v936_v48 }
 0x12c   :  { %1801 = vadd.xlane.f32.xlu0 %v1800_v7  ;;  %v1803_v58 = vsel %vm668_vm0, %v1696_v12, 0.0  ;;  %v863_v45 = vpop.f32.mrf.mxu0  ;;  %v987_v25 = vpack.c.bf16 %v968_v33, %v967_v38 }
 0x12d   :  { %1804 = vadd.xlane.f32.xlu1 %v1803_v58  ;;  %v864_v26 = vadd.f32 %v5387_v51, %v863_v45  ;;  %vm908_vm3 = vcmp.gt.f32.partialorder %v872_v6, 0.0  ;;  %v941_v9 = vmul.f32 %v5397_v20, %v872_v6 }
 0x12e   :  { %v1698_v21 = vpop.permute.xlu1 %1697  ;;  %v3532_v3 = vpop.f32.mrf.mxu0  ;;  %3573 = vmatprep.mubr.bf16.mxu1 %v987_v25 }
 0x12f   :  { %v1700_v28 = vpop.permute.xlu0 %1699  ;;  %v1806_v18 = vsel %vm668_vm0, %v1698_v21, 0.0  ;;  %vm906_vm4 = vcmp.gt.f32.partialorder %v864_v26, 0.0  ;;  %v939_v7 = vmul.f32 %v5397_v20, %v864_v26  ;;  %v875_v36 = vadd.f32 %v3532_v3, %v5387_v51  ;;  %3574 = vmatmul.mubr.bf16.gmra.mxu1 %v988_v60 }
 0x130   :  { %1807 = vadd.xlane.f32.xlu0 %v1806_v18  ;;  %v1809_v29 = vsel %vm668_vm0, %v1700_v28, 0.0  ;;  %v866_v39 = vpop.f32.mrf.mxu0  ;;  %v973_v28 = vsel %vm908_vm3, %v872_v6, %v941_v9 }
 0x131   :  { %1810 = vadd.xlane.f32.xlu1 %v1809_v29  ;;  %vm909_vm5 = vcmp.gt.f32.partialorder %v875_v36, 0.0  ;;  %v942_v13 = vmul.f32 %v5397_v20, %v875_v36  ;;  %v867_v21 = vadd.f32 %v5387_v51, %v866_v39  ;;  %v971_v48 = vsel %vm906_vm4, %v864_v26, %v939_v7 }
 0x132   :  { %v1702_v12 = vpop.permute.xlu1 %1701  ;;  %v3591_v38 = vpop.f32.mrf.mxu0 }
 0x133   :  { %v1704_v58 = vpop.permute.xlu0 %1703  ;;  %v1812_v52 = vsel %vm668_vm0, %v1702_v12, 0.0  ;;  %vm907_vm6 = vcmp.gt.f32.partialorder %v867_v21, 0.0  ;;  %v940_v18 = vmul.f32 %v5397_v20, %v867_v21  ;;  %v2135_v45 = vadd.f32 %v3591_v38, %v5387_v51 }
 0x134   :  { %1813 = vadd.xlane.f32.xlu0 %v1812_v52  ;;  %v1815_v49 = vsel %vm668_vm0, %v1704_v58, 0.0  ;;  %v2126_v33 = vpop.f32.mrf.mxu0  ;;  %v974_v3 = vsel %vm909_vm5, %v875_v36, %v942_v13 }
 0x135   :  { %1816 = vadd.xlane.f32.xlu1 %v1815_v49  ;;  %v2127_v60 = vadd.f32 %v5387_v51, %v2126_v33  ;;  %v972_v12 = vsel %vm907_vm6, %v867_v21, %v940_v18  ;;  %v2287_v6 = vmul.f32 %v2135_v45, %v5397_v20  ;;  %v990_v7 = vpack.c.bf16 %v974_v3, %v973_v28 }
 0x136   :  { %v1706_v14 = vpop.permute.xlu1 %1705  ;;  %v3592_v26 = vpop.f32.mrf.mxu0  ;;  %v989_v9 = vpack.c.bf16 %v972_v12, %v971_v48  ;;  %vm2255_vm7 = vcmp.gt.f32.partialorder %v2135_v45, 0.0 }
 0x137   :  { %v1708_v55 = vpop.permute.xlu0 %1707  ;;  %v1818_v29 = vsel %vm668_vm0, %v1706_v14, 0.0  ;;  %vm2253_vm8 = vcmp.gt.f32.partialorder %v2127_v60, 0.0  ;;  %v2285_v52 = vmul.f32 %v2127_v60, %v5397_v20  ;;  %v2138_v39 = vadd.f32 %v3592_v26, %v5387_v51 }
 0x138   :  { %1819 = vadd.xlane.f32.xlu0 %v1818_v29  ;;  %v1821_v25 = vsel %vm668_vm0, %v1708_v55, 0.0  ;;  %3577 = vmatprep.mubr.bf16.mxu1 %v989_v9  ;;  %v2129_v36 = vpop.f32.mrf.mxu0  ;;  %v2319_v48 = vsel %vm2255_vm7, %v2135_v45, %v2287_v6 }
 0x139   :  { %1822 = vadd.xlane.f32.xlu1 %v1821_v25  ;;  %vm2256_vm9 = vcmp.gt.f32.partialorder %v2138_v39, 0.0  ;;  %v2288_v38 = vmul.f32 %v2138_v39, %v5397_v20  ;;  %v2130_v14 = vadd.f32 %v5387_v51, %v2129_v36  ;;  %3578 = vmatmul.mubr.bf16.gmra.mxu1 %v990_v7  ;;  %v2317_v55 = vsel %vm2253_vm8, %v2127_v60, %v2285_v52 }
 0x13a   :  { %v1710_v58 = vpop.permute.xlu1 %1709  ;;  %v3595_v28 = vpop.f32.mrf.mxu0 }
 0x13b   :  { %v1712_v49 = vpop.permute.xlu0 %1711  ;;  %v1824_v13 = vsel %vm668_vm0, %v1710_v58, 0.0  ;;  %v2320_v29 = vsel %vm2256_vm9, %v2138_v39, %v2288_v38  ;;  %vm2254_vm10 = vcmp.gt.f32.partialorder %v2130_v14, 0.0  ;;  %v2286_v33 = vmul.f32 %v2130_v14, %v5397_v20 }
 0x13c   :  { %v1827_v21 = vsel %vm668_vm0, %v1712_v49, 0.0  ;;  %1825 = vadd.xlane.f32.xlu0 %v1824_v13  ;;  %v2151_v3 = vadd.f32 %v3595_v28, %v5387_v51  ;;  %v2142_v12 = vpop.f32.mrf.mxu0  ;;  %v2350_v7 = vpack.c.bf16 %v2320_v29, %v2319_v48 }
 0x13d   :  { %1828 = vadd.xlane.f32.xlu1 %v1827_v21  ;;  %v2143_v45 = vadd.f32 %v5387_v51, %v2142_v12  ;;  %v2318_v6 = vsel %vm2254_vm10, %v2130_v14, %v2286_v33 }
 0x13e   :  { %v1714_v18 = vpop.permute.xlu1 %1713  ;;  %v2291_v58 = vmul.f32 %v2151_v3, %v5397_v20  ;;  %v3596_v60 = vpop.f32.mrf.mxu0  ;;  %v2349_v52 = vpack.c.bf16 %v2318_v6, %v2317_v55  ;;  %vm2259_vm11 = vcmp.gt.f32.partialorder %v2151_v3, 0.0 }
 0x13f   :  { %v1716_v25 = vpop.permute.xlu0 %1715  ;;  %v1830_v26 = vsel %vm668_vm0, %v1714_v18, 0.0  ;;  %vm2257_vm12 = vcmp.gt.f32.partialorder %v2143_v45, 0.0  ;;  %v2289_v49 = vmul.f32 %v2143_v45, %v5397_v20  ;;  %v2154_v36 = vadd.f32 %v3596_v60, %v5387_v51 }
 0x140   :  { %v1833_v9 = vsel %vm668_vm0, %v1716_v25, 0.0  ;;  %1831 = vadd.xlane.f32.xlu0 %v1830_v26  ;;  %v2145_v21 = vpop.f32.mrf.mxu0  ;;  %3637 = vmatprep.mubr.bf16.mxu0 %v2349_v52  ;;  %v2323_v18 = vsel %vm2259_vm11, %v2151_v3, %v2291_v58 }
 0x141   :  { %1834 = vadd.xlane.f32.xlu1 %v1833_v9  ;;  %vm2260_vm13 = vcmp.gt.f32.partialorder %v2154_v36, 0.0  ;;  %v2292_v48 = vmul.f32 %v2154_v36, %v5397_v20  ;;  %v2146_v28 = vadd.f32 %v5387_v51, %v2145_v21  ;;  %3638 = vmatmul.mubr.bf16.vlgmr.msra.gmra.mxu0 %v2350_v7  ;;  %v2321_v33 = vsel %vm2257_vm12, %v2143_v45, %v2289_v49 }
 0x142   :  { %v1718_v39 = vpop.permute.xlu1 %1717 }
 0x143   :  { %v1720_v13 = vpop.permute.xlu0 %1719  ;;  %v1836_v38 = vsel %vm668_vm0, %v1718_v39, 0.0  ;;  %v2324_v25 = vsel %vm2260_vm13, %v2154_v36, %v2292_v48  ;;  %vm2258_vm14 = vcmp.gt.f32.partialorder %v2146_v28, 0.0  ;;  %v2290_v12 = vmul.f32 %v2146_v28, %v5397_v20 }
 0x144   :  { %v1839_v14 = vsel %vm668_vm0, %v1720_v13, 0.0  ;;  %1837 = vadd.xlane.f32.xlu0 %v1836_v38  ;;  %v2352_v7 = vpack.c.bf16 %v2324_v25, %v2323_v18 }
 0x145   :  { %v3599_v55 = vpop.f32.mrf.mxu0  ;;  %1840 = vadd.xlane.f32.xlu1 %v1839_v14  ;;  %v2322_v58 = vsel %vm2258_vm14, %v2146_v28, %v2290_v12 }
 0x146   :  { %v1722_v29 = vpop.permute.xlu1 %1721  ;;  %v2167_v26 = vadd.f32 %v3599_v55, %v5387_v51  ;;  %v2351_v49 = vpack.c.bf16 %v2322_v58, %v2321_v33 }
 0x147   :  { %v1724_v9 = vpop.permute.xlu0 %1723  ;;  %v2158_v6 = vpop.f32.mrf.mxu0  ;;  %v1842_v60 = vsel %vm668_vm0, %v1722_v29, 0.0 }
 0x148   :  { %v1845_v52 = vsel %vm668_vm0, %v1724_v9, 0.0  ;;  %v2159_v3 = vadd.f32 %v5387_v51, %v2158_v6  ;;  %1843 = vadd.xlane.f32.xlu0 %v1842_v60  ;;  %vm2263_vm15 = vcmp.gt.f32.partialorder %v2167_v26, 0.0  ;;  %v2295_v45 = vmul.f32 %v2167_v26, %v5397_v20  ;;  %3641 = vmatprep.mubr.bf16.mxu1 %v2351_v49 }
 0x149   :  { %v3600_v39 = vpop.f32.mrf.mxu0  ;;  %1846 = vadd.xlane.f32.xlu1 %v1845_v52  ;;  %3642 = vmatmul.mubr.bf16.vlgmr.msra.gmra.mxu1 %v2352_v7 }
 0x14a   :  { %v1726_v36 = vpop.permute.xlu1 %1725  ;;  %vm2261_vm1 = vcmp.gt.f32.partialorder %v2159_v3, 0.0  ;;  %v2293_v13 = vmul.f32 %v2159_v3, %v5397_v20  ;;  %v2170_v21 = vadd.f32 %v3600_v39, %v5387_v51  ;;  %v2327_v12 = vsel %vm2263_vm15, %v2167_v26, %v2295_v45 }
 0x14b   :  { %v1728_v38 = vpop.permute.xlu0 %1727  ;;  %v1848_v14 = vsel %vm668_vm0, %v1726_v36, 0.0  ;;  %v2161_v48 = vpop.f32.mrf.mxu0 }
 0x14c   :  { %v1851_v28 = vsel %vm668_vm0, %v1728_v38, 0.0  ;;  %vm2264_vm2 = vcmp.gt.f32.partialorder %v2170_v21, 0.0  ;;  %v2296_v18 = vmul.f32 %v2170_v21, %v5397_v20  ;;  %v2162_v55 = vadd.f32 %v5387_v51, %v2161_v48  ;;  %1849 = vadd.xlane.f32.xlu0 %v1848_v14 }
 0x14d   :  { %1852 = vadd.xlane.f32.xlu1 %v1851_v28  ;;  %v2325_v25 = vsel %vm2261_vm1, %v2159_v3, %v2293_v13 }
 0x14e   :  { %v3603_v29 = vpop.f32.mrf.mxu0  ;;  %v1730_v33 = vpop.permute.xlu1 %1729  ;;  %vm2262_vm3 = vcmp.gt.f32.partialorder %v2162_v55, 0.0  ;;  %v2294_v9 = vmul.f32 %v2162_v55, %v5397_v20  ;;  %v2328_v39 = vsel %vm2264_vm2, %v2170_v21, %v2296_v18 }
 0x14f   :  { %v2183_v6 = vadd.f32 %v3603_v29, %v5387_v51  ;;  %v1732_v60 = vpop.permute.xlu0 %1731  ;;  %v1854_v52 = vsel %vm668_vm0, %v1730_v33, 0.0  ;;  %v2354_v13 = vpack.c.bf16 %v2328_v39, %v2327_v12 }
 0x150   :  { %v2174_v58 = vpop.f32.mrf.mxu0  ;;  %v1857_v7 = vsel %vm668_vm0, %v1732_v60, 0.0  ;;  %v2326_v36 = vsel %vm2262_vm3, %v2162_v55, %v2294_v9  ;;  %1855 = vadd.xlane.f32.xlu0 %v1854_v52 }
 0x151   :  { %v2175_v49 = vadd.f32 %v5387_v51, %v2174_v58  ;;  %vm2267_vm4 = vcmp.gt.f32.partialorder %v2183_v6, 0.0  ;;  %v2299_v26 = vmul.f32 %v2183_v6, %v5397_v20  ;;  %v2353_v45 = vpack.c.bf16 %v2326_v36, %v2325_v25  ;;  %1858 = vadd.xlane.f32.xlu1 %v1857_v7 }
 0x152   :  { %v3604_v3 = vpop.f32.mrf.mxu0  ;;  %v1734_v38 = vpop.permute.xlu1 %1733 }
 0x153   :  { %vm2265_vm5 = vcmp.gt.f32.partialorder %v2175_v49, 0.0  ;;  %v2297_v14 = vmul.f32 %v2175_v49, %v5397_v20  ;;  %v2186_v48 = vadd.f32 %v3604_v3, %v5387_v51  ;;  %v1860_v21 = vsel %vm668_vm0, %v1734_v38, 0.0  ;;  %3645 = vmatprep.mubr.bf16.mxu1 %v2353_v45 }
 0x154   :  { %v2177_v28 = vpop.f32.mrf.mxu0  ;;  %3646 = vmatmul.mubr.bf16.gmra.mxu1 %v2354_v13  ;;  %1861 = vadd.xlane.f32.xlu0 %v1860_v21  ;;  %v2331_v25 = vsel %vm2267_vm4, %v2183_v6, %v2299_v26 }
 0x155   :  { %vm2268_vm6 = vcmp.gt.f32.partialorder %v2186_v48, 0.0  ;;  %v2300_v18 = vmul.f32 %v2186_v48, %v5397_v20  ;;  %v2178_v55 = vadd.f32 %v5387_v51, %v2177_v28  ;;  %v2329_v33 = vsel %vm2265_vm5, %v2175_v49, %v2297_v14 }
 0x156   :  { %v3607_v29 = vpop.f32.mrf.mxu0 }
 0x157   :  { %vm2266_vm7 = vcmp.gt.f32.partialorder %v2178_v55, 0.0  ;;  %v2298_v12 = vmul.f32 %v2178_v55, %v5397_v20  ;;  %v2199_v9 = vadd.f32 %v3607_v29, %v5387_v51  ;;  %v2332_v60 = vsel %vm2268_vm6, %v2186_v48, %v2300_v18 }
 0x158   :  { %v2190_v52 = vpop.f32.mrf.mxu0  ;;  %v2356_v7 = vpack.c.bf16 %v2332_v60, %v2331_v25 }
 0x159   :  { %v2191_v58 = vadd.f32 %v5387_v51, %v2190_v52  ;;  %v2330_v39 = vsel %vm2266_vm7, %v2178_v55, %v2298_v12  ;;  %v2303_v36 = vmul.f32 %v2199_v9, %v5397_v20  ;;  %vm2271_vm8 = vcmp.gt.f32.partialorder %v2199_v9, 0.0 }
 0x15a   :  { %v3608_v3 = vpop.f32.mrf.mxu0  ;;  %v2355_v45 = vpack.c.bf16 %v2330_v39, %v2329_v33 }
 0x15b   :  { %vm2269_vm9 = vcmp.gt.f32.partialorder %v2191_v58, 0.0  ;;  %v2301_v49 = vmul.f32 %v2191_v58, %v5397_v20  ;;  %v2202_v6 = vadd.f32 %v3608_v3, %v5387_v51  ;;  %v2335_v21 = vsel %vm2271_vm8, %v2199_v9, %v2303_v36 }
 0x15c   :  { %v2193_v26 = vpop.f32.mrf.mxu0  ;;  %3649 = vmatprep.mubr.bf16.mxu1 %v2355_v45 }
 0x15d   :  { %vm2272_vm10 = vcmp.gt.f32.partialorder %v2202_v6, 0.0  ;;  %v2304_v13 = vmul.f32 %v2202_v6, %v5397_v20  ;;  %v2194_v38 = vadd.f32 %v5387_v51, %v2193_v26  ;;  %3650 = vmatmul.mubr.bf16.gmra.mxu1 %v2356_v7  ;;  %v2333_v48 = vsel %vm2269_vm9, %v2191_v58, %v2301_v49 }
 0x15e   :  { %v3611_v14 = vpop.f32.mrf.mxu0 }
 0x15f   :  { %vm2270_vm11 = vcmp.gt.f32.partialorder %v2194_v38, 0.0  ;;  %v2302_v28 = vmul.f32 %v2194_v38, %v5397_v20  ;;  %v2215_v18 = vadd.f32 %v3611_v14, %v5387_v51  ;;  %v2336_v55 = vsel %vm2272_vm10, %v2202_v6, %v2304_v13 }
 0x160   :  { %v2206_v29 = vpop.f32.mrf.mxu0  ;;  %v2358_v12 = vpack.c.bf16 %v2336_v55, %v2335_v21 }
 0x161   :  { %v2207_v33 = vadd.f32 %v5387_v51, %v2206_v29  ;;  %v2334_v25 = vsel %vm2270_vm11, %v2194_v38, %v2302_v28  ;;  %v2307_v60 = vmul.f32 %v2215_v18, %v5397_v20  ;;  %vm2275_vm12 = vcmp.gt.f32.partialorder %v2215_v18, 0.0  ;;  %v6988_v38 = vld [vmem:[#allocation21_spill] sm:$0xff] }
 0x162   :  { %v3612_v52 = vpop.f32.mrf.mxu0  ;;  %v2357_v39 = vpack.c.bf16 %v2334_v25, %v2333_v48  ;;  %2558 = vrot.lane.b32.xlu1 %v4422_v15, %s3858_s12 }
 0x163   :  { %vm2273_vm13 = vcmp.gt.f32.partialorder %v2207_v33, 0.0  ;;  %v2305_v58 = vmul.f32 %v2207_v33, %v5397_v20  ;;  %v2218_v9 = vadd.f32 %v3612_v52, %v5387_v51  ;;  %v2339_v6 = vsel %vm2275_vm12, %v2215_v18, %v2307_v60  ;;  %v6989_v60 = vld [vmem:[#allocation22_spill] sm:$0xff]  ;;  %v6990_v52 = vld [vmem:[#allocation20_spill] sm:$0xff] }
 0x164   :  { %v2209_v7 = vpop.f32.mrf.mxu0  ;;  %3653 = vmatprep.mubr.bf16.mxu1 %v2357_v39 }
 0x165   :  { %vm2276_vm14 = vcmp.gt.f32.partialorder %v2218_v9, 0.0  ;;  %v2308_v36 = vmul.f32 %v2218_v9, %v5397_v20  ;;  %v2210_v3 = vadd.f32 %v5387_v51, %v2209_v7  ;;  %3654 = vmatmul.mubr.bf16.gmra.mxu1 %v2358_v12  ;;  %v2337_v49 = vsel %vm2273_vm13, %v2207_v33, %v2305_v58 }
 0x166   :  { %v3615_v45 = vpop.f32.mrf.mxu0  ;;  %2562 = vrot.lane.b32.xlu1 %v6988_v38, %s3858_s12 }
 0x167   :  { %vm2274_vm15 = vcmp.gt.f32.partialorder %v2210_v3, 0.0  ;;  %v2306_v26 = vmul.f32 %v2210_v3, %v5397_v20  ;;  %v2231_v13 = vadd.f32 %v3615_v45, %v5387_v51  ;;  %v2340_v14 = vsel %vm2276_vm14, %v2218_v9, %v2308_v36 }
 0x168   :  { %v2222_v48 = vpop.f32.mrf.mxu0  ;;  %v2360_v55 = vpack.c.bf16 %v2340_v14, %v2339_v6 }
 0x169   :  { %v2223_v21 = vadd.f32 %v5387_v51, %v2222_v48  ;;  %v2338_v28 = vsel %vm2274_vm15, %v2210_v3, %v2306_v26  ;;  %v2311_v29 = vmul.f32 %v2231_v13, %v5397_v20  ;;  %vm2279_vm1 = vcmp.gt.f32.partialorder %v2231_v13, 0.0 }
 0x16a   :  { %v3616_v25 = vpop.f32.mrf.mxu0  ;;  %v2359_v12 = vpack.c.bf16 %v2338_v28, %v2337_v49  ;;  %2564 = vrot.lane.b32.xlu1 %v6989_v60, %s3858_s12  ;;  %2560 = vrot.lane.b32.xlu0 %v6990_v52, %s3858_s12 }
 0x16b   :  { %vm2277_vm2 = vcmp.gt.f32.partialorder %v2223_v21, 0.0  ;;  %v2309_v18 = vmul.f32 %v2223_v21, %v5397_v20  ;;  %v2234_v33 = vadd.f32 %v3616_v25, %v5387_v51  ;;  %v2343_v3 = vsel %vm2279_vm1, %v2231_v13, %v2311_v29 }
 0x16c   :  { %v2225_v39 = vpop.f32.mrf.mxu0  ;;  %3657 = vmatprep.mubr.bf16.mxu1 %v2359_v12 }
 0x16d   :  { %vm2280_vm3 = vcmp.gt.f32.partialorder %v2234_v33, 0.0  ;;  %v2312_v58 = vmul.f32 %v2234_v33, %v5397_v20  ;;  %v2226_v9 = vadd.f32 %v5387_v51, %v2225_v39  ;;  %3658 = vmatmul.mubr.bf16.gmra.mxu1 %v2360_v55  ;;  %v2341_v36 = vsel %vm2277_vm2, %v2223_v21, %v2309_v18 }
 0x16e   :  { %v3619_v7 = vpop.f32.mrf.mxu0  ;;  %2568 = vrot.lane.b32.xlu1 %v4447_v50, %s3858_s12  ;;  %2566 = vrot.lane.b32.xlu0 %v4445_v41, %s3858_s12 }
 0x16f   :  { %vm2278_vm4 = vcmp.gt.f32.partialorder %v2226_v9, 0.0  ;;  %v2310_v45 = vmul.f32 %v2226_v9, %v5397_v20  ;;  %v2247_v49 = vadd.f32 %v3619_v7, %v5387_v51  ;;  %v2344_v6 = vsel %vm2280_vm3, %v2234_v33, %v2312_v58 }
 0x170   :  { %v2238_v26 = vpop.f32.mrf.mxu0  ;;  %v2362_v28 = vpack.c.bf16 %v2344_v6, %v2343_v3 }
 0x171   :  { %v2239_v14 = vadd.f32 %v5387_v51, %v2238_v26  ;;  %v2342_v48 = vsel %vm2278_vm4, %v2226_v9, %v2310_v45  ;;  %v2315_v21 = vmul.f32 %v2247_v49, %v5397_v20  ;;  %vm2283_vm5 = vcmp.gt.f32.partialorder %v2247_v49, 0.0  ;;  %v6992_v26 = vld [vmem:[#allocation25_spill] sm:$0xff] }
 0x172   :  { %v3620_v13 = vpop.f32.mrf.mxu0  ;;  %v2361_v55 = vpack.c.bf16 %v2342_v48, %v2341_v36  ;;  %2572 = vrot.lane.b32.xlu1 %v4462_v57, %s3858_s12  ;;  %2570 = vrot.lane.b32.xlu0 %v4460_v30, %s3858_s12  ;;  %v6991_v36 = vld [vmem:[#allocation23_spill] sm:$0xff]  ;;  %v6997_v48 = vld [vmem:[#allocation28_spill] sm:$0xff] }
 0x173   :  { %v2313_v29 = vmul.f32 %v2239_v14, %v5397_v20  ;;  %v2250_v25 = vadd.f32 %v3620_v13, %v5387_v51  ;;  %vm2281_vm6 = vcmp.gt.f32.partialorder %v2239_v14, 0.0  ;;  %v2347_v39 = vsel %vm2283_vm5, %v2247_v49, %v2315_v21  ;;  %v6995_v49 = vld [vmem:[#allocation26_spill] sm:$0xff]  ;;  %v7000_v13 = vld [vmem:[#allocation33_spill] sm:$0xff] }
 0x174   :  { %v2241_v12 = vpop.f32.mrf.mxu0  ;;  %3661 = vmatprep.mubr.bf16.mxu1 %v2361_v55  ;;  %v6999_v21 = vld [vmem:[#allocation30_spill] sm:$0xff]  ;;  %v7001_v55 = vld [vmem:[#allocation32_spill] sm:$0xff] }
 0x175   :  { %vm2284_vm7 = vcmp.gt.f32.partialorder %v2250_v25, 0.0  ;;  %v2316_v18 = vmul.f32 %v2250_v25, %v5397_v20  ;;  %v2242_v33 = vadd.f32 %v5387_v51, %v2241_v12  ;;  %3662 = vmatmul.mubr.bf16.gmra.mxu1 %v2362_v28  ;;  %v2345_v9 = vsel %vm2281_vm6, %v2239_v14, %v2313_v29  ;;  %v6993_v51 = vld [vmem:[#allocation24_spill] sm:$0xff]  ;;  %v6996_v14 = vld [vmem:[#allocation29_spill] sm:$0xff]  ;;  %v6998_v28 = vld [vmem:[#allocation31_spill] sm:$0xff] }
 0x176   :  { %2576 = vrot.lane.b32.xlu1 %v4512_v1, %s3858_s12  ;;  %2574 = vrot.lane.b32.xlu0 %v6991_v36, %s3858_s12  ;;  %v7002_v29 = vld [vmem:[#allocation35_spill] sm:$0xff]  ;;  %v7004_v12 = vld [vmem:[#allocation37_spill] sm:$0xff] }
 0x177   :  { %vm2282_vm8 = vcmp.gt.f32.partialorder %v2242_v33, 0.0  ;;  %v2314_v58 = vmul.f32 %v2242_v33, %v5397_v20  ;;  %v2348_v7 = vsel %vm2284_vm7, %v2250_v25, %v2316_v18  ;;  %v6994_v20 = vld [vmem:[#allocation27_spill] sm:$0xff]  ;;  %v7003_v25 = vld [vmem:[#allocation34_spill] sm:$0xff]  ;;  %v7005_v18 = vld [vmem:[#allocation36_spill] sm:$0xff] }
 0x178   :  { %v2364_v45 = vpack.c.bf16 %v2348_v7, %v2347_v39  ;;  %v7007_v39 = vld [vmem:[#allocation38_spill] sm:$0xff] }
 0x179   :  { %v2346_v3 = vsel %vm2282_vm8, %v2242_v33, %v2314_v58  ;;  %v7006_v33 = vld [vmem:[#allocation39_spill] sm:$0xff]  ;;  %v7008_v58 = vld [vmem:[#allocation41_spill] sm:$0xff] }
 0x17a   :  { %v2363_v6 = vpack.c.bf16 %v2346_v3, %v2345_v9  ;;  %2580 = vrot.lane.b32.xlu1 %v6992_v26, %s3858_s12  ;;  %2578 = vrot.lane.b32.xlu0 %v6993_v51, %s3858_s12  ;;  %v7009_v9 = vld [vmem:[#allocation40_spill] sm:$0xff]  ;;  %v7011_v3 = vld [vmem:[#allocation7_spill] sm:$0xff] }
 0x17c   :  { %3665 = vmatprep.mubr.bf16.mxu1 %v2363_v6 }
 0x17d   :  { %3666 = vmatmul.mubr.bf16.gmra.mxu1 %v2364_v45  ;;  %v7012_v45 = vld [vmem:[#allocation6_spill] sm:$0xff] }
 0x17e   :  { %2584 = vrot.lane.b32.xlu1 %v6994_v20, %s3858_s12  ;;  %2582 = vrot.lane.b32.xlu0 %v6995_v49, %s3858_s12 }
 0x182   :  { %2588 = vrot.lane.b32.xlu1 %v6996_v14, %s3858_s12  ;;  %2586 = vrot.lane.b32.xlu0 %v6997_v48, %s3858_s12 }
 0x186   :  { %2592 = vrot.lane.b32.xlu1 %v6998_v28, %s3858_s12  ;;  %2590 = vrot.lane.b32.xlu0 %v6999_v21, %s3858_s12 }
 0x18a   :  { %2596 = vrot.lane.b32.xlu1 %v7000_v13, %s3858_s12  ;;  %2594 = vrot.lane.b32.xlu0 %v7001_v55, %s3858_s12 }
 0x18e   :  { %2600 = vrot.lane.b32.xlu1 %v7002_v29, %s3858_s12  ;;  %2598 = vrot.lane.b32.xlu0 %v7003_v25, %s3858_s12  ;;  %v7016_v25 = vld [vmem:[#allocation8_spill] sm:$0xff] }
 0x192   :  { %2604 = vrot.lane.b32.xlu1 %v7004_v12, %s3858_s12  ;;  %2602 = vrot.lane.b32.xlu0 %v7005_v18, %s3858_s12 }
 0x196   :  { %2608 = vrot.lane.b32.xlu1 %v7006_v33, %s3858_s12  ;;  %2606 = vrot.lane.b32.xlu0 %v7007_v39, %s3858_s12  ;;  %v7015_v39 = vld [vmem:[#allocation9_spill] sm:$0xff] }
 0x19a   :  { %2612 = vrot.lane.b32.xlu1 %v7008_v58, %s3858_s12  ;;  %2610 = vrot.lane.b32.xlu0 %v7009_v9, %s3858_s12 }
 0x19d   :  { %v5675_v7 = vpop.xlane.xlu0 %1768 }
 0x19e   :  { %7010 = vst [vmem:[#allocation10_spill] sm:$0xff] %v5675_v7  ;;  %2616 = vrot.lane.b32.xlu1 %v7011_v3, %s3858_s12  ;;  %2614 = vrot.lane.b32.xlu0 %v7012_v45, %s3858_s12 }
 0x1a1   :  { %v5681_v6 = vpop.xlane.xlu0 %1774 }
 0x1a2   :  { %7013 = vst [vmem:[#allocation11_spill] sm:$0xff] %v5681_v6  ;;  %v5683_v18 = vpop.xlane.xlu1 %1771  ;;  %2620 = vrot.lane.b32.xlu1 %v7015_v39, %s3858_s12  ;;  %2618 = vrot.lane.b32.xlu0 %v7016_v25, %s3858_s12 }
 0x1a3   :  { %7014 = vst [vmem:[#allocation12_spill] sm:$0xff] %v5683_v18 }
 0x1a5   :  { %v5689_v58 = vpop.xlane.xlu0 %1777 }
 0x1a6   :  { %7017 = vst [vmem:[#allocation13_spill] sm:$0xff] %v5689_v58  ;;  %v5691_v9 = vpop.xlane.xlu1 %1780 }
 0x1a7   :  { %7018 = vst [vmem:[#allocation14_spill] sm:$0xff] %v5691_v9 }
 0x1a9   :  { %v5693_v7 = vpop.xlane.xlu0 %1783 }
 0x1aa   :  { %7019 = vst [vmem:[#allocation15_spill] sm:$0xff] %v5693_v7  ;;  %v5695_v3 = vpop.xlane.xlu1 %1786 }
 0x1ab   :  { %7020 = vst [vmem:[#allocation16_spill] sm:$0xff] %v5695_v3 }
 0x1ad   :  { %v5697_v55 = vpop.xlane.xlu0 %1789 }
 0x1ae   :  { %7021 = vst [vmem:[#allocation17_spill] sm:$0xff] %v5697_v55  ;;  %v5699_v45 = vpop.xlane.xlu1 %1792  ;;  %v5718_v55 = vld [vmem:[%s6802_s8] ss:$0 sm:$0xff] }
 0x1af   :  { %7022 = vst [vmem:[#allocation18_spill] sm:$0xff] %v5699_v45 }
 0x1b1   :  { %v5703_v18 = vpop.xlane.xlu0 %1795 }
 0x1b2   :  { %v5701_v6 = vpop.xlane.xlu1 %1798  ;;  %7024 = vst [vmem:[#allocation21_spill] sm:$0xff] %v5703_v18 }
 0x1b3   :  { %7023 = vst [vmem:[#allocation19_spill] sm:$0xff] %v5701_v6 }
 0x1b5   :  { %v5707_v33 = vpop.xlane.xlu0 %1801 }
 0x1b6   :  { %v5705_v39 = vpop.xlane.xlu1 %1804  ;;  %7026 = vst [vmem:[#allocation20_spill] sm:$0xff] %v5707_v33 }
 0x1b7   :  { %7025 = vst [vmem:[#allocation22_spill] sm:$0xff] %v5705_v39 }
 0x1b9   :  { %v5711_v58 = vpop.xlane.xlu0 %1807 }
 0x1ba   :  { %v5709_v25 = vpop.xlane.xlu1 %1810  ;;  %7028 = vst [vmem:[#allocation25_spill] sm:$0xff] %v5711_v58  ;;  %v3551_v45 = vpop.f32.mrf.mxu1 }
 0x1bb   :  { %7027 = vst [vmem:[#allocation23_spill] sm:$0xff] %v5709_v25  ;;  %v1105_v6 = vadd.f32 %v3551_v45, %v5718_v55 }
 0x1bc   :  { %v1096_v39 = vpop.f32.mrf.mxu1 }
 0x1bd   :  { %v5720_v3 = vpop.xlane.xlu0 %1813  ;;  %v1353_v33 = vmul.f32 %v5324_v32, %v1105_v6  ;;  %v1481_v25 = vmul.f32 %v1105_v6, %v1105_v6  ;;  %v1097_v58 = vadd.f32 %v5718_v55, %v1096_v39 }
 0x1be   :  { %v5713_v9 = vpop.xlane.xlu1 %1816  ;;  %7030 = vst [vmem:[#allocation27_spill] sm:$0xff] %v5720_v3  ;;  %v3552_v7 = vpop.f32.mrf.mxu1 }
 0x1bf   :  { %7029 = vst [vmem:[#allocation24_spill] sm:$0xff] %v5713_v9  ;;  %v1479_v9 = vmul.f32 %v1097_v58, %v1097_v58  ;;  %v1517_v21 = vsel %vm668_vm0, %v1481_v25, 0.0  ;;  %v1351_v12 = vmul.f32 %v5337_v8, %v1097_v58  ;;  %v1108_v48 = vadd.f32 %v3552_v7, %v5718_v55 }
 0x1c0   :  { %v1389_v3 = vsel %vm668_vm0, %v1353_v33, 0.0  ;;  %v1099_v45 = vpop.f32.mrf.mxu1 }
 0x1c1   :  { %v5731_v29 = vpop.xlane.xlu0 %1819  ;;  %1390 = vadd.xlane.f32.xlu0 %v1389_v3  ;;  %v1100_v32 = vadd.f32 %v5718_v55, %v1099_v45  ;;  %v1511_v8 = vsel %vm668_vm0, %v1479_v9, 0.0  ;;  %v1354_v58 = vmul.f32 %v5335_v34, %v1108_v48  ;;  %v1383_v33 = vsel %vm668_vm0, %v1351_v12, 0.0 }
 0x1c2   :  { %v5723_v18 = vpop.xlane.xlu1 %1822  ;;  %7032 = vst [vmem:[#allocation31_spill] sm:$0xff] %v5731_v29  ;;  %v3555_v39 = vpop.f32.mrf.mxu1  ;;  %v1482_v29 = vmul.f32 %v1108_v48, %v1108_v48 }
 0x1c3   :  { %7031 = vst [vmem:[#allocation29_spill] sm:$0xff] %v5723_v18  ;;  %v1352_v18 = vmul.f32 %v5351_v54, %v1100_v32  ;;  %v1121_v25 = vadd.f32 %v3555_v39, %v5718_v55  ;;  %v1392_v9 = vsel %vm668_vm0, %v1354_v58, 0.0  ;;  %v1480_v49 = vmul.f32 %v1100_v32, %v1100_v32 }
 0x1c5   :  { %1384 = vadd.xlane.f32.xlu0 %v1383_v33  ;;  %v5741_v3 = vpop.xlane.xlu0 %1825  ;;  %v1357_v45 = vmul.f32 %v5366_v42, %v1121_v25  ;;  %v1386_v54 = vsel %vm668_vm0, %v1352_v18, 0.0  ;;  %v1514_v32 = vsel %vm668_vm0, %v1480_v49, 0.0 }
 0x1c6   :  { %1518 = vadd.xlane.f32.xlu1 %v1517_v21  ;;  %v5734_v6 = vpop.xlane.xlu1 %1828  ;;  %v1112_v21 = vpop.f32.mrf.mxu1  ;;  %7034 = vst [vmem:[#allocation43_spill] sm:$0xff] %v5741_v3 }
 0x1c7   :  { %7033 = vst [vmem:[#allocation42_spill] sm:$0xff] %v5734_v6  ;;  %v1113_v12 = vadd.f32 %v5718_v55, %v1112_v21  ;;  %v1401_v33 = vsel %vm668_vm0, %v1357_v45, 0.0 }
 0x1c8   :  { %v3556_v7 = vpop.f32.mrf.mxu1 }
 0x1c9   :  { %1393 = vadd.xlane.f32.xlu0 %v1392_v9  ;;  %v1124_v3 = vadd.f32 %v3556_v7, %v5718_v55  ;;  %v5752_v18 = vpop.xlane.xlu0 %1831  ;;  %v1483_v9 = vmul.f32 %v1113_v12, %v1113_v12 }
 0x1ca   :  { %1512 = vadd.xlane.f32.xlu1 %v1511_v8  ;;  %v5744_v6 = vpop.xlane.xlu1 %1834  ;;  %v1115_v39 = vpop.f32.mrf.mxu1  ;;  %v1485_v8 = vmul.f32 %v1121_v25, %v1121_v25  ;;  %7036 = vst [vmem:[#allocation45_spill] sm:$0xff] %v5752_v18 }
 0x1cb   :  { %7035 = vst [vmem:[#allocation44_spill] sm:$0xff] %v5744_v6  ;;  %v1520_v6 = vsel %vm668_vm0, %v1482_v29, 0.0  ;;  %v1358_v21 = vmul.f32 %v5359_v63, %v1124_v3 }
 0x1cc   :  { %v3559_v34 = vpop.f32.mrf.mxu1  ;;  %v1529_v25 = vsel %vm668_vm0, %v1485_v8, 0.0  ;;  %v1116_v8 = vadd.f32 %v5718_v55, %v1115_v39 }
 0x1cd   :  { %1521 = vadd.xlane.f32.xlu0 %v1520_v6  ;;  %v5760_v29 = vpop.xlane.xlu0 %1837  ;;  %v1404_v63 = vsel %vm668_vm0, %v1358_v21, 0.0 }
 0x1ce   :  { %1387 = vadd.xlane.f32.xlu1 %v1386_v54  ;;  %v1128_v42 = vpop.f32.mrf.mxu1  ;;  %v5754_v48 = vpop.xlane.xlu1 %1840  ;;  %v1355_v54 = vmul.f32 %v5361_v62, %v1113_v12  ;;  %7038 = vst [vmem:[#allocation47_spill] sm:$0xff] %v5760_v29  ;;  %v1486_v62 = vmul.f32 %v1124_v3, %v1124_v3  ;;  %v1523_v12 = vsel %vm668_vm0, %v1483_v9, 0.0 }
 0x1cf   :  { %7037 = vst [vmem:[#allocation46_spill] sm:$0xff] %v5754_v48  ;;  %v1129_v21 = vadd.f32 %v5718_v55, %v1128_v42 }
 0x1d0   :  { %v3560_v58 = vpop.f32.mrf.mxu1  ;;  %v1395_v6 = vsel %vm668_vm0, %v1355_v54, 0.0 }
 0x1d1   :  { %1515 = vadd.xlane.f32.xlu0 %v1514_v32  ;;  %v1356_v32 = vmul.f32 %v5346_v56, %v1116_v8 }
 0x1d2   :  { %1402 = vadd.xlane.f32.xlu1 %v1401_v33  ;;  %v1131_v45 = vpop.f32.mrf.mxu1  ;;  %v1137_v33 = vadd.f32 %v3559_v34, %v5718_v55  ;;  %v5763_v48 = vpop.xlane.xlu1 %1846  ;;  %v1532_v34 = vsel %vm668_vm0, %v1486_v62, 0.0  ;;  %v1359_v62 = vmul.f32 %v5370_v43, %v1129_v21 }
 0x1d3   :  { %7039 = vst [vmem:[#allocation48_spill] sm:$0xff] %v5763_v48  ;;  %v5772_v48 = vpop.xlane.xlu0 %1843  ;;  %v1398_v56 = vsel %vm668_vm0, %v1356_v32, 0.0  ;;  %v1132_v43 = vadd.f32 %v5718_v55, %v1131_v45 }
 0x1d4   :  { %7040 = vst [vmem:[#allocation49_spill] sm:$0xff] %v5772_v48  ;;  %v1489_v54 = vmul.f32 %v1137_v33, %v1137_v33 }
 0x1d5   :  { %1405 = vadd.xlane.f32.xlu0 %v1404_v63  ;;  %v1484_v63 = vmul.f32 %v1116_v8, %v1116_v8 }
 0x1d6   :  { %1530 = vadd.xlane.f32.xlu1 %v1529_v25  ;;  %v3563_v7 = vpop.f32.mrf.mxu1  ;;  %v1361_v25 = vmul.f32 %v5374_v44, %v1137_v33  ;;  %v5774_v3 = vpop.xlane.xlu1 %1852  ;;  %v1140_v44 = vadd.f32 %v3560_v58, %v5718_v55  ;;  %v1541_v33 = vsel %vm668_vm0, %v1489_v54, 0.0 }
 0x1d7   :  { %7041 = vst [vmem:[#allocation50_spill] sm:$0xff] %v5774_v3  ;;  %v1526_v8 = vsel %vm668_vm0, %v1484_v63, 0.0  ;;  %v1153_v32 = vadd.f32 %v3563_v7, %v5718_v55  ;;  %v1360_v7 = vmul.f32 %v5364_v47, %v1132_v43 }
 0x1d8   :  { %v1144_v18 = vpop.f32.mrf.mxu1  ;;  %v1362_v42 = vmul.f32 %v5368_v19, %v1140_v44 }
 0x1d9   :  { %1533 = vadd.xlane.f32.xlu0 %v1532_v34  ;;  %v1407_v34 = vsel %vm668_vm0, %v1359_v62, 0.0  ;;  %v1365_v63 = vmul.f32 %v5382_v17, %v1153_v32  ;;  %v1493_v62 = vmul.f32 %v1153_v32, %v1153_v32  ;;  %v1488_v17 = vmul.f32 %v1132_v43, %v1132_v43 }
 0x1da   :  { %1396 = vadd.xlane.f32.xlu1 %v1395_v6  ;;  %v3564_v49 = vpop.f32.mrf.mxu1  ;;  %v1413_v6 = vsel %vm668_vm0, %v1361_v25, 0.0  ;;  %v5783_v3 = vpop.xlane.xlu1 %1858  ;;  %v1487_v25 = vmul.f32 %v1129_v21, %v1129_v21  ;;  %v1410_v47 = vsel %vm668_vm0, %v1360_v7, 0.0 }
 0x1db   :  { %7043 = vst [vmem:[#allocation52_spill] sm:$0xff] %v5783_v3  ;;  %v1553_v32 = vsel %vm668_vm0, %v1493_v62, 0.0 }
 0x1dc   :  { %v1147_v39 = vpop.f32.mrf.mxu1  ;;  %v1535_v21 = vsel %vm668_vm0, %v1487_v25, 0.0  ;;  %v1156_v25 = vadd.f32 %v3564_v49, %v5718_v55 }
 0x1dd   :  { %1399 = vadd.xlane.f32.xlu0 %v1398_v56  ;;  %v1416_v56 = vsel %vm668_vm0, %v1362_v42, 0.0 }
 0x1de   :  { %1524 = vadd.xlane.f32.xlu1 %v1523_v12  ;;  %v3567_v9 = vpop.f32.mrf.mxu1  ;;  %v5781_v12 = vpop.xlane.xlu0 %1849 }
 0x1df   :  { %7042 = vst [vmem:[#allocation51_spill] sm:$0xff] %v5781_v12  ;;  %v5794_v54 = vpop.permute.xlu1 %2558  ;;  %v1169_v7 = vadd.f32 %v3567_v9, %v5718_v55 }
 0x1e0   :  { %v1160_v58 = vpop.f32.mrf.mxu1 }
 0x1e1   :  { %1527 = vadd.xlane.f32.xlu0 %v1526_v8 }
 0x1e2   :  { %1414 = vadd.xlane.f32.xlu1 %v1413_v6  ;;  %v1490_v6 = vmul.f32 %v1140_v44, %v1140_v44  ;;  %v5792_v3 = vpop.xlane.xlu0 %1855  ;;  %v3568_v19 = vpop.f32.mrf.mxu1 }
 0x1e3   :  { %7044 = vst [vmem:[#allocation53_spill] sm:$0xff] %v5792_v3  ;;  %v5805_v8 = vpop.permute.xlu1 %2562 }
 0x1e4   :  { %v1544_v44 = vsel %vm668_vm0, %v1490_v6, 0.0  ;;  %v5800_v45 = vpop.f32.mrf.mxu1 }
 0x1e5   :  { %1417 = vadd.xlane.f32.xlu0 %v1416_v56 }
 0x1e6   :  { %1542 = vadd.xlane.f32.xlu1 %v1541_v33  ;;  %v1145_v33 = vadd.f32 %v5718_v55, %v1144_v18  ;;  %v5803_v42 = vpop.xlane.xlu0 %1861  ;;  %v1366_v18 = vmul.f32 %v5376_v5, %v1156_v25 }
 0x1e7   :  { %7045 = vst [vmem:[#allocation54_spill] sm:$0xff] %v5803_v42  ;;  %v3571_v6 = vpop.f32.mrf.mxu1 }
 0x1e8   :  { %v1363_v56 = vmul.f32 %v5378_v4, %v1145_v33  ;;  %v1491_v43 = vmul.f32 %v1145_v33, %v1145_v33  ;;  %v1148_v4 = vadd.f32 %v5718_v55, %v1147_v39  ;;  %v1428_v5 = vsel %vm668_vm0, %v1366_v18, 0.0 }
 0x1e9   :  { %1545 = vadd.xlane.f32.xlu0 %v1544_v44  ;;  %v1176_v49 = vpop.f32.mrf.mxu1  ;;  %v1161_v18 = vadd.f32 %v5718_v55, %v1160_v58 }
 0x1ea   :  { %1408 = vadd.xlane.f32.xlu1 %v1407_v34  ;;  %v1425_v34 = vsel %vm668_vm0, %v1365_v63, 0.0  ;;  %v5814_v44 = vpop.permute.xlu0 %2560  ;;  %v5816_v63 = vpop.permute.xlu1 %2564  ;;  %v1547_v33 = vsel %vm668_vm0, %v1491_v43, 0.0  ;;  %v1364_v9 = vmul.f32 %v5372_v53, %v1148_v4 }
 0x1eb   :  { %v3572_v62 = vpop.f32.mrf.mxu1 }
 0x1ed   :  { %1411 = vadd.xlane.f32.xlu0 %v1410_v47  ;;  %v1494_v47 = vmul.f32 %v1156_v25, %v1156_v25  ;;  %v1179_v39 = vpop.f32.mrf.mxu1 }
 0x1ee   :  { %1536 = vadd.xlane.f32.xlu1 %v1535_v21  ;;  %v1538_v21 = vsel %vm668_vm0, %v1488_v17, 0.0  ;;  %v1369_v17 = vmul.f32 %v5403_v46, %v1169_v7  ;;  %v5825_v42 = vpop.permute.xlu1 %2568  ;;  %v1172_v46 = vadd.f32 %v3568_v19, %v5718_v55 }
 0x1ef   :  { %v1556_v25 = vsel %vm668_vm0, %v1494_v47, 0.0  ;;  %v3575_v53 = vpop.f32.mrf.mxu1  ;;  %v1367_v47 = vmul.f32 %v5391_v37, %v1161_v18  ;;  %v1164_v37 = vadd.f32 %v5718_v55, %v5800_v45 }
 0x1f0   :  { %v1370_v58 = vmul.f32 %v5389_v61, %v1172_v46 }
 0x1f1   :  { %1539 = vadd.xlane.f32.xlu0 %v1538_v21  ;;  %v1437_v21 = vsel %vm668_vm0, %v1369_v17, 0.0  ;;  %v1192_v19 = vpop.f32.mrf.mxu1  ;;  %v1495_v17 = vmul.f32 %v1161_v18, %v1161_v18 }
 0x1f2   :  { %1426 = vadd.xlane.f32.xlu1 %v1425_v34  ;;  %v1419_v34 = vsel %vm668_vm0, %v1363_v56, 0.0  ;;  %v1497_v56 = vmul.f32 %v1169_v7, %v1169_v7  ;;  %v5836_v43 = vpop.permute.xlu1 %2572  ;;  %v1440_v61 = vsel %vm668_vm0, %v1370_v58, 0.0  ;;  %v1177_v58 = vadd.f32 %v5718_v55, %v1176_v49 }
 0x1f3   :  { %v1559_v18 = vsel %vm668_vm0, %v1495_v17, 0.0 }
 0x1f4   :  { %v1565_v7 = vsel %vm668_vm0, %v1497_v56, 0.0  ;;  %v3576_v56 = vpop.f32.mrf.mxu1 }
 0x1f5   :  { %1429 = vadd.xlane.f32.xlu0 %v1428_v5  ;;  %v1422_v5 = vsel %vm668_vm0, %v1364_v9, 0.0 }
 0x1f6   :  { %1554 = vadd.xlane.f32.xlu1 %v1553_v32  ;;  %v5823_v32 = vpop.permute.xlu0 %2566  ;;  %v1195_v45 = vpop.f32.mrf.mxu1 }
 0x1f9   :  { %1557 = vadd.xlane.f32.xlu0 %v1556_v25  ;;  %v5845_v25 = vpop.permute.xlu1 %2576  ;;  %v3579_v17 = vpop.f32.mrf.mxu1 }
 0x1fa   :  { %1420 = vadd.xlane.f32.xlu1 %v1419_v34  ;;  %v1492_v34 = vmul.f32 %v1148_v4, %v1148_v4  ;;  %v5834_v3 = vpop.permute.xlu0 %2570 }
 0x1fc   :  { %v1550_v4 = vsel %vm668_vm0, %v1492_v34, 0.0 }
 0x1fd   :  { %1423 = vadd.xlane.f32.xlu0 %v1422_v5  ;;  %v1498_v5 = vmul.f32 %v1172_v46, %v1172_v46  ;;  %v5857_v46 = vpop.permute.xlu1 %2580 }
 0x1fe   :  { %1548 = vadd.xlane.f32.xlu1 %v1547_v33  ;;  %v1185_v33 = vadd.f32 %v3571_v6, %v5718_v55  ;;  %v5843_v9 = vpop.permute.xlu0 %2574  ;;  %v1368_v6 = vmul.f32 %v5380_v27, %v1164_v37 }
 0x200   :  { %v1373_v34 = vmul.f32 %v5421_v10, %v1185_v33  ;;  %v1188_v10 = vadd.f32 %v3572_v62, %v5718_v55  ;;  %v1434_v27 = vsel %vm668_vm0, %v1368_v6, 0.0  ;;  %v1208_v62 = vpop.f32.mrf.mxu1  ;;  %v1201_v6 = vadd.f32 %v3575_v53, %v5718_v55 }
 0x201   :  { %1551 = vadd.xlane.f32.xlu0 %v1550_v4  ;;  %v5866_v12 = vpop.permute.xlu1 %2584 }
 0x202   :  { %1438 = vadd.xlane.f32.xlu1 %v1437_v21  ;;  %v1431_v21 = vsel %vm668_vm0, %v1367_v47, 0.0  ;;  %v5855_v4 = vpop.permute.xlu0 %2578  ;;  %v1501_v47 = vmul.f32 %v1185_v33, %v1185_v33  ;;  %v1374_v49 = vmul.f32 %v5409_v22, %v1188_v10  ;;  %v3580_v22 = vpop.f32.mrf.mxu1 }
 0x204   :  { %v1577_v33 = vsel %vm668_vm0, %v1501_v47, 0.0 }
 0x205   :  { %1441 = vadd.xlane.f32.xlu0 %v1440_v61  ;;  %v1496_v61 = vmul.f32 %v1164_v37, %v1164_v37  ;;  %v5877_v47 = vpop.permute.xlu1 %2588 }
 0x206   :  { %1566 = vadd.xlane.f32.xlu1 %v1565_v7  ;;  %v1568_v7 = vsel %vm668_vm0, %v1498_v5, 0.0  ;;  %v1371_v5 = vmul.f32 %v5413_v31, %v1177_v58  ;;  %v1180_v31 = vadd.f32 %v5718_v55, %v1179_v39  ;;  %v5883_v39 = vpop.f32.mrf.mxu1 }
 0x207   :  { %v1562_v37 = vsel %vm668_vm0, %v1496_v61, 0.0  ;;  %v1377_v61 = vmul.f32 %v5440_v35, %v1201_v6 }
 0x208   :  { %v1372_v53 = vmul.f32 %v5400_v2, %v1180_v31  ;;  %v1500_v35 = vmul.f32 %v1180_v31, %v1180_v31 }
 0x209   :  { %1569 = vadd.xlane.f32.xlu0 %v1568_v7  ;;  %v1443_v7 = vsel %vm668_vm0, %v1371_v5, 0.0  ;;  %v1505_v5 = vmul.f32 %v1201_v6, %v1201_v6 }
 0x20a   :  { %1432 = vadd.xlane.f32.xlu1 %v1431_v21  ;;  %v1449_v21 = vsel %vm668_vm0, %v1373_v34, 0.0  ;;  %v1499_v34 = vmul.f32 %v1177_v58, %v1177_v58  ;;  %v1446_v2 = vsel %vm668_vm0, %v1372_v53, 0.0  ;;  %v1217_v53 = vadd.f32 %v3579_v17, %v5718_v55 }
 0x20b   :  { %v1589_v6 = vsel %vm668_vm0, %v1505_v5, 0.0  ;;  %v1196_v5 = vadd.f32 %v5718_v55, %v1195_v45 }
 0x20c   :  { %v1571_v58 = vsel %vm668_vm0, %v1499_v34, 0.0  ;;  %v1204_v34 = vadd.f32 %v3576_v56, %v5718_v55 }
 0x20d   :  { %1435 = vadd.xlane.f32.xlu0 %v1434_v27  ;;  %v1452_v27 = vsel %vm668_vm0, %v1374_v49, 0.0 }
 0x20e   :  { %1560 = vadd.xlane.f32.xlu1 %v1559_v18  ;;  %v5864_v18 = vpop.permute.xlu0 %2582 }
 0x211   :  { %1563 = vadd.xlane.f32.xlu0 %v1562_v37  ;;  %v5888_v37 = vpop.permute.xlu1 %2592 }
 0x212   :  { %1450 = vadd.xlane.f32.xlu1 %v1449_v21  ;;  %v1502_v21 = vmul.f32 %v1188_v10, %v1188_v10  ;;  %v5875_v48 = vpop.permute.xlu0 %2586 }
 0x214   :  { %v1580_v10 = vsel %vm668_vm0, %v1502_v21, 0.0 }
 0x215   :  { %1453 = vadd.xlane.f32.xlu0 %v1452_v27  ;;  %v5892_v27 = vpop.f32.mrf.mxu1  ;;  %v5903_v56 = vpop.permute.xlu1 %2596 }
 0x216   :  { %1578 = vadd.xlane.f32.xlu1 %v1577_v33  ;;  %v1193_v33 = vadd.f32 %v5718_v55, %v1192_v19  ;;  %v5886_v49 = vpop.permute.xlu0 %2590  ;;  %v1378_v19 = vmul.f32 %v5425_v23, %v1204_v34 }
 0x218   :  { %v1375_v21 = vmul.f32 %v5430_v40, %v1193_v33  ;;  %v1506_v40 = vmul.f32 %v1204_v34, %v1204_v34 }
 0x219   :  { %1581 = vadd.xlane.f32.xlu0 %v1580_v10  ;;  %v1503_v10 = vmul.f32 %v1193_v33, %v1193_v33  ;;  %v1376_v33 = vmul.f32 %v5417_v11, %v1196_v5 }
 0x21a   :  { %1444 = vadd.xlane.f32.xlu1 %v1443_v7  ;;  %v1461_v7 = vsel %vm668_vm0, %v1377_v61, 0.0  ;;  %v1574_v61 = vsel %vm668_vm0, %v1500_v35, 0.0  ;;  %v5901_v31 = vpop.permute.xlu0 %2594  ;;  %v1381_v35 = vmul.f32 %v5458_v24, %v1217_v53  ;;  %v1592_v45 = vsel %vm668_vm0, %v1506_v40, 0.0 }
 0x21b   :  { %v1583_v17 = vsel %vm668_vm0, %v1503_v10, 0.0  ;;  %v1458_v11 = vsel %vm668_vm0, %v1376_v33, 0.0 }
 0x21c   :  { %v1473_v24 = vsel %vm668_vm0, %v1381_v35, 0.0 }
 0x21d   :  { %1447 = vadd.xlane.f32.xlu0 %v1446_v2  ;;  %v3639_v2 = vpop.f32.mrf.mxu0 }
 0x21e   :  { %1572 = vadd.xlane.f32.xlu1 %v1571_v58  ;;  %v5898_v58 = vpop.f32.mrf.mxu1  ;;  %v5912_v29 = vpop.permute.xlu0 %2598 }
 0x21f   :  { %7046 = vst [vmem:[#allocation55_spill] sm:$0xff] %v5912_v29  ;;  %v2399_v34 = vpop.f32.mrf.mxu0  ;;  %v1220_v29 = vadd.f32 %v3580_v22, %v5718_v55 }
 0x220   :  { %v5908_v23 = vpop.f32.mrf.mxu1 }
 0x221   :  { %1575 = vadd.xlane.f32.xlu0 %v1574_v61  ;;  %v5914_v61 = vpop.permute.xlu1 %2600 }
 0x222   :  { %1462 = vadd.xlane.f32.xlu1 %v1461_v7  ;;  %v1455_v7 = vsel %vm668_vm0, %v1375_v21, 0.0  ;;  %7047 = vst [vmem:[#allocation56_spill] sm:$0xff] %v5914_v61  ;;  %v5918_v21 = vpop.f32.mrf.mxu1  ;;  %v3640_v61 = vpop.f32.mrf.mxu0 }
 0x224   :  { %v3647_v13 = vpop.f32.mrf.mxu1  ;;  %v2402_v35 = vpop.f32.mrf.mxu0 }
 0x225   :  { %v5925_v10 = vpop.permute.xlu1 %2604  ;;  %v5934_v33 = vadd.f32 %v5718_v55, %v2402_v35 }
 0x226   :  { %1590 = vadd.xlane.f32.xlu1 %v1589_v6  ;;  %v1464_v6 = vsel %vm668_vm0, %v1378_v19, 0.0  ;;  %v1209_v19 = vadd.f32 %v5718_v55, %v1208_v62  ;;  %7048 = vst [vmem:[#allocation57_spill] sm:$0xff] %v5925_v10  ;;  %v1382_v62 = vmul.f32 %v5445_v0, %v1220_v29  ;;  %v1510_v10 = vmul.f32 %v1220_v29, %v1220_v29 }
 0x227   :  { %1465 = vadd.xlane.f32.xlu0 %v1464_v6  ;;  %v1504_v6 = vmul.f32 %v1196_v5, %v1196_v5  ;;  %v2431_v5 = vpop.f32.mrf.mxu1 }
 0x228   :  { %v1379_v40 = vmul.f32 %v5450_v16, %v1209_v19  ;;  %v1212_v16 = vadd.f32 %v5718_v55, %v5883_v39  ;;  %v1604_v35 = vsel %vm668_vm0, %v1510_v10, 0.0 }
 0x229   :  { %v1586_v22 = vsel %vm668_vm0, %v1504_v6, 0.0  ;;  %v5943_v0 = vpop.f32.mrf.mxu1  ;;  %v1476_v6 = vsel %vm668_vm0, %v1382_v62, 0.0 }
 0x22a   :  { %1456 = vadd.xlane.f32.xlu1 %v1455_v7  ;;  %v1509_v7 = vmul.f32 %v1217_v53, %v1217_v53 }
 0x22b   :  { %1593 = vadd.xlane.f32.xlu0 %v1592_v45  ;;  %v1507_v45 = vmul.f32 %v1209_v19, %v1209_v19  ;;  %v2655_v19 = vmul.f32 %v5814_v44, %v5934_v33  ;;  %v5954_v39 = vpop.f32.mrf.mxu1 }
 0x22c   :  { %v1601_v53 = vsel %vm668_vm0, %v1509_v7, 0.0 }
 0x22d   :  { %v1595_v29 = vsel %vm668_vm0, %v1507_v45, 0.0  ;;  %v2689_v45 = vsel %vm668_vm0, %v2655_v19, 0.0 }
 0x22e   :  { %1584 = vadd.xlane.f32.xlu1 %v1583_v17  ;;  %v5927_v17 = vpop.permute.xlu0 %2602 }
 0x22f   :  { %1459 = vadd.xlane.f32.xlu0 %v1458_v11  ;;  %v1467_v11 = vsel %vm668_vm0, %v1379_v40, 0.0  ;;  %v1380_v40 = vmul.f32 %v5435_v59, %v1212_v16  ;;  %v1508_v59 = vmul.f32 %v1212_v16, %v1212_v16 }
 0x231   :  { %v1470_v10 = vsel %vm668_vm0, %v1380_v40, 0.0 }
 0x232   :  { %1474 = vadd.xlane.f32.xlu1 %v1473_v24  ;;  %v5936_v24 = vpop.permute.xlu1 %2608  ;;  %v5941_v7 = vpop.permute.xlu0 %2606 }
 0x233   :  { %1587 = vadd.xlane.f32.xlu0 %v1586_v22 }
 0x236   :  { %1602 = vadd.xlane.f32.xlu1 %v1601_v53  ;;  %v5950_v53 = vadd.f32 %v5892_v27, %v5718_v55  ;;  %v5957_v22 = vpop.permute.xlu1 %2612  ;;  %v5959_v62 = vpop.permute.xlu0 %2610  ;;  %v5965_v27 = vadd.f32 %v5718_v55, %v5898_v58 }
 0x237   :  { %1477 = vadd.xlane.f32.xlu0 %v1476_v6  ;;  %v3651_v6 = vpop.f32.mrf.mxu1 }
 0x238   :  { %v2660_v44 = vmul.f32 %v5834_v3, %v5950_v53  ;;  %v5975_v3 = vadd.f32 %v3647_v13, %v5718_v55 }
 0x239   :  { %v2447_v40 = vpop.f32.mrf.mxu1 }
 0x23a   :  { %1468 = vadd.xlane.f32.xlu1 %v1467_v11  ;;  %v5969_v11 = vadd.f32 %v3639_v2, %v5718_v55  ;;  %v2704_v58 = vsel %vm668_vm0, %v2660_v44, 0.0  ;;  %v5983_v2 = vadd.f32 %v5718_v55, %v2399_v34  ;;  %v5985_v19 = vpop.permute.xlu0 %2614  ;;  %v2664_v13 = vmul.f32 %v5855_v4, %v5975_v3 }
 0x23b   :  { %1605 = vadd.xlane.f32.xlu0 %v1604_v35  ;;  %v5977_v35 = vpop.permute.xlu1 %2616  ;;  %v5997_v34 = vadd.f32 %v3640_v61, %v5718_v55 }
 0x23c   :  { %v2656_v16 = vmul.f32 %v5805_v8, %v5969_v11  ;;  %v2654_v8 = vmul.f32 %v5794_v54, %v5983_v2  ;;  %v2716_v54 = vsel %vm668_vm0, %v2664_v13, 0.0  ;;  %v6024_v13 = vadd.f32 %v5718_v55, %v2447_v40 }
 0x23d   :  { %v2657_v61 = vmul.f32 %v5816_v63, %v5997_v34 }
 0x23e   :  { %1596 = vadd.xlane.f32.xlu1 %v1595_v29  ;;  %v2658_v29 = vmul.f32 %v5823_v32, %v5965_v27  ;;  %v5991_v32 = vadd.f32 %v5718_v55, %v2431_v5  ;;  %v6007_v5 = vadd.f32 %v3651_v6, %v5718_v55  ;;  %v2666_v40 = vmul.f32 %v5864_v18, %v6024_v13 }
 0x23f   :  { %1471 = vadd.xlane.f32.xlu0 %v1470_v10  ;;  %v3652_v10 = vpop.f32.mrf.mxu1 }
 0x240   :  { %v2698_v44 = vsel %vm668_vm0, %v2658_v29, 0.0  ;;  %v2662_v4 = vmul.f32 %v5843_v9, %v5991_v32  ;;  %v6014_v29 = vadd.f32 %v5908_v23, %v5718_v55  ;;  %v2668_v6 = vmul.f32 %v5875_v48, %v6007_v5 }
 0x242   :  { %2690 = vadd.xlane.f32.xlu1 %v2689_v45  ;;  %v1598_v45 = vsel %vm668_vm0, %v1508_v59, 0.0  ;;  %v6000_v59 = vpop.permute.xlu1 %2620  ;;  %v2710_v63 = vsel %vm668_vm0, %v2662_v4, 0.0  ;;  %v2661_v23 = vmul.f32 %v5836_v43, %v6014_v29  ;;  %v2728_v43 = vsel %vm668_vm0, %v2668_v6, 0.0 }
 0x243   :  { %1599 = vadd.xlane.f32.xlu0 %v1598_v45  ;;  %v6002_v45 = vpop.permute.xlu0 %2618 }
 0x246   :  { %2705 = vadd.xlane.f32.xlu1 %v2704_v58  ;;  %v2692_v58 = vsel %vm668_vm0, %v2656_v16, 0.0  ;;  %v2450_v16 = vpop.f32.mrf.mxu1 }
 0x247   :  { %2693 = vadd.xlane.f32.xlu0 %v2692_v58 }
 0x24a   :  { %2699 = vadd.xlane.f32.xlu1 %v2698_v44  ;;  %v2686_v44 = vsel %vm668_vm0, %v2654_v8, 0.0  ;;  %v6019_v9 = vpop.xlane.xlu0 %1390  ;;  %v3655_v8 = vpop.f32.mrf.mxu1 }
 0x24b   :  { %2687 = vadd.xlane.f32.xlu0 %v2686_v44  ;;  %7049 = vst [vmem:[#allocation58_spill] sm:$0xff] %v6019_v9  ;;  %v2695_v44 = vsel %vm668_vm0, %v2657_v61, 0.0  ;;  %v6041_v4 = vadd.f32 %v3655_v8, %v5718_v55 }
 0x24c   :  { %v2463_v61 = vpop.f32.mrf.mxu1 }
 0x24d   :  { %v2672_v8 = vmul.f32 %v5901_v31, %v6041_v4  ;;  %v6058_v6 = vadd.f32 %v5718_v55, %v2463_v61  ;;  %v6078_v61 = vadd.f32 %v3652_v10, %v5718_v55 }
 0x24e   :  { %2717 = vadd.xlane.f32.xlu1 %v2716_v54  ;;  %v6031_v54 = vadd.f32 %v5718_v55, %v5918_v21  ;;  %v6036_v48 = vpop.xlane.xlu0 %1384  ;;  %v3656_v10 = vpop.f32.mrf.mxu1 }
 0x24f   :  { %v6017_v58 = vpop.xlane.xlu1 %1518  ;;  %2696 = vadd.xlane.f32.xlu0 %v2695_v44  ;;  %7050 = vst [vmem:[#allocation59_spill] sm:$0xff] %v6036_v48  ;;  %v2707_v44 = vsel %vm668_vm0, %v2661_v23, 0.0  ;;  %v2670_v31 = vmul.f32 %v5886_v49, %v6058_v6  ;;  %v2669_v49 = vmul.f32 %v5877_v47, %v6078_v61 }
 0x250   :  { %v2659_v21 = vmul.f32 %v5825_v42, %v6031_v54  ;;  %v2722_v42 = vsel %vm668_vm0, %v2666_v40, 0.0  ;;  %v2740_v40 = vsel %vm668_vm0, %v2672_v8, 0.0  ;;  %v6089_v8 = vadd.f32 %v5718_v55, %v2450_v16 }
 0x251   :  { %v2731_v47 = vsel %vm668_vm0, %v2669_v49, 0.0 }
 0x252   :  { %2711 = vadd.xlane.f32.xlu1 %v2710_v63  ;;  %v6048_v63 = vadd.f32 %v5943_v0, %v5718_v55  ;;  %v6053_v18 = vpop.xlane.xlu0 %1393  ;;  %v2701_v23 = vsel %vm668_vm0, %v2659_v21, 0.0 }
 0x253   :  { %v6034_v9 = vpop.xlane.xlu1 %1512  ;;  %2708 = vadd.xlane.f32.xlu0 %v2707_v44  ;;  %7051 = vst [vmem:[#allocation60_spill] sm:$0xff] %v6053_v18 }
 0x254   :  { %v2665_v0 = vmul.f32 %v5857_v46, %v6048_v63 }
 0x256   :  { %2729 = vadd.xlane.f32.xlu1 %v2728_v43  ;;  %v6065_v43 = vadd.f32 %v5718_v55, %v5954_v39  ;;  %v6070_v18 = vpop.xlane.xlu0 %1521  ;;  %v2719_v39 = vsel %vm668_vm0, %v2665_v0, 0.0 }
 0x257   :  { %v6051_v48 = vpop.xlane.xlu1 %1387  ;;  %2702 = vadd.xlane.f32.xlu0 %v2701_v23  ;;  %v2734_v23 = vsel %vm668_vm0, %v2670_v31, 0.0  ;;  %v6099_v31 = vadd.f32 %v3656_v10, %v5718_v55 }
 0x258   :  { %v2663_v46 = vmul.f32 %v5845_v25, %v6065_v43 }
 0x25a   :  { %2723 = vadd.xlane.f32.xlu1 %v2722_v42  ;;  %v6083_v42 = vpop.xlane.xlu0 %1515  ;;  %v2713_v25 = vsel %vm668_vm0, %v2663_v46, 0.0  ;;  %v2673_v46 = vmul.f32 %v5903_v56, %v6099_v31 }
 0x25b   :  { %v6068_v44 = vpop.xlane.xlu1 %1402  ;;  %2720 = vadd.xlane.f32.xlu0 %v2719_v39  ;;  %v2667_v39 = vmul.f32 %v5866_v12, %v6089_v8 }
 0x25c   :  { %7052 = vst [vmem:[#allocation61_spill] sm:$0xff] %v6068_v44  ;;  %v2466_v44 = vpop.f32.mrf.mxu1 }
 0x25e   :  { %2741 = vadd.xlane.f32.xlu1 %v2740_v40  ;;  %v6094_v0 = vpop.xlane.xlu0 %1405 }
 0x25f   :  { %v6081_v21 = vpop.xlane.xlu1 %1530  ;;  %2714 = vadd.xlane.f32.xlu0 %v2713_v25  ;;  %7054 = vst [vmem:[#allocation63_spill] sm:$0xff] %v6094_v0  ;;  %v6109_v25 = vadd.f32 %v5718_v55, %v2466_v44  ;;  %v2725_v0 = vsel %vm668_vm0, %v2667_v39, 0.0 }
 0x261   :  { %v2671_v49 = vmul.f32 %v5888_v37, %v6109_v25  ;;  %v2912_v37 = vmul.f32 %v6988_v38, %v6988_v38 }
 0x262   :  { %2735 = vadd.xlane.f32.xlu1 %v2734_v23  ;;  %v6104_v23 = vpop.xlane.xlu0 %1533 }
 0x263   :  { %v6092_v40 = vpop.xlane.xlu1 %1396  ;;  %2732 = vadd.xlane.f32.xlu0 %v2731_v47  ;;  %v2743_v47 = vsel %vm668_vm0, %v2673_v46, 0.0  ;;  %v2737_v44 = vsel %vm668_vm0, %v2671_v49, 0.0  ;;  %v2913_v46 = vmul.f32 %v6989_v60, %v6989_v60 }
 0x264   :  { %7053 = vst [vmem:[#allocation62_spill] sm:$0xff] %v6092_v40  ;;  %v2910_v40 = vmul.f32 %v4422_v15, %v4422_v15 }
 0x266   :  { %v6114_v10 = vpop.xlane.xlu0 %1399 }
 0x267   :  { %v6102_v16 = vpop.xlane.xlu1 %1524  ;;  %2726 = vadd.xlane.f32.xlu0 %v2725_v0 }
 0x26a   :  { %v6123_v55 = vpop.xlane.xlu0 %1527 }
 0x26b   :  { %v6112_v12 = vpop.xlane.xlu1 %1414  ;;  %2744 = vadd.xlane.f32.xlu0 %v2743_v47 }
 0x26c   :  { %7055 = vst [vmem:[#allocation64_spill] sm:$0xff] %v6112_v12 }
 0x26e   :  { %v6131_v39 = vpop.xlane.xlu0 %1417 }
 0x26f   :  { %v6121_v56 = vpop.xlane.xlu1 %1542  ;;  %2738 = vadd.xlane.f32.xlu0 %v2737_v44  ;;  %7057 = vst [vmem:[#allocation66_spill] sm:$0xff] %v6131_v39 }
 0x272   :  { %v6138_v47 = vpop.xlane.xlu0 %1545 }
 0x273   :  { %2974 = vrot.lane.b32.xlu1 %v2910_v40, %s3858_s12  ;;  %v6127_v0 = vpop.xlane.xlu1 %1408  ;;  %v2915_v40 = vmul.f32 %v4447_v50, %v4447_v50  ;;  %v2911_v50 = vmul.f32 %v6990_v52, %v6990_v52  ;;  %v2923_v52 = vmul.f32 %v6994_v20, %v6994_v20  ;;  %v2918_v20 = vmul.f32 %v6991_v36, %v6991_v36 }
 0x274   :  { %7056 = vst [vmem:[#allocation65_spill] sm:$0xff] %v6127_v0 }
 0x276   :  { %v6145_v44 = vpop.xlane.xlu0 %1411 }
 0x277   :  { %2978 = vrot.lane.b32.xlu1 %v2912_v37, %s3858_s12  ;;  %v6134_v15 = vpop.xlane.xlu1 %1536  ;;  %7059 = vst [vmem:[#allocation68_spill] sm:$0xff] %v6145_v44  ;;  %v2917_v37 = vmul.f32 %v4462_v57, %v4462_v57  ;;  %v2921_v57 = vmul.f32 %v6992_v26, %v6992_v26  ;;  %v2916_v26 = vmul.f32 %v4460_v30, %v4460_v30 }
 0x278   :  { %v2927_v30 = vmul.f32 %v6998_v28, %v6998_v28 }
 0x27a   :  { %v6152_v39 = vpop.xlane.xlu0 %1539 }
 0x27b   :  { %2980 = vrot.lane.b32.xlu1 %v2913_v46, %s3858_s12  ;;  %v6141_v49 = vpop.xlane.xlu1 %1426  ;;  %v2919_v46 = vmul.f32 %v4512_v1, %v4512_v1 }
 0x27c   :  { %7058 = vst [vmem:[#allocation67_spill] sm:$0xff] %v6141_v49 }
 0x27e   :  { %v6159_v49 = vpop.xlane.xlu0 %1429 }
 0x27f   :  { %2984 = vrot.lane.b32.xlu1 %v2915_v40, %s3858_s12  ;;  %v6148_v38 = vpop.xlane.xlu1 %1554  ;;  %7061 = vst [vmem:[#allocation70_spill] sm:$0xff] %v6159_v49  ;;  %v7074_v49 = vld [vmem:[#allocation28_spill] sm:$0xff] }
 0x282   :  { %v6168_v12 = vpop.xlane.xlu0 %1557 }
 0x283   :  { %2988 = vrot.lane.b32.xlu1 %v2917_v37, %s3858_s12  ;;  %v6155_v60 = vpop.xlane.xlu1 %1420  ;;  %v2914_v37 = vmul.f32 %v4445_v41, %v4445_v41  ;;  %v2925_v41 = vmul.f32 %v6996_v14, %v6996_v14  ;;  %v2920_v14 = vmul.f32 %v6993_v51, %v6993_v51 }
 0x284   :  { %7060 = vst [vmem:[#allocation69_spill] sm:$0xff] %v6155_v60  ;;  %v7084_v60 = vld [vmem:[#allocation41_spill] sm:$0xff] }
 0x285   :  { %2976 = vrot.lane.b32.xlu0 %v2911_v50, %s3858_s12 }
 0x287   :  { %2992 = vrot.lane.b32.xlu1 %v2919_v46, %s3858_s12  ;;  %v6164_v40 = vpop.xlane.xlu1 %1548  ;;  %v6178_v46 = vpop.xlane.xlu0 %1423 }
 0x288   :  { %7063 = vst [vmem:[#allocation72_spill] sm:$0xff] %v6178_v46  ;;  %v7076_v46 = vld [vmem:[#allocation37_spill] sm:$0xff] }
 0x289   :  { %2982 = vrot.lane.b32.xlu0 %v2914_v37, %s3858_s12 }
 0x28b   :  { %2996 = vrot.lane.b32.xlu1 %v2921_v57, %s3858_s12  ;;  %v6174_v1 = vpop.xlane.xlu1 %1438  ;;  %v6188_v57 = vpop.xlane.xlu0 %1551 }
 0x28c   :  { %7062 = vst [vmem:[#allocation71_spill] sm:$0xff] %v6174_v1  ;;  %v7068_v1 = vld [vmem:[#allocation33_spill] sm:$0xff] }
 0x28d   :  { %2986 = vrot.lane.b32.xlu0 %v2916_v26, %s3858_s12  ;;  %v2929_v36 = vmul.f32 %v7068_v1, %v7068_v1  ;;  %v2924_v1 = vmul.f32 %v7074_v49, %v7074_v49 }
 0x28f   :  { %3000 = vrot.lane.b32.xlu1 %v2923_v52, %s3858_s12  ;;  %v6184_v50 = vpop.xlane.xlu1 %1566  ;;  %v6198_v52 = vpop.xlane.xlu0 %1441 }
 0x290   :  { %7064 = vst [vmem:[#allocation73_spill] sm:$0xff] %v6184_v50  ;;  %7066 = vst [vmem:[#allocation75_spill] sm:$0xff] %v6198_v52  ;;  %v7072_v52 = vld [vmem:[#allocation35_spill] sm:$0xff] }
 0x291   :  { %2990 = vrot.lane.b32.xlu0 %v2918_v20, %s3858_s12  ;;  %v2931_v51 = vmul.f32 %v7072_v52, %v7072_v52 }
 0x293   :  { %3004 = vrot.lane.b32.xlu1 %v2925_v41, %s3858_s12  ;;  %v6194_v37 = vpop.xlane.xlu1 %1432  ;;  %v6208_v41 = vpop.xlane.xlu0 %1569 }
 0x294   :  { %7065 = vst [vmem:[#allocation74_spill] sm:$0xff] %v6194_v37  ;;  %7069 = vst [vmem:[#allocation33_spill] sm:$0xff] %v6208_v41  ;;  %v7070_v37 = vld [vmem:[#allocation26_spill] sm:$0xff] }
 0x295   :  { %2994 = vrot.lane.b32.xlu0 %v2920_v14, %s3858_s12  ;;  %v2922_v28 = vmul.f32 %v7070_v37, %v7070_v37  ;;  %v2933_v37 = vmul.f32 %v7076_v46, %v7076_v46 }
 0x297   :  { %3008 = vrot.lane.b32.xlu1 %v2927_v30, %s3858_s12  ;;  %v6204_v26 = vpop.xlane.xlu1 %1560  ;;  %v6218_v30 = vpop.xlane.xlu0 %1435 }
 0x298   :  { %7067 = vst [vmem:[#allocation76_spill] sm:$0xff] %v6204_v26  ;;  %7073 = vst [vmem:[#allocation35_spill] sm:$0xff] %v6218_v30  ;;  %v7080_v30 = vld [vmem:[#allocation39_spill] sm:$0xff] }
 0x299   :  { %2998 = vrot.lane.b32.xlu0 %v2922_v28, %s3858_s12  ;;  %v2935_v49 = vmul.f32 %v7080_v30, %v7080_v30 }
 0x29b   :  { %3012 = vrot.lane.b32.xlu1 %v2929_v36, %s3858_s12  ;;  %v6214_v20 = vpop.xlane.xlu1 %1450  ;;  %v6228_v36 = vpop.xlane.xlu0 %1563 }
 0x29c   :  { %7071 = vst [vmem:[#allocation26_spill] sm:$0xff] %v6214_v20  ;;  %7077 = vst [vmem:[#allocation37_spill] sm:$0xff] %v6228_v36  ;;  %v7078_v20 = vld [vmem:[#allocation30_spill] sm:$0xff] }
 0x29d   :  { %3002 = vrot.lane.b32.xlu0 %v2924_v1, %s3858_s12  ;;  %v2926_v52 = vmul.f32 %v7078_v20, %v7078_v20  ;;  %v2937_v20 = vmul.f32 %v7084_v60, %v7084_v60 }
 0x29f   :  { %3016 = vrot.lane.b32.xlu1 %v2931_v51, %s3858_s12  ;;  %v6224_v14 = vpop.xlane.xlu1 %1578  ;;  %v6238_v51 = vpop.xlane.xlu0 %1453 }
 0x2a0   :  { %7075 = vst [vmem:[#allocation28_spill] sm:$0xff] %v6224_v14  ;;  %7081 = vst [vmem:[#allocation39_spill] sm:$0xff] %v6238_v51  ;;  %v7082_v14 = vld [vmem:[#allocation32_spill] sm:$0xff]  ;;  %v7088_v51 = vld [vmem:[#allocation7_spill] sm:$0xff] }
 0x2a1   :  { %3006 = vrot.lane.b32.xlu0 %v2926_v52, %s3858_s12  ;;  %v2928_v46 = vmul.f32 %v7082_v14, %v7082_v14  ;;  %v2939_v14 = vmul.f32 %v7088_v51, %v7088_v51 }
 0x2a3   :  { %3020 = vrot.lane.b32.xlu1 %v2933_v37, %s3858_s12  ;;  %v6234_v28 = vpop.xlane.xlu1 %1444  ;;  %v6248_v37 = vpop.xlane.xlu0 %1581 }
 0x2a4   :  { %7079 = vst [vmem:[#allocation30_spill] sm:$0xff] %v6234_v28  ;;  %7085 = vst [vmem:[#allocation41_spill] sm:$0xff] %v6248_v37  ;;  %v7086_v28 = vld [vmem:[#allocation34_spill] sm:$0xff] }
 0x2a5   :  { %3010 = vrot.lane.b32.xlu0 %v2928_v46, %s3858_s12  ;;  %v2930_v30 = vmul.f32 %v7086_v28, %v7086_v28  ;;  %v7093_v28 = vld [vmem:[#allocation38_spill] sm:$0xff] }
 0x2a7   :  { %3024 = vrot.lane.b32.xlu1 %v2935_v49, %s3858_s12  ;;  %v6244_v1 = vpop.xlane.xlu1 %1572  ;;  %v6258_v49 = vpop.xlane.xlu0 %1447 }
 0x2a8   :  { %7083 = vst [vmem:[#allocation32_spill] sm:$0xff] %v6244_v1  ;;  %7089 = vst [vmem:[#allocation7_spill] sm:$0xff] %v6258_v49  ;;  %v7090_v1 = vld [vmem:[#allocation36_spill] sm:$0xff] }
 0x2a9   :  { %3014 = vrot.lane.b32.xlu0 %v2930_v30, %s3858_s12  ;;  %v2932_v60 = vmul.f32 %v7090_v1, %v7090_v1  ;;  %v7096_v30 = vld [vmem:[#allocation40_spill] sm:$0xff] }
 0x2aa   :  { %v2936_v1 = vmul.f32 %v7096_v30, %v7096_v30 }
 0x2ab   :  { %3028 = vrot.lane.b32.xlu1 %v2937_v20, %s3858_s12  ;;  %v6254_v52 = vpop.xlane.xlu1 %1462  ;;  %v6266_v37 = vpop.xlane.xlu0 %1575  ;;  %v2934_v20 = vmul.f32 %v7093_v28, %v7093_v28 }
 0x2ac   :  { %7087 = vst [vmem:[#allocation34_spill] sm:$0xff] %v6254_v52  ;;  %7092 = vst [vmem:[#allocation77_spill] sm:$0xff] %v6266_v37 }
 0x2ad   :  { %3018 = vrot.lane.b32.xlu0 %v2932_v60, %s3858_s12 }
 0x2af   :  { %3032 = vrot.lane.b32.xlu1 %v2939_v14, %s3858_s12  ;;  %v6264_v46 = vpop.xlane.xlu1 %1590 }
 0x2b0   :  { %7091 = vst [vmem:[#allocation36_spill] sm:$0xff] %v6264_v46  ;;  %v6273_v51 = vpop.xlane.xlu0 %1465  ;;  %v7099_v46 = vld [vmem:[#allocation6_spill] sm:$0xff] }
 0x2b1   :  { %7095 = vst [vmem:[#allocation78_spill] sm:$0xff] %v6273_v51  ;;  %3022 = vrot.lane.b32.xlu0 %v2934_v20, %s3858_s12  ;;  %v2938_v60 = vmul.f32 %v7099_v46, %v7099_v46  ;;  %v7102_v51 = vld [vmem:[#allocation8_spill] sm:$0xff] }
 0x2b2   :  { %v2940_v20 = vmul.f32 %v7102_v51, %v7102_v51  ;;  %v2782_v51 = vmul.f32 %v5983_v2, %v5983_v2 }
 0x2b3   :  { %v6271_v52 = vpop.xlane.xlu1 %1456 }
 0x2b4   :  { %7094 = vst [vmem:[#allocation38_spill] sm:$0xff] %v6271_v52  ;;  %v6280_v14 = vpop.xlane.xlu0 %1593 }
 0x2b5   :  { %7098 = vst [vmem:[#allocation79_spill] sm:$0xff] %v6280_v14  ;;  %3026 = vrot.lane.b32.xlu0 %v2936_v1, %s3858_s12 }
 0x2b7   :  { %v6278_v49 = vpop.xlane.xlu1 %1584 }
 0x2b8   :  { %7097 = vst [vmem:[#allocation40_spill] sm:$0xff] %v6278_v49  ;;  %v6287_v28 = vpop.xlane.xlu0 %1459 }
 0x2b9   :  { %7101 = vst [vmem:[#allocation80_spill] sm:$0xff] %v6287_v28  ;;  %3030 = vrot.lane.b32.xlu0 %v2938_v60, %s3858_s12 }
 0x2bb   :  { %v6285_v37 = vpop.xlane.xlu1 %1474 }
 0x2bc   :  { %7100 = vst [vmem:[#allocation6_spill] sm:$0xff] %v6285_v37  ;;  %v6294_v30 = vpop.xlane.xlu0 %1587 }
 0x2bd   :  { %7104 = vst [vmem:[#allocation81_spill] sm:$0xff] %v6294_v30  ;;  %3034 = vrot.lane.b32.xlu0 %v2940_v20, %s3858_s12  ;;  %v2814_v20 = vsel %vm668_vm0, %v2782_v51, 0.0 }
 0x2bf   :  { %v6292_v52 = vpop.xlane.xlu1 %1602 }
 0x2c0   :  { %7103 = vst [vmem:[#allocation8_spill] sm:$0xff] %v6292_v52  ;;  %v6299_v1 = vpop.xlane.xlu0 %1477 }
 0x2c1   :  { %7106 = vst [vmem:[#allocation83_spill] sm:$0xff] %v6299_v1 }
 0x2c3   :  { %v6297_v14 = vpop.xlane.xlu1 %1468 }
 0x2c4   :  { %7105 = vst [vmem:[#allocation82_spill] sm:$0xff] %v6297_v14  ;;  %v6303_v37 = vpop.xlane.xlu0 %1605 }
 0x2c5   :  { %7108 = vst [vmem:[#allocation85_spill] sm:$0xff] %v6303_v37 }
 0x2c7   :  { %v6301_v46 = vpop.xlane.xlu1 %1596 }
 0x2c8   :  { %7107 = vst [vmem:[#allocation84_spill] sm:$0xff] %v6301_v46  ;;  %v6307_v60 = vpop.xlane.xlu0 %1471 }
 0x2c9   :  { %7109 = vst [vmem:[#allocation86_spill] sm:$0xff] %v6307_v60  ;;  %v2783_v60 = vmul.f32 %v5934_v33, %v5934_v33 }
 0x2cb   :  { %v6305_v28 = vpop.xlane.xlu1 %2690  ;;  %v2817_v51 = vsel %vm668_vm0, %v2783_v60, 0.0 }
 0x2cc   :  { %v6313_v30 = vpop.xlane.xlu0 %1599 }
 0x2cd   :  { %7110 = vst [vmem:[#allocation87_spill] sm:$0xff] %v6313_v30 }
 0x2cf   :  { %v6311_v52 = vpop.xlane.xlu1 %2705 }
 0x2d0   :  { %v6318_v1 = vpop.xlane.xlu0 %2693 }
 0x2d3   :  { %2815 = vadd.xlane.f32.xlu1 %v2814_v20  ;;  %v6316_v14 = vpop.xlane.xlu1 %2699 }
 0x2d4   :  { %v6322_v37 = vpop.xlane.xlu0 %2687 }
 0x2d7   :  { %v6320_v46 = vpop.xlane.xlu1 %2717 }
 0x2d8   :  { %7111 = vst [vmem:[#allocation88_spill] sm:$0xff] %v6320_v46  ;;  %v6328_v2 = vpop.xlane.xlu0 %2696 }
 0x2db   :  { %v6326_v49 = vpop.xlane.xlu1 %2711 }
 0x2dc   :  { %7112 = vst [vmem:[#allocation89_spill] sm:$0xff] %v6326_v49  ;;  %2818 = vadd.xlane.f32.xlu0 %v2817_v51  ;;  %v6333_v20 = vpop.xlane.xlu0 %2708 }
 0x2dd   :  { %7114 = vst [vmem:[#allocation91_spill] sm:$0xff] %v6333_v20 }
 0x2df   :  { %v6330_v41 = vpop.xlane.xlu1 %2729 }
 0x2e0   :  { %7113 = vst [vmem:[#allocation90_spill] sm:$0xff] %v6330_v41  ;;  %v6337_v50 = vpop.xlane.xlu0 %2702 }
 0x2e3   :  { %v6335_v30 = vpop.xlane.xlu1 %2723 }
 0x2e4   :  { %7115 = vst [vmem:[#allocation92_spill] sm:$0xff] %v6335_v30  ;;  %v6341_v36 = vpop.xlane.xlu0 %2720 }
 0x2e5   :  { %7117 = vst [vmem:[#allocation94_spill] sm:$0xff] %v6341_v36  ;;  %v7124_v36 = vld [vmem:[#allocation9_spill] sm:$0xff] }
 0x2e7   :  { %v6339_v46 = vpop.xlane.xlu1 %2741 }
 0x2e8   :  { %7116 = vst [vmem:[#allocation93_spill] sm:$0xff] %v6339_v46  ;;  %v6345_v49 = vpop.xlane.xlu0 %2714  ;;  %v2784_v46 = vmul.f32 %v5969_v11, %v5969_v11 }
 0x2e9   :  { %7119 = vst [vmem:[#allocation96_spill] sm:$0xff] %v6345_v49  ;;  %v2941_v49 = vmul.f32 %v7124_v36, %v7124_v36  ;;  %v2786_v36 = vmul.f32 %v5965_v27, %v5965_v27 }
 0x2eb   :  { %v6343_v33 = vpop.xlane.xlu1 %2735 }
 0x2ec   :  { %7118 = vst [vmem:[#allocation95_spill] sm:$0xff] %v6343_v33  ;;  %v6347_v26 = vpop.xlane.xlu0 %2732 }
 0x2ed   :  { %7120 = vst [vmem:[#allocation97_spill] sm:$0xff] %v6347_v26 }
 0x2ef   :  { %v2975_v44 = vpop.permute.xlu1 %2974 }
 0x2f0   :  { %v3070_v60 = vsel %vm668_vm0, %v2975_v44, 0.0  ;;  %v6350_v51 = vpop.xlane.xlu0 %2726  ;;  %v2820_v44 = vsel %vm668_vm0, %v2784_v46, 0.0 }
 0x2f1   :  { %3071 = vadd.xlane.f32.xlu0 %v3070_v60  ;;  %7121 = vst [vmem:[#allocation98_spill] sm:$0xff] %v6350_v51 }
 0x2f3   :  { %v2979_v26 = vpop.permute.xlu1 %2978 }
 0x2f4   :  { %v6352_v41 = vpop.xlane.xlu0 %2744  ;;  %v3076_v60 = vsel %vm668_vm0, %v2979_v26, 0.0 }
 0x2f5   :  { %7122 = vst [vmem:[#allocation99_spill] sm:$0xff] %v6352_v41  ;;  %v2785_v41 = vmul.f32 %v5997_v34, %v5997_v34 }
 0x2f7   :  { %v2823_v11 = vsel %vm668_vm0, %v2785_v41, 0.0  ;;  %v2788_v41 = vmul.f32 %v5950_v53, %v5950_v53  ;;  %v2792_v53 = vmul.f32 %v5975_v3, %v5975_v3 }
 0x2f8   :  { %v6354_v30 = vpop.xlane.xlu0 %2738 }
 0x2f9   :  { %7123 = vst [vmem:[#allocation100_spill] sm:$0xff] %v6354_v30  ;;  %v2981_v30 = vpop.permute.xlu1 %2980  ;;  %v2832_v27 = vsel %vm668_vm0, %v2788_v41, 0.0 }
 0x2fc   :  { %v2977_v20 = vpop.permute.xlu0 %2976 }
 0x2fd   :  { %v3073_v33 = vsel %vm668_vm0, %v2977_v20, 0.0  ;;  %v3079_v20 = vsel %vm668_vm0, %v2981_v30, 0.0  ;;  %v2787_v30 = vmul.f32 %v6031_v54, %v6031_v54 }
 0x2fe   :  { %3074 = vadd.xlane.f32.xlu1 %v3073_v33  ;;  %v2826_v33 = vsel %vm668_vm0, %v2786_v36, 0.0 }
 0x2ff   :  { %v2829_v36 = vsel %vm668_vm0, %v2787_v30, 0.0 }
 0x300   :  { %v2983_v46 = vpop.permute.xlu0 %2982 }
 0x301   :  { %v3082_v26 = vsel %vm668_vm0, %v2983_v46, 0.0 }
 0x302   :  { %2821 = vadd.xlane.f32.xlu1 %v2820_v44 }
 0x304   :  { %v2987_v44 = vpop.permute.xlu0 %2986 }
 0x306   :  { %3077 = vadd.xlane.f32.xlu1 %v3076_v60  ;;  %v2789_v60 = vmul.f32 %v6014_v29, %v6014_v29  ;;  %v2790_v29 = vmul.f32 %v5991_v32, %v5991_v32  ;;  %v2795_v32 = vmul.f32 %v6089_v8, %v6089_v8  ;;  %v2797_v8 = vmul.f32 %v6078_v61, %v6078_v61 }
 0x307   :  { %3036 = vrot.lane.b32.xlu0 %v2941_v49, %s3858_s12  ;;  %v2985_v49 = vpop.permute.xlu1 %2984  ;;  %v2799_v61 = vmul.f32 %v6109_v25, %v6109_v25 }
 0x308   :  { %v3085_v34 = vsel %vm668_vm0, %v2985_v49, 0.0  ;;  %v2835_v54 = vsel %vm668_vm0, %v2789_v60, 0.0  ;;  %v2844_v49 = vsel %vm668_vm0, %v2792_v53, 0.0  ;;  %v2991_v3 = vpop.permute.xlu0 %2990  ;;  %v2838_v41 = vsel %vm668_vm0, %v2790_v29, 0.0 }
 0x309   :  { %v2859_v29 = vsel %vm668_vm0, %v2797_v8, 0.0 }
 0x30a   :  { %2824 = vadd.xlane.f32.xlu1 %v2823_v11  ;;  %v2791_v11 = vmul.f32 %v6065_v43, %v6065_v43  ;;  %v2793_v43 = vmul.f32 %v6048_v63, %v6048_v63  ;;  %v3094_v63 = vsel %vm668_vm0, %v2991_v3, 0.0 }
 0x30c   :  { %v2841_v46 = vsel %vm668_vm0, %v2791_v11, 0.0  ;;  %v2847_v30 = vsel %vm668_vm0, %v2793_v43, 0.0  ;;  %v2995_v60 = vpop.permute.xlu0 %2994 }
 0x30d   :  { %v3100_v53 = vsel %vm668_vm0, %v2995_v60, 0.0 }
 0x30e   :  { %3080 = vadd.xlane.f32.xlu1 %v3079_v20  ;;  %v3088_v20 = vsel %vm668_vm0, %v2987_v44, 0.0 }
 0x312   :  { %2827 = vadd.xlane.f32.xlu1 %v2826_v33  ;;  %v2989_v33 = vpop.permute.xlu1 %2988 }
 0x316   :  { %3083 = vadd.xlane.f32.xlu1 %v3082_v26  ;;  %v3091_v26 = vsel %vm668_vm0, %v2989_v33, 0.0  ;;  %v2993_v44 = vpop.permute.xlu1 %2992 }
 0x317   :  { %v3097_v11 = vsel %vm668_vm0, %v2993_v44, 0.0  ;;  %v2801_v44 = vmul.f32 %v6099_v31, %v6099_v31 }
 0x31a   :  { %3086 = vadd.xlane.f32.xlu1 %v3085_v34  ;;  %v2794_v34 = vmul.f32 %v6024_v13, %v6024_v13  ;;  %v2796_v13 = vmul.f32 %v6007_v5, %v6007_v5  ;;  %v2798_v5 = vmul.f32 %v6058_v6, %v6058_v6 }
 0x31c   :  { %v2862_v3 = vsel %vm668_vm0, %v2798_v5, 0.0 }
 0x31e   :  { %2833 = vadd.xlane.f32.xlu1 %v2832_v27  ;;  %v2850_v27 = vsel %vm668_vm0, %v2794_v34, 0.0 }
 0x322   :  { %3089 = vadd.xlane.f32.xlu1 %v3088_v20  ;;  %v2853_v20 = vsel %vm668_vm0, %v2795_v32, 0.0 }
 0x326   :  { %2830 = vadd.xlane.f32.xlu0 %v2829_v36  ;;  %2836 = vadd.xlane.f32.xlu1 %v2835_v54  ;;  %v2999_v36 = vpop.permute.xlu0 %2998  ;;  %v2856_v54 = vsel %vm668_vm0, %v2796_v13, 0.0 }
 0x32a   :  { %2842 = vadd.xlane.f32.xlu0 %v2841_v46  ;;  %3092 = vadd.xlane.f32.xlu1 %v3091_v26  ;;  %v2997_v46 = vpop.permute.xlu1 %2996  ;;  %v3003_v43 = vpop.permute.xlu0 %3002 }
 0x32b   :  { %v3103_v33 = vsel %vm668_vm0, %v2997_v46, 0.0  ;;  %v3659_v26 = vpop.f32.mrf.mxu1  ;;  %v3112_v60 = vsel %vm668_vm0, %v3003_v43, 0.0 }
 0x32e   :  { %2845 = vadd.xlane.f32.xlu0 %v2844_v49  ;;  %2839 = vadd.xlane.f32.xlu1 %v2838_v41  ;;  %v3106_v49 = vsel %vm668_vm0, %v2999_v36, 0.0  ;;  %v3001_v34 = vpop.permute.xlu1 %3000  ;;  %v2479_v41 = vpop.f32.mrf.mxu1 }
 0x32f   :  { %v3007_v6 = vpop.permute.xlu0 %3006  ;;  %v3109_v32 = vsel %vm668_vm0, %v3001_v34, 0.0 }
 0x330   :  { %v3118_v43 = vsel %vm668_vm0, %v3007_v6, 0.0 }
 0x332   :  { %2848 = vadd.xlane.f32.xlu0 %v2847_v30  ;;  %3095 = vadd.xlane.f32.xlu1 %v3094_v63  ;;  %v2800_v30 = vmul.f32 %v6041_v4, %v6041_v4  ;;  %v2865_v63 = vsel %vm668_vm0, %v2799_v61, 0.0  ;;  %v3005_v25 = vpop.permute.xlu1 %3004  ;;  %v6429_v4 = vld [vmem:[%s6802_s8] ss:$0 sm:$0xff]  ;;  %s3860_s8 = smov [#allocation3]  }
 0x333   :  { %v3115_v31 = vsel %vm668_vm0, %v3005_v25, 0.0  ;;  %s3348_s29 = sshll.u32 %s3860_s8, 4  ;;  %s3349_s29 = int_to_ptr.vmem [resolvable:$true] %s3348_s29 }
 0x334   :  { %v2868_v13 = vsel %vm668_vm0, %v2800_v30, 0.0  ;;  %s3836_s30 = scalar_lea.vmem %s3349_s29, 16  ;;  %s3840_s1 = scalar_lea.vmem %s3349_s29, 32 }
 0x335   :  { %p3837_p0 = scmp.ne.s32.totalorder %s3349_s29, %s3836_s30  ;;  %p3841_p1 = scmp.lt.s32.totalorder %s3349_s29, %s3349_s29 }
 0x336   :  { %2851 = vadd.xlane.f32.xlu0 %v2850_v27  ;;  %3098 = vadd.xlane.f32.xlu1 %v3097_v11  ;;  %v3660_v27 = vpop.f32.mrf.mxu1  ;;  %v3011_v11 = vpop.permute.xlu0 %3010  ;;  %p3842_p2 = scmp.lt.s32.totalorder %s3840_s1, %s3836_s30 }
 0x337   :  { %v6453_v6 = vadd.f32 %v6429_v4, %v3660_v27 }
 0x338   :  { %v2482_v36 = vpop.f32.mrf.mxu1  ;;  %p3843_p3 = por %p3842_p2, %p3841_p1 }
 0x339   :  { %v6439_v46 = vadd.f32 %v6429_v4, %v2482_v36 }
 0x33a   :  { %2854 = vadd.xlane.f32.xlu0 %v2853_v20  ;;  %3101 = vadd.xlane.f32.xlu1 %v3100_v53  ;;  %v6432_v20 = vadd.f32 %v6429_v4, %v2479_v41  ;;  %v2871_v53 = vsel %vm668_vm0, %v2801_v44, 0.0  ;;  %v3663_v5 = vpop.f32.mrf.mxu1  ;;  %v3124_v44 = vsel %vm668_vm0, %v3011_v11, 0.0  ;;  %p3844_p4 = pnand %p3843_p3, %p3837_p0 }
 0x33c   :  { %v2802_v8 = vmul.f32 %v6432_v20, %v6432_v20 }
 0x33e   :  { %2857 = vadd.xlane.f32.xlu0 %v2856_v54  ;;  %3104 = vadd.xlane.f32.xlu1 %v3103_v33  ;;  %v3009_v54 = vpop.permute.xlu1 %3008  ;;  %v3015_v33 = vpop.permute.xlu0 %3014  ;;  %v2874_v61 = vsel %vm668_vm0, %v2802_v8, 0.0 }
 0x33f   :  { %v3121_v30 = vsel %vm668_vm0, %v3009_v54, 0.0 }
 0x342   :  { %2860 = vadd.xlane.f32.xlu0 %v2859_v29  ;;  %3107 = vadd.xlane.f32.xlu1 %v3106_v49  ;;  %v2803_v29 = vmul.f32 %v6439_v46, %v6439_v46  ;;  %v6446_v49 = vadd.f32 %v6429_v4, %v3659_v26  ;;  %v3013_v34 = vpop.permute.xlu1 %3012  ;;  %v2805_v26 = vmul.f32 %v6453_v6, %v6453_v6 }
 0x344   :  { %v2804_v41 = vmul.f32 %v6446_v49, %v6446_v49  ;;  %v2883_v54 = vsel %vm668_vm0, %v2805_v26, 0.0 }
 0x346   :  { %2863 = vadd.xlane.f32.xlu0 %v2862_v3  ;;  %3110 = vadd.xlane.f32.xlu1 %v3109_v32  ;;  %v2495_v3 = vpop.f32.mrf.mxu1  ;;  %v2877_v32 = vsel %vm668_vm0, %v2803_v29, 0.0 }
 0x347   :  { %v6460_v36 = vadd.f32 %v6429_v4, %v2495_v3 }
 0x348   :  { %v3664_v25 = vpop.f32.mrf.mxu1 }
 0x349   :  { %v2806_v27 = vmul.f32 %v6460_v36, %v6460_v36 }
 0x34a   :  { %2866 = vadd.xlane.f32.xlu0 %v2865_v63  ;;  %3113 = vadd.xlane.f32.xlu1 %v3112_v60  ;;  %v3019_v63 = vpop.permute.xlu0 %3018  ;;  %v2880_v60 = vsel %vm668_vm0, %v2804_v41, 0.0  ;;  %v2498_v8 = vpop.f32.mrf.mxu1 }
 0x34b   :  { %v6467_v11 = vadd.f32 %v6429_v4, %v2498_v8  ;;  %v2886_v3 = vsel %vm668_vm0, %v2806_v27, 0.0 }
 0x34e   :  { %2869 = vadd.xlane.f32.xlu0 %v2868_v13  ;;  %3116 = vadd.xlane.f32.xlu1 %v3115_v31  ;;  %v3017_v13 = vpop.permute.xlu1 %3016  ;;  %v3023_v31 = vpop.permute.xlu0 %3022 }
 0x34f   :  { %v3133_v26 = vsel %vm668_vm0, %v3017_v13, 0.0 }
 0x352   :  { %2872 = vadd.xlane.f32.xlu0 %v2871_v53  ;;  %3119 = vadd.xlane.f32.xlu1 %v3118_v43  ;;  %v3127_v53 = vsel %vm668_vm0, %v3013_v34, 0.0  ;;  %v3021_v29 = vpop.permute.xlu1 %3020  ;;  %v2807_v43 = vmul.f32 %v6467_v11, %v6467_v11  ;;  %v3027_v41 = vpop.permute.xlu0 %3026  ;;  %v6474_v34 = vadd.f32 %v6429_v4, %v3663_v5 }
 0x356   :  { %2875 = vadd.xlane.f32.xlu0 %v2874_v61  ;;  %3122 = vadd.xlane.f32.xlu1 %v3121_v30  ;;  %v3130_v61 = vsel %vm668_vm0, %v3015_v33, 0.0  ;;  %v3667_v30 = vpop.f32.mrf.mxu1  ;;  %v6481_v33 = vadd.f32 %v6429_v4, %v3664_v25  ;;  %v3031_v27 = vpop.permute.xlu0 %3030 }
 0x358   :  { %v2511_v8 = vpop.f32.mrf.mxu1  ;;  %v2809_v5 = vmul.f32 %v6481_v33, %v6481_v33 }
 0x359   :  { %v2512_v13 = vadd.f32 %v6429_v4, %v2511_v8 }
 0x35a   :  { %2878 = vadd.xlane.f32.xlu0 %v2877_v32  ;;  %3125 = vadd.xlane.f32.xlu1 %v3124_v44  ;;  %v2808_v32 = vmul.f32 %v6474_v34, %v6474_v34  ;;  %v2889_v44 = vsel %vm668_vm0, %v2807_v43, 0.0  ;;  %v2895_v25 = vsel %vm668_vm0, %v2809_v5, 0.0 }
 0x35e   :  { %2881 = vadd.xlane.f32.xlu0 %v2880_v60  ;;  %3128 = vadd.xlane.f32.xlu1 %v3127_v53  ;;  %v3025_v60 = vpop.permute.xlu1 %3024  ;;  %v3136_v53 = vsel %vm668_vm0, %v3019_v63, 0.0  ;;  %v3142_v63 = vsel %vm668_vm0, %v3023_v31, 0.0  ;;  %v3148_v31 = vsel %vm668_vm0, %v3027_v41, 0.0 }
 0x35f   :  { %v3145_v8 = vsel %vm668_vm0, %v3025_v60, 0.0  ;;  %v2676_v60 = vmul.f32 %v5927_v17, %v6446_v49  ;;  %v2678_v17 = vmul.f32 %v5941_v7, %v6460_v36 }
 0x361   :  { %v2752_v41 = vsel %vm668_vm0, %v2676_v60, 0.0  ;;  %v2758_v60 = vsel %vm668_vm0, %v2678_v17, 0.0  ;;  %v2681_v17 = vmul.f32 %v5957_v22, %v6481_v33 }
 0x362   :  { %2884 = vadd.xlane.f32.xlu0 %v2883_v54  ;;  %3131 = vadd.xlane.f32.xlu1 %v3130_v61  ;;  %v2892_v54 = vsel %vm668_vm0, %v2808_v32, 0.0  ;;  %v3029_v43 = vpop.permute.xlu1 %3028  ;;  %v2810_v61 = vmul.f32 %v2512_v13, %v2512_v13 }
 0x364   :  { %v2898_v32 = vsel %vm668_vm0, %v2810_v61, 0.0 }
 0x366   :  { %2887 = vadd.xlane.f32.xlu0 %v2886_v3  ;;  %3134 = vadd.xlane.f32.xlu1 %v3133_v26  ;;  %v3139_v3 = vsel %vm668_vm0, %v3021_v29, 0.0  ;;  %v3035_v26 = vpop.permute.xlu0 %3034 }
 0x36a   :  { %2890 = vadd.xlane.f32.xlu0 %v2889_v44  ;;  %3137 = vadd.xlane.f32.xlu1 %v3136_v53  ;;  %v7125_v44 = vld [vmem:[#allocation55_spill] sm:$0xff]  ;;  %v3033_v53 = vpop.permute.xlu1 %3032 }
 0x36b   :  { %v2674_v51 = vmul.f32 %v7125_v44, %v6432_v20  ;;  %v3668_v20 = vpop.f32.mrf.mxu1  ;;  %v3157_v61 = vsel %vm668_vm0, %v3033_v53, 0.0 }
 0x36c   :  { %v2523_v7 = vadd.f32 %v6429_v4, %v3668_v20 }
 0x36d   :  { %v2746_v29 = vsel %vm668_vm0, %v2674_v51, 0.0  ;;  %v3151_v51 = vsel %vm668_vm0, %v3029_v43, 0.0 }
 0x36e   :  { %2893 = vadd.xlane.f32.xlu0 %v2892_v54  ;;  %3140 = vadd.xlane.f32.xlu1 %v3139_v3  ;;  %v2819_v54 = vpop.xlane.xlu0 %2818  ;;  %v2816_v0 = vpop.xlane.xlu1 %2815  ;;  %v2520_v3 = vadd.f32 %v6429_v4, %v3667_v30  ;;  %v2685_v22 = vmul.f32 %v6000_v59, %v2523_v7  ;;  %v7128_v59 = vld [vmem:[#allocation12_spill] sm:$0xff] }
 0x370   :  { %v2812_v44 = vmul.f32 %v2520_v3, %v2520_v3 }
 0x372   :  { %2896 = vadd.xlane.f32.xlu0 %v2895_v25  ;;  %3143 = vadd.xlane.f32.xlu1 %v3142_v63  ;;  %v2514_v63 = vpop.f32.mrf.mxu1 }
 0x376   :  { %2899 = vadd.xlane.f32.xlu0 %v2898_v32  ;;  %3146 = vadd.xlane.f32.xlu1 %v3145_v8  ;;  %v2904_v32 = vsel %vm668_vm0, %v2812_v44, 0.0  ;;  %v3154_v8 = vsel %vm668_vm0, %v3031_v27, 0.0 }
 0x37a   :  { %2747 = vadd.xlane.f32.xlu0 %v2746_v29  ;;  %v3072_v5 = vpop.xlane.xlu0 %3071  ;;  %3149 = vadd.xlane.f32.xlu1 %v3148_v31  ;;  %v7126_v29 = vld [vmem:[#allocation56_spill] sm:$0xff] }
 0x37b   :  { %v3166_v25 = vmul.f32 %v3072_v5, %v2816_v0  ;;  %v2515_v0 = vadd.f32 %v6429_v4, %v2514_v63  ;;  %v2675_v5 = vmul.f32 %v7126_v29, %v6439_v46 }
 0x37d   :  { %v2811_v30 = vmul.f32 %v2515_v0, %v2515_v0  ;;  %v3198_v44 = vmax.f32 %v3166_v25, 1e-16  ;;  %v2749_v63 = vsel %vm668_vm0, %v2675_v5, 0.0  ;;  %v2682_v25 = vmul.f32 %v5985_v19, %v2512_v13 }
 0x37e   :  { %3158 = vadd.xlane.f32.xlu0 %v3157_v61  ;;  %3152 = vadd.xlane.f32.xlu1 %v3151_v51  ;;  %v3037_v53 = vpop.permute.xlu0 %3036  ;;  %v2680_v61 = vmul.f32 %v5959_v62, %v6474_v34  ;;  %v2813_v51 = vmul.f32 %v2523_v7, %v2523_v7  ;;  %v2679_v13 = vmul.f32 %v5936_v24, %v6467_v11 }
 0x37f   :  { %v3163_v49 = vsel %vm668_vm0, %v3037_v53, 0.0  ;;  %v2901_v43 = vsel %vm668_vm0, %v2811_v30, 0.0  ;;  %3704 = vrsqrt.f32 %v3198_v44  ;;  %v7127_v30 = vld [vmem:[#allocation57_spill] sm:$0xff]  ;;  %v2770_v20 = vsel %vm668_vm0, %v2682_v25, 0.0 }
 0x380   :  { %v2907_v4 = vsel %vm668_vm0, %v2813_v51, 0.0  ;;  %v2779_v51 = vsel %vm668_vm0, %v2685_v22, 0.0  ;;  %v1864_v7 = vmul.f32 %v7128_v59, %v6083_v42  ;;  %v7134_v22 = vld [vmem:[#allocation16_spill] sm:$0xff] }
 0x382   :  { %2905 = vadd.xlane.f32.xlu0 %v2904_v32  ;;  %3155 = vadd.xlane.f32.xlu1 %v3154_v8  ;;  %v2764_v32 = vsel %vm668_vm0, %v2680_v61, 0.0  ;;  %v2677_v8 = vmul.f32 %v7127_v30, %v6453_v6  ;;  %v2767_v61 = vsel %vm668_vm0, %v2681_v17, 0.0 }
 0x386   :  { %2753 = vadd.xlane.f32.xlu0 %v2752_v41  ;;  %2902 = vadd.xlane.f32.xlu1 %v2901_v43  ;;  %v2684_v41 = vmul.f32 %v6002_v45, %v2520_v3 }
 0x387   :  { %v3075_v31 = vpop.xlane.xlu1 %3074 }
 0x388   :  { %v3167_v27 = vmul.f32 %v3075_v31, %v2819_v54  ;;  %v3160_v54 = vsel %vm668_vm0, %v3035_v26, 0.0  ;;  %v2755_v26 = vsel %vm668_vm0, %v2677_v8, 0.0  ;;  %v2776_v29 = vsel %vm668_vm0, %v2684_v41, 0.0  ;;  %v7129_v8 = vld [vmem:[#allocation10_spill] sm:$0xff] }
 0x389   :  { %v1863_v41 = vmul.f32 %v7129_v8, %v6034_v9  ;;  %v7138_v8 = vld [vmem:[#allocation59_spill] sm:$0xff] }
 0x38a   :  { %3164 = vadd.xlane.f32.xlu0 %v3163_v49  ;;  %v3199_v46 = vmax.f32 %v3167_v27, 1e-16  ;;  %2750 = vadd.xlane.f32.xlu1 %v2749_v63  ;;  %v2761_v49 = vsel %vm668_vm0, %v2679_v13, 0.0  ;;  %v2683_v27 = vmul.f32 %v5977_v35, %v2515_v0  ;;  %v1896_v13 = vmax.f32 %v1864_v7, 1e-16 }
 0x38b   :  { %v2822_v36 = vpop.xlane.xlu1 %2821  ;;  %v1895_v42 = vmax.f32 %v1863_v41, 1e-16 }
 0x38c   :  { %3706 = vrsqrt.f32 %v3199_v46  ;;  %v3705_v6 = vpop.eup %3704  ;;  %v2773_v33 = vsel %vm668_vm0, %v2683_v27, 0.0  ;;  %vm42_vm0 = vcmask 0  }
 0x38d   :  { %v3262_v43 = vmul.f32 %v3705_v6, %v6322_v37 }
 0x38e   :  { %2759 = vadd.xlane.f32.xlu0 %v2758_v60  ;;  %3161 = vadd.xlane.f32.xlu1 %v3160_v54 }
 0x38f   :  { %v3078_v62 = vpop.xlane.xlu1 %3077 }
 0x390   :  { %v3168_v34 = vmul.f32 %v3078_v62, %v2822_v36 }
 0x392   :  { %2765 = vadd.xlane.f32.xlu0 %v2764_v32  ;;  %v3200_v53 = vmax.f32 %v3168_v34, 1e-16  ;;  %2908 = vadd.xlane.f32.xlu1 %v2907_v4 }
 0x393   :  { %v2825_v19 = vpop.xlane.xlu1 %2824 }
 0x394   :  { %3708 = vrsqrt.f32 %v3200_v53 }
 0x396   :  { %2771 = vadd.xlane.f32.xlu0 %v2770_v20  ;;  %2756 = vadd.xlane.f32.xlu1 %v2755_v26  ;;  %v7130_v26 = vld [vmem:[#allocation11_spill] sm:$0xff] }
 0x397   :  { %v3081_v45 = vpop.xlane.xlu1 %3080 }
 0x398   :  { %v3169_v3 = vmul.f32 %v3081_v45, %v2825_v19 }
 0x399   :  { %v3707_v5 = vpop.eup %3706 }
 0x39a   :  { %2777 = vadd.xlane.f32.xlu0 %v2776_v29  ;;  %v3263_v44 = vmul.f32 %v3707_v5, %v6305_v28  ;;  %v3201_v24 = vmax.f32 %v3169_v3, 1e-16  ;;  %2762 = vadd.xlane.f32.xlu1 %v2761_v49  ;;  %v1865_v29 = vmul.f32 %v7130_v26, %v6017_v58  ;;  %v7131_v5 = vld [vmem:[#allocation13_spill] sm:$0xff] }
 0x39b   :  { %v2828_v11 = vpop.xlane.xlu1 %2827  ;;  %v1866_v17 = vmul.f32 %v7131_v5, %v6070_v18 }
 0x39c   :  { %v3294_v31 = vadd.f32 %v3263_v44, %v3262_v43  ;;  %3710 = vrsqrt.f32 %v3201_v24  ;;  %v1897_v49 = vmax.f32 %v1865_v29, 1e-16  ;;  %v7132_v43 = vld [vmem:[#allocation14_spill] sm:$0xff] }
 0x39d   :  { %v1867_v44 = vmul.f32 %v7132_v43, %v6102_v16  ;;  %v7139_v29 = vld [vmem:[#allocation58_spill] sm:$0xff]  ;;  %v7141_v43 = vld [vmem:[#allocation20_spill] sm:$0xff] }
 0x39e   :  { %2768 = vadd.xlane.f32.xlu1 %v2767_v61  ;;  %v3859_v61 = vmov 0.0  }
 0x39f   :  { %v3084_v63 = vpop.xlane.xlu1 %3083  ;;  %v1899_v27 = vmax.f32 %v1867_v44, 1e-16  ;;  %43 = vst.msk [vmem:[#allocation3] sm:$0x1] %vm42_vm0, %v3859_v61  ;;  %v1874_v44 = vmul.f32 %v7141_v43, %v6138_v47  ;;  %v7153_v43 = vld [vmem:[#allocation68_spill] sm:$0xff] }
 0x3a0   :  { %v3170_v60 = vmul.f32 %v3084_v63, %v2828_v11 }
 0x3a1   :  { %v3709_v46 = vpop.eup %3708 }
 0x3a2   :  { %v3264_v37 = vmul.f32 %v3709_v46, %v6318_v1  ;;  %v3202_v28 = vmax.f32 %v3170_v60, 1e-16  ;;  %2774 = vadd.xlane.f32.xlu1 %v2773_v33  ;;  %v1869_v33 = vmul.f32 %v7134_v22, %v6081_v21 }
 0x3a3   :  { %v3087_v36 = vpop.xlane.xlu1 %3086 }
 0x3a4   :  { %v3295_v25 = vadd.f32 %v3294_v31, %v3264_v37  ;;  %3712 = vrsqrt.f32 %v3202_v28  ;;  %v1898_v31 = vmax.f32 %v1866_v17, 1e-16 }
 0x3a6   :  { %2780 = vadd.xlane.f32.xlu1 %v2779_v51 }
 0x3a7   :  { %v2834_v35 = vpop.xlane.xlu1 %2833 }
 0x3a9   :  { %v3711_v0 = vpop.eup %3710 }
 0x3aa   :  { %v3265_v54 = vmul.f32 %v3711_v0, %v6328_v2 }
 0x3ab   :  { %v3090_v32 = vpop.xlane.xlu1 %3089 }
 0x3ac   :  { %v3296_v34 = vadd.f32 %v3295_v25, %v3265_v54  ;;  %v3172_v30 = vmul.f32 %v3090_v32, %v2834_v35  ;;  %v7135_v25 = vld [vmem:[#allocation17_spill] sm:$0xff]  ;;  %v1901_v54 = vmax.f32 %v1869_v33, 1e-16  ;;  %v7136_v32 = vld [vmem:[#allocation18_spill] sm:$0xff] }
 0x3ad   :  { %v1870_v51 = vmul.f32 %v7135_v25, %v6104_v23  ;;  %v1906_v25 = vmax.f32 %v1874_v44, 1e-16 }
 0x3ae   :  { %v3204_v4 = vmax.f32 %v3172_v30, 1e-16  ;;  %v7137_v30 = vld [vmem:[#allocation21_spill] sm:$0xff] }
 0x3af   :  { %v2831_v62 = vpop.xlane.xlu0 %2830  ;;  %v6545_v53 = vpop.xlane.xlu1 %2836  ;;  %v1902_v23 = vmax.f32 %v1870_v51, 1e-16 }
 0x3b0   :  { %v3171_v1 = vmul.f32 %v3087_v36, %v2831_v62  ;;  %3714 = vrsqrt.f32 %v3204_v4  ;;  %v1871_v62 = vmul.f32 %v7136_v32, %v6134_v15 }
 0x3b1   :  { %v3713_v2 = vpop.eup %3712 }
 0x3b2   :  { %v3203_v20 = vmax.f32 %v3171_v1, 1e-16  ;;  %v3266_v6 = vmul.f32 %v3713_v2, %v6316_v14  ;;  %v7133_v14 = vld [vmem:[#allocation15_spill] sm:$0xff]  ;;  %v1872_v1 = vmul.f32 %v7137_v30, %v6152_v39  ;;  %v1903_v41 = vmax.f32 %v1871_v62, 1e-16 }
 0x3b3   :  { %v6547_v19 = vpop.xlane.xlu0 %2842  ;;  %v6552_v45 = vpop.xlane.xlu1 %3092  ;;  %v1868_v11 = vmul.f32 %v7133_v14, %v6123_v55  ;;  %v7142_v14 = vld [vmem:[#allocation60_spill] sm:$0xff] }
 0x3b4   :  { %3716 = vrsqrt.f32 %v3203_v20  ;;  %v3297_v9 = vadd.f32 %v3296_v34, %v3266_v6  ;;  %v1904_v2 = vmax.f32 %v1872_v1, 1e-16 }
 0x3b5   :  { %3718 = vrsqrt.f32 %v1896_v13  ;;  %v1900_v60 = vmax.f32 %v1868_v11, 1e-16 }
 0x3b6   :  { %3720 = vrsqrt.f32 %v1895_v42 }
 0x3b7   :  { %v6554_v3 = vpop.xlane.xlu0 %2845  ;;  %v6560_v24 = vpop.xlane.xlu1 %2839  ;;  %3722 = vrsqrt.f32 %v1897_v49 }
 0x3b8   :  { %3724 = vrsqrt.f32 %v1898_v31  ;;  %v7143_v31 = vld [vmem:[#allocation62_spill] sm:$0xff] }
 0x3b9   :  { %3726 = vrsqrt.f32 %v1899_v27 }
 0x3ba   :  { %3728 = vrsqrt.f32 %v1900_v60  ;;  %v7144_v60 = vld [vmem:[#allocation22_spill] sm:$0xff] }
 0x3bb   :  { %v6562_v58 = vpop.xlane.xlu0 %2848  ;;  %v6567_v18 = vpop.xlane.xlu1 %3095  ;;  %3730 = vrsqrt.f32 %v1901_v54 }
 0x3bc   :  { %3732 = vrsqrt.f32 %v1902_v23 }
 0x3bd   :  { %v3715_v16 = vpop.eup %3714  ;;  %3734 = vrsqrt.f32 %v1903_v41  ;;  %v7148_v41 = vld [vmem:[#allocation27_spill] sm:$0xff] }
 0x3be   :  { %v3268_v35 = vmul.f32 %v3715_v16, %v6311_v52  ;;  %3736 = vrsqrt.f32 %v1904_v2 }
 0x3bf   :  { %v6569_v63 = vpop.xlane.xlu0 %2851  ;;  %v6574_v37 = vpop.xlane.xlu1 %3098 }
 0x3c1   :  { %v3717_v46 = vpop.eup %3716 }
 0x3c2   :  { %v3267_v55 = vmul.f32 %v3717_v46, %v6337_v50  ;;  %v3719_v36 = vpop.eup %3718 }
 0x3c3   :  { %v6576_v28 = vpop.xlane.xlu0 %2854  ;;  %v3721_v21 = vpop.eup %3720  ;;  %v1960_v34 = vmul.f32 %v3719_v36, %v6051_v48  ;;  %v7140_v48 = vld [vmem:[#allocation19_spill] sm:$0xff] }
 0x3c4   :  { %v3298_v0 = vadd.f32 %v3297_v9, %v3267_v55  ;;  %v6585_v50 = vpop.xlane.xlu1 %3101  ;;  %v1959_v52 = vmul.f32 %v3721_v21, %v7138_v8  ;;  %v3723_v4 = vpop.eup %3722  ;;  %v1873_v6 = vmul.f32 %v7140_v48, %v6121_v56  ;;  %v1875_v56 = vmul.f32 %v7144_v60, %v6164_v40  ;;  %v7145_v55 = vld [vmem:[#allocation25_spill] sm:$0xff]  ;;  %v7151_v48 = vld [vmem:[#allocation76_spill] sm:$0xff] }
 0x3c5   :  { %v3725_v26 = vpop.eup %3724  ;;  %v1961_v42 = vmul.f32 %v3723_v4, %v7139_v29  ;;  %v1876_v36 = vmul.f32 %v7145_v55, %v6188_v57  ;;  %v7146_v21 = vld [vmem:[#allocation61_spill] sm:$0xff]  ;;  %v1878_v4 = vmul.f32 %v7148_v41, %v6168_v12  ;;  %v3174_v41 = vmul.f32 %v6567_v18, %v6560_v24 }
 0x3c6   :  { %v6583_v59 = vadd.f32 %v3298_v0, %v3268_v35  ;;  %v1991_v13 = vadd.f32 %v1960_v34, %v1959_v52  ;;  %v3727_v39 = vpop.eup %3726  ;;  %v1962_v11 = vmul.f32 %v3725_v26, %v7142_v14  ;;  %v1905_v61 = vmax.f32 %v1873_v6, 1e-16  ;;  %v7150_v26 = vld [vmem:[#allocation65_spill] sm:$0xff]  ;;  %v7152_v6 = vld [vmem:[#allocation24_spill] sm:$0xff] }
 0x3c7   :  { %v6587_v7 = vpop.xlane.xlu0 %2857  ;;  %v3729_v49 = vpop.eup %3728  ;;  %v1963_v27 = vmul.f32 %v3727_v39, %v7143_v31  ;;  %v1907_v51 = vmax.f32 %v1875_v56, 1e-16  ;;  %v1908_v32 = vmax.f32 %v1876_v36, 1e-16  ;;  %v7154_v14 = vld [vmem:[#allocation37_spill] sm:$0xff] }
 0x3c8   :  { %v6593_v20 = vpop.xlane.xlu1 %3104  ;;  %v1992_v17 = vadd.f32 %v1991_v13, %v1961_v42  ;;  %v1964_v33 = vmul.f32 %v3729_v49, %v6114_v10  ;;  %3738 = vrsqrt.f32 %v1905_v61  ;;  %v3731_v35 = vpop.eup %3730  ;;  %v7147_v10 = vld [vmem:[#allocation23_spill] sm:$0xff]  ;;  %v7166_v18 = vld [vmem:[#allocation77_spill] sm:$0xff] }
 0x3c9   :  { %3740 = vrsqrt.f32 %v1906_v25  ;;  %v3733_v62 = vpop.eup %3732  ;;  %v1965_v34 = vmul.f32 %v3731_v35, %v7146_v21  ;;  %v1877_v30 = vmul.f32 %v7147_v10, %v6148_v38  ;;  %v7149_v13 = vld [vmem:[#allocation63_spill] sm:$0xff]  ;;  %v1879_v38 = vmul.f32 %v7152_v6, %v7151_v48  ;;  %v7156_v25 = vld [vmem:[#allocation64_spill] sm:$0xff]  ;;  %v7158_v35 = vld [vmem:[#allocation29_spill] sm:$0xff] }
 0x3ca   :  { %v1993_v22 = vadd.f32 %v1992_v17, %v1962_v11  ;;  %3742 = vrsqrt.f32 %v1907_v51  ;;  %v3735_v57 = vpop.eup %3734  ;;  %v1966_v2 = vmul.f32 %v3733_v62, %v7149_v13  ;;  %v7155_v11 = vld [vmem:[#allocation31_spill] sm:$0xff]  ;;  %v7157_v51 = vld [vmem:[#allocation73_spill] sm:$0xff]  ;;  %v3173_v62 = vmul.f32 %v6552_v45, %v6545_v53  ;;  %v7164_v53 = vld [vmem:[#allocation42_spill] sm:$0xff] }
 0x3cb   :  { %v6595_v15 = vpop.xlane.xlu0 %2860  ;;  %3744 = vrsqrt.f32 %v1908_v32  ;;  %v3737_v52 = vpop.eup %3736  ;;  %v1967_v29 = vmul.f32 %v3735_v57, %v7150_v26  ;;  %v1909_v42 = vmax.f32 %v1877_v30, 1e-16  ;;  %v1880_v31 = vmul.f32 %v7155_v11, %v7154_v14  ;;  %v7159_v30 = vld [vmem:[#allocation33_spill] sm:$0xff]  ;;  %v7160_v57 = vld [vmem:[#allocation43_spill] sm:$0xff] }
 0x3cc   :  { %v6600_v9 = vpop.xlane.xlu1 %3107  ;;  %v1994_v47 = vadd.f32 %v1993_v22, %v1963_v27  ;;  %v1968_v44 = vmul.f32 %v3737_v52, %v7153_v43  ;;  %v1910_v27 = vmax.f32 %v1878_v4, 1e-16  ;;  %v1911_v61 = vmax.f32 %v1879_v38, 1e-16  ;;  %v7161_v4 = vld [vmem:[#allocation66_spill] sm:$0xff]  ;;  %v7167_v11 = vld [vmem:[#allocation45_spill] sm:$0xff] }
 0x3cd   :  { %3746 = vrsqrt.f32 %v1909_v42  ;;  %v1912_v55 = vmax.f32 %v1880_v31, 1e-16  ;;  %v7163_v42 = vld [vmem:[#allocation32_spill] sm:$0xff]  ;;  %v3205_v48 = vmax.f32 %v3173_v62, 1e-16  ;;  %v3175_v6 = vmul.f32 %v6574_v37, %v6547_v19 }
 0x3ce   :  { %v1995_v40 = vadd.f32 %v1994_v47, %v1964_v33  ;;  %3748 = vrsqrt.f32 %v1910_v27  ;;  %v1883_v45 = vmul.f32 %v7164_v53, %v7163_v42  ;;  %v1884_v31 = vmul.f32 %v7167_v11, %v7166_v18  ;;  %v7170_v62 = vld [vmem:[#allocation44_spill] sm:$0xff]  ;;  %v7174_v42 = vld [vmem:[#allocation74_spill] sm:$0xff]  ;;  %v7177_v18 = vld [vmem:[#allocation35_spill] sm:$0xff] }
 0x3cf   :  { %v6602_v5 = vpop.xlane.xlu0 %2863  ;;  %3750 = vrsqrt.f32 %v1911_v61  ;;  %v3206_v27 = vmax.f32 %v3174_v41, 1e-16  ;;  %v3207_v19 = vmax.f32 %v3175_v6, 1e-16  ;;  %v3177_v37 = vmul.f32 %v6593_v20, %v6562_v58  ;;  %v7171_v41 = vld [vmem:[#allocation41_spill] sm:$0xff] }
 0x3d0   :  { %v6610_v16 = vpop.xlane.xlu1 %3110  ;;  %v1996_v8 = vadd.f32 %v1995_v40, %v1965_v34  ;;  %v1881_v40 = vmul.f32 %v7158_v35, %v7157_v51  ;;  %3752 = vrsqrt.f32 %v1912_v55  ;;  %v7168_v35 = vld [vmem:[#allocation67_spill] sm:$0xff]  ;;  %v7178_v11 = vld [vmem:[#allocation81_spill] sm:$0xff] }
 0x3d1   :  { %v3209_v20 = vmax.f32 %v3177_v37, 1e-16 }
 0x3d2   :  { %v1997_v49 = vadd.f32 %v1996_v8, %v1966_v2  ;;  %v1882_v8 = vmul.f32 %v7160_v57, %v7159_v30  ;;  %v7162_v2 = vld [vmem:[#allocation69_spill] sm:$0xff]  ;;  %v3179_v30 = vmul.f32 %v6610_v16, %v6576_v28  ;;  %v7175_v16 = vld [vmem:[#allocation40_spill] sm:$0xff] }
 0x3d3   :  { %v6612_v46 = vpop.xlane.xlu0 %2866 }
 0x3d4   :  { %v6617_v0 = vpop.xlane.xlu1 %3113  ;;  %v1998_v12 = vadd.f32 %v1997_v49, %v1967_v29  ;;  %v1913_v29 = vmax.f32 %v1881_v40, 1e-16  ;;  %v1914_v24 = vmax.f32 %v1882_v8, 1e-16  ;;  %v3211_v6 = vmax.f32 %v3179_v30, 1e-16 }
 0x3d5   :  { %v3739_v60 = vpop.eup %3738 }
 0x3d6   :  { %v1999_v33 = vadd.f32 %v1998_v12, %v1968_v44  ;;  %v3741_v36 = vpop.eup %3740  ;;  %v1969_v47 = vmul.f32 %v3739_v60, %v7156_v25  ;;  %v7165_v44 = vld [vmem:[#allocation72_spill] sm:$0xff]  ;;  %v3176_v12 = vmul.f32 %v6585_v50, %v6554_v3  ;;  %3754 = vrsqrt.f32 %v1913_v29 }
 0x3d7   :  { %v6619_v54 = vpop.xlane.xlu0 %2869  ;;  %v3743_v32 = vpop.eup %3742  ;;  %v1970_v13 = vmul.f32 %v3741_v36, %v7161_v4  ;;  %v1915_v60 = vmax.f32 %v1883_v45, 1e-16  ;;  %3756 = vrsqrt.f32 %v3205_v48  ;;  %v3178_v3 = vmul.f32 %v6600_v9, %v6569_v63  ;;  %v7172_v63 = vld [vmem:[#allocation47_spill] sm:$0xff]  ;;  %v7176_v45 = vld [vmem:[#allocation46_spill] sm:$0xff] }
 0x3d8   :  { %v6624_v1 = vpop.xlane.xlu1 %3116  ;;  %v2000_v10 = vadd.f32 %v1999_v33, %v1969_v47  ;;  %v3745_v52 = vpop.eup %3744  ;;  %v1971_v26 = vmul.f32 %v3743_v32, %v7162_v2  ;;  %3758 = vrsqrt.f32 %v1914_v24  ;;  %v1916_v47 = vmax.f32 %v1884_v31, 1e-16  ;;  %v7169_v32 = vld [vmem:[#allocation28_spill] sm:$0xff]  ;;  %v7179_v31 = vld [vmem:[#allocation49_spill] sm:$0xff] }
 0x3d9   :  { %v1972_v14 = vmul.f32 %v3745_v52, %v7165_v44  ;;  %3760 = vrsqrt.f32 %v3206_v27  ;;  %v3208_v51 = vmax.f32 %v3176_v12, 1e-16  ;;  %v1886_v9 = vmul.f32 %v7172_v63, %v7171_v41 }
 0x3da   :  { %v2001_v43 = vadd.f32 %v2000_v10, %v1970_v13  ;;  %v3747_v33 = vpop.eup %3746  ;;  %v1885_v10 = vmul.f32 %v7170_v62, %v7169_v32  ;;  %3762 = vrsqrt.f32 %v1915_v60  ;;  %v3210_v13 = vmax.f32 %v3178_v3, 1e-16  ;;  %v7182_v62 = vld [vmem:[#allocation71_spill] sm:$0xff] }
 0x3db   :  { %v6626_v23 = vpop.xlane.xlu0 %2872  ;;  %v3749_v50 = vpop.eup %3748  ;;  %v1973_v40 = vmul.f32 %v3747_v33, %v7168_v35  ;;  %3764 = vrsqrt.f32 %v3207_v19  ;;  %v3180_v2 = vmul.f32 %v6617_v0, %v6587_v7  ;;  %v1887_v48 = vmul.f32 %v7176_v45, %v7175_v16  ;;  %v7180_v33 = vld [vmem:[#allocation36_spill] sm:$0xff] }
 0x3dc   :  { %v6634_v39 = vpop.xlane.xlu1 %3119  ;;  %v2002_v61 = vadd.f32 %v2001_v43, %v1971_v26  ;;  %v3751_v58 = vpop.eup %3750  ;;  %3766 = vrsqrt.f32 %v1916_v47  ;;  %v7173_v26 = vld [vmem:[#allocation70_spill] sm:$0xff]  ;;  %v1917_v28 = vmax.f32 %v1885_v10, 1e-16  ;;  %v3181_v43 = vmul.f32 %v6624_v1, %v6595_v15  ;;  %v7181_v15 = vld [vmem:[#allocation48_spill] sm:$0xff] }
 0x3dd   :  { %v3753_v4 = vpop.eup %3752  ;;  %3768 = vrsqrt.f32 %v3208_v51  ;;  %v1974_v29 = vmul.f32 %v3749_v50, %v7173_v26  ;;  %v1975_v53 = vmul.f32 %v3751_v58, %v7174_v42  ;;  %v1918_v0 = vmax.f32 %v1886_v9, 1e-16  ;;  %v7184_v26 = vld [vmem:[#allocation89_spill] sm:$0xff] }
 0x3de   :  { %v2003_v25 = vadd.f32 %v2002_v61, %v1972_v14  ;;  %3770 = vrsqrt.f32 %v3209_v20  ;;  %v1976_v7 = vmul.f32 %v3753_v4, %v7177_v18  ;;  %v1888_v27 = vmul.f32 %v7179_v31, %v7178_v11 }
 0x3df   :  { %v6636_v17 = vpop.xlane.xlu0 %2875  ;;  %3772 = vrsqrt.f32 %v3210_v13  ;;  %v3212_v12 = vmax.f32 %v3180_v2, 1e-16  ;;  %v3182_v61 = vmul.f32 %v6634_v39, %v6602_v5  ;;  %v1889_v1 = vmul.f32 %v7181_v15, %v7180_v33  ;;  %v7193_v15 = vld [vmem:[#allocation87_spill] sm:$0xff] }
 0x3e0   :  { %v6641_v56 = vpop.xlane.xlu1 %3122  ;;  %v2004_v52 = vadd.f32 %v2003_v25, %v1973_v40  ;;  %3774 = vrsqrt.f32 %v1917_v28  ;;  %v1919_v19 = vmax.f32 %v1887_v48, 1e-16  ;;  %v3213_v25 = vmax.f32 %v3181_v43, 1e-16  ;;  %v7187_v28 = vld [vmem:[#allocation51_spill] sm:$0xff]  ;;  %v7188_v48 = vld [vmem:[#allocation30_spill] sm:$0xff] }
 0x3e1   :  { %3776 = vrsqrt.f32 %v3211_v6  ;;  %v1920_v35 = vmax.f32 %v1888_v27, 1e-16  ;;  %v3183_v5 = vmul.f32 %v6641_v56, %v6612_v46  ;;  %v3214_v40 = vmax.f32 %v3182_v61, 1e-16  ;;  %v7189_v43 = vld [vmem:[#allocation84_spill] sm:$0xff] }
 0x3e2   :  { %v2005_v24 = vadd.f32 %v2004_v52, %v1974_v29  ;;  %3778 = vrsqrt.f32 %v1918_v0  ;;  %v1921_v58 = vmax.f32 %v1889_v1, 1e-16  ;;  %v7183_v52 = vld [vmem:[#allocation91_spill] sm:$0xff]  ;;  %v7194_v1 = vld [vmem:[#allocation53_spill] sm:$0xff] }
 0x3e3   :  { %v6643_v22 = vpop.xlane.xlu0 %2878  ;;  %v3755_v37 = vpop.eup %3754  ;;  %3780 = vrsqrt.f32 %v3212_v12  ;;  %v3215_v4 = vmax.f32 %v3183_v5, 1e-16 }
 0x3e4   :  { %v6650_v21 = vpop.xlane.xlu1 %3125  ;;  %v2006_v60 = vadd.f32 %v2005_v24, %v1975_v53  ;;  %v3757_v3 = vpop.eup %3756  ;;  %v1977_v10 = vmul.f32 %v3755_v37, %v7182_v62  ;;  %3782 = vrsqrt.f32 %v1919_v19  ;;  %v7186_v53 = vld [vmem:[#allocation79_spill] sm:$0xff]  ;;  %v7190_v24 = vld [vmem:[#allocation50_spill] sm:$0xff]  ;;  %v1892_v19 = vmul.f32 %v7194_v1, %v7193_v15 }
 0x3e5   :  { %v3759_v39 = vpop.eup %3758  ;;  %v3184_v20 = vmul.f32 %v6650_v21, %v6619_v54  ;;  %v3269_v41 = vmul.f32 %v3757_v3, %v7183_v52  ;;  %3784 = vrsqrt.f32 %v3213_v25  ;;  %v7185_v21 = vld [vmem:[#allocation75_spill] sm:$0xff]  ;;  %v1890_v16 = vmul.f32 %v7187_v28, %v7186_v53  ;;  %v7196_v62 = vld [vmem:[#allocation94_spill] sm:$0xff] }
 0x3e6   :  { %v2007_v50 = vadd.f32 %v2006_v60, %v1976_v7  ;;  %v3761_v32 = vpop.eup %3760  ;;  %3786 = vrsqrt.f32 %v1920_v35  ;;  %v1978_v42 = vmul.f32 %v3759_v39, %v7185_v21  ;;  %v1891_v18 = vmul.f32 %v7190_v24, %v7189_v43  ;;  %v7192_v60 = vld [vmem:[#allocation7_spill] sm:$0xff]  ;;  %v7201_v53 = vld [vmem:[#allocation98_spill] sm:$0xff] }
 0x3e7   :  { %v6652_v34 = vpop.xlane.xlu0 %2881  ;;  %v3763_v30 = vpop.eup %3762  ;;  %v3270_v29 = vmul.f32 %v3761_v32, %v7184_v26  ;;  %3788 = vrsqrt.f32 %v3214_v40  ;;  %v3216_v45 = vmax.f32 %v3184_v20, 1e-16  ;;  %v3300_v7 = vadd.f32 %v6583_v59, %v3269_v41  ;;  %v7195_v59 = vld [vmem:[#allocation88_spill] sm:$0xff] }
 0x3e8   :  { %v6664_v38 = vpop.xlane.xlu1 %3128  ;;  %v3765_v46 = vpop.eup %3764  ;;  %v2008_v56 = vadd.f32 %v2007_v50, %v1977_v10  ;;  %3790 = vrsqrt.f32 %v1921_v58  ;;  %v1979_v6 = vmul.f32 %v3763_v30, %v7188_v48  ;;  %v1922_v50 = vmax.f32 %v1890_v16, 1e-16 }
 0x3e9   :  { %v3185_v13 = vmul.f32 %v6664_v38, %v6626_v23  ;;  %v3767_v2 = vpop.eup %3766  ;;  %v7191_v23 = vld [vmem:[#allocation96_spill] sm:$0xff]  ;;  %3792 = vrsqrt.f32 %v3215_v4  ;;  %v3301_v37 = vadd.f32 %v3300_v7, %v3270_v29  ;;  %v1923_v40 = vmax.f32 %v1891_v18, 1e-16  ;;  %v7202_v18 = vld [vmem:[#allocation90_spill] sm:$0xff] }
 0x3ea   :  { %v3769_v54 = vpop.eup %3768  ;;  %v3271_v38 = vmul.f32 %v3765_v46, %v7191_v23  ;;  %v2009_v27 = vadd.f32 %v2008_v56, %v1978_v42  ;;  %v1980_v33 = vmul.f32 %v3767_v2, %v7192_v60  ;;  %3794 = vrsqrt.f32 %v3216_v45  ;;  %v7197_v56 = vld [vmem:[#allocation92_spill] sm:$0xff] }
 0x3eb   :  { %v6666_v49 = vpop.xlane.xlu0 %2884  ;;  %v3771_v31 = vpop.eup %3770  ;;  %v3217_v12 = vmax.f32 %v3185_v13, 1e-16  ;;  %v3272_v25 = vmul.f32 %v3769_v54, %v7195_v59  ;;  %v1924_v41 = vmax.f32 %v1892_v19, 1e-16  ;;  %v7200_v54 = vld [vmem:[#allocation26_spill] sm:$0xff]  ;;  %v7207_v19 = vld [vmem:[#allocation97_spill] sm:$0xff] }
 0x3ec   :  { %v6675_v55 = vpop.xlane.xlu1 %3131  ;;  %v3773_v3 = vpop.eup %3772  ;;  %v2010_v39 = vadd.f32 %v2009_v27, %v1979_v6  ;;  %v3302_v32 = vadd.f32 %v3301_v37, %v3271_v38 }
 0x3ed   :  { %v3186_v61 = vmul.f32 %v6675_v55, %v6636_v17  ;;  %v3775_v5 = vpop.eup %3774  ;;  %v3273_v17 = vmul.f32 %v3771_v31, %v7196_v62  ;;  %3796 = vrsqrt.f32 %v3217_v12  ;;  %v3274_v4 = vmul.f32 %v3773_v3, %v7197_v56  ;;  %v7203_v31 = vld [vmem:[#allocation39_spill] sm:$0xff] }
 0x3ee   :  { %v3777_v58 = vpop.eup %3776  ;;  %v2011_v52 = vadd.f32 %v2010_v39, %v1980_v33  ;;  %v3303_v46 = vadd.f32 %v3302_v32, %v3272_v25  ;;  %3798 = vrsqrt.f32 %v1922_v50  ;;  %v1981_v21 = vmul.f32 %v3775_v5, %v7200_v54  ;;  %v7204_v33 = vld [vmem:[#allocation38_spill] sm:$0xff]  ;;  %v7208_v39 = vld [vmem:[#allocation80_spill] sm:$0xff]  ;;  %v7209_v32 = vld [vmem:[#allocation95_spill] sm:$0xff] }
 0x3ef   :  { %v6677_v36 = vpop.xlane.xlu0 %2887  ;;  %v3218_v20 = vmax.f32 %v3186_v61, 1e-16  ;;  %v3779_v30 = vpop.eup %3778  ;;  %3800 = vrsqrt.f32 %v1923_v40  ;;  %v3275_v28 = vmul.f32 %v3777_v58, %v7201_v53 }
 0x3f0   :  { %v6686_v57 = vpop.xlane.xlu1 %3134  ;;  %v3781_v13 = vpop.eup %3780  ;;  %v3304_v42 = vadd.f32 %v3303_v46, %v3273_v17  ;;  %v2012_v43 = vadd.f32 %v2011_v52, %v1981_v21  ;;  %v1982_v27 = vmul.f32 %v3779_v30, %v7203_v31  ;;  %v7212_v21 = vld [vmem:[#allocation34_spill] sm:$0xff] }
 0x3f1   :  { %v3187_v35 = vmul.f32 %v6686_v57, %v6643_v22  ;;  %v7198_v22 = vld [vmem:[#allocation8_spill] sm:$0xff]  ;;  %v3783_v29 = vpop.eup %3782  ;;  %3802 = vrsqrt.f32 %v3218_v20  ;;  %v3276_v7 = vmul.f32 %v3781_v13, %v7202_v18 }
 0x3f2   :  { %v7199_v57 = vld [vmem:[#allocation52_spill] sm:$0xff]  ;;  %v3785_v45 = vpop.eup %3784  ;;  %3804 = vrsqrt.f32 %v1924_v41  ;;  %v3305_v24 = vadd.f32 %v3304_v42, %v3274_v4  ;;  %v1983_v15 = vmul.f32 %v3783_v29, %v7204_v33  ;;  %v2013_v5 = vadd.f32 %v2012_v43, %v1982_v27  ;;  %v7214_v27 = vld [vmem:[#allocation78_spill] sm:$0xff] }
 0x3f3   :  { %v6688_v8 = vpop.xlane.xlu0 %2890  ;;  %v1893_v2 = vmul.f32 %v7199_v57, %v7198_v22  ;;  %v3219_v26 = vmax.f32 %v3187_v35, 1e-16  ;;  %v3787_v6 = vpop.eup %3786  ;;  %v3277_v37 = vmul.f32 %v3785_v45, %v7207_v19  ;;  %v7213_v45 = vld [vmem:[#allocation99_spill] sm:$0xff]  ;;  %v7216_v19 = vld [vmem:[#allocation86_spill] sm:$0xff] }
 0x3f4   :  { %v6700_v44 = vpop.xlane.xlu1 %3137  ;;  %v3789_v38 = vpop.eup %3788  ;;  %v3306_v59 = vadd.f32 %v3305_v24, %v3275_v28  ;;  %v1984_v40 = vmul.f32 %v3787_v6, %v7208_v39  ;;  %v2014_v20 = vadd.f32 %v2013_v5, %v1983_v15 }
 0x3f5   :  { %v3188_v48 = vmul.f32 %v6700_v44, %v6652_v34  ;;  %v1925_v12 = vmax.f32 %v1893_v2, 1e-16  ;;  %3806 = vrsqrt.f32 %v3219_v26  ;;  %v3791_v60 = vpop.eup %3790  ;;  %v7205_v34 = vld [vmem:[#allocation85_spill] sm:$0xff]  ;;  %v7206_v44 = vld [vmem:[#allocation54_spill] sm:$0xff] }
 0x3f6   :  { %v1894_v1 = vmul.f32 %v7206_v44, %v7205_v34  ;;  %v3793_v35 = vpop.eup %3792  ;;  %v2015_v22 = vadd.f32 %v2014_v20, %v1984_v40  ;;  %v1985_v42 = vmul.f32 %v3791_v60, %v7212_v21 }
 0x3f7   :  { %v6702_v14 = vpop.xlane.xlu0 %2893  ;;  %v3220_v3 = vmax.f32 %v3188_v48, 1e-16  ;;  %v3795_v58 = vpop.eup %3794  ;;  %3808 = vrsqrt.f32 %v1925_v12 }
 0x3f8   :  { %v6711_v47 = vpop.xlane.xlu1 %3140  ;;  %v1926_v30 = vmax.f32 %v1894_v1, 1e-16  ;;  %v2016_v43 = vadd.f32 %v2015_v22, %v1985_v42 }
 0x3f9   :  { %v3189_v61 = vmul.f32 %v6711_v47, %v6666_v49  ;;  %v3278_v49 = vmul.f32 %v3789_v38, %v7209_v32  ;;  %v3307_v47 = vadd.f32 %v3306_v59, %v3276_v7  ;;  %3810 = vrsqrt.f32 %v3220_v3 }
 0x3fa   :  { %v3797_v13 = vpop.eup %3796 }
 0x3fb   :  { %v6713_v51 = vpop.xlane.xlu0 %2896  ;;  %v3221_v62 = vmax.f32 %v3189_v61, 1e-16  ;;  %v3308_v52 = vadd.f32 %v3307_v47, %v3277_v37  ;;  %v3799_v54 = vpop.eup %3798  ;;  %v7215_v61 = vld [vmem:[#allocation82_spill] sm:$0xff] }
 0x3fc   :  { %v6721_v63 = vpop.xlane.xlu1 %3143  ;;  %v3801_v28 = vpop.eup %3800  ;;  %v1986_v12 = vmul.f32 %v3799_v54, %v7214_v27 }
 0x3fd   :  { %v3190_v50 = vmul.f32 %v6721_v63, %v6677_v36  ;;  %v7210_v63 = vld [vmem:[#allocation100_spill] sm:$0xff]  ;;  %v3309_v57 = vadd.f32 %v3308_v52, %v3278_v49  ;;  %3812 = vrsqrt.f32 %v3221_v62  ;;  %v1987_v60 = vmul.f32 %v3801_v28, %v7215_v61 }
 0x3fe   :  { %v3279_v56 = vmul.f32 %v3793_v35, %v7210_v63  ;;  %3814 = vrsqrt.f32 %v1926_v30  ;;  %v3803_v6 = vpop.eup %3802  ;;  %v2017_v1 = vadd.f32 %v2016_v43, %v1986_v12 }
 0x3ff   :  { %v6723_v9 = vpop.xlane.xlu0 %2899  ;;  %v3222_v36 = vmax.f32 %v3190_v50, 1e-16  ;;  %v3805_v18 = vpop.eup %3804 }
 0x400   :  { %v6736_v0 = vpop.xlane.xlu1 %3146  ;;  %v1988_v37 = vmul.f32 %v3805_v18, %v7216_v19  ;;  %v2018_v35 = vadd.f32 %v2017_v1, %v1987_v60 }
 0x401   :  { %v3191_v17 = vmul.f32 %v6736_v0, %v6688_v8  ;;  %v7211_v0 = vld [vmem:[#allocation93_spill] sm:$0xff]  ;;  %3816 = vrsqrt.f32 %v3222_v36 }
 0x402   :  { %v3280_v26 = vmul.f32 %v3795_v58, %v7211_v0  ;;  %v3807_v31 = vpop.eup %3806  ;;  %v2019_v32 = vadd.f32 %v2018_v35, %v1988_v37  ;;  %v7217_v58 = vld [vmem:[#allocation6_spill] sm:$0xff] }
 0x403   :  { %v6738_v11 = vpop.xlane.xlu0 %2747  ;;  %v3223_v8 = vmax.f32 %v3191_v17, 1e-16 }
 0x404   :  { %v3150_v55 = vpop.xlane.xlu1 %3149  ;;  %v3282_v7 = vmul.f32 %v3803_v6, %v6738_v11  ;;  %v3809_v50 = vpop.eup %3808 }
 0x405   :  { %v3192_v4 = vmul.f32 %v3150_v55, %v6702_v14  ;;  %v3281_v14 = vmul.f32 %v3797_v13, %v7213_v45  ;;  %v3310_v55 = vadd.f32 %v3309_v57, %v3279_v56  ;;  %3818 = vrsqrt.f32 %v3223_v8  ;;  %v7218_v57 = vld [vmem:[#allocation83_spill] sm:$0xff] }
 0x406   :  { %v3811_v40 = vpop.eup %3810  ;;  %v1989_v20 = vmul.f32 %v3809_v50, %v7217_v58 }
 0x407   :  { %v6749_v10 = vpop.xlane.xlu0 %3158  ;;  %v3224_v48 = vmax.f32 %v3192_v4, 1e-16 }
 0x408   :  { %v3153_v16 = vpop.xlane.xlu1 %3152  ;;  %v2020_v4 = vadd.f32 %v2019_v32, %v1989_v20 }
 0x409   :  { %v3193_v2 = vmul.f32 %v3153_v16, %v6713_v51  ;;  %3820 = vrsqrt.f32 %v3224_v48 }
 0x40a   :  { %v3813_v47 = vpop.eup %3812 }
 0x40b   :  { %v6759_v23 = vpop.xlane.xlu0 %2905  ;;  %v3225_v51 = vmax.f32 %v3193_v2, 1e-16  ;;  %v3815_v17 = vpop.eup %3814 }
 0x40c   :  { %v3156_v25 = vpop.xlane.xlu1 %3155  ;;  %v1990_v2 = vmul.f32 %v3815_v17, %v7218_v57 }
 0x40d   :  { %v3194_v29 = vmul.f32 %v3156_v25, %v6723_v9  ;;  %v3311_v9 = vadd.f32 %v3310_v55, %v3280_v26  ;;  %3822 = vrsqrt.f32 %v3225_v51 }
 0x40e   :  { %v2021_v21 = vadd.f32 %v2020_v4, %v1990_v2 }
 0x40f   :  { %v2754_v41 = vpop.xlane.xlu0 %2753  ;;  %v3226_v38 = vmax.f32 %v3194_v29, 1e-16  ;;  %v3312_v15 = vadd.f32 %v3311_v9, %v3281_v14 }
 0x410   :  { %v2903_v46 = vpop.xlane.xlu1 %2902  ;;  %v3284_v49 = vmul.f32 %v3811_v40, %v2754_v41  ;;  %v2022_v43 = vrot.slane %v2021_v21, 4 }
 0x411   :  { %v3195_v16 = vmul.f32 %v6749_v10, %v2903_v46  ;;  %v3313_v59 = vadd.f32 %v3312_v15, %v3282_v7  ;;  %3824 = vrsqrt.f32 %v3226_v38  ;;  %v3817_v46 = vpop.eup %3816 }
 0x412   :  { %v3819_v13 = vpop.eup %3818 }
 0x413   :  { %v3165_v24 = vpop.xlane.xlu0 %3164  ;;  %v3227_v10 = vmax.f32 %v3195_v16, 1e-16 }
 0x414   :  { %v2751_v53 = vpop.xlane.xlu1 %2750 }
 0x415   :  { %v3283_v34 = vmul.f32 %v3807_v31, %v2751_v53  ;;  %3826 = vrsqrt.f32 %v3227_v10  ;;  %v2023_v31 = vadd.f32 %v2022_v43, %v2021_v21 }
 0x416   :  { %v3821_v0 = vpop.eup %3820 }
 0x417   :  { %v2760_v25 = vpop.xlane.xlu0 %2759  ;;  %v3314_v5 = vadd.f32 %v3313_v59, %v3283_v34 }
 0x418   :  { %v3162_v33 = vpop.xlane.xlu1 %3161  ;;  %v3286_v63 = vmul.f32 %v3817_v46, %v2760_v25 }
 0x419   :  { %v3196_v44 = vmul.f32 %v3162_v33, %v6759_v23  ;;  %v3315_v52 = vadd.f32 %v3314_v5, %v3284_v49  ;;  %v2024_v33 = vrot.slane %v2023_v31, 2 }
 0x41a   :  { %v3823_v26 = vpop.eup %3822 }
 0x41b   :  { %v3228_v11 = vmax.f32 %v3196_v44, 1e-16  ;;  %v2766_v36 = vpop.xlane.xlu0 %2765  ;;  %v2025_v44 = vadd.f32 %v2024_v33, %v2023_v31 }
 0x41c   :  { %v2909_v3 = vpop.xlane.xlu1 %2908  ;;  %v3288_v29 = vmul.f32 %v3821_v0, %v2766_v36 }
 0x41d   :  { %v3197_v39 = vmul.f32 %v3165_v24, %v2909_v3  ;;  %3828 = vrsqrt.f32 %v3228_v11  ;;  %v2026_v19 = vrot.slane %v2025_v44, 1  ;;  %v612_v3 = vld [vmem:[#allocation3] sm:$0x1] }
 0x41e   :  { %v3825_v42 = vpop.eup %3824 }
 0x41f   :  { %v3229_v23 = vmax.f32 %v3197_v39, 1e-16  ;;  %v2772_v53 = vpop.xlane.xlu0 %2771  ;;  %v2027_v11 = vadd.f32 %v2026_v19, %v2025_v44 }
 0x420   :  { %v2757_v62 = vpop.xlane.xlu1 %2756  ;;  %v3290_v48 = vmul.f32 %v3825_v42, %v2772_v53 }
 0x421   :  { %v3285_v30 = vmul.f32 %v3813_v47, %v2757_v62  ;;  %3830 = vrsqrt.f32 %v3229_v23 }
 0x422   :  { %v3827_v55 = vpop.eup %3826 }
 0x423   :  { %v3316_v56 = vadd.f32 %v3315_v52, %v3285_v30  ;;  %v2778_v9 = vpop.xlane.xlu0 %2777 }
 0x424   :  { %v2763_v22 = vpop.xlane.xlu1 %2762 }
 0x425   :  { %v3287_v41 = vmul.f32 %v3819_v13, %v2763_v22  ;;  %v3317_v8 = vadd.f32 %v3316_v56, %v3286_v63 }
 0x427   :  { %v3318_v54 = vadd.f32 %v3317_v8, %v3287_v41 }
 0x428   :  { %v2769_v28 = vpop.xlane.xlu1 %2768 }
 0x429   :  { %v3289_v45 = vmul.f32 %v3823_v26, %v2769_v28  ;;  %v3319_v14 = vadd.f32 %v3318_v54, %v3288_v29 }
 0x42a   :  { %v3829_v51 = vpop.eup %3828 }
 0x42b   :  { %v3320_v6 = vadd.f32 %v3319_v14, %v3289_v45  ;;  %v3292_v7 = vmul.f32 %v3829_v51, %v2778_v9 }
 0x42c   :  { %v2775_v16 = vpop.xlane.xlu1 %2774 }
 0x42d   :  { %v3291_v24 = vmul.f32 %v3827_v55, %v2775_v16  ;;  %v3321_v18 = vadd.f32 %v3320_v6, %v3290_v48 }
 0x42e   :  { %v3831_v27 = vpop.eup %3830 }
 0x42f   :  { %v3322_v38 = vadd.f32 %v3321_v18, %v3291_v24 }
 0x430   :  { %v2781_v12 = vpop.xlane.xlu1 %2780 }
 0x431   :  { %v3293_v61 = vmul.f32 %v3831_v27, %v2781_v12  ;;  %v3323_v60 = vadd.f32 %v3322_v38, %v3292_v7 }
 0x433   :  { %v3324_v15 = vadd.f32 %v3323_v60, %v3293_v61 }
 0x435   :  { %v3325_v34 = vrot.slane %v3324_v15, 4 }
 0x437   :  { %v3326_v1 = vadd.f32 %v3325_v34, %v3324_v15 }
 0x439   :  { %v3327_v10 = vrot.slane %v3326_v1, 2 }
 0x43b   :  { %v3328_v37 = vadd.f32 %v3327_v10, %v3326_v1 }
 0x43d   :  { %v3329_v59 = vrot.slane %v3328_v37, 1 }
 0x43f   :  { %v3330_v25 = vadd.f32 %v3329_v59, %v3328_v37 }
 0x441   :  { %v3331_v50 = vadd.f32 %v3330_v25, %v2027_v11 }
 0x443   :  { %v3332_v35 = vadd.f32 %v3331_v50, %v612_v3 }
 0x445   :  { %3334 = vst.msk [vmem:[#allocation3] sm:$0x1] %vm42_vm0, %v3332_v35 }
 0x44c   :  { %v3338_v5 = vld [vmem:[#allocation3] sm:$0x1] }
 0x44d   :  { %v3339_v39 = vmul.f32 0.00390625, %v3338_v5 }
 0x44f   :  { %v3340_v40 = vsub.f32 2.0, %v3339_v39 }
 0x451   :  { %3341 = vst.msk [vmem:[#allocation3] sm:$0x1] %vm42_vm0, %v3340_v40 }
 0x452   :  { %3847 = shalt.err (!%p3844_p4)
}
 0x453   :  { %3351 = dma.vmem_to_hbm [thread:$0]  %s3349_s29, 16, %s6804_s10, [#allocation4]  }
 0x454   :  { %3856 = dma.done.wait [#allocation4], 16  }
 0x455   :  { %3857 = vsyncadd [#allocation4], 4294967280 }
 0x456   :  { %3355 = vsyncpa [#allocation4], 1 }

</bundles_post_ra>
